<compile_context>
chip_gen: v7x
topology: tpu7x:2x2x1
jax: 0.10.0
libtpu: 0.0.40
codegen_flags: <defaults>
</compile_context>

<pallas_src>
import functools
import math

import jax
import jax.numpy as jnp
from jax.experimental import pallas as pl
from jax.experimental.pallas import tpu as pltpu


WIDTH = 16                  # scaled-down stem width (real ResNet-50 uses 64)
EXPANSION = 4
LAYER_CFG = ((WIDTH, 3, 1), (WIDTH * 2, 4, 2), (WIDTH * 4, 6, 2), (WIDTH * 8, 3, 2))
EMBEDDING_DIM = 64
NUM_CLASSES = 100
LANE = 128
STEM_CIN_PAD = 8            # pad RGB (3) -> 8 so the stem contraction dim is sublane-aligned
_VMEM_LIMIT = 32 * 1024 * 1024   # safe on v5e/v6e (128 MiB) and v7x (64 MiB physical)


def _rup(c, m=LANE):
    return ((c + m - 1) // m) * m


# ------------------------------ Pallas kernels ------------------------------

def _conv_kernel(x_ref, w_ref, b_ref, o_ref, acc_ref, *, relu):
    """Conv+BN(+ReLU): accumulate one kernel-tap dot per grid step into f32 scratch."""
    kk = pl.program_id(1)

    @pl.when(kk == 0)
    def _():
        acc_ref[...] = jnp.zeros_like(acc_ref)

    acc_ref[...] += jnp.dot(x_ref[0], w_ref[0], preferred_element_type=jnp.float32)

    @pl.when(kk == pl.num_programs(1) - 1)
    def _():
        r = acc_ref[...] + b_ref[...]
        if relu:
            r = jnp.maximum(r, 0.0)
        o_ref[...] = r.astype(o_ref.dtype)


def _conv_res_kernel(x_ref, w_ref, b_ref, r_ref, o_ref, acc_ref, *, relu):
    """Conv+BN + identity residual add + ReLU (bottleneck conv3, identity shortcut)."""
    kk = pl.program_id(1)

    @pl.when(kk == 0)
    def _():
        acc_ref[...] = jnp.zeros_like(acc_ref)

    acc_ref[...] += jnp.dot(x_ref[0], w_ref[0], preferred_element_type=jnp.float32)

    @pl.when(kk == pl.num_programs(1) - 1)
    def _():
        r = acc_ref[...] + b_ref[...] + r_ref[...].astype(jnp.float32)
        if relu:
            r = jnp.maximum(r, 0.0)
        o_ref[...] = r.astype(o_ref.dtype)


def _conv_ds_kernel(x_ref, w_ref, b_ref, xd_ref, wd_ref, bd_ref, o_ref, acc_ref, *, relu):
    """Bottleneck conv3 with the 1x1 downsample conv+BN fused in: the accumulator is
    seeded with the downsample branch, then the conv3 taps accumulate on top."""
    kk = pl.program_id(1)

    @pl.when(kk == 0)
    def _():
        acc_ref[...] = (jnp.dot(xd_ref[0], wd_ref[0], preferred_element_type=jnp.float32)
                        + bd_ref[...])

    acc_ref[...] += jnp.dot(x_ref[0], w_ref[0], preferred_element_type=jnp.float32)

    @pl.when(kk == pl.num_programs(1) - 1)
    def _():
        r = acc_ref[...] + b_ref[...]
        if relu:
            r = jnp.maximum(r, 0.0)
        o_ref[...] = r.astype(o_ref.dtype)


def _maxpool_kernel(x_ref, o_ref):
    """Running max over shifted [M, C] tap slabs (one slab per grid step)."""
    k = pl.program_id(0)

    @pl.when(k == 0)
    def _():
        o_ref[...] = x_ref[0]

    @pl.when(k > 0)
    def _():
        o_ref[...] = jnp.maximum(o_ref[...], x_ref[0])


def _head_full_kernel(x_ref, w1_ref, b1_ref, w2_ref, b2_ref, out_ref, *, inv_hw):
    """Fused global-avg-pool + embedding fc + classifier fc."""
    pooled = jnp.sum(x_ref[...].astype(jnp.float32), axis=1) * inv_hw          # [N, C]
    emb = jnp.dot(pooled.astype(jnp.bfloat16), w1_ref[...],
                  preferred_element_type=jnp.float32) + b1_ref[...]
    out_ref[...] = jnp.dot(emb.astype(jnp.bfloat16), w2_ref[...],
                           preferred_element_type=jnp.float32) + b2_ref[...]


def _head_extract_kernel(x_ref, w1_ref, b1_ref, emb_ref, *, inv_hw):
    """Fused global-avg-pool + embedding fc (is_extract=True path)."""
    pooled = jnp.sum(x_ref[...].astype(jnp.float32), axis=1) * inv_hw
    emb_ref[...] = jnp.dot(pooled.astype(jnp.bfloat16), w1_ref[...],
                           preferred_element_type=jnp.float32) + b1_ref[...]


# ------------------------------ glue / wrappers ------------------------------

def _tap_stack(x, kh, kw, stride, padding, pad_value=0.0):
    """x: [N,H,W,C] -> per-tap slabs [kh*kw, N*Ho*Wo, C] (streamed through VMEM by the
    kernel grid; no kh*kw*C im2col block ever lands in VMEM at once)."""
    N, H, W, C = x.shape
    if padding:
        x = jnp.pad(x, ((0, 0), (padding, padding), (padding, padding), (0, 0)),
                    constant_values=pad_value)
    Ho = (H + 2 * padding - kh) // stride + 1
    Wo = (W + 2 * padding - kw) // stride + 1
    slabs = []
    for i in range(kh):
        for j in range(kw):
            s = x[:, i:i + stride * (Ho - 1) + 1:stride,
                  j:j + stride * (Wo - 1) + 1:stride, :]
            slabs.append(s.reshape(N * Ho * Wo, C))
    return jnp.stack(slabs, axis=0), Ho, Wo


def conv_bn(x, wb, *, k, stride, padding, relu, residual=None, downsample=None):
    """Fused Conv2d(kxk) + folded BatchNorm [+ residual | fused downsample] [+ ReLU].

    x: [N,H,W,Cin_p] bf16; wb = (w_taps [k*k, Cin_p, Cout_p] bf16, bias [1, Cout_p] f32).
    residual: [M, Cout_p] bf16.  downsample: (xd_taps [1,M,Cind], wd [1,Cind,Cout_p], bd).
    Returns [N, Ho, Wo, Cout_p] bf16.
    """
    w_taps, bias = wb
    N = x.shape[0]
    taps, Ho, Wo = _tap_stack(x, k, k, stride, padding)
    KK, M, Cin = taps.shape
    CoutP = w_taps.shape[-1]

    tm = 256 if (M > 256 and M % 256 == 0) else M
    grid = (M // tm, KK)

    in_specs = [
        pl.BlockSpec((1, tm, Cin), lambda m, kk: (kk, m, 0)),
        pl.BlockSpec((1, Cin, CoutP), lambda m, kk: (kk, 0, 0)),
        pl.BlockSpec((1, CoutP), lambda m, kk: (0, 0)),
    ]
    operands = [taps, w_taps, bias]

    if downsample is not None:
        xd, wd, bd = downsample
        Cind = xd.shape[-1]
        in_specs += [
            pl.BlockSpec((1, tm, Cind), lambda m, kk: (0, m, 0)),
            pl.BlockSpec((1, Cind, CoutP), lambda m, kk: (0, 0, 0)),
            pl.BlockSpec((1, CoutP), lambda m, kk: (0, 0)),
        ]
        operands += [xd, wd, bd]
        kernel = functools.partial(_conv_ds_kernel, relu=relu)
    elif residual is not None:
        in_specs.append(pl.BlockSpec((tm, CoutP), lambda m, kk: (m, 0)))
        operands.append(residual)
        kernel = functools.partial(_conv_res_kernel, relu=relu)
    else:
        kernel = functools.partial(_conv_kernel, relu=relu)

    out = pl.pallas_call(
        kernel,
        grid=grid,
        in_specs=in_specs,
        out_specs=pl.BlockSpec((tm, CoutP), lambda m, kk: (m, 0)),
        out_shape=jax.ShapeDtypeStruct((M, CoutP), jnp.bfloat16),
        scratch_shapes=[pltpu.VMEM((tm, CoutP), jnp.float32)],
        compiler_params=pltpu.CompilerParams(
            dimension_semantics=("parallel", "arbitrary"),
            vmem_limit_bytes=_VMEM_LIMIT),
    )(*operands)
    return out.reshape(N, Ho, Wo, CoutP)


def maxpool_3x3_s2(x):
    # -inf padding is safe here: every 3x3/s2 window overlaps >=1 real pixel at these
    # resolutions (and the input is post-ReLU, so real values are >= 0).
    N, H, W, C = x.shape
    taps, Ho, Wo = _tap_stack(x, 3, 3, 2, 1, pad_value=-jnp.inf)
    KK, M, _ = taps.shape
    out = pl.pallas_call(
        _maxpool_kernel,
        grid=(KK,),
        in_specs=[pl.BlockSpec((1, M, C), lambda kk: (kk, 0, 0))],
        out_specs=pl.BlockSpec((M, C), lambda kk: (0, 0)),
        out_shape=jax.ShapeDtypeStruct((M, C), jnp.bfloat16),
        compiler_params=pltpu.CompilerParams(
            dimension_semantics=("arbitrary",),
            vmem_limit_bytes=_VMEM_LIMIT),
    )(taps)
    return out.reshape(N, Ho, Wo, C)


def head(x, params, is_extract):
    """Fused global-avg-pool + pretrained.fc (embedding) [+ self.fc (classifier)]."""
    N, H, W, C = x.shape
    xr = x.reshape(N, H * W, C)
    inv_hw = 1.0 / float(H * W)
    w1, b1 = params["fc_embed"]
    cp = pltpu.CompilerParams(dimension_semantics=("arbitrary",),
                              vmem_limit_bytes=_VMEM_LIMIT)
    if is_extract:
        emb = pl.pallas_call(
            functools.partial(_head_extract_kernel, inv_hw=inv_hw),
            grid=(1,),
            in_specs=[pl.BlockSpec(xr.shape, lambda i: (0, 0, 0)),
                      pl.BlockSpec(w1.shape, lambda i: (0, 0)),
                      pl.BlockSpec(b1.shape, lambda i: (0, 0))],
            out_specs=pl.BlockSpec((N, w1.shape[1]), lambda i: (0, 0)),
            out_shape=jax.ShapeDtypeStruct((N, w1.shape[1]), jnp.float32),
            compiler_params=cp,
        )(xr, w1, b1)
        return emb[:, :EMBEDDING_DIM]

    w2, b2 = params["fc_head"]
    logits = pl.pallas_call(
        functools.partial(_head_full_kernel, inv_hw=inv_hw),
        grid=(1,),
        in_specs=[pl.BlockSpec(xr.shape, lambda i: (0, 0, 0)),
                  pl.BlockSpec(w1.shape, lambda i: (0, 0)),
                  pl.BlockSpec(b1.shape, lambda i: (0, 0)),
                  pl.BlockSpec(w2.shape, lambda i: (0, 0)),
                  pl.BlockSpec(b2.shape, lambda i: (0, 0))],
        out_specs=pl.BlockSpec((N, w2.shape[1]), lambda i: (0, 0)),
        out_shape=jax.ShapeDtypeStruct((N, w2.shape[1]), jnp.float32),
        compiler_params=cp,
    )(xr, w1, b1, w2, b2)
    return logits[:, :NUM_CLASSES]


# ------------------------------ parameters ------------------------------

def _conv_bn_params(key, cin, cout, k, cin_pad, cout_pad):
    """Random conv + BN(eval) params; BN folded into the weights once, channels padded
    to lane-dense multiples of 128, weights cast to bf16, bias kept f32."""
    kw_, kg, kb, km, kv = jax.random.split(key, 5)
    fan_in = cin * k * k
    w = jax.random.normal(kw_, (k, k, cin, cout), jnp.float32) / math.sqrt(fan_in)
    gamma = jax.random.uniform(kg, (cout,), jnp.float32, 0.8, 1.2)
    beta = 0.05 * jax.random.normal(kb, (cout,), jnp.float32)
    mean = 0.05 * jax.random.normal(km, (cout,), jnp.float32)
    var = jax.random.uniform(kv, (cout,), jnp.float32, 0.8, 1.2)
    scale = gamma / jnp.sqrt(var + 1e-5)
    bias = beta - mean * scale
    wf = w * scale[None, None, None, :]
    wf = jnp.pad(wf, ((0, 0), (0, 0), (0, cin_pad - cin), (0, cout_pad - cout)))
    w_taps = wf.reshape(k * k, cin_pad, cout_pad).astype(jnp.bfloat16)
    bias = jnp.pad(bias, (0, cout_pad - cout)).reshape(1, cout_pad).astype(jnp.float32)
    return (w_taps, bias)


def _linear_params(key, fin, fout, fin_pad, fout_pad):
    kw_, kb = jax.random.split(key)
    bound = 1.0 / math.sqrt(fin)
    w = jax.random.uniform(kw_, (fin, fout), jnp.float32, -bound, bound)
    b = jax.random.uniform(kb, (fout,), jnp.float32, -bound, bound)
    w = jnp.pad(w, ((0, fin_pad - fin), (0, fout_pad - fout))).astype(jnp.bfloat16)
    b = jnp.pad(b, (0, fout_pad - fout)).reshape(1, fout_pad).astype(jnp.float32)
    return (w, b)


def make_params(key):
    keys = iter(jax.random.split(key, 64))
    params = {"conv1": _conv_bn_params(next(keys), 3, WIDTH, 7, STEM_CIN_PAD, _rup(WIDTH))}
    layers = []
    inplanes = WIDTH
    for planes, nblocks, stride in LAYER_CFG:
        blocks = []
        for b in range(nblocks):
            s = stride if b == 0 else 1
            blk = {
                "conv1": _conv_bn_params(next(keys), inplanes, planes, 1,
                                         _rup(inplanes), _rup(planes)),
                "conv2": _conv_bn_params(next(keys), planes, planes, 3,
                                         _rup(planes), _rup(planes)),
                "conv3": _conv_bn_params(next(keys), planes, planes * EXPANSION, 1,
                                         _rup(planes), _rup(planes * EXPANSION)),
            }
            if s != 1 or inplanes != planes * EXPANSION:
                blk["down"] = _conv_bn_params(next(keys), inplanes, planes * EXPANSION, 1,
                                              _rup(inplanes), _rup(planes * EXPANSION))
            inplanes = planes * EXPANSION
            blocks.append(blk)
        layers.append(blocks)
    params["layers"] = layers
    hidden = inplanes  # 512
    params["fc_embed"] = _linear_params(next(keys), hidden, EMBEDDING_DIM,
                                        _rup(hidden), _rup(EMBEDDING_DIM))   # replaces pretrained.fc
    params["fc_head"] = _linear_params(next(keys), EMBEDDING_DIM, NUM_CLASSES,
                                       _rup(EMBEDDING_DIM), _rup(NUM_CLASSES))  # self.fc
    return params


# ------------------------------ forward ------------------------------

def _bottleneck(x, blk, stride):
    N, H, W, C = x.shape
    out = conv_bn(x, blk["conv1"], k=1, stride=1, padding=0, relu=True)
    out = conv_bn(out, blk["conv2"], k=3, stride=stride, padding=1, relu=True)
    if "down" in blk:
        xd_taps, _, _ = _tap_stack(x, 1, 1, stride, 0)          # [1, M, Cin_p]
        wd, bd = blk["down"]
        out = conv_bn(out, blk["conv3"], k=1, stride=1, padding=0, relu=True,
                      downsample=(xd_taps, wd, bd))              # downsample fused in
    else:
        res = x.reshape(N * H * W, C)
        out = conv_bn(out, blk["conv3"], k=1, stride=1, padding=0, relu=True,
                      residual=res)
    return out


def resnet_cifar100_forward(params, x_nchw, is_extract=False):
    x = jnp.transpose(x_nchw, (0, 2, 3, 1)).astype(jnp.bfloat16)         # NCHW -> NHWC
    x = jnp.pad(x, ((0, 0), (0, 0), (0, 0), (0, STEM_CIN_PAD - x.shape[-1])))
    x = conv_bn(x, params["conv1"], k=7, stride=2, padding=3, relu=True)  # 7x7 s2 stem
    x = maxpool_3x3_s2(x)
    for blocks, (planes, nblocks, stride) in zip(params["layers"], LAYER_CFG):
        for b, blk in enumerate(blocks):
            s = stride if b == 0 else 1      # stride is a static Python int (not traced)
            x = _bottleneck(x, blk, s)
    return head(x, params, is_extract)        # avgpool + fc_embed (+ fc_head) fused


if __name__ == "__main__":
    key = jax.random.PRNGKey(0)
    pkey, xkey = jax.random.split(key)
    params = make_params(pkey)
    x = jax.random.normal(xkey, (2, 3, 32, 32), jnp.float32)  # NCHW, CIFAR-sized

    fwd = jax.jit(resnet_cifar100_forward, static_argnames=("is_extract",))
    logits = jax.block_until_ready(fwd(params, x, is_extract=False))
    assert logits.shape == (2, NUM_CLASSES) and logits.dtype == jnp.float32

    emb = jax.block_until_ready(fwd(params, x, is_extract=True))
    assert emb.shape == (2, EMBEDDING_DIM)

    print("KERNEL_OK")
</pallas_src>

<mosaic_0001>
module attributes {stable_mosaic.version = 11 : i64} {
  func.func @_conv_kernel(%arg0: i32, %arg1: i32, %arg2: memref<1x256x8xbf16, #tpu.memory_space<vmem>>, %arg3: memref<1x8x128xbf16, #tpu.memory_space<vmem>>, %arg4: memref<1x128xf32, #tpu.memory_space<vmem>>, %arg5: memref<256x128xbf16, #tpu.memory_space<vmem>>, %arg6: memref<256x128xf32, #tpu.memory_space<vmem>>) attributes {dimension_semantics = [#tpu.dimension_semantics<parallel>, #tpu.dimension_semantics<arbitrary>], iteration_bounds = array<i64: 2, 49>, scalar_prefetch = 0 : i64, scratch_operands = 1 : i64, tpu.core_type = #tpu.core_type<tc>, window_params = [{transform_indices = @transform_0, window_bounds = array<i64: 1, 256, 8>}, {transform_indices = @transform_1, window_bounds = array<i64: 1, 8, 128>}, {pipeline_mode = #tpu.pipeline_mode<synchronous>, transform_indices = @transform_2, window_bounds = array<i64: 1, 128>}, {transform_indices = @transform_3, window_bounds = array<i64: 256, 128>}]} {
    %c0_i32 = arith.constant 0 : i32
    %0 = arith.cmpi eq, %arg1, %c0_i32 : i32
    %1 = arith.extui %0 : i1 to i32
    %c0_i32_0 = arith.constant 0 : i32
    %2 = arith.cmpi ne, %1, %c0_i32_0 : i32
    scf.if %2 {
      %cst_11 = arith.constant 0.000000e+00 : f32
      %14 = vector.broadcast %cst_11 : f32 to vector<256x128xf32>
      %c0_12 = arith.constant 0 : index
      %c0_13 = arith.constant 0 : index
      %15 = vector.load %arg6[%c0_12, %c0_13] : memref<256x128xf32, #tpu.memory_space<vmem>>, vector<256x128xf32>
      tpu.vector_store %arg6[%c0_12, %c0_13], %14 {strides = array<i32>} : memref<256x128xf32, #tpu.memory_space<vmem>>, vector<256x128xf32>,
    } else {
    }
    %c0 = arith.constant 0 : index
    %c0_1 = arith.constant 0 : index
    %3 = vector.load %arg6[%c0, %c0_1] : memref<256x128xf32, #tpu.memory_space<vmem>>, vector<256x128xf32>
    %c0_2 = arith.constant 0 : index
    %c0_3 = arith.constant 0 : index
    %c0_4 = arith.constant 0 : index
    %4 = vector.load %arg2[%c0_2, %c0_3, %c0_4] : memref<1x256x8xbf16, #tpu.memory_space<vmem>>, vector<1x256x8xbf16>
    %5 = vector.shape_cast %4 : vector<1x256x8xbf16> to vector<256x8xbf16>
    %c0_5 = arith.constant 0 : index
    %c0_6 = arith.constant 0 : index
    %c0_7 = arith.constant 0 : index
    %6 = vector.load %arg3[%c0_5, %c0_6, %c0_7] : memref<1x8x128xbf16, #tpu.memory_space<vmem>>, vector<1x8x128xbf16>
    %7 = vector.shape_cast %6 : vector<1x8x128xbf16> to vector<8x128xbf16>
    %cst = arith.constant dense<0.000000e+00> : vector<256x128xf32>
    %8 = tpu.matmul %5, %7, %cst {dimension_numbers = #tpu.dot_dimension_numbers<[1], [0], [0], [1], [0, 0, 1, 1], [], []>} : vector<256x8xbf16>, vector<8x128xbf16>, vector<256x128xf32> -> vector<256x128xf32>
    %9 = arith.addf %3, %8 : vector<256x128xf32>
    %c0_8 = arith.constant 0 : index
    %c0_9 = arith.constant 0 : index
    %10 = vector.load %arg6[%c0_8, %c0_9] : memref<256x128xf32, #tpu.memory_space<vmem>>, vector<256x128xf32>
    tpu.vector_store %arg6[%c0_8, %c0_9], %9 {strides = array<i32>} : memref<256x128xf32, #tpu.memory_space<vmem>>, vector<256x128xf32>,
    %c48_i32 = arith.constant 48 : i32
    %11 = arith.cmpi eq, %arg1, %c48_i32 : i32
    %12 = arith.extui %11 : i1 to i32
    %c0_i32_10 = arith.constant 0 : i32
    %13 = arith.cmpi ne, %12, %c0_i32_10 : i32
    scf.if %13 {
      %c0_11 = arith.constant 0 : index
      %c0_12 = arith.constant 0 : index
      %14 = vector.load %arg6[%c0_11, %c0_12] : memref<256x128xf32, #tpu.memory_space<vmem>>, vector<256x128xf32>
      %c0_13 = arith.constant 0 : index
      %c0_14 = arith.constant 0 : index
      %15 = vector.load %arg4[%c0_13, %c0_14] : memref<1x128xf32, #tpu.memory_space<vmem>>, vector<1x128xf32>
      %16 = vector.broadcast %15 : vector<1x128xf32> to vector<256x128xf32>
      %17 = arith.addf %14, %16 : vector<256x128xf32>
      %cst_15 = arith.constant 0.000000e+00 : f32
      %18 = vector.broadcast %cst_15 : f32 to vector<256x128xf32>
      %19 = arith.maximumf %17, %18 : vector<256x128xf32>
      %20 = arith.truncf %19 : vector<256x128xf32> to vector<256x128xbf16>
      %c0_16 = arith.constant 0 : index
      %c0_17 = arith.constant 0 : index
      %21 = vector.load %arg5[%c0_16, %c0_17] : memref<256x128xbf16, #tpu.memory_space<vmem>>, vector<256x128xbf16>
      tpu.vector_store %arg5[%c0_16, %c0_17], %20 {strides = array<i32>} : memref<256x128xbf16, #tpu.memory_space<vmem>>, vector<256x128xbf16>,
    } else {
    }
    return
  }
  func.func @transform_0(%arg0: i32, %arg1: i32) -> (i32, i32, i32) {
    %c0_i32 = arith.constant 0 : i32
    %c0_i32_0 = arith.constant 0 : i32
    return %arg1, %arg0, %c0_i32 : i32, i32, i32
  }
  func.func @transform_1(%arg0: i32, %arg1: i32) -> (i32, i32, i32) {
    %c0_i32 = arith.constant 0 : i32
    %c0_i32_0 = arith.constant 0 : i32
    %c0_i32_1 = arith.constant 0 : i32
    return %arg1, %c0_i32, %c0_i32_0 : i32, i32, i32
  }
  func.func @transform_2(%arg0: i32, %arg1: i32) -> (i32, i32) {
    %c0_i32 = arith.constant 0 : i32
    %c0_i32_0 = arith.constant 0 : i32
    %c0_i32_1 = arith.constant 0 : i32
    return %c0_i32, %c0_i32_0 : i32, i32
  }
  func.func @transform_3(%arg0: i32, %arg1: i32) -> (i32, i32) {
    %c0_i32 = arith.constant 0 : i32
    %c0_i32_0 = arith.constant 0 : i32
    return %arg0, %c0_i32 : i32, i32
  }
}

module attributes {stable_mosaic.version = 11 : i64} {
  func.func @_maxpool_kernel(%arg0: i32, %arg1: memref<1x128x128xbf16, #tpu.memory_space<vmem>>, %arg2: memref<128x128xbf16, #tpu.memory_space<vmem>>) attributes {dimension_semantics = [#tpu.dimension_semantics<arbitrary>], iteration_bounds = array<i64: 9>, scalar_prefetch = 0 : i64, scratch_operands = 0 : i64, tpu.core_type = #tpu.core_type<tc>, window_params = [{transform_indices = @transform_0, window_bounds = array<i64: 1, 128, 128>}, {pipeline_mode = #tpu.pipeline_mode<synchronous>, transform_indices = @transform_1, window_bounds = array<i64: 128, 128>}]} {
    %c0_i32 = arith.constant 0 : i32
    %0 = arith.cmpi eq, %arg0, %c0_i32 : i32
    %1 = arith.extui %0 : i1 to i32
    %c0_i32_0 = arith.constant 0 : i32
    %2 = arith.cmpi ne, %1, %c0_i32_0 : i32
    scf.if %2 {
      %c0 = arith.constant 0 : index
      %c0_3 = arith.constant 0 : index
      %c0_4 = arith.constant 0 : index
      %6 = vector.load %arg1[%c0, %c0_3, %c0_4] : memref<1x128x128xbf16, #tpu.memory_space<vmem>>, vector<1x128x128xbf16>
      %7 = vector.shape_cast %6 : vector<1x128x128xbf16> to vector<128x128xbf16>
      %c0_5 = arith.constant 0 : index
      %c0_6 = arith.constant 0 : index
      %8 = vector.load %arg2[%c0_5, %c0_6] : memref<128x128xbf16, #tpu.memory_space<vmem>>, vector<128x128xbf16>
      tpu.vector_store %arg2[%c0_5, %c0_6], %7 {strides = array<i32>} : memref<128x128xbf16, #tpu.memory_space<vmem>>, vector<128x128xbf16>,
    } else {
    }
    %c0_i32_1 = arith.constant 0 : i32
    %3 = arith.cmpi sgt, %arg0, %c0_i32_1 : i32
    %4 = arith.extui %3 : i1 to i32
    %c0_i32_2 = arith.constant 0 : i32
    %5 = arith.cmpi ne, %4, %c0_i32_2 : i32
    scf.if %5 {
      %c0 = arith.constant 0 : index
      %c0_3 = arith.constant 0 : index
      %6 = vector.load %arg2[%c0, %c0_3] : memref<128x128xbf16, #tpu.memory_space<vmem>>, vector<128x128xbf16>
      %c0_4 = arith.constant 0 : index
      %c0_5 = arith.constant 0 : index
      %c0_6 = arith.constant 0 : index
      %7 = vector.load %arg1[%c0_4, %c0_5, %c0_6] : memref<1x128x128xbf16, #tpu.memory_space<vmem>>, vector<1x128x128xbf16>
      %8 = vector.shape_cast %7 : vector<1x128x128xbf16> to vector<128x128xbf16>
      %9 = arith.maximumf %6, %8 : vector<128x128xbf16>
      %c0_7 = arith.constant 0 : index
      %c0_8 = arith.constant 0 : index
      %10 = vector.load %arg2[%c0_7, %c0_8] : memref<128x128xbf16, #tpu.memory_space<vmem>>, vector<128x128xbf16>
      tpu.vector_store %arg2[%c0_7, %c0_8], %9 {strides = array<i32>} : memref<128x128xbf16, #tpu.memory_space<vmem>>, vector<128x128xbf16>,
    } else {
    }
    return
  }
  func.func @transform_0(%arg0: i32) -> (i32, i32, i32) {
    %c0_i32 = arith.constant 0 : i32
    %c0_i32_0 = arith.constant 0 : i32
    %c0_i32_1 = arith.constant 0 : i32
    return %arg0, %c0_i32, %c0_i32_0 : i32, i32, i32
  }
  func.func @transform_1(%arg0: i32) -> (i32, i32) {
    %c0_i32 = arith.constant 0 : i32
    %c0_i32_0 = arith.constant 0 : i32
    %c0_i32_1 = arith.constant 0 : i32
    return %c0_i32, %c0_i32_0 : i32, i32
  }
}

module attributes {stable_mosaic.version = 11 : i64} {
  func.func @_conv_kernel(%arg0: i32, %arg1: i32, %arg2: memref<1x128x128xbf16, #tpu.memory_space<vmem>>, %arg3: memref<1x128x128xbf16, #tpu.memory_space<vmem>>, %arg4: memref<1x128xf32, #tpu.memory_space<vmem>>, %arg5: memref<128x128xbf16, #tpu.memory_space<vmem>>, %arg6: memref<128x128xf32, #tpu.memory_space<vmem>>) attributes {dimension_semantics = [#tpu.dimension_semantics<parallel>, #tpu.dimension_semantics<arbitrary>], iteration_bounds = array<i64: 1, 1>, scalar_prefetch = 0 : i64, scratch_operands = 1 : i64, tpu.core_type = #tpu.core_type<tc>, window_params = [{transform_indices = @transform_0, window_bounds = array<i64: 1, 128, 128>}, {transform_indices = @transform_1, window_bounds = array<i64: 1, 128, 128>}, {pipeline_mode = #tpu.pipeline_mode<synchronous>, transform_indices = @transform_2, window_bounds = array<i64: 1, 128>}, {transform_indices = @transform_3, window_bounds = array<i64: 128, 128>}]} {
    %c0_i32 = arith.constant 0 : i32
    %0 = arith.cmpi eq, %arg1, %c0_i32 : i32
    %1 = arith.extui %0 : i1 to i32
    %c0_i32_0 = arith.constant 0 : i32
    %2 = arith.cmpi ne, %1, %c0_i32_0 : i32
    scf.if %2 {
      %cst_12 = arith.constant 0.000000e+00 : f32
      %14 = vector.broadcast %cst_12 : f32 to vector<128x128xf32>
      %c0_13 = arith.constant 0 : index
      %c0_14 = arith.constant 0 : index
      %15 = vector.load %arg6[%c0_13, %c0_14] : memref<128x128xf32, #tpu.memory_space<vmem>>, vector<128x128xf32>
      tpu.vector_store %arg6[%c0_13, %c0_14], %14 {strides = array<i32>} : memref<128x128xf32, #tpu.memory_space<vmem>>, vector<128x128xf32>,
    } else {
    }
    %c0 = arith.constant 0 : index
    %c0_1 = arith.constant 0 : index
    %3 = vector.load %arg6[%c0, %c0_1] : memref<128x128xf32, #tpu.memory_space<vmem>>, vector<128x128xf32>
    %c0_2 = arith.constant 0 : index
    %c0_3 = arith.constant 0 : index
    %c0_4 = arith.constant 0 : index
    %4 = vector.load %arg2[%c0_2, %c0_3, %c0_4] : memref<1x128x128xbf16, #tpu.memory_space<vmem>>, vector<1x128x128xbf16>
    %5 = vector.shape_cast %4 : vector<1x128x128xbf16> to vector<128x128xbf16>
    %c0_5 = arith.constant 0 : index
    %c0_6 = arith.constant 0 : index
    %c0_7 = arith.constant 0 : index
    %6 = vector.load %arg3[%c0_5, %c0_6, %c0_7] : memref<1x128x128xbf16, #tpu.memory_space<vmem>>, vector<1x128x128xbf16>
    %7 = vector.shape_cast %6 : vector<1x128x128xbf16> to vector<128x128xbf16>
    %cst = arith.constant dense<0.000000e+00> : vector<128x128xf32>
    %8 = tpu.matmul %5, %7, %cst {dimension_numbers = #tpu.dot_dimension_numbers<[1], [0], [0], [1], [0, 0, 1, 1], [], []>} : vector<128x128xbf16>, vector<128x128xbf16>, vector<128x128xf32> -> vector<128x128xf32>
    %9 = arith.addf %3, %8 : vector<128x128xf32>
    %c0_8 = arith.constant 0 : index
    %c0_9 = arith.constant 0 : index
    %10 = vector.load %arg6[%c0_8, %c0_9] : memref<128x128xf32, #tpu.memory_space<vmem>>, vector<128x128xf32>
    tpu.vector_store %arg6[%c0_8, %c0_9], %9 {strides = array<i32>} : memref<128x128xf32, #tpu.memory_space<vmem>>, vector<128x128xf32>,
    %c0_i32_10 = arith.constant 0 : i32
    %11 = arith.cmpi eq, %arg1, %c0_i32_10 : i32
    %12 = arith.extui %11 : i1 to i32
    %c0_i32_11 = arith.constant 0 : i32
    %13 = arith.cmpi ne, %12, %c0_i32_11 : i32
    scf.if %13 {
      %c0_12 = arith.constant 0 : index
      %c0_13 = arith.constant 0 : index
      %14 = vector.load %arg6[%c0_12, %c0_13] : memref<128x128xf32, #tpu.memory_space<vmem>>, vector<128x128xf32>
      %c0_14 = arith.constant 0 : index
      %c0_15 = arith.constant 0 : index
      %15 = vector.load %arg4[%c0_14, %c0_15] : memref<1x128xf32, #tpu.memory_space<vmem>>, vector<1x128xf32>
      %16 = vector.broadcast %15 : vector<1x128xf32> to vector<128x128xf32>
      %17 = arith.addf %14, %16 : vector<128x128xf32>
      %cst_16 = arith.constant 0.000000e+00 : f32
      %18 = vector.broadcast %cst_16 : f32 to vector<128x128xf32>
      %19 = arith.maximumf %17, %18 : vector<128x128xf32>
      %20 = arith.truncf %19 : vector<128x128xf32> to vector<128x128xbf16>
      %c0_17 = arith.constant 0 : index
      %c0_18 = arith.constant 0 : index
      %21 = vector.load %arg5[%c0_17, %c0_18] : memref<128x128xbf16, #tpu.memory_space<vmem>>, vector<128x128xbf16>
      tpu.vector_store %arg5[%c0_17, %c0_18], %20 {strides = array<i32>} : memref<128x128xbf16, #tpu.memory_space<vmem>>, vector<128x128xbf16>,
    } else {
    }
    return
  }
  func.func @transform_0(%arg0: i32, %arg1: i32) -> (i32, i32, i32) {
    %c0_i32 = arith.constant 0 : i32
    %c0_i32_0 = arith.constant 0 : i32
    return %arg1, %arg0, %c0_i32 : i32, i32, i32
  }
  func.func @transform_1(%arg0: i32, %arg1: i32) -> (i32, i32, i32) {
    %c0_i32 = arith.constant 0 : i32
    %c0_i32_0 = arith.constant 0 : i32
    %c0_i32_1 = arith.constant 0 : i32
    return %arg1, %c0_i32, %c0_i32_0 : i32, i32, i32
  }
  func.func @transform_2(%arg0: i32, %arg1: i32) -> (i32, i32) {
    %c0_i32 = arith.constant 0 : i32
    %c0_i32_0 = arith.constant 0 : i32
    %c0_i32_1 = arith.constant 0 : i32
    return %c0_i32, %c0_i32_0 : i32, i32
  }
  func.func @transform_3(%arg0: i32, %arg1: i32) -> (i32, i32) {
    %c0_i32 = arith.constant 0 : i32
    %c0_i32_0 = arith.constant 0 : i32
    return %arg0, %c0_i32 : i32, i32
  }
}

module attributes {stable_mosaic.version = 11 : i64} {
  func.func @_conv_kernel(%arg0: i32, %arg1: i32, %arg2: memref<1x128x128xbf16, #tpu.memory_space<vmem>>, %arg3: memref<1x128x128xbf16, #tpu.memory_space<vmem>>, %arg4: memref<1x128xf32, #tpu.memory_space<vmem>>, %arg5: memref<128x128xbf16, #tpu.memory_space<vmem>>, %arg6: memref<128x128xf32, #tpu.memory_space<vmem>>) attributes {dimension_semantics = [#tpu.dimension_semantics<parallel>, #tpu.dimension_semantics<arbitrary>], iteration_bounds = array<i64: 1, 9>, scalar_prefetch = 0 : i64, scratch_operands = 1 : i64, tpu.core_type = #tpu.core_type<tc>, window_params = [{transform_indices = @transform_0, window_bounds = array<i64: 1, 128, 128>}, {transform_indices = @transform_1, window_bounds = array<i64: 1, 128, 128>}, {pipeline_mode = #tpu.pipeline_mode<synchronous>, transform_indices = @transform_2, window_bounds = array<i64: 1, 128>}, {transform_indices = @transform_3, window_bounds = array<i64: 128, 128>}]} {
    %c0_i32 = arith.constant 0 : i32
    %0 = arith.cmpi eq, %arg1, %c0_i32 : i32
    %1 = arith.extui %0 : i1 to i32
    %c0_i32_0 = arith.constant 0 : i32
    %2 = arith.cmpi ne, %1, %c0_i32_0 : i32
    scf.if %2 {
      %cst_11 = arith.constant 0.000000e+00 : f32
      %14 = vector.broadcast %cst_11 : f32 to vector<128x128xf32>
      %c0_12 = arith.constant 0 : index
      %c0_13 = arith.constant 0 : index
      %15 = vector.load %arg6[%c0_12, %c0_13] : memref<128x128xf32, #tpu.memory_space<vmem>>, vector<128x128xf32>
      tpu.vector_store %arg6[%c0_12, %c0_13], %14 {strides = array<i32>} : memref<128x128xf32, #tpu.memory_space<vmem>>, vector<128x128xf32>,
    } else {
    }
    %c0 = arith.constant 0 : index
    %c0_1 = arith.constant 0 : index
    %3 = vector.load %arg6[%c0, %c0_1] : memref<128x128xf32, #tpu.memory_space<vmem>>, vector<128x128xf32>
    %c0_2 = arith.constant 0 : index
    %c0_3 = arith.constant 0 : index
    %c0_4 = arith.constant 0 : index
    %4 = vector.load %arg2[%c0_2, %c0_3, %c0_4] : memref<1x128x128xbf16, #tpu.memory_space<vmem>>, vector<1x128x128xbf16>
    %5 = vector.shape_cast %4 : vector<1x128x128xbf16> to vector<128x128xbf16>
    %c0_5 = arith.constant 0 : index
    %c0_6 = arith.constant 0 : index
    %c0_7 = arith.constant 0 : index
    %6 = vector.load %arg3[%c0_5, %c0_6, %c0_7] : memref<1x128x128xbf16, #tpu.memory_space<vmem>>, vector<1x128x128xbf16>
    %7 = vector.shape_cast %6 : vector<1x128x128xbf16> to vector<128x128xbf16>
    %cst = arith.constant dense<0.000000e+00> : vector<128x128xf32>
    %8 = tpu.matmul %5, %7, %cst {dimension_numbers = #tpu.dot_dimension_numbers<[1], [0], [0], [1], [0, 0, 1, 1], [], []>} : vector<128x128xbf16>, vector<128x128xbf16>, vector<128x128xf32> -> vector<128x128xf32>
    %9 = arith.addf %3, %8 : vector<128x128xf32>
    %c0_8 = arith.constant 0 : index
    %c0_9 = arith.constant 0 : index
    %10 = vector.load %arg6[%c0_8, %c0_9] : memref<128x128xf32, #tpu.memory_space<vmem>>, vector<128x128xf32>
    tpu.vector_store %arg6[%c0_8, %c0_9], %9 {strides = array<i32>} : memref<128x128xf32, #tpu.memory_space<vmem>>, vector<128x128xf32>,
    %c8_i32 = arith.constant 8 : i32
    %11 = arith.cmpi eq, %arg1, %c8_i32 : i32
    %12 = arith.extui %11 : i1 to i32
    %c0_i32_10 = arith.constant 0 : i32
    %13 = arith.cmpi ne, %12, %c0_i32_10 : i32
    scf.if %13 {
      %c0_11 = arith.constant 0 : index
      %c0_12 = arith.constant 0 : index
      %14 = vector.load %arg6[%c0_11, %c0_12] : memref<128x128xf32, #tpu.memory_space<vmem>>, vector<128x128xf32>
      %c0_13 = arith.constant 0 : index
      %c0_14 = arith.constant 0 : index
      %15 = vector.load %arg4[%c0_13, %c0_14] : memref<1x128xf32, #tpu.memory_space<vmem>>, vector<1x128xf32>
      %16 = vector.broadcast %15 : vector<1x128xf32> to vector<128x128xf32>
      %17 = arith.addf %14, %16 : vector<128x128xf32>
      %cst_15 = arith.constant 0.000000e+00 : f32
      %18 = vector.broadcast %cst_15 : f32 to vector<128x128xf32>
      %19 = arith.maximumf %17, %18 : vector<128x128xf32>
      %20 = arith.truncf %19 : vector<128x128xf32> to vector<128x128xbf16>
      %c0_16 = arith.constant 0 : index
      %c0_17 = arith.constant 0 : index
      %21 = vector.load %arg5[%c0_16, %c0_17] : memref<128x128xbf16, #tpu.memory_space<vmem>>, vector<128x128xbf16>
      tpu.vector_store %arg5[%c0_16, %c0_17], %20 {strides = array<i32>} : memref<128x128xbf16, #tpu.memory_space<vmem>>, vector<128x128xbf16>,
    } else {
    }
    return
  }
  func.func @transform_0(%arg0: i32, %arg1: i32) -> (i32, i32, i32) {
    %c0_i32 = arith.constant 0 : i32
    %c0_i32_0 = arith.constant 0 : i32
    return %arg1, %arg0, %c0_i32 : i32, i32, i32
  }
  func.func @transform_1(%arg0: i32, %arg1: i32) -> (i32, i32, i32) {
    %c0_i32 = arith.constant 0 : i32
    %c0_i32_0 = arith.constant 0 : i32
    %c0_i32_1 = arith.constant 0 : i32
    return %arg1, %c0_i32, %c0_i32_0 : i32, i32, i32
  }
  func.func @transform_2(%arg0: i32, %arg1: i32) -> (i32, i32) {
    %c0_i32 = arith.constant 0 : i32
    %c0_i32_0 = arith.constant 0 : i32
    %c0_i32_1 = arith.constant 0 : i32
    return %c0_i32, %c0_i32_0 : i32, i32
  }
  func.func @transform_3(%arg0: i32, %arg1: i32) -> (i32, i32) {
    %c0_i32 = arith.constant 0 : i32
    %c0_i32_0 = arith.constant 0 : i32
    return %arg0, %c0_i32 : i32, i32
  }
}

module attributes {stable_mosaic.version = 11 : i64} {
  func.func @_conv_ds_kernel(%arg0: i32, %arg1: i32, %arg2: memref<1x128x128xbf16, #tpu.memory_space<vmem>>, %arg3: memref<1x128x128xbf16, #tpu.memory_space<vmem>>, %arg4: memref<1x128xf32, #tpu.memory_space<vmem>>, %arg5: memref<1x128x128xbf16, #tpu.memory_space<vmem>>, %arg6: memref<1x128x128xbf16, #tpu.memory_space<vmem>>, %arg7: memref<1x128xf32, #tpu.memory_space<vmem>>, %arg8: memref<128x128xbf16, #tpu.memory_space<vmem>>, %arg9: memref<128x128xf32, #tpu.memory_space<vmem>>) attributes {dimension_semantics = [#tpu.dimension_semantics<parallel>, #tpu.dimension_semantics<arbitrary>], iteration_bounds = array<i64: 1, 1>, scalar_prefetch = 0 : i64, scratch_operands = 1 : i64, tpu.core_type = #tpu.core_type<tc>, window_params = [{transform_indices = @transform_0, window_bounds = array<i64: 1, 128, 128>}, {transform_indices = @transform_1, window_bounds = array<i64: 1, 128, 128>}, {pipeline_mode = #tpu.pipeline_mode<synchronous>, transform_indices = @transform_2, window_bounds = array<i64: 1, 128>}, {transform_indices = @transform_3, window_bounds = array<i64: 1, 128, 128>}, {pipeline_mode = #tpu.pipeline_mode<synchronous>, transform_indices = @transform_4, window_bounds = array<i64: 1, 128, 128>}, {pipeline_mode = #tpu.pipeline_mode<synchronous>, transform_indices = @transform_5, window_bounds = array<i64: 1, 128>}, {transform_indices = @transform_6, window_bounds = array<i64: 128, 128>}]} {
    %c0_i32 = arith.constant 0 : i32
    %0 = arith.cmpi eq, %arg1, %c0_i32 : i32
    %1 = arith.extui %0 : i1 to i32
    %c0_i32_0 = arith.constant 0 : i32
    %2 = arith.cmpi ne, %1, %c0_i32_0 : i32
    scf.if %2 {
      %c0_12 = arith.constant 0 : index
      %c0_13 = arith.constant 0 : index
      %c0_14 = arith.constant 0 : index
      %14 = vector.load %arg5[%c0_12, %c0_13, %c0_14] : memref<1x128x128xbf16, #tpu.memory_space<vmem>>, vector<1x128x128xbf16>
      %15 = vector.shape_cast %14 : vector<1x128x128xbf16> to vector<128x128xbf16>
      %c0_15 = arith.constant 0 : index
      %c0_16 = arith.constant 0 : index
      %c0_17 = arith.constant 0 : index
      %16 = vector.load %arg6[%c0_15, %c0_16, %c0_17] : memref<1x128x128xbf16, #tpu.memory_space<vmem>>, vector<1x128x128xbf16>
      %17 = vector.shape_cast %16 : vector<1x128x128xbf16> to vector<128x128xbf16>
      %cst_18 = arith.constant dense<0.000000e+00> : vector<128x128xf32>
      %18 = tpu.matmul %15, %17, %cst_18 {dimension_numbers = #tpu.dot_dimension_numbers<[1], [0], [0], [1], [0, 0, 1, 1], [], []>} : vector<128x128xbf16>, vector<128x128xbf16>, vector<128x128xf32> -> vector<128x128xf32>
      %c0_19 = arith.constant 0 : index
      %c0_20 = arith.constant 0 : index
      %19 = vector.load %arg7[%c0_19, %c0_20] : memref<1x128xf32, #tpu.memory_space<vmem>>, vector<1x128xf32>
      %20 = vector.broadcast %19 : vector<1x128xf32> to vector<128x128xf32>
      %21 = arith.addf %18, %20 : vector<128x128xf32>
      %c0_21 = arith.constant 0 : index
      %c0_22 = arith.constant 0 : index
      %22 = vector.load %arg9[%c0_21, %c0_22] : memref<128x128xf32, #tpu.memory_space<vmem>>, vector<128x128xf32>
      tpu.vector_store %arg9[%c0_21, %c0_22], %21 {strides = array<i32>} : memref<128x128xf32, #tpu.memory_space<vmem>>, vector<128x128xf32>,
    } else {
    }
    %c0 = arith.constant 0 : index
    %c0_1 = arith.constant 0 : index
    %3 = vector.load %arg9[%c0, %c0_1] : memref<128x128xf32, #tpu.memory_space<vmem>>, vector<128x128xf32>
    %c0_2 = arith.constant 0 : index
    %c0_3 = arith.constant 0 : index
    %c0_4 = arith.constant 0 : index
    %4 = vector.load %arg2[%c0_2, %c0_3, %c0_4] : memref<1x128x128xbf16, #tpu.memory_space<vmem>>, vector<1x128x128xbf16>
    %5 = vector.shape_cast %4 : vector<1x128x128xbf16> to vector<128x128xbf16>
    %c0_5 = arith.constant 0 : index
    %c0_6 = arith.constant 0 : index
    %c0_7 = arith.constant 0 : index
    %6 = vector.load %arg3[%c0_5, %c0_6, %c0_7] : memref<1x128x128xbf16, #tpu.memory_space<vmem>>, vector<1x128x128xbf16>
    %7 = vector.shape_cast %6 : vector<1x128x128xbf16> to vector<128x128xbf16>
    %cst = arith.constant dense<0.000000e+00> : vector<128x128xf32>
    %8 = tpu.matmul %5, %7, %cst {dimension_numbers = #tpu.dot_dimension_numbers<[1], [0], [0], [1], [0, 0, 1, 1], [], []>} : vector<128x128xbf16>, vector<128x128xbf16>, vector<128x128xf32> -> vector<128x128xf32>
    %9 = arith.addf %3, %8 : vector<128x128xf32>
    %c0_8 = arith.constant 0 : index
    %c0_9 = arith.constant 0 : index
    %10 = vector.load %arg9[%c0_8, %c0_9] : memref<128x128xf32, #tpu.memory_space<vmem>>, vector<128x128xf32>
    tpu.vector_store %arg9[%c0_8, %c0_9], %9 {strides = array<i32>} : memref<128x128xf32, #tpu.memory_space<vmem>>, vector<128x128xf32>,
    %c0_i32_10 = arith.constant 0 : i32
    %11 = arith.cmpi eq, %arg1, %c0_i32_10 : i32
    %12 = arith.extui %11 : i1 to i32
    %c0_i32_11 = arith.constant 0 : i32
    %13 = arith.cmpi ne, %12, %c0_i32_11 : i32
    scf.if %13 {
      %c0_12 = arith.constant 0 : index
      %c0_13 = arith.constant 0 : index
      %14 = vector.load %arg9[%c0_12, %c0_13] : memref<128x128xf32, #tpu.memory_space<vmem>>, vector<128x128xf32>
      %c0_14 = arith.constant 0 : index
      %c0_15 = arith.constant 0 : index
      %15 = vector.load %arg4[%c0_14, %c0_15] : memref<1x128xf32, #tpu.memory_space<vmem>>, vector<1x128xf32>
      %16 = vector.broadcast %15 : vector<1x128xf32> to vector<128x128xf32>
      %17 = arith.addf %14, %16 : vector<128x128xf32>
      %cst_16 = arith.constant 0.000000e+00 : f32
      %18 = vector.broadcast %cst_16 : f32 to vector<128x128xf32>
      %19 = arith.maximumf %17, %18 : vector<128x128xf32>
      %20 = arith.truncf %19 : vector<128x128xf32> to vector<128x128xbf16>
      %c0_17 = arith.constant 0 : index
      %c0_18 = arith.constant 0 : index
      %21 = vector.load %arg8[%c0_17, %c0_18] : memref<128x128xbf16, #tpu.memory_space<vmem>>, vector<128x128xbf16>
      tpu.vector_store %arg8[%c0_17, %c0_18], %20 {strides = array<i32>} : memref<128x128xbf16, #tpu.memory_space<vmem>>, vector<128x128xbf16>,
    } else {
    }
    return
  }
  func.func @transform_0(%arg0: i32, %arg1: i32) -> (i32, i32, i32) {
    %c0_i32 = arith.constant 0 : i32
    %c0_i32_0 = arith.constant 0 : i32
    return %arg1, %arg0, %c0_i32 : i32, i32, i32
  }
  func.func @transform_1(%arg0: i32, %arg1: i32) -> (i32, i32, i32) {
    %c0_i32 = arith.constant 0 : i32
    %c0_i32_0 = arith.constant 0 : i32
    %c0_i32_1 = arith.constant 0 : i32
    return %arg1, %c0_i32, %c0_i32_0 : i32, i32, i32
  }
  func.func @transform_2(%arg0: i32, %arg1: i32) -> (i32, i32) {
    %c0_i32 = arith.constant 0 : i32
    %c0_i32_0 = arith.constant 0 : i32
    %c0_i32_1 = arith.constant 0 : i32
    return %c0_i32, %c0_i32_0 : i32, i32
  }
  func.func @transform_3(%arg0: i32, %arg1: i32) -> (i32, i32, i32) {
    %c0_i32 = arith.constant 0 : i32
    %c0_i32_0 = arith.constant 0 : i32
    %c0_i32_1 = arith.constant 0 : i32
    return %c0_i32, %arg0, %c0_i32_0 : i32, i32, i32
  }
  func.func @transform_4(%arg0: i32, %arg1: i32) -> (i32, i32, i32) {
    %c0_i32 = arith.constant 0 : i32
    %c0_i32_0 = arith.constant 0 : i32
    %c0_i32_1 = arith.constant 0 : i32
    %c0_i32_2 = arith.constant 0 : i32
    return %c0_i32, %c0_i32_0, %c0_i32_1 : i32, i32, i32
  }
  func.func @transform_5(%arg0: i32, %arg1: i32) -> (i32, i32) {
    %c0_i32 = arith.constant 0 : i32
    %c0_i32_0 = arith.constant 0 : i32
    %c0_i32_1 = arith.constant 0 : i32
    return %c0_i32, %c0_i32_0 : i32, i32
  }
  func.func @transform_6(%arg0: i32, %arg1: i32) -> (i32, i32) {
    %c0_i32 = arith.constant 0 : i32
    %c0_i32_0 = arith.constant 0 : i32
    return %arg0, %c0_i32 : i32, i32
  }
}

module attributes {stable_mosaic.version = 11 : i64} {
  func.func @_conv_kernel(%arg0: i32, %arg1: i32, %arg2: memref<1x128x128xbf16, #tpu.memory_space<vmem>>, %arg3: memref<1x128x128xbf16, #tpu.memory_space<vmem>>, %arg4: memref<1x128xf32, #tpu.memory_space<vmem>>, %arg5: memref<128x128xbf16, #tpu.memory_space<vmem>>, %arg6: memref<128x128xf32, #tpu.memory_space<vmem>>) attributes {dimension_semantics = [#tpu.dimension_semantics<parallel>, #tpu.dimension_semantics<arbitrary>], iteration_bounds = array<i64: 1, 1>, scalar_prefetch = 0 : i64, scratch_operands = 1 : i64, tpu.core_type = #tpu.core_type<tc>, window_params = [{transform_indices = @transform_0, window_bounds = array<i64: 1, 128, 128>}, {transform_indices = @transform_1, window_bounds = array<i64: 1, 128, 128>}, {pipeline_mode = #tpu.pipeline_mode<synchronous>, transform_indices = @transform_2, window_bounds = array<i64: 1, 128>}, {transform_indices = @transform_3, window_bounds = array<i64: 128, 128>}]} {
    %c0_i32 = arith.constant 0 : i32
    %0 = arith.cmpi eq, %arg1, %c0_i32 : i32
    %1 = arith.extui %0 : i1 to i32
    %c0_i32_0 = arith.constant 0 : i32
    %2 = arith.cmpi ne, %1, %c0_i32_0 : i32
    scf.if %2 {
      %cst_12 = arith.constant 0.000000e+00 : f32
      %14 = vector.broadcast %cst_12 : f32 to vector<128x128xf32>
      %c0_13 = arith.constant 0 : index
      %c0_14 = arith.constant 0 : index
      %15 = vector.load %arg6[%c0_13, %c0_14] : memref<128x128xf32, #tpu.memory_space<vmem>>, vector<128x128xf32>
      tpu.vector_store %arg6[%c0_13, %c0_14], %14 {strides = array<i32>} : memref<128x128xf32, #tpu.memory_space<vmem>>, vector<128x128xf32>,
    } else {
    }
    %c0 = arith.constant 0 : index
    %c0_1 = arith.constant 0 : index
    %3 = vector.load %arg6[%c0, %c0_1] : memref<128x128xf32, #tpu.memory_space<vmem>>, vector<128x128xf32>
    %c0_2 = arith.constant 0 : index
    %c0_3 = arith.constant 0 : index
    %c0_4 = arith.constant 0 : index
    %4 = vector.load %arg2[%c0_2, %c0_3, %c0_4] : memref<1x128x128xbf16, #tpu.memory_space<vmem>>, vector<1x128x128xbf16>
    %5 = vector.shape_cast %4 : vector<1x128x128xbf16> to vector<128x128xbf16>
    %c0_5 = arith.constant 0 : index
    %c0_6 = arith.constant 0 : index
    %c0_7 = arith.constant 0 : index
    %6 = vector.load %arg3[%c0_5, %c0_6, %c0_7] : memref<1x128x128xbf16, #tpu.memory_space<vmem>>, vector<1x128x128xbf16>
    %7 = vector.shape_cast %6 : vector<1x128x128xbf16> to vector<128x128xbf16>
    %cst = arith.constant dense<0.000000e+00> : vector<128x128xf32>
    %8 = tpu.matmul %5, %7, %cst {dimension_numbers = #tpu.dot_dimension_numbers<[1], [0], [0], [1], [0, 0, 1, 1], [], []>} : vector<128x128xbf16>, vector<128x128xbf16>, vector<128x128xf32> -> vector<128x128xf32>
    %9 = arith.addf %3, %8 : vector<128x128xf32>
    %c0_8 = arith.constant 0 : index
    %c0_9 = arith.constant 0 : index
    %10 = vector.load %arg6[%c0_8, %c0_9] : memref<128x128xf32, #tpu.memory_space<vmem>>, vector<128x128xf32>
    tpu.vector_store %arg6[%c0_8, %c0_9], %9 {strides = array<i32>} : memref<128x128xf32, #tpu.memory_space<vmem>>, vector<128x128xf32>,
    %c0_i32_10 = arith.constant 0 : i32
    %11 = arith.cmpi eq, %arg1, %c0_i32_10 : i32
    %12 = arith.extui %11 : i1 to i32
    %c0_i32_11 = arith.constant 0 : i32
    %13 = arith.cmpi ne, %12, %c0_i32_11 : i32
    scf.if %13 {
      %c0_12 = arith.constant 0 : index
      %c0_13 = arith.constant 0 : index
      %14 = vector.load %arg6[%c0_12, %c0_13] : memref<128x128xf32, #tpu.memory_space<vmem>>, vector<128x128xf32>
      %c0_14 = arith.constant 0 : index
      %c0_15 = arith.constant 0 : index
      %15 = vector.load %arg4[%c0_14, %c0_15] : memref<1x128xf32, #tpu.memory_space<vmem>>, vector<1x128xf32>
      %16 = vector.broadcast %15 : vector<1x128xf32> to vector<128x128xf32>
      %17 = arith.addf %14, %16 : vector<128x128xf32>
      %cst_16 = arith.constant 0.000000e+00 : f32
      %18 = vector.broadcast %cst_16 : f32 to vector<128x128xf32>
      %19 = arith.maximumf %17, %18 : vector<128x128xf32>
      %20 = arith.truncf %19 : vector<128x128xf32> to vector<128x128xbf16>
      %c0_17 = arith.constant 0 : index
      %c0_18 = arith.constant 0 : index
      %21 = vector.load %arg5[%c0_17, %c0_18] : memref<128x128xbf16, #tpu.memory_space<vmem>>, vector<128x128xbf16>
      tpu.vector_store %arg5[%c0_17, %c0_18], %20 {strides = array<i32>} : memref<128x128xbf16, #tpu.memory_space<vmem>>, vector<128x128xbf16>,
    } else {
    }
    return
  }
  func.func @transform_0(%arg0: i32, %arg1: i32) -> (i32, i32, i32) {
    %c0_i32 = arith.constant 0 : i32
    %c0_i32_0 = arith.constant 0 : i32
    return %arg1, %arg0, %c0_i32 : i32, i32, i32
  }
  func.func @transform_1(%arg0: i32, %arg1: i32) -> (i32, i32, i32) {
    %c0_i32 = arith.constant 0 : i32
    %c0_i32_0 = arith.constant 0 : i32
    %c0_i32_1 = arith.constant 0 : i32
    return %arg1, %c0_i32, %c0_i32_0 : i32, i32, i32
  }
  func.func @transform_2(%arg0: i32, %arg1: i32) -> (i32, i32) {
    %c0_i32 = arith.constant 0 : i32
    %c0_i32_0 = arith.constant 0 : i32
    %c0_i32_1 = arith.constant 0 : i32
    return %c0_i32, %c0_i32_0 : i32, i32
  }
  func.func @transform_3(%arg0: i32, %arg1: i32) -> (i32, i32) {
    %c0_i32 = arith.constant 0 : i32
    %c0_i32_0 = arith.constant 0 : i32
    return %arg0, %c0_i32 : i32, i32
  }
}

module attributes {stable_mosaic.version = 11 : i64} {
  func.func @_conv_res_kernel(%arg0: i32, %arg1: i32, %arg2: memref<1x128x128xbf16, #tpu.memory_space<vmem>>, %arg3: memref<1x128x128xbf16, #tpu.memory_space<vmem>>, %arg4: memref<1x128xf32, #tpu.memory_space<vmem>>, %arg5: memref<128x128xbf16, #tpu.memory_space<vmem>>, %arg6: memref<128x128xbf16, #tpu.memory_space<vmem>>, %arg7: memref<128x128xf32, #tpu.memory_space<vmem>>) attributes {dimension_semantics = [#tpu.dimension_semantics<parallel>, #tpu.dimension_semantics<arbitrary>], iteration_bounds = array<i64: 1, 1>, scalar_prefetch = 0 : i64, scratch_operands = 1 : i64, tpu.core_type = #tpu.core_type<tc>, window_params = [{transform_indices = @transform_0, window_bounds = array<i64: 1, 128, 128>}, {transform_indices = @transform_1, window_bounds = array<i64: 1, 128, 128>}, {pipeline_mode = #tpu.pipeline_mode<synchronous>, transform_indices = @transform_2, window_bounds = array<i64: 1, 128>}, {transform_indices = @transform_3, window_bounds = array<i64: 128, 128>}, {transform_indices = @transform_4, window_bounds = array<i64: 128, 128>}]} {
    %c0_i32 = arith.constant 0 : i32
    %0 = arith.cmpi eq, %arg1, %c0_i32 : i32
    %1 = arith.extui %0 : i1 to i32
    %c0_i32_0 = arith.constant 0 : i32
    %2 = arith.cmpi ne, %1, %c0_i32_0 : i32
    scf.if %2 {
      %cst_12 = arith.constant 0.000000e+00 : f32
      %14 = vector.broadcast %cst_12 : f32 to vector<128x128xf32>
      %c0_13 = arith.constant 0 : index
      %c0_14 = arith.constant 0 : index
      %15 = vector.load %arg7[%c0_13, %c0_14] : memref<128x128xf32, #tpu.memory_space<vmem>>, vector<128x128xf32>
      tpu.vector_store %arg7[%c0_13, %c0_14], %14 {strides = array<i32>} : memref<128x128xf32, #tpu.memory_space<vmem>>, vector<128x128xf32>,
    } else {
    }
    %c0 = arith.constant 0 : index
    %c0_1 = arith.constant 0 : index
    %3 = vector.load %arg7[%c0, %c0_1] : memref<128x128xf32, #tpu.memory_space<vmem>>, vector<128x128xf32>
    %c0_2 = arith.constant 0 : index
    %c0_3 = arith.constant 0 : index
    %c0_4 = arith.constant 0 : index
    %4 = vector.load %arg2[%c0_2, %c0_3, %c0_4] : memref<1x128x128xbf16, #tpu.memory_space<vmem>>, vector<1x128x128xbf16>
    %5 = vector.shape_cast %4 : vector<1x128x128xbf16> to vector<128x128xbf16>
    %c0_5 = arith.constant 0 : index
    %c0_6 = arith.constant 0 : index
    %c0_7 = arith.constant 0 : index
    %6 = vector.load %arg3[%c0_5, %c0_6, %c0_7] : memref<1x128x128xbf16, #tpu.memory_space<vmem>>, vector<1x128x128xbf16>
    %7 = vector.shape_cast %6 : vector<1x128x128xbf16> to vector<128x128xbf16>
    %cst = arith.constant dense<0.000000e+00> : vector<128x128xf32>
    %8 = tpu.matmul %5, %7, %cst {dimension_numbers = #tpu.dot_dimension_numbers<[1], [0], [0], [1], [0, 0, 1, 1], [], []>} : vector<128x128xbf16>, vector<128x128xbf16>, vector<128x128xf32> -> vector<128x128xf32>
    %9 = arith.addf %3, %8 : vector<128x128xf32>
    %c0_8 = arith.constant 0 : index
    %c0_9 = arith.constant 0 : index
    %10 = vector.load %arg7[%c0_8, %c0_9] : memref<128x128xf32, #tpu.memory_space<vmem>>, vector<128x128xf32>
    tpu.vector_store %arg7[%c0_8, %c0_9], %9 {strides = array<i32>} : memref<128x128xf32, #tpu.memory_space<vmem>>, vector<128x128xf32>,
    %c0_i32_10 = arith.constant 0 : i32
    %11 = arith.cmpi eq, %arg1, %c0_i32_10 : i32
    %12 = arith.extui %11 : i1 to i32
    %c0_i32_11 = arith.constant 0 : i32
    %13 = arith.cmpi ne, %12, %c0_i32_11 : i32
    scf.if %13 {
      %c0_12 = arith.constant 0 : index
      %c0_13 = arith.constant 0 : index
      %14 = vector.load %arg7[%c0_12, %c0_13] : memref<128x128xf32, #tpu.memory_space<vmem>>, vector<128x128xf32>
      %c0_14 = arith.constant 0 : index
      %c0_15 = arith.constant 0 : index
      %15 = vector.load %arg4[%c0_14, %c0_15] : memref<1x128xf32, #tpu.memory_space<vmem>>, vector<1x128xf32>
      %16 = vector.broadcast %15 : vector<1x128xf32> to vector<128x128xf32>
      %17 = arith.addf %14, %16 : vector<128x128xf32>
      %c0_16 = arith.constant 0 : index
      %c0_17 = arith.constant 0 : index
      %18 = vector.load %arg5[%c0_16, %c0_17] : memref<128x128xbf16, #tpu.memory_space<vmem>>, vector<128x128xbf16>
      %19 = arith.extf %18 : vector<128x128xbf16> to vector<128x128xf32>
      %20 = arith.addf %17, %19 : vector<128x128xf32>
      %cst_18 = arith.constant 0.000000e+00 : f32
      %21 = vector.broadcast %cst_18 : f32 to vector<128x128xf32>
      %22 = arith.maximumf %20, %21 : vector<128x128xf32>
      %23 = arith.truncf %22 : vector<128x128xf32> to vector<128x128xbf16>
      %c0_19 = arith.constant 0 : index
      %c0_20 = arith.constant 0 : index
      %24 = vector.load %arg6[%c0_19, %c0_20] : memref<128x128xbf16, #tpu.memory_space<vmem>>, vector<128x128xbf16>
      tpu.vector_store %arg6[%c0_19, %c0_20], %23 {strides = array<i32>} : memref<128x128xbf16, #tpu.memory_space<vmem>>, vector<128x128xbf16>,
    } else {
    }
    return
  }
  func.func @transform_0(%arg0: i32, %arg1: i32) -> (i32, i32, i32) {
    %c0_i32 = arith.constant 0 : i32
    %c0_i32_0 = arith.constant 0 : i32
    return %arg1, %arg0, %c0_i32 : i32, i32, i32
  }
  func.func @transform_1(%arg0: i32, %arg1: i32) -> (i32, i32, i32) {
    %c0_i32 = arith.constant 0 : i32
    %c0_i32_0 = arith.constant 0 : i32
    %c0_i32_1 = arith.constant 0 : i32
    return %arg1, %c0_i32, %c0_i32_0 : i32, i32, i32
  }
  func.func @transform_2(%arg0: i32, %arg1: i32) -> (i32, i32) {
    %c0_i32 = arith.constant 0 : i32
    %c0_i32_0 = arith.constant 0 : i32
    %c0_i32_1 = arith.constant 0 : i32
    return %c0_i32, %c0_i32_0 : i32, i32
  }
  func.func @transform_3(%arg0: i32, %arg1: i32) -> (i32, i32) {
    %c0_i32 = arith.constant 0 : i32
    %c0_i32_0 = arith.constant 0 : i32
    return %arg0, %c0_i32 : i32, i32
  }
  func.func @transform_4(%arg0: i32, %arg1: i32) -> (i32, i32) {
    %c0_i32 = arith.constant 0 : i32
    %c0_i32_0 = arith.constant 0 : i32
    return %arg0, %c0_i32 : i32, i32
  }
}

module attributes {stable_mosaic.version = 11 : i64} {
  func.func @_conv_kernel(%arg0: i32, %arg1: i32, %arg2: memref<1x128x128xbf16, #tpu.memory_space<vmem>>, %arg3: memref<1x128x128xbf16, #tpu.memory_space<vmem>>, %arg4: memref<1x128xf32, #tpu.memory_space<vmem>>, %arg5: memref<128x128xbf16, #tpu.memory_space<vmem>>, %arg6: memref<128x128xf32, #tpu.memory_space<vmem>>) attributes {dimension_semantics = [#tpu.dimension_semantics<parallel>, #tpu.dimension_semantics<arbitrary>], iteration_bounds = array<i64: 1, 1>, scalar_prefetch = 0 : i64, scratch_operands = 1 : i64, tpu.core_type = #tpu.core_type<tc>, window_params = [{transform_indices = @transform_0, window_bounds = array<i64: 1, 128, 128>}, {transform_indices = @transform_1, window_bounds = array<i64: 1, 128, 128>}, {pipeline_mode = #tpu.pipeline_mode<synchronous>, transform_indices = @transform_2, window_bounds = array<i64: 1, 128>}, {transform_indices = @transform_3, window_bounds = array<i64: 128, 128>}]} {
    %c0_i32 = arith.constant 0 : i32
    %0 = arith.cmpi eq, %arg1, %c0_i32 : i32
    %1 = arith.extui %0 : i1 to i32
    %c0_i32_0 = arith.constant 0 : i32
    %2 = arith.cmpi ne, %1, %c0_i32_0 : i32
    scf.if %2 {
      %cst_12 = arith.constant 0.000000e+00 : f32
      %14 = vector.broadcast %cst_12 : f32 to vector<128x128xf32>
      %c0_13 = arith.constant 0 : index
      %c0_14 = arith.constant 0 : index
      %15 = vector.load %arg6[%c0_13, %c0_14] : memref<128x128xf32, #tpu.memory_space<vmem>>, vector<128x128xf32>
      tpu.vector_store %arg6[%c0_13, %c0_14], %14 {strides = array<i32>} : memref<128x128xf32, #tpu.memory_space<vmem>>, vector<128x128xf32>,
    } else {
    }
    %c0 = arith.constant 0 : index
    %c0_1 = arith.constant 0 : index
    %3 = vector.load %arg6[%c0, %c0_1] : memref<128x128xf32, #tpu.memory_space<vmem>>, vector<128x128xf32>
    %c0_2 = arith.constant 0 : index
    %c0_3 = arith.constant 0 : index
    %c0_4 = arith.constant 0 : index
    %4 = vector.load %arg2[%c0_2, %c0_3, %c0_4] : memref<1x128x128xbf16, #tpu.memory_space<vmem>>, vector<1x128x128xbf16>
    %5 = vector.shape_cast %4 : vector<1x128x128xbf16> to vector<128x128xbf16>
    %c0_5 = arith.constant 0 : index
    %c0_6 = arith.constant 0 : index
    %c0_7 = arith.constant 0 : index
    %6 = vector.load %arg3[%c0_5, %c0_6, %c0_7] : memref<1x128x128xbf16, #tpu.memory_space<vmem>>, vector<1x128x128xbf16>
    %7 = vector.shape_cast %6 : vector<1x128x128xbf16> to vector<128x128xbf16>
    %cst = arith.constant dense<0.000000e+00> : vector<128x128xf32>
    %8 = tpu.matmul %5, %7, %cst {dimension_numbers = #tpu.dot_dimension_numbers<[1], [0], [0], [1], [0, 0, 1, 1], [], []>} : vector<128x128xbf16>, vector<128x128xbf16>, vector<128x128xf32> -> vector<128x128xf32>
    %9 = arith.addf %3, %8 : vector<128x128xf32>
    %c0_8 = arith.constant 0 : index
    %c0_9 = arith.constant 0 : index
    %10 = vector.load %arg6[%c0_8, %c0_9] : memref<128x128xf32, #tpu.memory_space<vmem>>, vector<128x128xf32>
    tpu.vector_store %arg6[%c0_8, %c0_9], %9 {strides = array<i32>} : memref<128x128xf32, #tpu.memory_space<vmem>>, vector<128x128xf32>,
    %c0_i32_10 = arith.constant 0 : i32
    %11 = arith.cmpi eq, %arg1, %c0_i32_10 : i32
    %12 = arith.extui %11 : i1 to i32
    %c0_i32_11 = arith.constant 0 : i32
    %13 = arith.cmpi ne, %12, %c0_i32_11 : i32
    scf.if %13 {
      %c0_12 = arith.constant 0 : index
      %c0_13 = arith.constant 0 : index
      %14 = vector.load %arg6[%c0_12, %c0_13] : memref<128x128xf32, #tpu.memory_space<vmem>>, vector<128x128xf32>
      %c0_14 = arith.constant 0 : index
      %c0_15 = arith.constant 0 : index
      %15 = vector.load %arg4[%c0_14, %c0_15] : memref<1x128xf32, #tpu.memory_space<vmem>>, vector<1x128xf32>
      %16 = vector.broadcast %15 : vector<1x128xf32> to vector<128x128xf32>
      %17 = arith.addf %14, %16 : vector<128x128xf32>
      %cst_16 = arith.constant 0.000000e+00 : f32
      %18 = vector.broadcast %cst_16 : f32 to vector<128x128xf32>
      %19 = arith.maximumf %17, %18 : vector<128x128xf32>
      %20 = arith.truncf %19 : vector<128x128xf32> to vector<128x128xbf16>
      %c0_17 = arith.constant 0 : index
      %c0_18 = arith.constant 0 : index
      %21 = vector.load %arg5[%c0_17, %c0_18] : memref<128x128xbf16, #tpu.memory_space<vmem>>, vector<128x128xbf16>
      tpu.vector_store %arg5[%c0_17, %c0_18], %20 {strides = array<i32>} : memref<128x128xbf16, #tpu.memory_space<vmem>>, vector<128x128xbf16>,
    } else {
    }
    return
  }
  func.func @transform_0(%arg0: i32, %arg1: i32) -> (i32, i32, i32) {
    %c0_i32 = arith.constant 0 : i32
    %c0_i32_0 = arith.constant 0 : i32
    return %arg1, %arg0, %c0_i32 : i32, i32, i32
  }
  func.func @transform_1(%arg0: i32, %arg1: i32) -> (i32, i32, i32) {
    %c0_i32 = arith.constant 0 : i32
    %c0_i32_0 = arith.constant 0 : i32
    %c0_i32_1 = arith.constant 0 : i32
    return %arg1, %c0_i32, %c0_i32_0 : i32, i32, i32
  }
  func.func @transform_2(%arg0: i32, %arg1: i32) -> (i32, i32) {
    %c0_i32 = arith.constant 0 : i32
    %c0_i32_0 = arith.constant 0 : i32
    %c0_i32_1 = arith.constant 0 : i32
    return %c0_i32, %c0_i32_0 : i32, i32
  }
  func.func @transform_3(%arg0: i32, %arg1: i32) -> (i32, i32) {
    %c0_i32 = arith.constant 0 : i32
    %c0_i32_0 = arith.constant 0 : i32
    return %arg0, %c0_i32 : i32, i32
  }
}

module attributes {stable_mosaic.version = 11 : i64} {
  func.func @_conv_kernel(%arg0: i32, %arg1: i32, %arg2: memref<1x32x128xbf16, #tpu.memory_space<vmem>>, %arg3: memref<1x128x128xbf16, #tpu.memory_space<vmem>>, %arg4: memref<1x128xf32, #tpu.memory_space<vmem>>, %arg5: memref<32x128xbf16, #tpu.memory_space<vmem>>, %arg6: memref<32x128xf32, #tpu.memory_space<vmem>>) attributes {dimension_semantics = [#tpu.dimension_semantics<parallel>, #tpu.dimension_semantics<arbitrary>], iteration_bounds = array<i64: 1, 9>, scalar_prefetch = 0 : i64, scratch_operands = 1 : i64, tpu.core_type = #tpu.core_type<tc>, window_params = [{transform_indices = @transform_0, window_bounds = array<i64: 1, 32, 128>}, {transform_indices = @transform_1, window_bounds = array<i64: 1, 128, 128>}, {pipeline_mode = #tpu.pipeline_mode<synchronous>, transform_indices = @transform_2, window_bounds = array<i64: 1, 128>}, {transform_indices = @transform_3, window_bounds = array<i64: 32, 128>}]} {
    %c0_i32 = arith.constant 0 : i32
    %0 = arith.cmpi eq, %arg1, %c0_i32 : i32
    %1 = arith.extui %0 : i1 to i32
    %c0_i32_0 = arith.constant 0 : i32
    %2 = arith.cmpi ne, %1, %c0_i32_0 : i32
    scf.if %2 {
      %cst_11 = arith.constant 0.000000e+00 : f32
      %14 = vector.broadcast %cst_11 : f32 to vector<32x128xf32>
      %c0_12 = arith.constant 0 : index
      %c0_13 = arith.constant 0 : index
      %15 = vector.load %arg6[%c0_12, %c0_13] : memref<32x128xf32, #tpu.memory_space<vmem>>, vector<32x128xf32>
      tpu.vector_store %arg6[%c0_12, %c0_13], %14 {strides = array<i32>} : memref<32x128xf32, #tpu.memory_space<vmem>>, vector<32x128xf32>,
    } else {
    }
    %c0 = arith.constant 0 : index
    %c0_1 = arith.constant 0 : index
    %3 = vector.load %arg6[%c0, %c0_1] : memref<32x128xf32, #tpu.memory_space<vmem>>, vector<32x128xf32>
    %c0_2 = arith.constant 0 : index
    %c0_3 = arith.constant 0 : index
    %c0_4 = arith.constant 0 : index
    %4 = vector.load %arg2[%c0_2, %c0_3, %c0_4] : memref<1x32x128xbf16, #tpu.memory_space<vmem>>, vector<1x32x128xbf16>
    %5 = vector.shape_cast %4 : vector<1x32x128xbf16> to vector<32x128xbf16>
    %c0_5 = arith.constant 0 : index
    %c0_6 = arith.constant 0 : index
    %c0_7 = arith.constant 0 : index
    %6 = vector.load %arg3[%c0_5, %c0_6, %c0_7] : memref<1x128x128xbf16, #tpu.memory_space<vmem>>, vector<1x128x128xbf16>
    %7 = vector.shape_cast %6 : vector<1x128x128xbf16> to vector<128x128xbf16>
    %cst = arith.constant dense<0.000000e+00> : vector<32x128xf32>
    %8 = tpu.matmul %5, %7, %cst {dimension_numbers = #tpu.dot_dimension_numbers<[1], [0], [0], [1], [0, 0, 1, 1], [], []>} : vector<32x128xbf16>, vector<128x128xbf16>, vector<32x128xf32> -> vector<32x128xf32>
    %9 = arith.addf %3, %8 : vector<32x128xf32>
    %c0_8 = arith.constant 0 : index
    %c0_9 = arith.constant 0 : index
    %10 = vector.load %arg6[%c0_8, %c0_9] : memref<32x128xf32, #tpu.memory_space<vmem>>, vector<32x128xf32>
    tpu.vector_store %arg6[%c0_8, %c0_9], %9 {strides = array<i32>} : memref<32x128xf32, #tpu.memory_space<vmem>>, vector<32x128xf32>,
    %c8_i32 = arith.constant 8 : i32
    %11 = arith.cmpi eq, %arg1, %c8_i32 : i32
    %12 = arith.extui %11 : i1 to i32
    %c0_i32_10 = arith.constant 0 : i32
    %13 = arith.cmpi ne, %12, %c0_i32_10 : i32
    scf.if %13 {
      %c0_11 = arith.constant 0 : index
      %c0_12 = arith.constant 0 : index
      %14 = vector.load %arg6[%c0_11, %c0_12] : memref<32x128xf32, #tpu.memory_space<vmem>>, vector<32x128xf32>
      %c0_13 = arith.constant 0 : index
      %c0_14 = arith.constant 0 : index
      %15 = vector.load %arg4[%c0_13, %c0_14] : memref<1x128xf32, #tpu.memory_space<vmem>>, vector<1x128xf32>
      %16 = vector.broadcast %15 : vector<1x128xf32> to vector<32x128xf32>
      %17 = arith.addf %14, %16 : vector<32x128xf32>
      %cst_15 = arith.constant 0.000000e+00 : f32
      %18 = vector.broadcast %cst_15 : f32 to vector<32x128xf32>
      %19 = arith.maximumf %17, %18 : vector<32x128xf32>
      %20 = arith.truncf %19 : vector<32x128xf32> to vector<32x128xbf16>
      %c0_16 = arith.constant 0 : index
      %c0_17 = arith.constant 0 : index
      %21 = vector.load %arg5[%c0_16, %c0_17] : memref<32x128xbf16, #tpu.memory_space<vmem>>, vector<32x128xbf16>
      tpu.vector_store %arg5[%c0_16, %c0_17], %20 {strides = array<i32>} : memref<32x128xbf16, #tpu.memory_space<vmem>>, vector<32x128xbf16>,
    } else {
    }
    return
  }
  func.func @transform_0(%arg0: i32, %arg1: i32) -> (i32, i32, i32) {
    %c0_i32 = arith.constant 0 : i32
    %c0_i32_0 = arith.constant 0 : i32
    return %arg1, %arg0, %c0_i32 : i32, i32, i32
  }
  func.func @transform_1(%arg0: i32, %arg1: i32) -> (i32, i32, i32) {
    %c0_i32 = arith.constant 0 : i32
    %c0_i32_0 = arith.constant 0 : i32
    %c0_i32_1 = arith.constant 0 : i32
    return %arg1, %c0_i32, %c0_i32_0 : i32, i32, i32
  }
  func.func @transform_2(%arg0: i32, %arg1: i32) -> (i32, i32) {
    %c0_i32 = arith.constant 0 : i32
    %c0_i32_0 = arith.constant 0 : i32
    %c0_i32_1 = arith.constant 0 : i32
    return %c0_i32, %c0_i32_0 : i32, i32
  }
  func.func @transform_3(%arg0: i32, %arg1: i32) -> (i32, i32) {
    %c0_i32 = arith.constant 0 : i32
    %c0_i32_0 = arith.constant 0 : i32
    return %arg0, %c0_i32 : i32, i32
  }
}

module attributes {stable_mosaic.version = 11 : i64} {
  func.func @_conv_ds_kernel(%arg0: i32, %arg1: i32, %arg2: memref<1x32x128xbf16, #tpu.memory_space<vmem>>, %arg3: memref<1x128x128xbf16, #tpu.memory_space<vmem>>, %arg4: memref<1x128xf32, #tpu.memory_space<vmem>>, %arg5: memref<1x32x128xbf16, #tpu.memory_space<vmem>>, %arg6: memref<1x128x128xbf16, #tpu.memory_space<vmem>>, %arg7: memref<1x128xf32, #tpu.memory_space<vmem>>, %arg8: memref<32x128xbf16, #tpu.memory_space<vmem>>, %arg9: memref<32x128xf32, #tpu.memory_space<vmem>>) attributes {dimension_semantics = [#tpu.dimension_semantics<parallel>, #tpu.dimension_semantics<arbitrary>], iteration_bounds = array<i64: 1, 1>, scalar_prefetch = 0 : i64, scratch_operands = 1 : i64, tpu.core_type = #tpu.core_type<tc>, window_params = [{transform_indices = @transform_0, window_bounds = array<i64: 1, 32, 128>}, {transform_indices = @transform_1, window_bounds = array<i64: 1, 128, 128>}, {pipeline_mode = #tpu.pipeline_mode<synchronous>, transform_indices = @transform_2, window_bounds = array<i64: 1, 128>}, {transform_indices = @transform_3, window_bounds = array<i64: 1, 32, 128>}, {pipeline_mode = #tpu.pipeline_mode<synchronous>, transform_indices = @transform_4, window_bounds = array<i64: 1, 128, 128>}, {pipeline_mode = #tpu.pipeline_mode<synchronous>, transform_indices = @transform_5, window_bounds = array<i64: 1, 128>}, {transform_indices = @transform_6, window_bounds = array<i64: 32, 128>}]} {
    %c0_i32 = arith.constant 0 : i32
    %0 = arith.cmpi eq, %arg1, %c0_i32 : i32
    %1 = arith.extui %0 : i1 to i32
    %c0_i32_0 = arith.constant 0 : i32
    %2 = arith.cmpi ne, %1, %c0_i32_0 : i32
    scf.if %2 {
      %c0_12 = arith.constant 0 : index
      %c0_13 = arith.constant 0 : index
      %c0_14 = arith.constant 0 : index
      %14 = vector.load %arg5[%c0_12, %c0_13, %c0_14] : memref<1x32x128xbf16, #tpu.memory_space<vmem>>, vector<1x32x128xbf16>
      %15 = vector.shape_cast %14 : vector<1x32x128xbf16> to vector<32x128xbf16>
      %c0_15 = arith.constant 0 : index
      %c0_16 = arith.constant 0 : index
      %c0_17 = arith.constant 0 : index
      %16 = vector.load %arg6[%c0_15, %c0_16, %c0_17] : memref<1x128x128xbf16, #tpu.memory_space<vmem>>, vector<1x128x128xbf16>
      %17 = vector.shape_cast %16 : vector<1x128x128xbf16> to vector<128x128xbf16>
      %cst_18 = arith.constant dense<0.000000e+00> : vector<32x128xf32>
      %18 = tpu.matmul %15, %17, %cst_18 {dimension_numbers = #tpu.dot_dimension_numbers<[1], [0], [0], [1], [0, 0, 1, 1], [], []>} : vector<32x128xbf16>, vector<128x128xbf16>, vector<32x128xf32> -> vector<32x128xf32>
      %c0_19 = arith.constant 0 : index
      %c0_20 = arith.constant 0 : index
      %19 = vector.load %arg7[%c0_19, %c0_20] : memref<1x128xf32, #tpu.memory_space<vmem>>, vector<1x128xf32>
      %20 = vector.broadcast %19 : vector<1x128xf32> to vector<32x128xf32>
      %21 = arith.addf %18, %20 : vector<32x128xf32>
      %c0_21 = arith.constant 0 : index
      %c0_22 = arith.constant 0 : index
      %22 = vector.load %arg9[%c0_21, %c0_22] : memref<32x128xf32, #tpu.memory_space<vmem>>, vector<32x128xf32>
      tpu.vector_store %arg9[%c0_21, %c0_22], %21 {strides = array<i32>} : memref<32x128xf32, #tpu.memory_space<vmem>>, vector<32x128xf32>,
    } else {
    }
    %c0 = arith.constant 0 : index
    %c0_1 = arith.constant 0 : index
    %3 = vector.load %arg9[%c0, %c0_1] : memref<32x128xf32, #tpu.memory_space<vmem>>, vector<32x128xf32>
    %c0_2 = arith.constant 0 : index
    %c0_3 = arith.constant 0 : index
    %c0_4 = arith.constant 0 : index
    %4 = vector.load %arg2[%c0_2, %c0_3, %c0_4] : memref<1x32x128xbf16, #tpu.memory_space<vmem>>, vector<1x32x128xbf16>
    %5 = vector.shape_cast %4 : vector<1x32x128xbf16> to vector<32x128xbf16>
    %c0_5 = arith.constant 0 : index
    %c0_6 = arith.constant 0 : index
    %c0_7 = arith.constant 0 : index
    %6 = vector.load %arg3[%c0_5, %c0_6, %c0_7] : memref<1x128x128xbf16, #tpu.memory_space<vmem>>, vector<1x128x128xbf16>
    %7 = vector.shape_cast %6 : vector<1x128x128xbf16> to vector<128x128xbf16>
    %cst = arith.constant dense<0.000000e+00> : vector<32x128xf32>
    %8 = tpu.matmul %5, %7, %cst {dimension_numbers = #tpu.dot_dimension_numbers<[1], [0], [0], [1], [0, 0, 1, 1], [], []>} : vector<32x128xbf16>, vector<128x128xbf16>, vector<32x128xf32> -> vector<32x128xf32>
    %9 = arith.addf %3, %8 : vector<32x128xf32>
    %c0_8 = arith.constant 0 : index
    %c0_9 = arith.constant 0 : index
    %10 = vector.load %arg9[%c0_8, %c0_9] : memref<32x128xf32, #tpu.memory_space<vmem>>, vector<32x128xf32>
    tpu.vector_store %arg9[%c0_8, %c0_9], %9 {strides = array<i32>} : memref<32x128xf32, #tpu.memory_space<vmem>>, vector<32x128xf32>,
    %c0_i32_10 = arith.constant 0 : i32
    %11 = arith.cmpi eq, %arg1, %c0_i32_10 : i32
    %12 = arith.extui %11 : i1 to i32
    %c0_i32_11 = arith.constant 0 : i32
    %13 = arith.cmpi ne, %12, %c0_i32_11 : i32
    scf.if %13 {
      %c0_12 = arith.constant 0 : index
      %c0_13 = arith.constant 0 : index
      %14 = vector.load %arg9[%c0_12, %c0_13] : memref<32x128xf32, #tpu.memory_space<vmem>>, vector<32x128xf32>
      %c0_14 = arith.constant 0 : index
      %c0_15 = arith.constant 0 : index
      %15 = vector.load %arg4[%c0_14, %c0_15] : memref<1x128xf32, #tpu.memory_space<vmem>>, vector<1x128xf32>
      %16 = vector.broadcast %15 : vector<1x128xf32> to vector<32x128xf32>
      %17 = arith.addf %14, %16 : vector<32x128xf32>
      %cst_16 = arith.constant 0.000000e+00 : f32
      %18 = vector.broadcast %cst_16 : f32 to vector<32x128xf32>
      %19 = arith.maximumf %17, %18 : vector<32x128xf32>
      %20 = arith.truncf %19 : vector<32x128xf32> to vector<32x128xbf16>
      %c0_17 = arith.constant 0 : index
      %c0_18 = arith.constant 0 : index
      %21 = vector.load %arg8[%c0_17, %c0_18] : memref<32x128xbf16, #tpu.memory_space<vmem>>, vector<32x128xbf16>
      tpu.vector_store %arg8[%c0_17, %c0_18], %20 {strides = array<i32>} : memref<32x128xbf16, #tpu.memory_space<vmem>>, vector<32x128xbf16>,
    } else {
    }
    return
  }
  func.func @transform_0(%arg0: i32, %arg1: i32) -> (i32, i32, i32) {
    %c0_i32 = arith.constant 0 : i32
    %c0_i32_0 = arith.constant 0 : i32
    return %arg1, %arg0, %c0_i32 : i32, i32, i32
  }
  func.func @transform_1(%arg0: i32, %arg1: i32) -> (i32, i32, i32) {
    %c0_i32 = arith.constant 0 : i32
    %c0_i32_0 = arith.constant 0 : i32
    %c0_i32_1 = arith.constant 0 : i32
    return %arg1, %c0_i32, %c0_i32_0 : i32, i32, i32
  }
  func.func @transform_2(%arg0: i32, %arg1: i32) -> (i32, i32) {
    %c0_i32 = arith.constant 0 : i32
    %c0_i32_0 = arith.constant 0 : i32
    %c0_i32_1 = arith.constant 0 : i32
    return %c0_i32, %c0_i32_0 : i32, i32
  }
  func.func @transform_3(%arg0: i32, %arg1: i32) -> (i32, i32, i32) {
    %c0_i32 = arith.constant 0 : i32
    %c0_i32_0 = arith.constant 0 : i32
    %c0_i32_1 = arith.constant 0 : i32
    return %c0_i32, %arg0, %c0_i32_0 : i32, i32, i32
  }
  func.func @transform_4(%arg0: i32, %arg1: i32) -> (i32, i32, i32) {
    %c0_i32 = arith.constant 0 : i32
    %c0_i32_0 = arith.constant 0 : i32
    %c0_i32_1 = arith.constant 0 : i32
    %c0_i32_2 = arith.constant 0 : i32
    return %c0_i32, %c0_i32_0, %c0_i32_1 : i32, i32, i32
  }
  func.func @transform_5(%arg0: i32, %arg1: i32) -> (i32, i32) {
    %c0_i32 = arith.constant 0 : i32
    %c0_i32_0 = arith.constant 0 : i32
    %c0_i32_1 = arith.constant 0 : i32
    return %c0_i32, %c0_i32_0 : i32, i32
  }
  func.func @transform_6(%arg0: i32, %arg1: i32) -> (i32, i32) {
    %c0_i32 = arith.constant 0 : i32
    %c0_i32_0 = arith.constant 0 : i32
    return %arg0, %c0_i32 : i32, i32
  }
}

module attributes {stable_mosaic.version = 11 : i64} {
  func.func @_conv_kernel(%arg0: i32, %arg1: i32, %arg2: memref<1x32x128xbf16, #tpu.memory_space<vmem>>, %arg3: memref<1x128x128xbf16, #tpu.memory_space<vmem>>, %arg4: memref<1x128xf32, #tpu.memory_space<vmem>>, %arg5: memref<32x128xbf16, #tpu.memory_space<vmem>>, %arg6: memref<32x128xf32, #tpu.memory_space<vmem>>) attributes {dimension_semantics = [#tpu.dimension_semantics<parallel>, #tpu.dimension_semantics<arbitrary>], iteration_bounds = array<i64: 1, 1>, scalar_prefetch = 0 : i64, scratch_operands = 1 : i64, tpu.core_type = #tpu.core_type<tc>, window_params = [{transform_indices = @transform_0, window_bounds = array<i64: 1, 32, 128>}, {transform_indices = @transform_1, window_bounds = array<i64: 1, 128, 128>}, {pipeline_mode = #tpu.pipeline_mode<synchronous>, transform_indices = @transform_2, window_bounds = array<i64: 1, 128>}, {transform_indices = @transform_3, window_bounds = array<i64: 32, 128>}]} {
    %c0_i32 = arith.constant 0 : i32
    %0 = arith.cmpi eq, %arg1, %c0_i32 : i32
    %1 = arith.extui %0 : i1 to i32
    %c0_i32_0 = arith.constant 0 : i32
    %2 = arith.cmpi ne, %1, %c0_i32_0 : i32
    scf.if %2 {
      %cst_12 = arith.constant 0.000000e+00 : f32
      %14 = vector.broadcast %cst_12 : f32 to vector<32x128xf32>
      %c0_13 = arith.constant 0 : index
      %c0_14 = arith.constant 0 : index
      %15 = vector.load %arg6[%c0_13, %c0_14] : memref<32x128xf32, #tpu.memory_space<vmem>>, vector<32x128xf32>
      tpu.vector_store %arg6[%c0_13, %c0_14], %14 {strides = array<i32>} : memref<32x128xf32, #tpu.memory_space<vmem>>, vector<32x128xf32>,
    } else {
    }
    %c0 = arith.constant 0 : index
    %c0_1 = arith.constant 0 : index
    %3 = vector.load %arg6[%c0, %c0_1] : memref<32x128xf32, #tpu.memory_space<vmem>>, vector<32x128xf32>
    %c0_2 = arith.constant 0 : index
    %c0_3 = arith.constant 0 : index
    %c0_4 = arith.constant 0 : index
    %4 = vector.load %arg2[%c0_2, %c0_3, %c0_4] : memref<1x32x128xbf16, #tpu.memory_space<vmem>>, vector<1x32x128xbf16>
    %5 = vector.shape_cast %4 : vector<1x32x128xbf16> to vector<32x128xbf16>
    %c0_5 = arith.constant 0 : index
    %c0_6 = arith.constant 0 : index
    %c0_7 = arith.constant 0 : index
    %6 = vector.load %arg3[%c0_5, %c0_6, %c0_7] : memref<1x128x128xbf16, #tpu.memory_space<vmem>>, vector<1x128x128xbf16>
    %7 = vector.shape_cast %6 : vector<1x128x128xbf16> to vector<128x128xbf16>
    %cst = arith.constant dense<0.000000e+00> : vector<32x128xf32>
    %8 = tpu.matmul %5, %7, %cst {dimension_numbers = #tpu.dot_dimension_numbers<[1], [0], [0], [1], [0, 0, 1, 1], [], []>} : vector<32x128xbf16>, vector<128x128xbf16>, vector<32x128xf32> -> vector<32x128xf32>
    %9 = arith.addf %3, %8 : vector<32x128xf32>
    %c0_8 = arith.constant 0 : index
    %c0_9 = arith.constant 0 : index
    %10 = vector.load %arg6[%c0_8, %c0_9] : memref<32x128xf32, #tpu.memory_space<vmem>>, vector<32x128xf32>
    tpu.vector_store %arg6[%c0_8, %c0_9], %9 {strides = array<i32>} : memref<32x128xf32, #tpu.memory_space<vmem>>, vector<32x128xf32>,
    %c0_i32_10 = arith.constant 0 : i32
    %11 = arith.cmpi eq, %arg1, %c0_i32_10 : i32
    %12 = arith.extui %11 : i1 to i32
    %c0_i32_11 = arith.constant 0 : i32
    %13 = arith.cmpi ne, %12, %c0_i32_11 : i32
    scf.if %13 {
      %c0_12 = arith.constant 0 : index
      %c0_13 = arith.constant 0 : index
      %14 = vector.load %arg6[%c0_12, %c0_13] : memref<32x128xf32, #tpu.memory_space<vmem>>, vector<32x128xf32>
      %c0_14 = arith.constant 0 : index
      %c0_15 = arith.constant 0 : index
      %15 = vector.load %arg4[%c0_14, %c0_15] : memref<1x128xf32, #tpu.memory_space<vmem>>, vector<1x128xf32>
      %16 = vector.broadcast %15 : vector<1x128xf32> to vector<32x128xf32>
      %17 = arith.addf %14, %16 : vector<32x128xf32>
      %cst_16 = arith.constant 0.000000e+00 : f32
      %18 = vector.broadcast %cst_16 : f32 to vector<32x128xf32>
      %19 = arith.maximumf %17, %18 : vector<32x128xf32>
      %20 = arith.truncf %19 : vector<32x128xf32> to vector<32x128xbf16>
      %c0_17 = arith.constant 0 : index
      %c0_18 = arith.constant 0 : index
      %21 = vector.load %arg5[%c0_17, %c0_18] : memref<32x128xbf16, #tpu.memory_space<vmem>>, vector<32x128xbf16>
      tpu.vector_store %arg5[%c0_17, %c0_18], %20 {strides = array<i32>} : memref<32x128xbf16, #tpu.memory_space<vmem>>, vector<32x128xbf16>,
    } else {
    }
    return
  }
  func.func @transform_0(%arg0: i32, %arg1: i32) -> (i32, i32, i32) {
    %c0_i32 = arith.constant 0 : i32
    %c0_i32_0 = arith.constant 0 : i32
    return %arg1, %arg0, %c0_i32 : i32, i32, i32
  }
  func.func @transform_1(%arg0: i32, %arg1: i32) -> (i32, i32, i32) {
    %c0_i32 = arith.constant 0 : i32
    %c0_i32_0 = arith.constant 0 : i32
    %c0_i32_1 = arith.constant 0 : i32
    return %arg1, %c0_i32, %c0_i32_0 : i32, i32, i32
  }
  func.func @transform_2(%arg0: i32, %arg1: i32) -> (i32, i32) {
    %c0_i32 = arith.constant 0 : i32
    %c0_i32_0 = arith.constant 0 : i32
    %c0_i32_1 = arith.constant 0 : i32
    return %c0_i32, %c0_i32_0 : i32, i32
  }
  func.func @transform_3(%arg0: i32, %arg1: i32) -> (i32, i32) {
    %c0_i32 = arith.constant 0 : i32
    %c0_i32_0 = arith.constant 0 : i32
    return %arg0, %c0_i32 : i32, i32
  }
}

module attributes {stable_mosaic.version = 11 : i64} {
  func.func @_conv_res_kernel(%arg0: i32, %arg1: i32, %arg2: memref<1x32x128xbf16, #tpu.memory_space<vmem>>, %arg3: memref<1x128x128xbf16, #tpu.memory_space<vmem>>, %arg4: memref<1x128xf32, #tpu.memory_space<vmem>>, %arg5: memref<32x128xbf16, #tpu.memory_space<vmem>>, %arg6: memref<32x128xbf16, #tpu.memory_space<vmem>>, %arg7: memref<32x128xf32, #tpu.memory_space<vmem>>) attributes {dimension_semantics = [#tpu.dimension_semantics<parallel>, #tpu.dimension_semantics<arbitrary>], iteration_bounds = array<i64: 1, 1>, scalar_prefetch = 0 : i64, scratch_operands = 1 : i64, tpu.core_type = #tpu.core_type<tc>, window_params = [{transform_indices = @transform_0, window_bounds = array<i64: 1, 32, 128>}, {transform_indices = @transform_1, window_bounds = array<i64: 1, 128, 128>}, {pipeline_mode = #tpu.pipeline_mode<synchronous>, transform_indices = @transform_2, window_bounds = array<i64: 1, 128>}, {transform_indices = @transform_3, window_bounds = array<i64: 32, 128>}, {transform_indices = @transform_4, window_bounds = array<i64: 32, 128>}]} {
    %c0_i32 = arith.constant 0 : i32
    %0 = arith.cmpi eq, %arg1, %c0_i32 : i32
    %1 = arith.extui %0 : i1 to i32
    %c0_i32_0 = arith.constant 0 : i32
    %2 = arith.cmpi ne, %1, %c0_i32_0 : i32
    scf.if %2 {
      %cst_12 = arith.constant 0.000000e+00 : f32
      %14 = vector.broadcast %cst_12 : f32 to vector<32x128xf32>
      %c0_13 = arith.constant 0 : index
      %c0_14 = arith.constant 0 : index
      %15 = vector.load %arg7[%c0_13, %c0_14] : memref<32x128xf32, #tpu.memory_space<vmem>>, vector<32x128xf32>
      tpu.vector_store %arg7[%c0_13, %c0_14], %14 {strides = array<i32>} : memref<32x128xf32, #tpu.memory_space<vmem>>, vector<32x128xf32>,
    } else {
    }
    %c0 = arith.constant 0 : index
    %c0_1 = arith.constant 0 : index
    %3 = vector.load %arg7[%c0, %c0_1] : memref<32x128xf32, #tpu.memory_space<vmem>>, vector<32x128xf32>
    %c0_2 = arith.constant 0 : index
    %c0_3 = arith.constant 0 : index
    %c0_4 = arith.constant 0 : index
    %4 = vector.load %arg2[%c0_2, %c0_3, %c0_4] : memref<1x32x128xbf16, #tpu.memory_space<vmem>>, vector<1x32x128xbf16>
    %5 = vector.shape_cast %4 : vector<1x32x128xbf16> to vector<32x128xbf16>
    %c0_5 = arith.constant 0 : index
    %c0_6 = arith.constant 0 : index
    %c0_7 = arith.constant 0 : index
    %6 = vector.load %arg3[%c0_5, %c0_6, %c0_7] : memref<1x128x128xbf16, #tpu.memory_space<vmem>>, vector<1x128x128xbf16>
    %7 = vector.shape_cast %6 : vector<1x128x128xbf16> to vector<128x128xbf16>
    %cst = arith.constant dense<0.000000e+00> : vector<32x128xf32>
    %8 = tpu.matmul %5, %7, %cst {dimension_numbers = #tpu.dot_dimension_numbers<[1], [0], [0], [1], [0, 0, 1, 1], [], []>} : vector<32x128xbf16>, vector<128x128xbf16>, vector<32x128xf32> -> vector<32x128xf32>
    %9 = arith.addf %3, %8 : vector<32x128xf32>
    %c0_8 = arith.constant 0 : index
    %c0_9 = arith.constant 0 : index
    %10 = vector.load %arg7[%c0_8, %c0_9] : memref<32x128xf32, #tpu.memory_space<vmem>>, vector<32x128xf32>
    tpu.vector_store %arg7[%c0_8, %c0_9], %9 {strides = array<i32>} : memref<32x128xf32, #tpu.memory_space<vmem>>, vector<32x128xf32>,
    %c0_i32_10 = arith.constant 0 : i32
    %11 = arith.cmpi eq, %arg1, %c0_i32_10 : i32
    %12 = arith.extui %11 : i1 to i32
    %c0_i32_11 = arith.constant 0 : i32
    %13 = arith.cmpi ne, %12, %c0_i32_11 : i32
    scf.if %13 {
      %c0_12 = arith.constant 0 : index
      %c0_13 = arith.constant 0 : index
      %14 = vector.load %arg7[%c0_12, %c0_13] : memref<32x128xf32, #tpu.memory_space<vmem>>, vector<32x128xf32>
      %c0_14 = arith.constant 0 : index
      %c0_15 = arith.constant 0 : index
      %15 = vector.load %arg4[%c0_14, %c0_15] : memref<1x128xf32, #tpu.memory_space<vmem>>, vector<1x128xf32>
      %16 = vector.broadcast %15 : vector<1x128xf32> to vector<32x128xf32>
      %17 = arith.addf %14, %16 : vector<32x128xf32>
      %c0_16 = arith.constant 0 : index
      %c0_17 = arith.constant 0 : index
      %18 = vector.load %arg5[%c0_16, %c0_17] : memref<32x128xbf16, #tpu.memory_space<vmem>>, vector<32x128xbf16>
      %19 = arith.extf %18 : vector<32x128xbf16> to vector<32x128xf32>
      %20 = arith.addf %17, %19 : vector<32x128xf32>
      %cst_18 = arith.constant 0.000000e+00 : f32
      %21 = vector.broadcast %cst_18 : f32 to vector<32x128xf32>
      %22 = arith.maximumf %20, %21 : vector<32x128xf32>
      %23 = arith.truncf %22 : vector<32x128xf32> to vector<32x128xbf16>
      %c0_19 = arith.constant 0 : index
      %c0_20 = arith.constant 0 : index
      %24 = vector.load %arg6[%c0_19, %c0_20] : memref<32x128xbf16, #tpu.memory_space<vmem>>, vector<32x128xbf16>
      tpu.vector_store %arg6[%c0_19, %c0_20], %23 {strides = array<i32>} : memref<32x128xbf16, #tpu.memory_space<vmem>>, vector<32x128xbf16>,
    } else {
    }
    return
  }
  func.func @transform_0(%arg0: i32, %arg1: i32) -> (i32, i32, i32) {
    %c0_i32 = arith.constant 0 : i32
    %c0_i32_0 = arith.constant 0 : i32
    return %arg1, %arg0, %c0_i32 : i32, i32, i32
  }
  func.func @transform_1(%arg0: i32, %arg1: i32) -> (i32, i32, i32) {
    %c0_i32 = arith.constant 0 : i32
    %c0_i32_0 = arith.constant 0 : i32
    %c0_i32_1 = arith.constant 0 : i32
    return %arg1, %c0_i32, %c0_i32_0 : i32, i32, i32
  }
  func.func @transform_2(%arg0: i32, %arg1: i32) -> (i32, i32) {
    %c0_i32 = arith.constant 0 : i32
    %c0_i32_0 = arith.constant 0 : i32
    %c0_i32_1 = arith.constant 0 : i32
    return %c0_i32, %c0_i32_0 : i32, i32
  }
  func.func @transform_3(%arg0: i32, %arg1: i32) -> (i32, i32) {
    %c0_i32 = arith.constant 0 : i32
    %c0_i32_0 = arith.constant 0 : i32
    return %arg0, %c0_i32 : i32, i32
  }
  func.func @transform_4(%arg0: i32, %arg1: i32) -> (i32, i32) {
    %c0_i32 = arith.constant 0 : i32
    %c0_i32_0 = arith.constant 0 : i32
    return %arg0, %c0_i32 : i32, i32
  }
}

module attributes {stable_mosaic.version = 11 : i64} {
  func.func @_conv_res_kernel(%arg0: i32, %arg1: i32, %arg2: memref<1x32x128xbf16, #tpu.memory_space<vmem>>, %arg3: memref<1x128x128xbf16, #tpu.memory_space<vmem>>, %arg4: memref<1x128xf32, #tpu.memory_space<vmem>>, %arg5: memref<32x128xbf16, #tpu.memory_space<vmem>>, %arg6: memref<32x128xbf16, #tpu.memory_space<vmem>>, %arg7: memref<32x128xf32, #tpu.memory_space<vmem>>) attributes {dimension_semantics = [#tpu.dimension_semantics<parallel>, #tpu.dimension_semantics<arbitrary>], iteration_bounds = array<i64: 1, 1>, scalar_prefetch = 0 : i64, scratch_operands = 1 : i64, tpu.core_type = #tpu.core_type<tc>, window_params = [{transform_indices = @transform_0, window_bounds = array<i64: 1, 32, 128>}, {transform_indices = @transform_1, window_bounds = array<i64: 1, 128, 128>}, {pipeline_mode = #tpu.pipeline_mode<synchronous>, transform_indices = @transform_2, window_bounds = array<i64: 1, 128>}, {transform_indices = @transform_3, window_bounds = array<i64: 32, 128>}, {transform_indices = @transform_4, window_bounds = array<i64: 32, 128>}]} {
    %c0_i32 = arith.constant 0 : i32
    %0 = arith.cmpi eq, %arg1, %c0_i32 : i32
    %1 = arith.extui %0 : i1 to i32
    %c0_i32_0 = arith.constant 0 : i32
    %2 = arith.cmpi ne, %1, %c0_i32_0 : i32
    scf.if %2 {
      %cst_12 = arith.constant 0.000000e+00 : f32
      %14 = vector.broadcast %cst_12 : f32 to vector<32x128xf32>
      %c0_13 = arith.constant 0 : index
      %c0_14 = arith.constant 0 : index
      %15 = vector.load %arg7[%c0_13, %c0_14] : memref<32x128xf32, #tpu.memory_space<vmem>>, vector<32x128xf32>
      tpu.vector_store %arg7[%c0_13, %c0_14], %14 {strides = array<i32>} : memref<32x128xf32, #tpu.memory_space<vmem>>, vector<32x128xf32>,
    } else {
    }
    %c0 = arith.constant 0 : index
    %c0_1 = arith.constant 0 : index
    %3 = vector.load %arg7[%c0, %c0_1] : memref<32x128xf32, #tpu.memory_space<vmem>>, vector<32x128xf32>
    %c0_2 = arith.constant 0 : index
    %c0_3 = arith.constant 0 : index
    %c0_4 = arith.constant 0 : index
    %4 = vector.load %arg2[%c0_2, %c0_3, %c0_4] : memref<1x32x128xbf16, #tpu.memory_space<vmem>>, vector<1x32x128xbf16>
    %5 = vector.shape_cast %4 : vector<1x32x128xbf16> to vector<32x128xbf16>
    %c0_5 = arith.constant 0 : index
    %c0_6 = arith.constant 0 : index
    %c0_7 = arith.constant 0 : index
    %6 = vector.load %arg3[%c0_5, %c0_6, %c0_7] : memref<1x128x128xbf16, #tpu.memory_space<vmem>>, vector<1x128x128xbf16>
    %7 = vector.shape_cast %6 : vector<1x128x128xbf16> to vector<128x128xbf16>
    %cst = arith.constant dense<0.000000e+00> : vector<32x128xf32>
    %8 = tpu.matmul %5, %7, %cst {dimension_numbers = #tpu.dot_dimension_numbers<[1], [0], [0], [1], [0, 0, 1, 1], [], []>} : vector<32x128xbf16>, vector<128x128xbf16>, vector<32x128xf32> -> vector<32x128xf32>
    %9 = arith.addf %3, %8 : vector<32x128xf32>
    %c0_8 = arith.constant 0 : index
    %c0_9 = arith.constant 0 : index
    %10 = vector.load %arg7[%c0_8, %c0_9] : memref<32x128xf32, #tpu.memory_space<vmem>>, vector<32x128xf32>
    tpu.vector_store %arg7[%c0_8, %c0_9], %9 {strides = array<i32>} : memref<32x128xf32, #tpu.memory_space<vmem>>, vector<32x128xf32>,
    %c0_i32_10 = arith.constant 0 : i32
    %11 = arith.cmpi eq, %arg1, %c0_i32_10 : i32
    %12 = arith.extui %11 : i1 to i32
    %c0_i32_11 = arith.constant 0 : i32
    %13 = arith.cmpi ne, %12, %c0_i32_11 : i32
    scf.if %13 {
      %c0_12 = arith.constant 0 : index
      %c0_13 = arith.constant 0 : index
      %14 = vector.load %arg7[%c0_12, %c0_13] : memref<32x128xf32, #tpu.memory_space<vmem>>, vector<32x128xf32>
      %c0_14 = arith.constant 0 : index
      %c0_15 = arith.constant 0 : index
      %15 = vector.load %arg4[%c0_14, %c0_15] : memref<1x128xf32, #tpu.memory_space<vmem>>, vector<1x128xf32>
      %16 = vector.broadcast %15 : vector<1x128xf32> to vector<32x128xf32>
      %17 = arith.addf %14, %16 : vector<32x128xf32>
      %c0_16 = arith.constant 0 : index
      %c0_17 = arith.constant 0 : index
      %18 = vector.load %arg5[%c0_16, %c0_17] : memref<32x128xbf16, #tpu.memory_space<vmem>>, vector<32x128xbf16>
      %19 = arith.extf %18 : vector<32x128xbf16> to vector<32x128xf32>
      %20 = arith.addf %17, %19 : vector<32x128xf32>
      %cst_18 = arith.constant 0.000000e+00 : f32
      %21 = vector.broadcast %cst_18 : f32 to vector<32x128xf32>
      %22 = arith.maximumf %20, %21 : vector<32x128xf32>
      %23 = arith.truncf %22 : vector<32x128xf32> to vector<32x128xbf16>
      %c0_19 = arith.constant 0 : index
      %c0_20 = arith.constant 0 : index
      %24 = vector.load %arg6[%c0_19, %c0_20] : memref<32x128xbf16, #tpu.memory_space<vmem>>, vector<32x128xbf16>
      tpu.vector_store %arg6[%c0_19, %c0_20], %23 {strides = array<i32>} : memref<32x128xbf16, #tpu.memory_space<vmem>>, vector<32x128xbf16>,
    } else {
    }
    return
  }
  func.func @transform_0(%arg0: i32, %arg1: i32) -> (i32, i32, i32) {
    %c0_i32 = arith.constant 0 : i32
    %c0_i32_0 = arith.constant 0 : i32
    return %arg1, %arg0, %c0_i32 : i32, i32, i32
  }
  func.func @transform_1(%arg0: i32, %arg1: i32) -> (i32, i32, i32) {
    %c0_i32 = arith.constant 0 : i32
    %c0_i32_0 = arith.constant 0 : i32
    %c0_i32_1 = arith.constant 0 : i32
    return %arg1, %c0_i32, %c0_i32_0 : i32, i32, i32
  }
  func.func @transform_2(%arg0: i32, %arg1: i32) -> (i32, i32) {
    %c0_i32 = arith.constant 0 : i32
    %c0_i32_0 = arith.constant 0 : i32
    %c0_i32_1 = arith.constant 0 : i32
    return %c0_i32, %c0_i32_0 : i32, i32
  }
  func.func @transform_3(%arg0: i32, %arg1: i32) -> (i32, i32) {
    %c0_i32 = arith.constant 0 : i32
    %c0_i32_0 = arith.constant 0 : i32
    return %arg0, %c0_i32 : i32, i32
  }
  func.func @transform_4(%arg0: i32, %arg1: i32) -> (i32, i32) {
    %c0_i32 = arith.constant 0 : i32
    %c0_i32_0 = arith.constant 0 : i32
    return %arg0, %c0_i32 : i32, i32
  }
}

module attributes {stable_mosaic.version = 11 : i64} {
  func.func @_conv_kernel(%arg0: i32, %arg1: i32, %arg2: memref<1x32x128xbf16, #tpu.memory_space<vmem>>, %arg3: memref<1x128x128xbf16, #tpu.memory_space<vmem>>, %arg4: memref<1x128xf32, #tpu.memory_space<vmem>>, %arg5: memref<32x128xbf16, #tpu.memory_space<vmem>>, %arg6: memref<32x128xf32, #tpu.memory_space<vmem>>) attributes {dimension_semantics = [#tpu.dimension_semantics<parallel>, #tpu.dimension_semantics<arbitrary>], iteration_bounds = array<i64: 1, 1>, scalar_prefetch = 0 : i64, scratch_operands = 1 : i64, tpu.core_type = #tpu.core_type<tc>, window_params = [{transform_indices = @transform_0, window_bounds = array<i64: 1, 32, 128>}, {transform_indices = @transform_1, window_bounds = array<i64: 1, 128, 128>}, {pipeline_mode = #tpu.pipeline_mode<synchronous>, transform_indices = @transform_2, window_bounds = array<i64: 1, 128>}, {transform_indices = @transform_3, window_bounds = array<i64: 32, 128>}]} {
    %c0_i32 = arith.constant 0 : i32
    %0 = arith.cmpi eq, %arg1, %c0_i32 : i32
    %1 = arith.extui %0 : i1 to i32
    %c0_i32_0 = arith.constant 0 : i32
    %2 = arith.cmpi ne, %1, %c0_i32_0 : i32
    scf.if %2 {
      %cst_12 = arith.constant 0.000000e+00 : f32
      %14 = vector.broadcast %cst_12 : f32 to vector<32x128xf32>
      %c0_13 = arith.constant 0 : index
      %c0_14 = arith.constant 0 : index
      %15 = vector.load %arg6[%c0_13, %c0_14] : memref<32x128xf32, #tpu.memory_space<vmem>>, vector<32x128xf32>
      tpu.vector_store %arg6[%c0_13, %c0_14], %14 {strides = array<i32>} : memref<32x128xf32, #tpu.memory_space<vmem>>, vector<32x128xf32>,
    } else {
    }
    %c0 = arith.constant 0 : index
    %c0_1 = arith.constant 0 : index
    %3 = vector.load %arg6[%c0, %c0_1] : memref<32x128xf32, #tpu.memory_space<vmem>>, vector<32x128xf32>
    %c0_2 = arith.constant 0 : index
    %c0_3 = arith.constant 0 : index
    %c0_4 = arith.constant 0 : index
    %4 = vector.load %arg2[%c0_2, %c0_3, %c0_4] : memref<1x32x128xbf16, #tpu.memory_space<vmem>>, vector<1x32x128xbf16>
    %5 = vector.shape_cast %4 : vector<1x32x128xbf16> to vector<32x128xbf16>
    %c0_5 = arith.constant 0 : index
    %c0_6 = arith.constant 0 : index
    %c0_7 = arith.constant 0 : index
    %6 = vector.load %arg3[%c0_5, %c0_6, %c0_7] : memref<1x128x128xbf16, #tpu.memory_space<vmem>>, vector<1x128x128xbf16>
    %7 = vector.shape_cast %6 : vector<1x128x128xbf16> to vector<128x128xbf16>
    %cst = arith.constant dense<0.000000e+00> : vector<32x128xf32>
    %8 = tpu.matmul %5, %7, %cst {dimension_numbers = #tpu.dot_dimension_numbers<[1], [0], [0], [1], [0, 0, 1, 1], [], []>} : vector<32x128xbf16>, vector<128x128xbf16>, vector<32x128xf32> -> vector<32x128xf32>
    %9 = arith.addf %3, %8 : vector<32x128xf32>
    %c0_8 = arith.constant 0 : index
    %c0_9 = arith.constant 0 : index
    %10 = vector.load %arg6[%c0_8, %c0_9] : memref<32x128xf32, #tpu.memory_space<vmem>>, vector<32x128xf32>
    tpu.vector_store %arg6[%c0_8, %c0_9], %9 {strides = array<i32>} : memref<32x128xf32, #tpu.memory_space<vmem>>, vector<32x128xf32>,
    %c0_i32_10 = arith.constant 0 : i32
    %11 = arith.cmpi eq, %arg1, %c0_i32_10 : i32
    %12 = arith.extui %11 : i1 to i32
    %c0_i32_11 = arith.constant 0 : i32
    %13 = arith.cmpi ne, %12, %c0_i32_11 : i32
    scf.if %13 {
      %c0_12 = arith.constant 0 : index
      %c0_13 = arith.constant 0 : index
      %14 = vector.load %arg6[%c0_12, %c0_13] : memref<32x128xf32, #tpu.memory_space<vmem>>, vector<32x128xf32>
      %c0_14 = arith.constant 0 : index
      %c0_15 = arith.constant 0 : index
      %15 = vector.load %arg4[%c0_14, %c0_15] : memref<1x128xf32, #tpu.memory_space<vmem>>, vector<1x128xf32>
      %16 = vector.broadcast %15 : vector<1x128xf32> to vector<32x128xf32>
      %17 = arith.addf %14, %16 : vector<32x128xf32>
      %cst_16 = arith.constant 0.000000e+00 : f32
      %18 = vector.broadcast %cst_16 : f32 to vector<32x128xf32>
      %19 = arith.maximumf %17, %18 : vector<32x128xf32>
      %20 = arith.truncf %19 : vector<32x128xf32> to vector<32x128xbf16>
      %c0_17 = arith.constant 0 : index
      %c0_18 = arith.constant 0 : index
      %21 = vector.load %arg5[%c0_17, %c0_18] : memref<32x128xbf16, #tpu.memory_space<vmem>>, vector<32x128xbf16>
      tpu.vector_store %arg5[%c0_17, %c0_18], %20 {strides = array<i32>} : memref<32x128xbf16, #tpu.memory_space<vmem>>, vector<32x128xbf16>,
    } else {
    }
    return
  }
  func.func @transform_0(%arg0: i32, %arg1: i32) -> (i32, i32, i32) {
    %c0_i32 = arith.constant 0 : i32
    %c0_i32_0 = arith.constant 0 : i32
    return %arg1, %arg0, %c0_i32 : i32, i32, i32
  }
  func.func @transform_1(%arg0: i32, %arg1: i32) -> (i32, i32, i32) {
    %c0_i32 = arith.constant 0 : i32
    %c0_i32_0 = arith.constant 0 : i32
    %c0_i32_1 = arith.constant 0 : i32
    return %arg1, %c0_i32, %c0_i32_0 : i32, i32, i32
  }
  func.func @transform_2(%arg0: i32, %arg1: i32) -> (i32, i32) {
    %c0_i32 = arith.constant 0 : i32
    %c0_i32_0 = arith.constant 0 : i32
    %c0_i32_1 = arith.constant 0 : i32
    return %c0_i32, %c0_i32_0 : i32, i32
  }
  func.func @transform_3(%arg0: i32, %arg1: i32) -> (i32, i32) {
    %c0_i32 = arith.constant 0 : i32
    %c0_i32_0 = arith.constant 0 : i32
    return %arg0, %c0_i32 : i32, i32
  }
}

module attributes {stable_mosaic.version = 11 : i64} {
  func.func @_conv_kernel(%arg0: i32, %arg1: i32, %arg2: memref<1x8x128xbf16, #tpu.memory_space<vmem>>, %arg3: memref<1x128x128xbf16, #tpu.memory_space<vmem>>, %arg4: memref<1x128xf32, #tpu.memory_space<vmem>>, %arg5: memref<8x128xbf16, #tpu.memory_space<vmem>>, %arg6: memref<8x128xf32, #tpu.memory_space<vmem>>) attributes {dimension_semantics = [#tpu.dimension_semantics<parallel>, #tpu.dimension_semantics<arbitrary>], iteration_bounds = array<i64: 1, 9>, scalar_prefetch = 0 : i64, scratch_operands = 1 : i64, tpu.core_type = #tpu.core_type<tc>, window_params = [{transform_indices = @transform_0, window_bounds = array<i64: 1, 8, 128>}, {transform_indices = @transform_1, window_bounds = array<i64: 1, 128, 128>}, {pipeline_mode = #tpu.pipeline_mode<synchronous>, transform_indices = @transform_2, window_bounds = array<i64: 1, 128>}, {transform_indices = @transform_3, window_bounds = array<i64: 8, 128>}]} {
    %c0_i32 = arith.constant 0 : i32
    %0 = arith.cmpi eq, %arg1, %c0_i32 : i32
    %1 = arith.extui %0 : i1 to i32
    %c0_i32_0 = arith.constant 0 : i32
    %2 = arith.cmpi ne, %1, %c0_i32_0 : i32
    scf.if %2 {
      %cst_11 = arith.constant 0.000000e+00 : f32
      %14 = vector.broadcast %cst_11 : f32 to vector<8x128xf32>
      %c0_12 = arith.constant 0 : index
      %c0_13 = arith.constant 0 : index
      %15 = vector.load %arg6[%c0_12, %c0_13] : memref<8x128xf32, #tpu.memory_space<vmem>>, vector<8x128xf32>
      tpu.vector_store %arg6[%c0_12, %c0_13], %14 {strides = array<i32>} : memref<8x128xf32, #tpu.memory_space<vmem>>, vector<8x128xf32>,
    } else {
    }
    %c0 = arith.constant 0 : index
    %c0_1 = arith.constant 0 : index
    %3 = vector.load %arg6[%c0, %c0_1] : memref<8x128xf32, #tpu.memory_space<vmem>>, vector<8x128xf32>
    %c0_2 = arith.constant 0 : index
    %c0_3 = arith.constant 0 : index
    %c0_4 = arith.constant 0 : index
    %4 = vector.load %arg2[%c0_2, %c0_3, %c0_4] : memref<1x8x128xbf16, #tpu.memory_space<vmem>>, vector<1x8x128xbf16>
    %5 = vector.shape_cast %4 : vector<1x8x128xbf16> to vector<8x128xbf16>
    %c0_5 = arith.constant 0 : index
    %c0_6 = arith.constant 0 : index
    %c0_7 = arith.constant 0 : index
    %6 = vector.load %arg3[%c0_5, %c0_6, %c0_7] : memref<1x128x128xbf16, #tpu.memory_space<vmem>>, vector<1x128x128xbf16>
    %7 = vector.shape_cast %6 : vector<1x128x128xbf16> to vector<128x128xbf16>
    %cst = arith.constant dense<0.000000e+00> : vector<8x128xf32>
    %8 = tpu.matmul %5, %7, %cst {dimension_numbers = #tpu.dot_dimension_numbers<[1], [0], [0], [1], [0, 0, 1, 1], [], []>} : vector<8x128xbf16>, vector<128x128xbf16>, vector<8x128xf32> -> vector<8x128xf32>
    %9 = arith.addf %3, %8 : vector<8x128xf32>
    %c0_8 = arith.constant 0 : index
    %c0_9 = arith.constant 0 : index
    %10 = vector.load %arg6[%c0_8, %c0_9] : memref<8x128xf32, #tpu.memory_space<vmem>>, vector<8x128xf32>
    tpu.vector_store %arg6[%c0_8, %c0_9], %9 {strides = array<i32>} : memref<8x128xf32, #tpu.memory_space<vmem>>, vector<8x128xf32>,
    %c8_i32 = arith.constant 8 : i32
    %11 = arith.cmpi eq, %arg1, %c8_i32 : i32
    %12 = arith.extui %11 : i1 to i32
    %c0_i32_10 = arith.constant 0 : i32
    %13 = arith.cmpi ne, %12, %c0_i32_10 : i32
    scf.if %13 {
      %c0_11 = arith.constant 0 : index
      %c0_12 = arith.constant 0 : index
      %14 = vector.load %arg6[%c0_11, %c0_12] : memref<8x128xf32, #tpu.memory_space<vmem>>, vector<8x128xf32>
      %c0_13 = arith.constant 0 : index
      %c0_14 = arith.constant 0 : index
      %15 = vector.load %arg4[%c0_13, %c0_14] : memref<1x128xf32, #tpu.memory_space<vmem>>, vector<1x128xf32>
      %16 = vector.broadcast %15 : vector<1x128xf32> to vector<8x128xf32>
      %17 = arith.addf %14, %16 : vector<8x128xf32>
      %cst_15 = arith.constant 0.000000e+00 : f32
      %18 = vector.broadcast %cst_15 : f32 to vector<8x128xf32>
      %19 = arith.maximumf %17, %18 : vector<8x128xf32>
      %20 = arith.truncf %19 : vector<8x128xf32> to vector<8x128xbf16>
      %c0_16 = arith.constant 0 : index
      %c0_17 = arith.constant 0 : index
      %21 = vector.load %arg5[%c0_16, %c0_17] : memref<8x128xbf16, #tpu.memory_space<vmem>>, vector<8x128xbf16>
      tpu.vector_store %arg5[%c0_16, %c0_17], %20 {strides = array<i32>} : memref<8x128xbf16, #tpu.memory_space<vmem>>, vector<8x128xbf16>,
    } else {
    }
    return
  }
  func.func @transform_0(%arg0: i32, %arg1: i32) -> (i32, i32, i32) {
    %c0_i32 = arith.constant 0 : i32
    %c0_i32_0 = arith.constant 0 : i32
    return %arg1, %arg0, %c0_i32 : i32, i32, i32
  }
  func.func @transform_1(%arg0: i32, %arg1: i32) -> (i32, i32, i32) {
    %c0_i32 = arith.constant 0 : i32
    %c0_i32_0 = arith.constant 0 : i32
    %c0_i32_1 = arith.constant 0 : i32
    return %arg1, %c0_i32, %c0_i32_0 : i32, i32, i32
  }
  func.func @transform_2(%arg0: i32, %arg1: i32) -> (i32, i32) {
    %c0_i32 = arith.constant 0 : i32
    %c0_i32_0 = arith.constant 0 : i32
    %c0_i32_1 = arith.constant 0 : i32
    return %c0_i32, %c0_i32_0 : i32, i32
  }
  func.func @transform_3(%arg0: i32, %arg1: i32) -> (i32, i32) {
    %c0_i32 = arith.constant 0 : i32
    %c0_i32_0 = arith.constant 0 : i32
    return %arg0, %c0_i32 : i32, i32
  }
}

module attributes {stable_mosaic.version = 11 : i64} {
  func.func @_conv_kernel(%arg0: i32, %arg1: i32, %arg2: memref<1x8x256xbf16, #tpu.memory_space<vmem>>, %arg3: memref<1x256x128xbf16, #tpu.memory_space<vmem>>, %arg4: memref<1x128xf32, #tpu.memory_space<vmem>>, %arg5: memref<8x128xbf16, #tpu.memory_space<vmem>>, %arg6: memref<8x128xf32, #tpu.memory_space<vmem>>) attributes {dimension_semantics = [#tpu.dimension_semantics<parallel>, #tpu.dimension_semantics<arbitrary>], iteration_bounds = array<i64: 1, 1>, scalar_prefetch = 0 : i64, scratch_operands = 1 : i64, tpu.core_type = #tpu.core_type<tc>, window_params = [{transform_indices = @transform_0, window_bounds = array<i64: 1, 8, 256>}, {transform_indices = @transform_1, window_bounds = array<i64: 1, 256, 128>}, {pipeline_mode = #tpu.pipeline_mode<synchronous>, transform_indices = @transform_2, window_bounds = array<i64: 1, 128>}, {transform_indices = @transform_3, window_bounds = array<i64: 8, 128>}]} {
    %c0_i32 = arith.constant 0 : i32
    %0 = arith.cmpi eq, %arg1, %c0_i32 : i32
    %1 = arith.extui %0 : i1 to i32
    %c0_i32_0 = arith.constant 0 : i32
    %2 = arith.cmpi ne, %1, %c0_i32_0 : i32
    scf.if %2 {
      %cst_12 = arith.constant 0.000000e+00 : f32
      %14 = vector.broadcast %cst_12 : f32 to vector<8x128xf32>
      %c0_13 = arith.constant 0 : index
      %c0_14 = arith.constant 0 : index
      %15 = vector.load %arg6[%c0_13, %c0_14] : memref<8x128xf32, #tpu.memory_space<vmem>>, vector<8x128xf32>
      tpu.vector_store %arg6[%c0_13, %c0_14], %14 {strides = array<i32>} : memref<8x128xf32, #tpu.memory_space<vmem>>, vector<8x128xf32>,
    } else {
    }
    %c0 = arith.constant 0 : index
    %c0_1 = arith.constant 0 : index
    %3 = vector.load %arg6[%c0, %c0_1] : memref<8x128xf32, #tpu.memory_space<vmem>>, vector<8x128xf32>
    %c0_2 = arith.constant 0 : index
    %c0_3 = arith.constant 0 : index
    %c0_4 = arith.constant 0 : index
    %4 = vector.load %arg2[%c0_2, %c0_3, %c0_4] : memref<1x8x256xbf16, #tpu.memory_space<vmem>>, vector<1x8x256xbf16>
    %5 = vector.shape_cast %4 : vector<1x8x256xbf16> to vector<8x256xbf16>
    %c0_5 = arith.constant 0 : index
    %c0_6 = arith.constant 0 : index
    %c0_7 = arith.constant 0 : index
    %6 = vector.load %arg3[%c0_5, %c0_6, %c0_7] : memref<1x256x128xbf16, #tpu.memory_space<vmem>>, vector<1x256x128xbf16>
    %7 = vector.shape_cast %6 : vector<1x256x128xbf16> to vector<256x128xbf16>
    %cst = arith.constant dense<0.000000e+00> : vector<8x128xf32>
    %8 = tpu.matmul %5, %7, %cst {dimension_numbers = #tpu.dot_dimension_numbers<[1], [0], [0], [1], [0, 0, 1, 1], [], []>} : vector<8x256xbf16>, vector<256x128xbf16>, vector<8x128xf32> -> vector<8x128xf32>
    %9 = arith.addf %3, %8 : vector<8x128xf32>
    %c0_8 = arith.constant 0 : index
    %c0_9 = arith.constant 0 : index
    %10 = vector.load %arg6[%c0_8, %c0_9] : memref<8x128xf32, #tpu.memory_space<vmem>>, vector<8x128xf32>
    tpu.vector_store %arg6[%c0_8, %c0_9], %9 {strides = array<i32>} : memref<8x128xf32, #tpu.memory_space<vmem>>, vector<8x128xf32>,
    %c0_i32_10 = arith.constant 0 : i32
    %11 = arith.cmpi eq, %arg1, %c0_i32_10 : i32
    %12 = arith.extui %11 : i1 to i32
    %c0_i32_11 = arith.constant 0 : i32
    %13 = arith.cmpi ne, %12, %c0_i32_11 : i32
    scf.if %13 {
      %c0_12 = arith.constant 0 : index
      %c0_13 = arith.constant 0 : index
      %14 = vector.load %arg6[%c0_12, %c0_13] : memref<8x128xf32, #tpu.memory_space<vmem>>, vector<8x128xf32>
      %c0_14 = arith.constant 0 : index
      %c0_15 = arith.constant 0 : index
      %15 = vector.load %arg4[%c0_14, %c0_15] : memref<1x128xf32, #tpu.memory_space<vmem>>, vector<1x128xf32>
      %16 = vector.broadcast %15 : vector<1x128xf32> to vector<8x128xf32>
      %17 = arith.addf %14, %16 : vector<8x128xf32>
      %cst_16 = arith.constant 0.000000e+00 : f32
      %18 = vector.broadcast %cst_16 : f32 to vector<8x128xf32>
      %19 = arith.maximumf %17, %18 : vector<8x128xf32>
      %20 = arith.truncf %19 : vector<8x128xf32> to vector<8x128xbf16>
      %c0_17 = arith.constant 0 : index
      %c0_18 = arith.constant 0 : index
      %21 = vector.load %arg5[%c0_17, %c0_18] : memref<8x128xbf16, #tpu.memory_space<vmem>>, vector<8x128xbf16>
      tpu.vector_store %arg5[%c0_17, %c0_18], %20 {strides = array<i32>} : memref<8x128xbf16, #tpu.memory_space<vmem>>, vector<8x128xbf16>,
    } else {
    }
    return
  }
  func.func @transform_0(%arg0: i32, %arg1: i32) -> (i32, i32, i32) {
    %c0_i32 = arith.constant 0 : i32
    %c0_i32_0 = arith.constant 0 : i32
    return %arg1, %arg0, %c0_i32 : i32, i32, i32
  }
  func.func @transform_1(%arg0: i32, %arg1: i32) -> (i32, i32, i32) {
    %c0_i32 = arith.constant 0 : i32
    %c0_i32_0 = arith.constant 0 : i32
    %c0_i32_1 = arith.constant 0 : i32
    return %arg1, %c0_i32, %c0_i32_0 : i32, i32, i32
  }
  func.func @transform_2(%arg0: i32, %arg1: i32) -> (i32, i32) {
    %c0_i32 = arith.constant 0 : i32
    %c0_i32_0 = arith.constant 0 : i32
    %c0_i32_1 = arith.constant 0 : i32
    return %c0_i32, %c0_i32_0 : i32, i32
  }
  func.func @transform_3(%arg0: i32, %arg1: i32) -> (i32, i32) {
    %c0_i32 = arith.constant 0 : i32
    %c0_i32_0 = arith.constant 0 : i32
    return %arg0, %c0_i32 : i32, i32
  }
}

module attributes {stable_mosaic.version = 11 : i64} {
  func.func @_conv_ds_kernel(%arg0: i32, %arg1: i32, %arg2: memref<1x8x128xbf16, #tpu.memory_space<vmem>>, %arg3: memref<1x128x256xbf16, #tpu.memory_space<vmem>>, %arg4: memref<1x256xf32, #tpu.memory_space<vmem>>, %arg5: memref<1x8x128xbf16, #tpu.memory_space<vmem>>, %arg6: memref<1x128x256xbf16, #tpu.memory_space<vmem>>, %arg7: memref<1x256xf32, #tpu.memory_space<vmem>>, %arg8: memref<8x256xbf16, #tpu.memory_space<vmem>>, %arg9: memref<8x256xf32, #tpu.memory_space<vmem>>) attributes {dimension_semantics = [#tpu.dimension_semantics<parallel>, #tpu.dimension_semantics<arbitrary>], iteration_bounds = array<i64: 1, 1>, scalar_prefetch = 0 : i64, scratch_operands = 1 : i64, tpu.core_type = #tpu.core_type<tc>, window_params = [{transform_indices = @transform_0, window_bounds = array<i64: 1, 8, 128>}, {transform_indices = @transform_1, window_bounds = array<i64: 1, 128, 256>}, {pipeline_mode = #tpu.pipeline_mode<synchronous>, transform_indices = @transform_2, window_bounds = array<i64: 1, 256>}, {transform_indices = @transform_3, window_bounds = array<i64: 1, 8, 128>}, {pipeline_mode = #tpu.pipeline_mode<synchronous>, transform_indices = @transform_4, window_bounds = array<i64: 1, 128, 256>}, {pipeline_mode = #tpu.pipeline_mode<synchronous>, transform_indices = @transform_5, window_bounds = array<i64: 1, 256>}, {transform_indices = @transform_6, window_bounds = array<i64: 8, 256>}]} {
    %c0_i32 = arith.constant 0 : i32
    %0 = arith.cmpi eq, %arg1, %c0_i32 : i32
    %1 = arith.extui %0 : i1 to i32
    %c0_i32_0 = arith.constant 0 : i32
    %2 = arith.cmpi ne, %1, %c0_i32_0 : i32
    scf.if %2 {
      %c0_12 = arith.constant 0 : index
      %c0_13 = arith.constant 0 : index
      %c0_14 = arith.constant 0 : index
      %14 = vector.load %arg5[%c0_12, %c0_13, %c0_14] : memref<1x8x128xbf16, #tpu.memory_space<vmem>>, vector<1x8x128xbf16>
      %15 = vector.shape_cast %14 : vector<1x8x128xbf16> to vector<8x128xbf16>
      %c0_15 = arith.constant 0 : index
      %c0_16 = arith.constant 0 : index
      %c0_17 = arith.constant 0 : index
      %16 = vector.load %arg6[%c0_15, %c0_16, %c0_17] : memref<1x128x256xbf16, #tpu.memory_space<vmem>>, vector<1x128x256xbf16>
      %17 = vector.shape_cast %16 : vector<1x128x256xbf16> to vector<128x256xbf16>
      %cst_18 = arith.constant dense<0.000000e+00> : vector<8x256xf32>
      %18 = tpu.matmul %15, %17, %cst_18 {dimension_numbers = #tpu.dot_dimension_numbers<[1], [0], [0], [1], [0, 0, 1, 1], [], []>} : vector<8x128xbf16>, vector<128x256xbf16>, vector<8x256xf32> -> vector<8x256xf32>
      %c0_19 = arith.constant 0 : index
      %c0_20 = arith.constant 0 : index
      %19 = vector.load %arg7[%c0_19, %c0_20] : memref<1x256xf32, #tpu.memory_space<vmem>>, vector<1x256xf32>
      %20 = vector.broadcast %19 : vector<1x256xf32> to vector<8x256xf32>
      %21 = arith.addf %18, %20 : vector<8x256xf32>
      %c0_21 = arith.constant 0 : index
      %c0_22 = arith.constant 0 : index
      %22 = vector.load %arg9[%c0_21, %c0_22] : memref<8x256xf32, #tpu.memory_space<vmem>>, vector<8x256xf32>
      tpu.vector_store %arg9[%c0_21, %c0_22], %21 {strides = array<i32>} : memref<8x256xf32, #tpu.memory_space<vmem>>, vector<8x256xf32>,
    } else {
    }
    %c0 = arith.constant 0 : index
    %c0_1 = arith.constant 0 : index
    %3 = vector.load %arg9[%c0, %c0_1] : memref<8x256xf32, #tpu.memory_space<vmem>>, vector<8x256xf32>
    %c0_2 = arith.constant 0 : index
    %c0_3 = arith.constant 0 : index
    %c0_4 = arith.constant 0 : index
    %4 = vector.load %arg2[%c0_2, %c0_3, %c0_4] : memref<1x8x128xbf16, #tpu.memory_space<vmem>>, vector<1x8x128xbf16>
    %5 = vector.shape_cast %4 : vector<1x8x128xbf16> to vector<8x128xbf16>
    %c0_5 = arith.constant 0 : index
    %c0_6 = arith.constant 0 : index
    %c0_7 = arith.constant 0 : index
    %6 = vector.load %arg3[%c0_5, %c0_6, %c0_7] : memref<1x128x256xbf16, #tpu.memory_space<vmem>>, vector<1x128x256xbf16>
    %7 = vector.shape_cast %6 : vector<1x128x256xbf16> to vector<128x256xbf16>
    %cst = arith.constant dense<0.000000e+00> : vector<8x256xf32>
    %8 = tpu.matmul %5, %7, %cst {dimension_numbers = #tpu.dot_dimension_numbers<[1], [0], [0], [1], [0, 0, 1, 1], [], []>} : vector<8x128xbf16>, vector<128x256xbf16>, vector<8x256xf32> -> vector<8x256xf32>
    %9 = arith.addf %3, %8 : vector<8x256xf32>
    %c0_8 = arith.constant 0 : index
    %c0_9 = arith.constant 0 : index
    %10 = vector.load %arg9[%c0_8, %c0_9] : memref<8x256xf32, #tpu.memory_space<vmem>>, vector<8x256xf32>
    tpu.vector_store %arg9[%c0_8, %c0_9], %9 {strides = array<i32>} : memref<8x256xf32, #tpu.memory_space<vmem>>, vector<8x256xf32>,
    %c0_i32_10 = arith.constant 0 : i32
    %11 = arith.cmpi eq, %arg1, %c0_i32_10 : i32
    %12 = arith.extui %11 : i1 to i32
    %c0_i32_11 = arith.constant 0 : i32
    %13 = arith.cmpi ne, %12, %c0_i32_11 : i32
    scf.if %13 {
      %c0_12 = arith.constant 0 : index
      %c0_13 = arith.constant 0 : index
      %14 = vector.load %arg9[%c0_12, %c0_13] : memref<8x256xf32, #tpu.memory_space<vmem>>, vector<8x256xf32>
      %c0_14 = arith.constant 0 : index
      %c0_15 = arith.constant 0 : index
      %15 = vector.load %arg4[%c0_14, %c0_15] : memref<1x256xf32, #tpu.memory_space<vmem>>, vector<1x256xf32>
      %16 = vector.broadcast %15 : vector<1x256xf32> to vector<8x256xf32>
      %17 = arith.addf %14, %16 : vector<8x256xf32>
      %cst_16 = arith.constant 0.000000e+00 : f32
      %18 = vector.broadcast %cst_16 : f32 to vector<8x256xf32>
      %19 = arith.maximumf %17, %18 : vector<8x256xf32>
      %20 = arith.truncf %19 : vector<8x256xf32> to vector<8x256xbf16>
      %c0_17 = arith.constant 0 : index
      %c0_18 = arith.constant 0 : index
      %21 = vector.load %arg8[%c0_17, %c0_18] : memref<8x256xbf16, #tpu.memory_space<vmem>>, vector<8x256xbf16>
      tpu.vector_store %arg8[%c0_17, %c0_18], %20 {strides = array<i32>} : memref<8x256xbf16, #tpu.memory_space<vmem>>, vector<8x256xbf16>,
    } else {
    }
    return
  }
  func.func @transform_0(%arg0: i32, %arg1: i32) -> (i32, i32, i32) {
    %c0_i32 = arith.constant 0 : i32
    %c0_i32_0 = arith.constant 0 : i32
    return %arg1, %arg0, %c0_i32 : i32, i32, i32
  }
  func.func @transform_1(%arg0: i32, %arg1: i32) -> (i32, i32, i32) {
    %c0_i32 = arith.constant 0 : i32
    %c0_i32_0 = arith.constant 0 : i32
    %c0_i32_1 = arith.constant 0 : i32
    return %arg1, %c0_i32, %c0_i32_0 : i32, i32, i32
  }
  func.func @transform_2(%arg0: i32, %arg1: i32) -> (i32, i32) {
    %c0_i32 = arith.constant 0 : i32
    %c0_i32_0 = arith.constant 0 : i32
    %c0_i32_1 = arith.constant 0 : i32
    return %c0_i32, %c0_i32_0 : i32, i32
  }
  func.func @transform_3(%arg0: i32, %arg1: i32) -> (i32, i32, i32) {
    %c0_i32 = arith.constant 0 : i32
    %c0_i32_0 = arith.constant 0 : i32
    %c0_i32_1 = arith.constant 0 : i32
    return %c0_i32, %arg0, %c0_i32_0 : i32, i32, i32
  }
  func.func @transform_4(%arg0: i32, %arg1: i32) -> (i32, i32, i32) {
    %c0_i32 = arith.constant 0 : i32
    %c0_i32_0 = arith.constant 0 : i32
    %c0_i32_1 = arith.constant 0 : i32
    %c0_i32_2 = arith.constant 0 : i32
    return %c0_i32, %c0_i32_0, %c0_i32_1 : i32, i32, i32
  }
  func.func @transform_5(%arg0: i32, %arg1: i32) -> (i32, i32) {
    %c0_i32 = arith.constant 0 : i32
    %c0_i32_0 = arith.constant 0 : i32
    %c0_i32_1 = arith.constant 0 : i32
    return %c0_i32, %c0_i32_0 : i32, i32
  }
  func.func @transform_6(%arg0: i32, %arg1: i32) -> (i32, i32) {
    %c0_i32 = arith.constant 0 : i32
    %c0_i32_0 = arith.constant 0 : i32
    return %arg0, %c0_i32 : i32, i32
  }
}

module attributes {stable_mosaic.version = 11 : i64} {
  func.func @_conv_res_kernel(%arg0: i32, %arg1: i32, %arg2: memref<1x8x128xbf16, #tpu.memory_space<vmem>>, %arg3: memref<1x128x256xbf16, #tpu.memory_space<vmem>>, %arg4: memref<1x256xf32, #tpu.memory_space<vmem>>, %arg5: memref<8x256xbf16, #tpu.memory_space<vmem>>, %arg6: memref<8x256xbf16, #tpu.memory_space<vmem>>, %arg7: memref<8x256xf32, #tpu.memory_space<vmem>>) attributes {dimension_semantics = [#tpu.dimension_semantics<parallel>, #tpu.dimension_semantics<arbitrary>], iteration_bounds = array<i64: 1, 1>, scalar_prefetch = 0 : i64, scratch_operands = 1 : i64, tpu.core_type = #tpu.core_type<tc>, window_params = [{transform_indices = @transform_0, window_bounds = array<i64: 1, 8, 128>}, {transform_indices = @transform_1, window_bounds = array<i64: 1, 128, 256>}, {pipeline_mode = #tpu.pipeline_mode<synchronous>, transform_indices = @transform_2, window_bounds = array<i64: 1, 256>}, {transform_indices = @transform_3, window_bounds = array<i64: 8, 256>}, {transform_indices = @transform_4, window_bounds = array<i64: 8, 256>}]} {
    %c0_i32 = arith.constant 0 : i32
    %0 = arith.cmpi eq, %arg1, %c0_i32 : i32
    %1 = arith.extui %0 : i1 to i32
    %c0_i32_0 = arith.constant 0 : i32
    %2 = arith.cmpi ne, %1, %c0_i32_0 : i32
    scf.if %2 {
      %cst_12 = arith.constant 0.000000e+00 : f32
      %14 = vector.broadcast %cst_12 : f32 to vector<8x256xf32>
      %c0_13 = arith.constant 0 : index
      %c0_14 = arith.constant 0 : index
      %15 = vector.load %arg7[%c0_13, %c0_14] : memref<8x256xf32, #tpu.memory_space<vmem>>, vector<8x256xf32>
      tpu.vector_store %arg7[%c0_13, %c0_14], %14 {strides = array<i32>} : memref<8x256xf32, #tpu.memory_space<vmem>>, vector<8x256xf32>,
    } else {
    }
    %c0 = arith.constant 0 : index
    %c0_1 = arith.constant 0 : index
    %3 = vector.load %arg7[%c0, %c0_1] : memref<8x256xf32, #tpu.memory_space<vmem>>, vector<8x256xf32>
    %c0_2 = arith.constant 0 : index
    %c0_3 = arith.constant 0 : index
    %c0_4 = arith.constant 0 : index
    %4 = vector.load %arg2[%c0_2, %c0_3, %c0_4] : memref<1x8x128xbf16, #tpu.memory_space<vmem>>, vector<1x8x128xbf16>
    %5 = vector.shape_cast %4 : vector<1x8x128xbf16> to vector<8x128xbf16>
    %c0_5 = arith.constant 0 : index
    %c0_6 = arith.constant 0 : index
    %c0_7 = arith.constant 0 : index
    %6 = vector.load %arg3[%c0_5, %c0_6, %c0_7] : memref<1x128x256xbf16, #tpu.memory_space<vmem>>, vector<1x128x256xbf16>
    %7 = vector.shape_cast %6 : vector<1x128x256xbf16> to vector<128x256xbf16>
    %cst = arith.constant dense<0.000000e+00> : vector<8x256xf32>
    %8 = tpu.matmul %5, %7, %cst {dimension_numbers = #tpu.dot_dimension_numbers<[1], [0], [0], [1], [0, 0, 1, 1], [], []>} : vector<8x128xbf16>, vector<128x256xbf16>, vector<8x256xf32> -> vector<8x256xf32>
    %9 = arith.addf %3, %8 : vector<8x256xf32>
    %c0_8 = arith.constant 0 : index
    %c0_9 = arith.constant 0 : index
    %10 = vector.load %arg7[%c0_8, %c0_9] : memref<8x256xf32, #tpu.memory_space<vmem>>, vector<8x256xf32>
    tpu.vector_store %arg7[%c0_8, %c0_9], %9 {strides = array<i32>} : memref<8x256xf32, #tpu.memory_space<vmem>>, vector<8x256xf32>,
    %c0_i32_10 = arith.constant 0 : i32
    %11 = arith.cmpi eq, %arg1, %c0_i32_10 : i32
    %12 = arith.extui %11 : i1 to i32
    %c0_i32_11 = arith.constant 0 : i32
    %13 = arith.cmpi ne, %12, %c0_i32_11 : i32
    scf.if %13 {
      %c0_12 = arith.constant 0 : index
      %c0_13 = arith.constant 0 : index
      %14 = vector.load %arg7[%c0_12, %c0_13] : memref<8x256xf32, #tpu.memory_space<vmem>>, vector<8x256xf32>
      %c0_14 = arith.constant 0 : index
      %c0_15 = arith.constant 0 : index
      %15 = vector.load %arg4[%c0_14, %c0_15] : memref<1x256xf32, #tpu.memory_space<vmem>>, vector<1x256xf32>
      %16 = vector.broadcast %15 : vector<1x256xf32> to vector<8x256xf32>
      %17 = arith.addf %14, %16 : vector<8x256xf32>
      %c0_16 = arith.constant 0 : index
      %c0_17 = arith.constant 0 : index
      %18 = vector.load %arg5[%c0_16, %c0_17] : memref<8x256xbf16, #tpu.memory_space<vmem>>, vector<8x256xbf16>
      %19 = arith.extf %18 : vector<8x256xbf16> to vector<8x256xf32>
      %20 = arith.addf %17, %19 : vector<8x256xf32>
      %cst_18 = arith.constant 0.000000e+00 : f32
      %21 = vector.broadcast %cst_18 : f32 to vector<8x256xf32>
      %22 = arith.maximumf %20, %21 : vector<8x256xf32>
      %23 = arith.truncf %22 : vector<8x256xf32> to vector<8x256xbf16>
      %c0_19 = arith.constant 0 : index
      %c0_20 = arith.constant 0 : index
      %24 = vector.load %arg6[%c0_19, %c0_20] : memref<8x256xbf16, #tpu.memory_space<vmem>>, vector<8x256xbf16>
      tpu.vector_store %arg6[%c0_19, %c0_20], %23 {strides = array<i32>} : memref<8x256xbf16, #tpu.memory_space<vmem>>, vector<8x256xbf16>,
    } else {
    }
    return
  }
  func.func @transform_0(%arg0: i32, %arg1: i32) -> (i32, i32, i32) {
    %c0_i32 = arith.constant 0 : i32
    %c0_i32_0 = arith.constant 0 : i32
    return %arg1, %arg0, %c0_i32 : i32, i32, i32
  }
  func.func @transform_1(%arg0: i32, %arg1: i32) -> (i32, i32, i32) {
    %c0_i32 = arith.constant 0 : i32
    %c0_i32_0 = arith.constant 0 : i32
    %c0_i32_1 = arith.constant 0 : i32
    return %arg1, %c0_i32, %c0_i32_0 : i32, i32, i32
  }
  func.func @transform_2(%arg0: i32, %arg1: i32) -> (i32, i32) {
    %c0_i32 = arith.constant 0 : i32
    %c0_i32_0 = arith.constant 0 : i32
    %c0_i32_1 = arith.constant 0 : i32
    return %c0_i32, %c0_i32_0 : i32, i32
  }
  func.func @transform_3(%arg0: i32, %arg1: i32) -> (i32, i32) {
    %c0_i32 = arith.constant 0 : i32
    %c0_i32_0 = arith.constant 0 : i32
    return %arg0, %c0_i32 : i32, i32
  }
  func.func @transform_4(%arg0: i32, %arg1: i32) -> (i32, i32) {
    %c0_i32 = arith.constant 0 : i32
    %c0_i32_0 = arith.constant 0 : i32
    return %arg0, %c0_i32 : i32, i32
  }
}

module attributes {stable_mosaic.version = 11 : i64} {
  func.func @_conv_kernel(%arg0: i32, %arg1: i32, %arg2: memref<1x2x128xbf16, #tpu.memory_space<vmem>>, %arg3: memref<1x128x128xbf16, #tpu.memory_space<vmem>>, %arg4: memref<1x128xf32, #tpu.memory_space<vmem>>, %arg5: memref<2x128xbf16, #tpu.memory_space<vmem>>, %arg6: memref<2x128xf32, #tpu.memory_space<vmem>>) attributes {dimension_semantics = [#tpu.dimension_semantics<parallel>, #tpu.dimension_semantics<arbitrary>], iteration_bounds = array<i64: 1, 9>, scalar_prefetch = 0 : i64, scratch_operands = 1 : i64, tpu.core_type = #tpu.core_type<tc>, window_params = [{transform_indices = @transform_0, window_bounds = array<i64: 1, 2, 128>}, {transform_indices = @transform_1, window_bounds = array<i64: 1, 128, 128>}, {pipeline_mode = #tpu.pipeline_mode<synchronous>, transform_indices = @transform_2, window_bounds = array<i64: 1, 128>}, {transform_indices = @transform_3, window_bounds = array<i64: 2, 128>}]} {
    %c0_i32 = arith.constant 0 : i32
    %0 = arith.cmpi eq, %arg1, %c0_i32 : i32
    %1 = arith.extui %0 : i1 to i32
    %c0_i32_0 = arith.constant 0 : i32
    %2 = arith.cmpi ne, %1, %c0_i32_0 : i32
    scf.if %2 {
      %cst_11 = arith.constant 0.000000e+00 : f32
      %14 = vector.broadcast %cst_11 : f32 to vector<2x128xf32>
      %c0_12 = arith.constant 0 : index
      %c0_13 = arith.constant 0 : index
      %15 = vector.load %arg6[%c0_12, %c0_13] : memref<2x128xf32, #tpu.memory_space<vmem>>, vector<2x128xf32>
      tpu.vector_store %arg6[%c0_12, %c0_13], %14 {strides = array<i32>} : memref<2x128xf32, #tpu.memory_space<vmem>>, vector<2x128xf32>,
    } else {
    }
    %c0 = arith.constant 0 : index
    %c0_1 = arith.constant 0 : index
    %3 = vector.load %arg6[%c0, %c0_1] : memref<2x128xf32, #tpu.memory_space<vmem>>, vector<2x128xf32>
    %c0_2 = arith.constant 0 : index
    %c0_3 = arith.constant 0 : index
    %c0_4 = arith.constant 0 : index
    %4 = vector.load %arg2[%c0_2, %c0_3, %c0_4] : memref<1x2x128xbf16, #tpu.memory_space<vmem>>, vector<1x2x128xbf16>
    %5 = vector.shape_cast %4 : vector<1x2x128xbf16> to vector<2x128xbf16>
    %c0_5 = arith.constant 0 : index
    %c0_6 = arith.constant 0 : index
    %c0_7 = arith.constant 0 : index
    %6 = vector.load %arg3[%c0_5, %c0_6, %c0_7] : memref<1x128x128xbf16, #tpu.memory_space<vmem>>, vector<1x128x128xbf16>
    %7 = vector.shape_cast %6 : vector<1x128x128xbf16> to vector<128x128xbf16>
    %cst = arith.constant dense<0.000000e+00> : vector<2x128xf32>
    %8 = tpu.matmul %5, %7, %cst {dimension_numbers = #tpu.dot_dimension_numbers<[1], [0], [0], [1], [0, 0, 1, 1], [], []>} : vector<2x128xbf16>, vector<128x128xbf16>, vector<2x128xf32> -> vector<2x128xf32>
    %9 = arith.addf %3, %8 : vector<2x128xf32>
    %c0_8 = arith.constant 0 : index
    %c0_9 = arith.constant 0 : index
    %10 = vector.load %arg6[%c0_8, %c0_9] : memref<2x128xf32, #tpu.memory_space<vmem>>, vector<2x128xf32>
    tpu.vector_store %arg6[%c0_8, %c0_9], %9 {strides = array<i32>} : memref<2x128xf32, #tpu.memory_space<vmem>>, vector<2x128xf32>,
    %c8_i32 = arith.constant 8 : i32
    %11 = arith.cmpi eq, %arg1, %c8_i32 : i32
    %12 = arith.extui %11 : i1 to i32
    %c0_i32_10 = arith.constant 0 : i32
    %13 = arith.cmpi ne, %12, %c0_i32_10 : i32
    scf.if %13 {
      %c0_11 = arith.constant 0 : index
      %c0_12 = arith.constant 0 : index
      %14 = vector.load %arg6[%c0_11, %c0_12] : memref<2x128xf32, #tpu.memory_space<vmem>>, vector<2x128xf32>
      %c0_13 = arith.constant 0 : index
      %c0_14 = arith.constant 0 : index
      %15 = vector.load %arg4[%c0_13, %c0_14] : memref<1x128xf32, #tpu.memory_space<vmem>>, vector<1x128xf32>
      %16 = vector.broadcast %15 : vector<1x128xf32> to vector<2x128xf32>
      %17 = arith.addf %14, %16 : vector<2x128xf32>
      %cst_15 = arith.constant 0.000000e+00 : f32
      %18 = vector.broadcast %cst_15 : f32 to vector<2x128xf32>
      %19 = arith.maximumf %17, %18 : vector<2x128xf32>
      %20 = arith.truncf %19 : vector<2x128xf32> to vector<2x128xbf16>
      %c0_16 = arith.constant 0 : index
      %c0_17 = arith.constant 0 : index
      %21 = vector.load %arg5[%c0_16, %c0_17] : memref<2x128xbf16, #tpu.memory_space<vmem>>, vector<2x128xbf16>
      tpu.vector_store %arg5[%c0_16, %c0_17], %20 {strides = array<i32>} : memref<2x128xbf16, #tpu.memory_space<vmem>>, vector<2x128xbf16>,
    } else {
    }
    return
  }
  func.func @transform_0(%arg0: i32, %arg1: i32) -> (i32, i32, i32) {
    %c0_i32 = arith.constant 0 : i32
    %c0_i32_0 = arith.constant 0 : i32
    return %arg1, %arg0, %c0_i32 : i32, i32, i32
  }
  func.func @transform_1(%arg0: i32, %arg1: i32) -> (i32, i32, i32) {
    %c0_i32 = arith.constant 0 : i32
    %c0_i32_0 = arith.constant 0 : i32
    %c0_i32_1 = arith.constant 0 : i32
    return %arg1, %c0_i32, %c0_i32_0 : i32, i32, i32
  }
  func.func @transform_2(%arg0: i32, %arg1: i32) -> (i32, i32) {
    %c0_i32 = arith.constant 0 : i32
    %c0_i32_0 = arith.constant 0 : i32
    %c0_i32_1 = arith.constant 0 : i32
    return %c0_i32, %c0_i32_0 : i32, i32
  }
  func.func @transform_3(%arg0: i32, %arg1: i32) -> (i32, i32) {
    %c0_i32 = arith.constant 0 : i32
    %c0_i32_0 = arith.constant 0 : i32
    return %arg0, %c0_i32 : i32, i32
  }
}

module attributes {stable_mosaic.version = 11 : i64} {
  func.func @_conv_ds_kernel(%arg0: i32, %arg1: i32, %arg2: memref<1x2x128xbf16, #tpu.memory_space<vmem>>, %arg3: memref<1x128x512xbf16, #tpu.memory_space<vmem>>, %arg4: memref<1x512xf32, #tpu.memory_space<vmem>>, %arg5: memref<1x2x256xbf16, #tpu.memory_space<vmem>>, %arg6: memref<1x256x512xbf16, #tpu.memory_space<vmem>>, %arg7: memref<1x512xf32, #tpu.memory_space<vmem>>, %arg8: memref<2x512xbf16, #tpu.memory_space<vmem>>, %arg9: memref<2x512xf32, #tpu.memory_space<vmem>>) attributes {dimension_semantics = [#tpu.dimension_semantics<parallel>, #tpu.dimension_semantics<arbitrary>], iteration_bounds = array<i64: 1, 1>, scalar_prefetch = 0 : i64, scratch_operands = 1 : i64, tpu.core_type = #tpu.core_type<tc>, window_params = [{transform_indices = @transform_0, window_bounds = array<i64: 1, 2, 128>}, {transform_indices = @transform_1, window_bounds = array<i64: 1, 128, 512>}, {pipeline_mode = #tpu.pipeline_mode<synchronous>, transform_indices = @transform_2, window_bounds = array<i64: 1, 512>}, {transform_indices = @transform_3, window_bounds = array<i64: 1, 2, 256>}, {pipeline_mode = #tpu.pipeline_mode<synchronous>, transform_indices = @transform_4, window_bounds = array<i64: 1, 256, 512>}, {pipeline_mode = #tpu.pipeline_mode<synchronous>, transform_indices = @transform_5, window_bounds = array<i64: 1, 512>}, {transform_indices = @transform_6, window_bounds = array<i64: 2, 512>}]} {
    %c0_i32 = arith.constant 0 : i32
    %0 = arith.cmpi eq, %arg1, %c0_i32 : i32
    %1 = arith.extui %0 : i1 to i32
    %c0_i32_0 = arith.constant 0 : i32
    %2 = arith.cmpi ne, %1, %c0_i32_0 : i32
    scf.if %2 {
      %c0_12 = arith.constant 0 : index
      %c0_13 = arith.constant 0 : index
      %c0_14 = arith.constant 0 : index
      %14 = vector.load %arg5[%c0_12, %c0_13, %c0_14] : memref<1x2x256xbf16, #tpu.memory_space<vmem>>, vector<1x2x256xbf16>
      %15 = vector.shape_cast %14 : vector<1x2x256xbf16> to vector<2x256xbf16>
      %c0_15 = arith.constant 0 : index
      %c0_16 = arith.constant 0 : index
      %c0_17 = arith.constant 0 : index
      %16 = vector.load %arg6[%c0_15, %c0_16, %c0_17] : memref<1x256x512xbf16, #tpu.memory_space<vmem>>, vector<1x256x512xbf16>
      %17 = vector.shape_cast %16 : vector<1x256x512xbf16> to vector<256x512xbf16>
      %cst_18 = arith.constant dense<0.000000e+00> : vector<2x512xf32>
      %18 = tpu.matmul %15, %17, %cst_18 {dimension_numbers = #tpu.dot_dimension_numbers<[1], [0], [0], [1], [0, 0, 1, 1], [], []>} : vector<2x256xbf16>, vector<256x512xbf16>, vector<2x512xf32> -> vector<2x512xf32>
      %c0_19 = arith.constant 0 : index
      %c0_20 = arith.constant 0 : index
      %19 = vector.load %arg7[%c0_19, %c0_20] : memref<1x512xf32, #tpu.memory_space<vmem>>, vector<1x512xf32>
      %20 = vector.broadcast %19 : vector<1x512xf32> to vector<2x512xf32>
      %21 = arith.addf %18, %20 : vector<2x512xf32>
      %c0_21 = arith.constant 0 : index
      %c0_22 = arith.constant 0 : index
      %22 = vector.load %arg9[%c0_21, %c0_22] : memref<2x512xf32, #tpu.memory_space<vmem>>, vector<2x512xf32>
      tpu.vector_store %arg9[%c0_21, %c0_22], %21 {strides = array<i32>} : memref<2x512xf32, #tpu.memory_space<vmem>>, vector<2x512xf32>,
    } else {
    }
    %c0 = arith.constant 0 : index
    %c0_1 = arith.constant 0 : index
    %3 = vector.load %arg9[%c0, %c0_1] : memref<2x512xf32, #tpu.memory_space<vmem>>, vector<2x512xf32>
    %c0_2 = arith.constant 0 : index
    %c0_3 = arith.constant 0 : index
    %c0_4 = arith.constant 0 : index
    %4 = vector.load %arg2[%c0_2, %c0_3, %c0_4] : memref<1x2x128xbf16, #tpu.memory_space<vmem>>, vector<1x2x128xbf16>
    %5 = vector.shape_cast %4 : vector<1x2x128xbf16> to vector<2x128xbf16>
    %c0_5 = arith.constant 0 : index
    %c0_6 = arith.constant 0 : index
    %c0_7 = arith.constant 0 : index
    %6 = vector.load %arg3[%c0_5, %c0_6, %c0_7] : memref<1x128x512xbf16, #tpu.memory_space<vmem>>, vector<1x128x512xbf16>
    %7 = vector.shape_cast %6 : vector<1x128x512xbf16> to vector<128x512xbf16>
    %cst = arith.constant dense<0.000000e+00> : vector<2x512xf32>
    %8 = tpu.matmul %5, %7, %cst {dimension_numbers = #tpu.dot_dimension_numbers<[1], [0], [0], [1], [0, 0, 1, 1], [], []>} : vector<2x128xbf16>, vector<128x512xbf16>, vector<2x512xf32> -> vector<2x512xf32>
    %9 = arith.addf %3, %8 : vector<2x512xf32>
    %c0_8 = arith.constant 0 : index
    %c0_9 = arith.constant 0 : index
    %10 = vector.load %arg9[%c0_8, %c0_9] : memref<2x512xf32, #tpu.memory_space<vmem>>, vector<2x512xf32>
    tpu.vector_store %arg9[%c0_8, %c0_9], %9 {strides = array<i32>} : memref<2x512xf32, #tpu.memory_space<vmem>>, vector<2x512xf32>,
    %c0_i32_10 = arith.constant 0 : i32
    %11 = arith.cmpi eq, %arg1, %c0_i32_10 : i32
    %12 = arith.extui %11 : i1 to i32
    %c0_i32_11 = arith.constant 0 : i32
    %13 = arith.cmpi ne, %12, %c0_i32_11 : i32
    scf.if %13 {
      %c0_12 = arith.constant 0 : index
      %c0_13 = arith.constant 0 : index
      %14 = vector.load %arg9[%c0_12, %c0_13] : memref<2x512xf32, #tpu.memory_space<vmem>>, vector<2x512xf32>
      %c0_14 = arith.constant 0 : index
      %c0_15 = arith.constant 0 : index
      %15 = vector.load %arg4[%c0_14, %c0_15] : memref<1x512xf32, #tpu.memory_space<vmem>>, vector<1x512xf32>
      %16 = vector.broadcast %15 : vector<1x512xf32> to vector<2x512xf32>
      %17 = arith.addf %14, %16 : vector<2x512xf32>
      %cst_16 = arith.constant 0.000000e+00 : f32
      %18 = vector.broadcast %cst_16 : f32 to vector<2x512xf32>
      %19 = arith.maximumf %17, %18 : vector<2x512xf32>
      %20 = arith.truncf %19 : vector<2x512xf32> to vector<2x512xbf16>
      %c0_17 = arith.constant 0 : index
      %c0_18 = arith.constant 0 : index
      %21 = vector.load %arg8[%c0_17, %c0_18] : memref<2x512xbf16, #tpu.memory_space<vmem>>, vector<2x512xbf16>
      tpu.vector_store %arg8[%c0_17, %c0_18], %20 {strides = array<i32>} : memref<2x512xbf16, #tpu.memory_space<vmem>>, vector<2x512xbf16>,
    } else {
    }
    return
  }
  func.func @transform_0(%arg0: i32, %arg1: i32) -> (i32, i32, i32) {
    %c0_i32 = arith.constant 0 : i32
    %c0_i32_0 = arith.constant 0 : i32
    return %arg1, %arg0, %c0_i32 : i32, i32, i32
  }
  func.func @transform_1(%arg0: i32, %arg1: i32) -> (i32, i32, i32) {
    %c0_i32 = arith.constant 0 : i32
    %c0_i32_0 = arith.constant 0 : i32
    %c0_i32_1 = arith.constant 0 : i32
    return %arg1, %c0_i32, %c0_i32_0 : i32, i32, i32
  }
  func.func @transform_2(%arg0: i32, %arg1: i32) -> (i32, i32) {
    %c0_i32 = arith.constant 0 : i32
    %c0_i32_0 = arith.constant 0 : i32
    %c0_i32_1 = arith.constant 0 : i32
    return %c0_i32, %c0_i32_0 : i32, i32
  }
  func.func @transform_3(%arg0: i32, %arg1: i32) -> (i32, i32, i32) {
    %c0_i32 = arith.constant 0 : i32
    %c0_i32_0 = arith.constant 0 : i32
    %c0_i32_1 = arith.constant 0 : i32
    return %c0_i32, %arg0, %c0_i32_0 : i32, i32, i32
  }
  func.func @transform_4(%arg0: i32, %arg1: i32) -> (i32, i32, i32) {
    %c0_i32 = arith.constant 0 : i32
    %c0_i32_0 = arith.constant 0 : i32
    %c0_i32_1 = arith.constant 0 : i32
    %c0_i32_2 = arith.constant 0 : i32
    return %c0_i32, %c0_i32_0, %c0_i32_1 : i32, i32, i32
  }
  func.func @transform_5(%arg0: i32, %arg1: i32) -> (i32, i32) {
    %c0_i32 = arith.constant 0 : i32
    %c0_i32_0 = arith.constant 0 : i32
    %c0_i32_1 = arith.constant 0 : i32
    return %c0_i32, %c0_i32_0 : i32, i32
  }
  func.func @transform_6(%arg0: i32, %arg1: i32) -> (i32, i32) {
    %c0_i32 = arith.constant 0 : i32
    %c0_i32_0 = arith.constant 0 : i32
    return %arg0, %c0_i32 : i32, i32
  }
}

module attributes {stable_mosaic.version = 11 : i64} {
  func.func @_conv_kernel(%arg0: i32, %arg1: i32, %arg2: memref<1x2x512xbf16, #tpu.memory_space<vmem>>, %arg3: memref<1x512x128xbf16, #tpu.memory_space<vmem>>, %arg4: memref<1x128xf32, #tpu.memory_space<vmem>>, %arg5: memref<2x128xbf16, #tpu.memory_space<vmem>>, %arg6: memref<2x128xf32, #tpu.memory_space<vmem>>) attributes {dimension_semantics = [#tpu.dimension_semantics<parallel>, #tpu.dimension_semantics<arbitrary>], iteration_bounds = array<i64: 1, 1>, scalar_prefetch = 0 : i64, scratch_operands = 1 : i64, tpu.core_type = #tpu.core_type<tc>, window_params = [{transform_indices = @transform_0, window_bounds = array<i64: 1, 2, 512>}, {transform_indices = @transform_1, window_bounds = array<i64: 1, 512, 128>}, {pipeline_mode = #tpu.pipeline_mode<synchronous>, transform_indices = @transform_2, window_bounds = array<i64: 1, 128>}, {transform_indices = @transform_3, window_bounds = array<i64: 2, 128>}]} {
    %c0_i32 = arith.constant 0 : i32
    %0 = arith.cmpi eq, %arg1, %c0_i32 : i32
    %1 = arith.extui %0 : i1 to i32
    %c0_i32_0 = arith.constant 0 : i32
    %2 = arith.cmpi ne, %1, %c0_i32_0 : i32
    scf.if %2 {
      %cst_12 = arith.constant 0.000000e+00 : f32
      %14 = vector.broadcast %cst_12 : f32 to vector<2x128xf32>
      %c0_13 = arith.constant 0 : index
      %c0_14 = arith.constant 0 : index
      %15 = vector.load %arg6[%c0_13, %c0_14] : memref<2x128xf32, #tpu.memory_space<vmem>>, vector<2x128xf32>
      tpu.vector_store %arg6[%c0_13, %c0_14], %14 {strides = array<i32>} : memref<2x128xf32, #tpu.memory_space<vmem>>, vector<2x128xf32>,
    } else {
    }
    %c0 = arith.constant 0 : index
    %c0_1 = arith.constant 0 : index
    %3 = vector.load %arg6[%c0, %c0_1] : memref<2x128xf32, #tpu.memory_space<vmem>>, vector<2x128xf32>
    %c0_2 = arith.constant 0 : index
    %c0_3 = arith.constant 0 : index
    %c0_4 = arith.constant 0 : index
    %4 = vector.load %arg2[%c0_2, %c0_3, %c0_4] : memref<1x2x512xbf16, #tpu.memory_space<vmem>>, vector<1x2x512xbf16>
    %5 = vector.shape_cast %4 : vector<1x2x512xbf16> to vector<2x512xbf16>
    %c0_5 = arith.constant 0 : index
    %c0_6 = arith.constant 0 : index
    %c0_7 = arith.constant 0 : index
    %6 = vector.load %arg3[%c0_5, %c0_6, %c0_7] : memref<1x512x128xbf16, #tpu.memory_space<vmem>>, vector<1x512x128xbf16>
    %7 = vector.shape_cast %6 : vector<1x512x128xbf16> to vector<512x128xbf16>
    %cst = arith.constant dense<0.000000e+00> : vector<2x128xf32>
    %8 = tpu.matmul %5, %7, %cst {dimension_numbers = #tpu.dot_dimension_numbers<[1], [0], [0], [1], [0, 0, 1, 1], [], []>} : vector<2x512xbf16>, vector<512x128xbf16>, vector<2x128xf32> -> vector<2x128xf32>
    %9 = arith.addf %3, %8 : vector<2x128xf32>
    %c0_8 = arith.constant 0 : index
    %c0_9 = arith.constant 0 : index
    %10 = vector.load %arg6[%c0_8, %c0_9] : memref<2x128xf32, #tpu.memory_space<vmem>>, vector<2x128xf32>
    tpu.vector_store %arg6[%c0_8, %c0_9], %9 {strides = array<i32>} : memref<2x128xf32, #tpu.memory_space<vmem>>, vector<2x128xf32>,
    %c0_i32_10 = arith.constant 0 : i32
    %11 = arith.cmpi eq, %arg1, %c0_i32_10 : i32
    %12 = arith.extui %11 : i1 to i32
    %c0_i32_11 = arith.constant 0 : i32
    %13 = arith.cmpi ne, %12, %c0_i32_11 : i32
    scf.if %13 {
      %c0_12 = arith.constant 0 : index
      %c0_13 = arith.constant 0 : index
      %14 = vector.load %arg6[%c0_12, %c0_13] : memref<2x128xf32, #tpu.memory_space<vmem>>, vector<2x128xf32>
      %c0_14 = arith.constant 0 : index
      %c0_15 = arith.constant 0 : index
      %15 = vector.load %arg4[%c0_14, %c0_15] : memref<1x128xf32, #tpu.memory_space<vmem>>, vector<1x128xf32>
      %16 = vector.broadcast %15 : vector<1x128xf32> to vector<2x128xf32>
      %17 = arith.addf %14, %16 : vector<2x128xf32>
      %cst_16 = arith.constant 0.000000e+00 : f32
      %18 = vector.broadcast %cst_16 : f32 to vector<2x128xf32>
      %19 = arith.maximumf %17, %18 : vector<2x128xf32>
      %20 = arith.truncf %19 : vector<2x128xf32> to vector<2x128xbf16>
      %c0_17 = arith.constant 0 : index
      %c0_18 = arith.constant 0 : index
      %21 = vector.load %arg5[%c0_17, %c0_18] : memref<2x128xbf16, #tpu.memory_space<vmem>>, vector<2x128xbf16>
      tpu.vector_store %arg5[%c0_17, %c0_18], %20 {strides = array<i32>} : memref<2x128xbf16, #tpu.memory_space<vmem>>, vector<2x128xbf16>,
    } else {
    }
    return
  }
  func.func @transform_0(%arg0: i32, %arg1: i32) -> (i32, i32, i32) {
    %c0_i32 = arith.constant 0 : i32
    %c0_i32_0 = arith.constant 0 : i32
    return %arg1, %arg0, %c0_i32 : i32, i32, i32
  }
  func.func @transform_1(%arg0: i32, %arg1: i32) -> (i32, i32, i32) {
    %c0_i32 = arith.constant 0 : i32
    %c0_i32_0 = arith.constant 0 : i32
    %c0_i32_1 = arith.constant 0 : i32
    return %arg1, %c0_i32, %c0_i32_0 : i32, i32, i32
  }
  func.func @transform_2(%arg0: i32, %arg1: i32) -> (i32, i32) {
    %c0_i32 = arith.constant 0 : i32
    %c0_i32_0 = arith.constant 0 : i32
    %c0_i32_1 = arith.constant 0 : i32
    return %c0_i32, %c0_i32_0 : i32, i32
  }
  func.func @transform_3(%arg0: i32, %arg1: i32) -> (i32, i32) {
    %c0_i32 = arith.constant 0 : i32
    %c0_i32_0 = arith.constant 0 : i32
    return %arg0, %c0_i32 : i32, i32
  }
}

module attributes {stable_mosaic.version = 11 : i64} {
  func.func @_conv_res_kernel(%arg0: i32, %arg1: i32, %arg2: memref<1x2x128xbf16, #tpu.memory_space<vmem>>, %arg3: memref<1x128x512xbf16, #tpu.memory_space<vmem>>, %arg4: memref<1x512xf32, #tpu.memory_space<vmem>>, %arg5: memref<2x512xbf16, #tpu.memory_space<vmem>>, %arg6: memref<2x512xbf16, #tpu.memory_space<vmem>>, %arg7: memref<2x512xf32, #tpu.memory_space<vmem>>) attributes {dimension_semantics = [#tpu.dimension_semantics<parallel>, #tpu.dimension_semantics<arbitrary>], iteration_bounds = array<i64: 1, 1>, scalar_prefetch = 0 : i64, scratch_operands = 1 : i64, tpu.core_type = #tpu.core_type<tc>, window_params = [{transform_indices = @transform_0, window_bounds = array<i64: 1, 2, 128>}, {transform_indices = @transform_1, window_bounds = array<i64: 1, 128, 512>}, {pipeline_mode = #tpu.pipeline_mode<synchronous>, transform_indices = @transform_2, window_bounds = array<i64: 1, 512>}, {transform_indices = @transform_3, window_bounds = array<i64: 2, 512>}, {transform_indices = @transform_4, window_bounds = array<i64: 2, 512>}]} {
    %c0_i32 = arith.constant 0 : i32
    %0 = arith.cmpi eq, %arg1, %c0_i32 : i32
    %1 = arith.extui %0 : i1 to i32
    %c0_i32_0 = arith.constant 0 : i32
    %2 = arith.cmpi ne, %1, %c0_i32_0 : i32
    scf.if %2 {
      %cst_12 = arith.constant 0.000000e+00 : f32
      %14 = vector.broadcast %cst_12 : f32 to vector<2x512xf32>
      %c0_13 = arith.constant 0 : index
      %c0_14 = arith.constant 0 : index
      %15 = vector.load %arg7[%c0_13, %c0_14] : memref<2x512xf32, #tpu.memory_space<vmem>>, vector<2x512xf32>
      tpu.vector_store %arg7[%c0_13, %c0_14], %14 {strides = array<i32>} : memref<2x512xf32, #tpu.memory_space<vmem>>, vector<2x512xf32>,
    } else {
    }
    %c0 = arith.constant 0 : index
    %c0_1 = arith.constant 0 : index
    %3 = vector.load %arg7[%c0, %c0_1] : memref<2x512xf32, #tpu.memory_space<vmem>>, vector<2x512xf32>
    %c0_2 = arith.constant 0 : index
    %c0_3 = arith.constant 0 : index
    %c0_4 = arith.constant 0 : index
    %4 = vector.load %arg2[%c0_2, %c0_3, %c0_4] : memref<1x2x128xbf16, #tpu.memory_space<vmem>>, vector<1x2x128xbf16>
    %5 = vector.shape_cast %4 : vector<1x2x128xbf16> to vector<2x128xbf16>
    %c0_5 = arith.constant 0 : index
    %c0_6 = arith.constant 0 : index
    %c0_7 = arith.constant 0 : index
    %6 = vector.load %arg3[%c0_5, %c0_6, %c0_7] : memref<1x128x512xbf16, #tpu.memory_space<vmem>>, vector<1x128x512xbf16>
    %7 = vector.shape_cast %6 : vector<1x128x512xbf16> to vector<128x512xbf16>
    %cst = arith.constant dense<0.000000e+00> : vector<2x512xf32>
    %8 = tpu.matmul %5, %7, %cst {dimension_numbers = #tpu.dot_dimension_numbers<[1], [0], [0], [1], [0, 0, 1, 1], [], []>} : vector<2x128xbf16>, vector<128x512xbf16>, vector<2x512xf32> -> vector<2x512xf32>
    %9 = arith.addf %3, %8 : vector<2x512xf32>
    %c0_8 = arith.constant 0 : index
    %c0_9 = arith.constant 0 : index
    %10 = vector.load %arg7[%c0_8, %c0_9] : memref<2x512xf32, #tpu.memory_space<vmem>>, vector<2x512xf32>
    tpu.vector_store %arg7[%c0_8, %c0_9], %9 {strides = array<i32>} : memref<2x512xf32, #tpu.memory_space<vmem>>, vector<2x512xf32>,
    %c0_i32_10 = arith.constant 0 : i32
    %11 = arith.cmpi eq, %arg1, %c0_i32_10 : i32
    %12 = arith.extui %11 : i1 to i32
    %c0_i32_11 = arith.constant 0 : i32
    %13 = arith.cmpi ne, %12, %c0_i32_11 : i32
    scf.if %13 {
      %c0_12 = arith.constant 0 : index
      %c0_13 = arith.constant 0 : index
      %14 = vector.load %arg7[%c0_12, %c0_13] : memref<2x512xf32, #tpu.memory_space<vmem>>, vector<2x512xf32>
      %c0_14 = arith.constant 0 : index
      %c0_15 = arith.constant 0 : index
      %15 = vector.load %arg4[%c0_14, %c0_15] : memref<1x512xf32, #tpu.memory_space<vmem>>, vector<1x512xf32>
      %16 = vector.broadcast %15 : vector<1x512xf32> to vector<2x512xf32>
      %17 = arith.addf %14, %16 : vector<2x512xf32>
      %c0_16 = arith.constant 0 : index
      %c0_17 = arith.constant 0 : index
      %18 = vector.load %arg5[%c0_16, %c0_17] : memref<2x512xbf16, #tpu.memory_space<vmem>>, vector<2x512xbf16>
      %19 = arith.extf %18 : vector<2x512xbf16> to vector<2x512xf32>
      %20 = arith.addf %17, %19 : vector<2x512xf32>
      %cst_18 = arith.constant 0.000000e+00 : f32
      %21 = vector.broadcast %cst_18 : f32 to vector<2x512xf32>
      %22 = arith.maximumf %20, %21 : vector<2x512xf32>
      %23 = arith.truncf %22 : vector<2x512xf32> to vector<2x512xbf16>
      %c0_19 = arith.constant 0 : index
      %c0_20 = arith.constant 0 : index
      %24 = vector.load %arg6[%c0_19, %c0_20] : memref<2x512xbf16, #tpu.memory_space<vmem>>, vector<2x512xbf16>
      tpu.vector_store %arg6[%c0_19, %c0_20], %23 {strides = array<i32>} : memref<2x512xbf16, #tpu.memory_space<vmem>>, vector<2x512xbf16>,
    } else {
    }
    return
  }
  func.func @transform_0(%arg0: i32, %arg1: i32) -> (i32, i32, i32) {
    %c0_i32 = arith.constant 0 : i32
    %c0_i32_0 = arith.constant 0 : i32
    return %arg1, %arg0, %c0_i32 : i32, i32, i32
  }
  func.func @transform_1(%arg0: i32, %arg1: i32) -> (i32, i32, i32) {
    %c0_i32 = arith.constant 0 : i32
    %c0_i32_0 = arith.constant 0 : i32
    %c0_i32_1 = arith.constant 0 : i32
    return %arg1, %c0_i32, %c0_i32_0 : i32, i32, i32
  }
  func.func @transform_2(%arg0: i32, %arg1: i32) -> (i32, i32) {
    %c0_i32 = arith.constant 0 : i32
    %c0_i32_0 = arith.constant 0 : i32
    %c0_i32_1 = arith.constant 0 : i32
    return %c0_i32, %c0_i32_0 : i32, i32
  }
  func.func @transform_3(%arg0: i32, %arg1: i32) -> (i32, i32) {
    %c0_i32 = arith.constant 0 : i32
    %c0_i32_0 = arith.constant 0 : i32
    return %arg0, %c0_i32 : i32, i32
  }
  func.func @transform_4(%arg0: i32, %arg1: i32) -> (i32, i32) {
    %c0_i32 = arith.constant 0 : i32
    %c0_i32_0 = arith.constant 0 : i32
    return %arg0, %c0_i32 : i32, i32
  }
}

module attributes {stable_mosaic.version = 11 : i64} {
  func.func @_conv_kernel(%arg0: i32, %arg1: i32, %arg2: memref<1x2x128xbf16, #tpu.memory_space<vmem>>, %arg3: memref<1x128x128xbf16, #tpu.memory_space<vmem>>, %arg4: memref<1x128xf32, #tpu.memory_space<vmem>>, %arg5: memref<2x128xbf16, #tpu.memory_space<vmem>>, %arg6: memref<2x128xf32, #tpu.memory_space<vmem>>) attributes {dimension_semantics = [#tpu.dimension_semantics<parallel>, #tpu.dimension_semantics<arbitrary>], iteration_bounds = array<i64: 1, 9>, scalar_prefetch = 0 : i64, scratch_operands = 1 : i64, tpu.core_type = #tpu.core_type<tc>, window_params = [{transform_indices = @transform_0, window_bounds = array<i64: 1, 2, 128>}, {transform_indices = @transform_1, window_bounds = array<i64: 1, 128, 128>}, {pipeline_mode = #tpu.pipeline_mode<synchronous>, transform_indices = @transform_2, window_bounds = array<i64: 1, 128>}, {transform_indices = @transform_3, window_bounds = array<i64: 2, 128>}]} {
    %c0_i32 = arith.constant 0 : i32
    %0 = arith.cmpi eq, %arg1, %c0_i32 : i32
    %1 = arith.extui %0 : i1 to i32
    %c0_i32_0 = arith.constant 0 : i32
    %2 = arith.cmpi ne, %1, %c0_i32_0 : i32
    scf.if %2 {
      %cst_11 = arith.constant 0.000000e+00 : f32
      %14 = vector.broadcast %cst_11 : f32 to vector<2x128xf32>
      %c0_12 = arith.constant 0 : index
      %c0_13 = arith.constant 0 : index
      %15 = vector.load %arg6[%c0_12, %c0_13] : memref<2x128xf32, #tpu.memory_space<vmem>>, vector<2x128xf32>
      tpu.vector_store %arg6[%c0_12, %c0_13], %14 {strides = array<i32>} : memref<2x128xf32, #tpu.memory_space<vmem>>, vector<2x128xf32>,
    } else {
    }
    %c0 = arith.constant 0 : index
    %c0_1 = arith.constant 0 : index
    %3 = vector.load %arg6[%c0, %c0_1] : memref<2x128xf32, #tpu.memory_space<vmem>>, vector<2x128xf32>
    %c0_2 = arith.constant 0 : index
    %c0_3 = arith.constant 0 : index
    %c0_4 = arith.constant 0 : index
    %4 = vector.load %arg2[%c0_2, %c0_3, %c0_4] : memref<1x2x128xbf16, #tpu.memory_space<vmem>>, vector<1x2x128xbf16>
    %5 = vector.shape_cast %4 : vector<1x2x128xbf16> to vector<2x128xbf16>
    %c0_5 = arith.constant 0 : index
    %c0_6 = arith.constant 0 : index
    %c0_7 = arith.constant 0 : index
    %6 = vector.load %arg3[%c0_5, %c0_6, %c0_7] : memref<1x128x128xbf16, #tpu.memory_space<vmem>>, vector<1x128x128xbf16>
    %7 = vector.shape_cast %6 : vector<1x128x128xbf16> to vector<128x128xbf16>
    %cst = arith.constant dense<0.000000e+00> : vector<2x128xf32>
    %8 = tpu.matmul %5, %7, %cst {dimension_numbers = #tpu.dot_dimension_numbers<[1], [0], [0], [1], [0, 0, 1, 1], [], []>} : vector<2x128xbf16>, vector<128x128xbf16>, vector<2x128xf32> -> vector<2x128xf32>
    %9 = arith.addf %3, %8 : vector<2x128xf32>
    %c0_8 = arith.constant 0 : index
    %c0_9 = arith.constant 0 : index
    %10 = vector.load %arg6[%c0_8, %c0_9] : memref<2x128xf32, #tpu.memory_space<vmem>>, vector<2x128xf32>
    tpu.vector_store %arg6[%c0_8, %c0_9], %9 {strides = array<i32>} : memref<2x128xf32, #tpu.memory_space<vmem>>, vector<2x128xf32>,
    %c8_i32 = arith.constant 8 : i32
    %11 = arith.cmpi eq, %arg1, %c8_i32 : i32
    %12 = arith.extui %11 : i1 to i32
    %c0_i32_10 = arith.constant 0 : i32
    %13 = arith.cmpi ne, %12, %c0_i32_10 : i32
    scf.if %13 {
      %c0_11 = arith.constant 0 : index
      %c0_12 = arith.constant 0 : index
      %14 = vector.load %arg6[%c0_11, %c0_12] : memref<2x128xf32, #tpu.memory_space<vmem>>, vector<2x128xf32>
      %c0_13 = arith.constant 0 : index
      %c0_14 = arith.constant 0 : index
      %15 = vector.load %arg4[%c0_13, %c0_14] : memref<1x128xf32, #tpu.memory_space<vmem>>, vector<1x128xf32>
      %16 = vector.broadcast %15 : vector<1x128xf32> to vector<2x128xf32>
      %17 = arith.addf %14, %16 : vector<2x128xf32>
      %cst_15 = arith.constant 0.000000e+00 : f32
      %18 = vector.broadcast %cst_15 : f32 to vector<2x128xf32>
      %19 = arith.maximumf %17, %18 : vector<2x128xf32>
      %20 = arith.truncf %19 : vector<2x128xf32> to vector<2x128xbf16>
      %c0_16 = arith.constant 0 : index
      %c0_17 = arith.constant 0 : index
      %21 = vector.load %arg5[%c0_16, %c0_17] : memref<2x128xbf16, #tpu.memory_space<vmem>>, vector<2x128xbf16>
      tpu.vector_store %arg5[%c0_16, %c0_17], %20 {strides = array<i32>} : memref<2x128xbf16, #tpu.memory_space<vmem>>, vector<2x128xbf16>,
    } else {
    }
    return
  }
  func.func @transform_0(%arg0: i32, %arg1: i32) -> (i32, i32, i32) {
    %c0_i32 = arith.constant 0 : i32
    %c0_i32_0 = arith.constant 0 : i32
    return %arg1, %arg0, %c0_i32 : i32, i32, i32
  }
  func.func @transform_1(%arg0: i32, %arg1: i32) -> (i32, i32, i32) {
    %c0_i32 = arith.constant 0 : i32
    %c0_i32_0 = arith.constant 0 : i32
    %c0_i32_1 = arith.constant 0 : i32
    return %arg1, %c0_i32, %c0_i32_0 : i32, i32, i32
  }
  func.func @transform_2(%arg0: i32, %arg1: i32) -> (i32, i32) {
    %c0_i32 = arith.constant 0 : i32
    %c0_i32_0 = arith.constant 0 : i32
    %c0_i32_1 = arith.constant 0 : i32
    return %c0_i32, %c0_i32_0 : i32, i32
  }
  func.func @transform_3(%arg0: i32, %arg1: i32) -> (i32, i32) {
    %c0_i32 = arith.constant 0 : i32
    %c0_i32_0 = arith.constant 0 : i32
    return %arg0, %c0_i32 : i32, i32
  }
}

module attributes {stable_mosaic.version = 11 : i64} {
  func.func @_head_full_kernel(%arg0: i32, %arg1: memref<2x1x512xbf16, #tpu.memory_space<vmem>>, %arg2: memref<512x128xbf16, #tpu.memory_space<vmem>>, %arg3: memref<1x128xf32, #tpu.memory_space<vmem>>, %arg4: memref<128x128xbf16, #tpu.memory_space<vmem>>, %arg5: memref<1x128xf32, #tpu.memory_space<vmem>>, %arg6: memref<2x128xf32, #tpu.memory_space<vmem>>) attributes {dimension_semantics = [#tpu.dimension_semantics<arbitrary>], iteration_bounds = array<i64: 1>, scalar_prefetch = 0 : i64, scratch_operands = 0 : i64, tpu.core_type = #tpu.core_type<tc>, window_params = [{pipeline_mode = #tpu.pipeline_mode<synchronous>, transform_indices = @transform_0, window_bounds = array<i64: 2, 1, 512>}, {pipeline_mode = #tpu.pipeline_mode<synchronous>, transform_indices = @transform_1, window_bounds = array<i64: 512, 128>}, {pipeline_mode = #tpu.pipeline_mode<synchronous>, transform_indices = @transform_2, window_bounds = array<i64: 1, 128>}, {pipeline_mode = #tpu.pipeline_mode<synchronous>, transform_indices = @transform_3, window_bounds = array<i64: 128, 128>}, {pipeline_mode = #tpu.pipeline_mode<synchronous>, transform_indices = @transform_4, window_bounds = array<i64: 1, 128>}, {pipeline_mode = #tpu.pipeline_mode<synchronous>, transform_indices = @transform_5, window_bounds = array<i64: 2, 128>}]} {
    %c0 = arith.constant 0 : index
    %c0_0 = arith.constant 0 : index
    %c0_1 = arith.constant 0 : index
    %0 = vector.load %arg1[%c0, %c0_0, %c0_1] : memref<2x1x512xbf16, #tpu.memory_space<vmem>>, vector<2x1x512xbf16>
    %1 = arith.extf %0 : vector<2x1x512xbf16> to vector<2x1x512xf32>
    %cst = arith.constant dense<0.000000e+00> : vector<2x512xf32>
    %2 = vector.multi_reduction <add>, %1, %cst [1] : vector<2x1x512xf32> to vector<2x512xf32>
    %cst_2 = arith.constant 1.000000e+00 : f32
    %3 = vector.broadcast %cst_2 : f32 to vector<2x512xf32>
    %4 = arith.mulf %2, %3 : vector<2x512xf32>
    %5 = arith.truncf %4 : vector<2x512xf32> to vector<2x512xbf16>
    %c0_3 = arith.constant 0 : index
    %c0_4 = arith.constant 0 : index
    %6 = vector.load %arg2[%c0_3, %c0_4] : memref<512x128xbf16, #tpu.memory_space<vmem>>, vector<512x128xbf16>
    %cst_5 = arith.constant dense<0.000000e+00> : vector<2x128xf32>
    %7 = tpu.matmul %5, %6, %cst_5 {dimension_numbers = #tpu.dot_dimension_numbers<[1], [0], [0], [1], [0, 0, 1, 1], [], []>} : vector<2x512xbf16>, vector<512x128xbf16>, vector<2x128xf32> -> vector<2x128xf32>
    %c0_6 = arith.constant 0 : index
    %c0_7 = arith.constant 0 : index
    %8 = vector.load %arg3[%c0_6, %c0_7] : memref<1x128xf32, #tpu.memory_space<vmem>>, vector<1x128xf32>
    %9 = vector.broadcast %8 : vector<1x128xf32> to vector<2x128xf32>
    %10 = arith.addf %7, %9 : vector<2x128xf32>
    %11 = arith.truncf %10 : vector<2x128xf32> to vector<2x128xbf16>
    %c0_8 = arith.constant 0 : index
    %c0_9 = arith.constant 0 : index
    %12 = vector.load %arg4[%c0_8, %c0_9] : memref<128x128xbf16, #tpu.memory_space<vmem>>, vector<128x128xbf16>
    %cst_10 = arith.constant dense<0.000000e+00> : vector<2x128xf32>
    %13 = tpu.matmul %11, %12, %cst_10 {dimension_numbers = #tpu.dot_dimension_numbers<[1], [0], [0], [1], [0, 0, 1, 1], [], []>} : vector<2x128xbf16>, vector<128x128xbf16>, vector<2x128xf32> -> vector<2x128xf32>
    %c0_11 = arith.constant 0 : index
    %c0_12 = arith.constant 0 : index
    %14 = vector.load %arg5[%c0_11, %c0_12] : memref<1x128xf32, #tpu.memory_space<vmem>>, vector<1x128xf32>
    %15 = vector.broadcast %14 : vector<1x128xf32> to vector<2x128xf32>
    %16 = arith.addf %13, %15 : vector<2x128xf32>
    %c0_13 = arith.constant 0 : index
    %c0_14 = arith.constant 0 : index
    %17 = vector.load %arg6[%c0_13, %c0_14] : memref<2x128xf32, #tpu.memory_space<vmem>>, vector<2x128xf32>
    tpu.vector_store %arg6[%c0_13, %c0_14], %16 {strides = array<i32>} : memref<2x128xf32, #tpu.memory_space<vmem>>, vector<2x128xf32>,
    return
  }
  func.func @transform_0(%arg0: i32) -> (i32, i32, i32) {
    %c0_i32 = arith.constant 0 : i32
    %c0_i32_0 = arith.constant 0 : i32
    %c0_i32_1 = arith.constant 0 : i32
    %c0_i32_2 = arith.constant 0 : i32
    return %c0_i32, %c0_i32_0, %c0_i32_1 : i32, i32, i32
  }
  func.func @transform_1(%arg0: i32) -> (i32, i32) {
    %c0_i32 = arith.constant 0 : i32
    %c0_i32_0 = arith.constant 0 : i32
    %c0_i32_1 = arith.constant 0 : i32
    return %c0_i32, %c0_i32_0 : i32, i32
  }
  func.func @transform_2(%arg0: i32) -> (i32, i32) {
    %c0_i32 = arith.constant 0 : i32
    %c0_i32_0 = arith.constant 0 : i32
    %c0_i32_1 = arith.constant 0 : i32
    return %c0_i32, %c0_i32_0 : i32, i32
  }
  func.func @transform_3(%arg0: i32) -> (i32, i32) {
    %c0_i32 = arith.constant 0 : i32
    %c0_i32_0 = arith.constant 0 : i32
    %c0_i32_1 = arith.constant 0 : i32
    return %c0_i32, %c0_i32_0 : i32, i32
  }
  func.func @transform_4(%arg0: i32) -> (i32, i32) {
    %c0_i32 = arith.constant 0 : i32
    %c0_i32_0 = arith.constant 0 : i32
    %c0_i32_1 = arith.constant 0 : i32
    return %c0_i32, %c0_i32_0 : i32, i32
  }
  func.func @transform_5(%arg0: i32) -> (i32, i32) {
    %c0_i32 = arith.constant 0 : i32
    %c0_i32_0 = arith.constant 0 : i32
    %c0_i32_1 = arith.constant 0 : i32
    return %c0_i32, %c0_i32_0 : i32, i32
  }
}

</mosaic_0001>

<bundles_post_ra>
// kernel: resnet_cifar100_forward.53
= control target key start
LH: loop header
LB: loop body
LE: loop exit
PB: predicated region body
PF: predicated region fallthrough
CT: control target
= control target key end

     0   :  { %s1410_s12 = smov 0   ;;  %s1412_s13 = smov 0   ;;  %s1562_s0 = inlined_call_operand.vmem [shape: bf16[49,512,8], index: 0, kind: input, shape index: {}]   ;;  %s1563_s1 = inlined_call_operand.vmem [shape: bf16[49,8,128], index: 1, kind: input, shape index: {}]   ;;  %s1564_s2 = inlined_call_operand.vmem [shape: f32[1,128], index: 2, kind: input, shape index: {}]   ;;  %s1565_s3 = inlined_call_operand.vmem [shape: bf16[512,128], index: 3, kind: output, shape index: {}]  }
   0x1   :  { %s1414_s14 = smov 0   ;;  %s1416_s15 = smov 0  }
   0x2   :  { %s1418_s16 = smov 0  }
   0x3 LB: > { %s22_s17 = sadd.s32 1, %s1379_s14  ;;  %s25_s18 = sadd.s32 1, %s1383_s15  ;;  %s1387_s16 = sphi %s1418_s16, %s13_s16   ;;  %s1383_s15 = sphi %s1416_s15, %s1569_s15   ;;  %s1379_s14 = sphi %s1414_s14, %s1568_s14   ;;  %s1375_s13 = sphi %s1412_s13, %s1567_s13   ;;  %s1371_s12 = sphi %s1410_s12, %s1566_s12  }
   0x4   : > { %p23_p0 = scmp.ge.s32.totalorder %s22_s17, 49  ;;  %p1034_p1 = scmp.ge.s32.totalorder %s1387_s16, 1 }
   0x5   : > { %p165_p2 = scmp.lt.s32.totalorder %s1387_s16, 99 }
   0x6   : > { %s1571_s17 = smov (%p23_p0, %s22_s17), 0  ;;  %s1573_s18 = smov (!%p23_p0, %s25_s18), %s1383_s15 }
   0x7   : > { %p166_p3 = pnand %p1034_p1, %p165_p2  ;;  %p27_p4 = scmp.ge.s32.totalorder %s1573_s18, 2 }
   0x8   : > { %s1035_s19 = sshll.u32 (!%p166_p3), %s1375_s13, 5  ;;  %p198_p5 = scmp.lt.s32.totalorder (!%p166_p3), %s1371_s12, 48 }
   0x9   : > { %s1575_s18 = smov (%p27_p4, %s1573_s18), 0  ;;  %169 = sbr.rel (%p166_p3) target bundleno = 298 (0x12a), region = 32 }
   0xa   : > { %p200_p6 = scmp.lt.s32.totalorder (!%p166_p3), %s1035_s19, 63  ;;  %p1041_p7 = scmp.ne.s32.totalorder (!%p166_p3), %s1371_s12, 0 }
  0x10   : > { %s199_s20 = scalar_select %p198_p5, %s1371_s12, 48 }
  0x11   : > { %s1577_s19 = smov (!%p200_p6, %s1035_s19), 63  ;;  %221 = sbr.rel (%p1041_p7) target bundleno = 35 (0x23), region = 36 }
  0x12   : > { %s1036_s21 = sshll.u32 %s199_s20, 6  ;;  %s1038_s22 = sshll.u32 %s199_s20, 2  ;;  %v1389_v0 = vmov (!%p1041_p7), 0.0  }
  0x13   : > { %s203_s23 = sadd.s32 %s1036_s21, %s1577_s19  ;;  %s1447_s26 = scalar_lea.vmem %s1563_s1, %s1038_s22  ;;  %222 = vst [vmem:[#allocation2] sm:$0xff] (!%p1041_p7), %v1389_v0  ;;  %223 = vst [vmem:[#allocation2 + $0x8] sm:$0xff] (!%p1041_p7), %v1389_v0 }
  0x14   : > { %s1037_s27 = sshll.u32 %s203_s23, 2  ;;  %s1040_s28 = sshll.u32 %s1577_s19, 2  ;;  %224 = vst [vmem:[#allocation2 + $0x10] sm:$0xff] (!%p1041_p7), %v1389_v0  ;;  %225 = vst [vmem:[#allocation2 + $0x18] sm:$0xff] (!%p1041_p7), %v1389_v0 }
  0x15   : > { %s1452_s4 = scalar_lea.vmem %s1562_s0, %s1037_s27  ;;  %s1457_s7 = scalar_lea.vmem %s1565_s3, %s1040_s28  ;;  %226 = vst [vmem:[#allocation2 + $0x20] sm:$0xff] (!%p1041_p7), %v1389_v0  ;;  %227 = vst [vmem:[#allocation2 + $0x28] sm:$0xff] (!%p1041_p7), %v1389_v0 }
  0x16   : > { %228 = vst [vmem:[#allocation2 + $0x30] sm:$0xff] (!%p1041_p7), %v1389_v0  ;;  %229 = vst [vmem:[#allocation2 + $0x38] sm:$0xff] (!%p1041_p7), %v1389_v0 }
  0x17   : > { %230 = vst [vmem:[#allocation2 + $0x40] sm:$0xff] (!%p1041_p7), %v1389_v0  ;;  %231 = vst [vmem:[#allocation2 + $0x48] sm:$0xff] (!%p1041_p7), %v1389_v0 }
  0x18   : > { %232 = vst [vmem:[#allocation2 + $0x50] sm:$0xff] %v1389_v0  ;;  %233 = vst [vmem:[#allocation2 + $0x58] sm:$0xff] %v1389_v0 }
  0x19   : > { %234 = vst [vmem:[#allocation2 + $0x60] sm:$0xff] %v1389_v0  ;;  %235 = vst [vmem:[#allocation2 + $0x68] sm:$0xff] %v1389_v0 }
  0x1a   : > { %236 = vst [vmem:[#allocation2 + $0x70] sm:$0xff] %v1389_v0  ;;  %237 = vst [vmem:[#allocation2 + $0x78] sm:$0xff] %v1389_v0 }
  0x1b   : > { %238 = vst [vmem:[#allocation2 + $0x80] sm:$0xff] %v1389_v0  ;;  %239 = vst [vmem:[#allocation2 + $0x88] sm:$0xff] %v1389_v0 }
  0x1c   : > { %240 = vst [vmem:[#allocation2 + $0x90] sm:$0xff] %v1389_v0  ;;  %241 = vst [vmem:[#allocation2 + $0x98] sm:$0xff] %v1389_v0 }
  0x1d   : > { %242 = vst [vmem:[#allocation2 + $0xa0] sm:$0xff] %v1389_v0  ;;  %243 = vst [vmem:[#allocation2 + $0xa8] sm:$0xff] %v1389_v0 }
  0x1e   : > { %244 = vst [vmem:[#allocation2 + $0xb0] sm:$0xff] %v1389_v0  ;;  %245 = vst [vmem:[#allocation2 + $0xb8] sm:$0xff] %v1389_v0 }
  0x1f   : > { %246 = vst [vmem:[#allocation2 + $0xc0] sm:$0xff] %v1389_v0  ;;  %247 = vst [vmem:[#allocation2 + $0xc8] sm:$0xff] %v1389_v0 }
  0x20   : > { %248 = vst [vmem:[#allocation2 + $0xd0] sm:$0xff] %v1389_v0  ;;  %249 = vst [vmem:[#allocation2 + $0xd8] sm:$0xff] %v1389_v0 }
  0x21   : > { %250 = vst [vmem:[#allocation2 + $0xe0] sm:$0xff] %v1389_v0  ;;  %251 = vst [vmem:[#allocation2 + $0xe8] sm:$0xff] %v1389_v0 }
  0x22   : > { %252 = vst [vmem:[#allocation2 + $0xf0] sm:$0xff] %v1389_v0  ;;  %253 = vst [vmem:[#allocation2 + $0xf8] sm:$0xff] %v1389_v0 }
  0x23 PF: > { %v318_v1 = vld [vmem:[%s1447_s26] sm:$0xf]  ;;  %vm448_vm0 = vcmask 1043456   ;;  %vm399_vm1 = vcmask 64512   ;;  %v1335_v5 = vld [vmem:[%s1452_s4 + $0x8] sm:$0xff]   ;;  %v1337_v7 = vld [vmem:[%s1452_s4 + $0x10] sm:$0xff]  }
  0x24   : > { %v1333_v2 = vld [vmem:[%s1452_s4] sm:$0xff]   ;;  %1290 = vmatprep.subr.msk.bf16.mxu0 %vm448_vm0, %v318_v1  ;;  %1291 = vmatprep.subr.msk.bf16.mxu1 %vm448_vm0, %v318_v1  ;;  %v450_v3 = vsel %vm448_vm0, %v318_v1, 0  ;;  %v1336_v6 = vld [vmem:[%s1452_s4 + $0x48] sm:$0xff]   ;;  %v1338_v8 = vld [vmem:[%s1452_s4 + $0x50] sm:$0xff]   ;;  %p1074_p8 = scmp.ne.s32.totalorder %s1371_s12, 48 }
  0x25   : > { %1255 = vmatpush3.bf16.msra.mxu0 %v450_v3  ;;  %1289 = vmatpush3.bf16.msra.mxu1 %v450_v3  ;;  %v1334_v4 = vld [vmem:[%s1452_s4 + $0x40] sm:$0xff]   ;;  %v1339_v9 = vld [vmem:[%s1452_s4 + $0x18] sm:$0xff]   ;;  %v1343_v13 = vld [vmem:[%s1452_s4 + $0x28] sm:$0xff]  }
  0x26   : > { %1256 = vmatprep.mubr.msk.bf16.mxu0 %vm399_vm1, %v1333_v2  ;;  %1272 = vmatprep.mubr.msk.bf16.mxu1 %vm399_vm1, %v1334_v4  ;;  %v1340_v10 = vld [vmem:[%s1452_s4 + $0x58] sm:$0xff]   ;;  %v1341_v11 = vld [vmem:[%s1452_s4 + $0x20] sm:$0xff]   ;;  %v1344_v14 = vld [vmem:[%s1452_s4 + $0x68] sm:$0xff]  }
  0x27   : > { %v1342_v12 = vld [vmem:[%s1452_s4 + $0x60] sm:$0xff]   ;;  %v1345_v15 = vld [vmem:[%s1452_s4 + $0x30] sm:$0xff]   ;;  %v1347_v17 = vld [vmem:[%s1452_s4 + $0x38] sm:$0xff]  }
  0x28   : > { %1257 = vmatmul.mubr.msk.bf16.vlgmr.msra.gmra.mrb[0].mxu0 %vm399_vm1, %v1335_v5  ;;  %1273 = vmatmul.mubr.msk.bf16.vlgmr.msra.gmra.mrb[0].mxu1 %vm399_vm1, %v1336_v6  ;;  %v1346_v16 = vld [vmem:[%s1452_s4 + $0x70] sm:$0xff]   ;;  %v1348_v18 = vld [vmem:[%s1452_s4 + $0x78] sm:$0xff]   ;;  %v254_v21 = vld [vmem:[#allocation2] sm:$0xff] }
  0x29   : > { %1260 = vmatprep.mubr.msk.bf16.mxu0 %vm399_vm1, %v1337_v7  ;;  %1276 = vmatprep.mubr.msk.bf16.mxu1 %vm399_vm1, %v1338_v8  ;;  %v256_v19 = vld [vmem:[#allocation2 + $0x10] sm:$0xff]  ;;  %v270_v23 = vld [vmem:[#allocation2 + $0x80] sm:$0xff]  ;;  %v257_v24 = vld [vmem:[#allocation2 + $0x18] sm:$0xff] }
  0x2a   : > { %v272_v20 = vld [vmem:[#allocation2 + $0x90] sm:$0xff]  ;;  %v273_v28 = vld [vmem:[#allocation2 + $0x98] sm:$0xff]  ;;  %v255_v29 = vld [vmem:[#allocation2 + $0x8] sm:$0xff] }
  0x2b   : > { %v271_v34 = vld [vmem:[#allocation2 + $0x88] sm:$0xff]  ;;  %v260_v43 = vld [vmem:[#allocation2 + $0x30] sm:$0xff]  ;;  %v258_v45 = vld [vmem:[#allocation2 + $0x20] sm:$0xff] }
  0x2c   : > { %v276_v44 = vld [vmem:[#allocation2 + $0xb0] sm:$0xff]  ;;  %v274_v47 = vld [vmem:[#allocation2 + $0xa0] sm:$0xff]  ;;  %v261_v48 = vld [vmem:[#allocation2 + $0x38] sm:$0xff] }
  0x2d   : > { %v277_v52 = vld [vmem:[#allocation2 + $0xb8] sm:$0xff]  ;;  %v259_v53 = vld [vmem:[#allocation2 + $0x28] sm:$0xff]  ;;  %v264_v3 = vld [vmem:[#allocation2 + $0x50] sm:$0xff] }
  0x2e   : > { %v275_v58 = vld [vmem:[#allocation2 + $0xa8] sm:$0xff]  ;;  %v280_v4 = vld [vmem:[#allocation2 + $0xd0] sm:$0xff]  ;;  %v262_v5 = vld [vmem:[#allocation2 + $0x40] sm:$0xff] }
  0x2f   : > { %v278_v7 = vld [vmem:[#allocation2 + $0xc0] sm:$0xff]  ;;  %v265_v8 = vld [vmem:[#allocation2 + $0x58] sm:$0xff] }
  0x30   : > { %1261 = vmatmul.mubr.msk.bf16.gmra.mrb[4].mxu0 %vm399_vm1, %v1339_v9  ;;  %1277 = vmatmul.mubr.msk.bf16.gmra.mrb[4].mxu1 %vm399_vm1, %v1340_v10 }
  0x31   : > { %1264 = vmatprep.mubr.msk.bf16.mxu0 %vm399_vm1, %v1341_v11  ;;  %1280 = vmatprep.mubr.msk.bf16.mxu1 %vm399_vm1, %v1342_v12  ;;  %v281_v12 = vld [vmem:[#allocation2 + $0xd8] sm:$0xff] }
  0x38   : > { %1265 = vmatmul.mubr.msk.bf16.gmra.mrb[8].mxu0 %vm399_vm1, %v1343_v13  ;;  %1281 = vmatmul.mubr.msk.bf16.gmra.mrb[8].mxu1 %vm399_vm1, %v1344_v14  ;;  %v263_v13 = vld [vmem:[#allocation2 + $0x48] sm:$0xff] }
  0x39   : > { %1268 = vmatprep.mubr.msk.bf16.mxu0 %vm399_vm1, %v1345_v15  ;;  %1284 = vmatprep.mubr.msk.bf16.mxu1 %vm399_vm1, %v1346_v16 }
  0x40   : > { %1269 = vmatmul.mubr.msk.bf16.gmra.mrb[12].mxu0 %vm399_vm1, %v1347_v17  ;;  %1285 = vmatmul.mubr.msk.bf16.gmra.mrb[12].mxu1 %vm399_vm1, %v1348_v18  ;;  %v279_v18 = vld [vmem:[#allocation2 + $0xc8] sm:$0xff] }
  0xfb   : > { %v1258_v22 = vpop.f32.mrb[0].mxu0  ;;  %v1274_v26 = vpop.f32.mrb[0].mxu1 }
  0xfc   : > { %v615_v25 = vadd.f32 %v1258_v22, %v256_v19  ;;  %v486_v27 = vpop.f32.mrb[1].mxu0  ;;  %v631_v30 = vadd.f32 %v1274_v26, %v272_v20  ;;  %v550_v32 = vpop.f32.mrb[1].mxu1 }
  0xfd   : > { %v613_v31 = vadd.f32 %v486_v27, %v254_v21  ;;  %v1259_v33 = vpop.f32.mrb[2].mxu0  ;;  %v629_v35 = vadd.f32 %v550_v32, %v270_v23  ;;  %v1275_v37 = vpop.f32.mrb[2].mxu1  ;;  %v268_v27 = vld [vmem:[#allocation2 + $0x70] sm:$0xff]  ;;  %v269_v32 = vld [vmem:[#allocation2 + $0x78] sm:$0xff] }
  0xfe   : > { %647 = vst [vmem:[#allocation2 + $0x10] sm:$0xff] %v615_v25  ;;  %v616_v36 = vadd.f32 %v1259_v33, %v257_v24  ;;  %v489_v38 = vpop.f32.mrb[3].mxu0  ;;  %663 = vst [vmem:[#allocation2 + $0x90] sm:$0xff] %v631_v30  ;;  %v632_v39 = vadd.f32 %v1275_v37, %v273_v28  ;;  %v553_v41 = vpop.f32.mrb[3].mxu1  ;;  %v284_v28 = vld [vmem:[#allocation2 + $0xf0] sm:$0xff]  ;;  %v267_v37 = vld [vmem:[#allocation2 + $0x68] sm:$0xff] }
  0xff   : > { %645 = vst [vmem:[#allocation2] sm:$0xff] %v613_v31  ;;  %v614_v40 = vadd.f32 %v489_v38, %v255_v29  ;;  %661 = vst [vmem:[#allocation2 + $0x80] sm:$0xff] %v629_v35  ;;  %v630_v42 = vadd.f32 %v553_v41, %v271_v34  ;;  %v266_v29 = vld [vmem:[#allocation2 + $0x60] sm:$0xff] }
 0x100   : > { %648 = vst [vmem:[#allocation2 + $0x18] sm:$0xff] %v616_v36  ;;  %664 = vst [vmem:[#allocation2 + $0x98] sm:$0xff] %v632_v39  ;;  %v282_v31 = vld [vmem:[#allocation2 + $0xe0] sm:$0xff]  ;;  %v285_v36 = vld [vmem:[#allocation2 + $0xf8] sm:$0xff] }
 0x101   : > { %646 = vst [vmem:[#allocation2 + $0x8] sm:$0xff] %v614_v40  ;;  %662 = vst [vmem:[#allocation2 + $0x88] sm:$0xff] %v630_v42  ;;  %v283_v42 = vld [vmem:[#allocation2 + $0xe8] sm:$0xff] }
 0x103   : > { %v1262_v46 = vpop.f32.mrb[4].mxu0  ;;  %v1278_v50 = vpop.f32.mrb[4].mxu1 }
 0x104   : > { %v619_v49 = vadd.f32 %v1262_v46, %v260_v43  ;;  %v502_v51 = vpop.f32.mrb[5].mxu0  ;;  %v635_v54 = vadd.f32 %v1278_v50, %v276_v44  ;;  %v566_v56 = vpop.f32.mrb[5].mxu1 }
 0x105   : > { %v617_v55 = vadd.f32 %v502_v51, %v258_v45  ;;  %v1263_v57 = vpop.f32.mrb[6].mxu0  ;;  %v633_v59 = vadd.f32 %v566_v56, %v274_v47  ;;  %v1279_v61 = vpop.f32.mrb[6].mxu1  ;;  %v683_v56 = vld [vmem:[#allocation2 + $0x10] sm:$0xff] (!%p1074_p8) }
 0x106   : > { %651 = vst [vmem:[#allocation2 + $0x30] sm:$0xff] %v619_v49  ;;  %v620_v60 = vadd.f32 %v1263_v57, %v261_v48  ;;  %v505_v62 = vpop.f32.mrb[7].mxu0  ;;  %667 = vst [vmem:[#allocation2 + $0xb0] sm:$0xff] %v635_v54  ;;  %v636_v63 = vadd.f32 %v1279_v61, %v277_v52  ;;  %v569_v1 = vpop.f32.mrb[7].mxu1  ;;  %v681_v51 = vld [vmem:[#allocation2] sm:$0xff] (!%p1074_p8) }
 0x107   : > { %649 = vst [vmem:[#allocation2 + $0x20] sm:$0xff] %v617_v55  ;;  %v618_v0 = vadd.f32 %v505_v62, %v259_v53  ;;  %665 = vst [vmem:[#allocation2 + $0xa0] sm:$0xff] %v633_v59  ;;  %v634_v2 = vadd.f32 %v569_v1, %v275_v58  ;;  %v1497_v53 = vld [vmem:[%s1564_s2] ss:$0 sm:$0xff] (!%p1074_p8)  ;;  %v684_v57 = vld [vmem:[#allocation2 + $0x18] sm:$0xff] (!%p1074_p8) }
 0x108   : > { %652 = vst [vmem:[#allocation2 + $0x38] sm:$0xff] %v620_v60  ;;  %668 = vst [vmem:[#allocation2 + $0xb8] sm:$0xff] %v636_v63  ;;  %v682_v52 = vld [vmem:[#allocation2 + $0x8] sm:$0xff] (!%p1074_p8)  ;;  %v720_v54 = vadd.f32 (!%p1074_p8), %v1497_v53, %v681_v51  ;;  %v722_v59 = vadd.f32 (!%p1074_p8), %v1497_v53, %v683_v56  ;;  %v723_v60 = vadd.f32 (!%p1074_p8), %v1497_v53, %v684_v57 }
 0x109   : > { %650 = vst [vmem:[#allocation2 + $0x28] sm:$0xff] %v618_v0  ;;  %666 = vst [vmem:[#allocation2 + $0xa8] sm:$0xff] %v634_v2  ;;  %v721_v55 = vadd.f32 (!%p1074_p8), %v1497_v53, %v682_v52 }
 0x10a   : > { %v752_v1 = vmax.f32 (!%p1074_p8), %v720_v54, 0.0 }
 0x10b   : > { %v1266_v6 = vpop.f32.mrb[8].mxu0  ;;  %v1282_v10 = vpop.f32.mrb[8].mxu1  ;;  %v753_v2 = vmax.f32 (!%p1074_p8), %v721_v55, 0.0 }
 0x10c   : > { %v623_v9 = vadd.f32 %v1266_v6, %v264_v3  ;;  %v518_v11 = vpop.f32.mrb[9].mxu0  ;;  %v639_v14 = vadd.f32 %v1282_v10, %v280_v4  ;;  %v582_v16 = vpop.f32.mrb[9].mxu1 }
 0x10d   : > { %v621_v15 = vadd.f32 %v518_v11, %v262_v5  ;;  %v1267_v17 = vpop.f32.mrb[10].mxu0  ;;  %v637_v19 = vadd.f32 %v582_v16, %v278_v7  ;;  %v1283_v21 = vpop.f32.mrb[10].mxu1  ;;  %v687_v63 = vld [vmem:[#allocation2 + $0x30] sm:$0xff] (!%p1074_p8) }
 0x10e   : > { %655 = vst [vmem:[#allocation2 + $0x50] sm:$0xff] %v623_v9  ;;  %v624_v20 = vadd.f32 %v1267_v17, %v265_v8  ;;  %v521_v22 = vpop.f32.mrb[11].mxu0  ;;  %671 = vst [vmem:[#allocation2 + $0xd0] sm:$0xff] %v639_v14  ;;  %v640_v23 = vadd.f32 %v1283_v21, %v281_v12  ;;  %v585_v25 = vpop.f32.mrb[11].mxu1  ;;  %v685_v58 = vld [vmem:[#allocation2 + $0x20] sm:$0xff] (!%p1074_p8)  ;;  %v726_v4 = vadd.f32 (!%p1074_p8), %v1497_v53, %v687_v63  ;;  %v754_v8 = vmax.f32 (!%p1074_p8), %v722_v59, 0.0 }
 0x10f   : > { %653 = vst [vmem:[#allocation2 + $0x40] sm:$0xff] %v621_v15  ;;  %v622_v24 = vadd.f32 %v521_v22, %v263_v13  ;;  %669 = vst [vmem:[#allocation2 + $0xc0] sm:$0xff] %v637_v19  ;;  %v638_v26 = vadd.f32 %v585_v25, %v279_v18  ;;  %v724_v62 = vadd.f32 (!%p1074_p8), %v1497_v53, %v685_v58  ;;  %v688_v0 = vld [vmem:[#allocation2 + $0x38] sm:$0xff] (!%p1074_p8)  ;;  %v755_v9 = vmax.f32 (!%p1074_p8), %v723_v60, 0.0  ;;  %v703_v51 = vld [vmem:[#allocation2 + $0xb0] sm:$0xff] (!%p1074_p8) }
 0x110   : > { %656 = vst [vmem:[#allocation2 + $0x58] sm:$0xff] %v624_v20  ;;  %672 = vst [vmem:[#allocation2 + $0xd8] sm:$0xff] %v640_v23  ;;  %v686_v61 = vld [vmem:[#allocation2 + $0x28] sm:$0xff] (!%p1074_p8)  ;;  %v727_v11 = vadd.f32 (!%p1074_p8), %v1497_v53, %v688_v0  ;;  %v1145_v14 = vpack.c.bf16 (!%p1074_p8), %v753_v2, %v752_v1  ;;  %v758_v16 = vmax.f32 (!%p1074_p8), %v726_v4, 0.0  ;;  %v704_v52 = vld [vmem:[#allocation2 + $0xb8] sm:$0xff] (!%p1074_p8) }
 0x111   : > { %654 = vst [vmem:[#allocation2 + $0x48] sm:$0xff] %v622_v24  ;;  %670 = vst [vmem:[#allocation2 + $0xc8] sm:$0xff] %v638_v26  ;;  %v725_v3 = vadd.f32 (!%p1074_p8), %v1497_v53, %v686_v61  ;;  %v756_v10 = vmax.f32 (!%p1074_p8), %v724_v62, 0.0  ;;  %v1150_v19 = vpack.c.bf16 (!%p1074_p8), %v755_v9, %v754_v8  ;;  %v743_v4 = vadd.f32 (!%p1074_p8), %v1497_v53, %v704_v52 }
 0x112   : > { %v759_v20 = vmax.f32 (!%p1074_p8), %v727_v11, 0.0  ;;  %1146 = vst [vmem:[%s1457_s7] sm:$0xff] (!%p1074_p8), %v1145_v14  }
 0x113   : > { %v1270_v30 = vpop.f32.mrb[12].mxu0  ;;  %v1286_v34 = vpop.f32.mrb[12].mxu1  ;;  %680 = sbr.rel (%p1074_p8) target bundleno = 298 (0x12a), region = 40  ;;  %v757_v15 = vmax.f32 (!%p1074_p8), %v725_v3, 0.0  ;;  %1222 = vst [vmem:[%s1457_s7 + $0x8] sm:$0xff] (!%p1074_p8), %v1150_v19   ;;  %v742_v3 = vadd.f32 (!%p1074_p8), %v1497_v53, %v703_v51  ;;  %v775_v14 = vmax.f32 (!%p1074_p8), %v743_v4, 0.0 }
 0x114   : > { %v627_v33 = vadd.f32 %v1270_v30, %v268_v27  ;;  %v534_v35 = vpop.f32.mrb[13].mxu0  ;;  %v643_v38 = vadd.f32 %v1286_v34, %v284_v28  ;;  %v598_v40 = vpop.f32.mrb[13].mxu1  ;;  %v698_v30 = vld [vmem:[#allocation2 + $0x88] sm:$0xff] (!%p1074_p8) }
 0x115   : > { %v625_v39 = vadd.f32 %v534_v35, %v266_v29  ;;  %v1271_v41 = vpop.f32.mrb[14].mxu0  ;;  %v641_v43 = vadd.f32 %v598_v40, %v282_v31  ;;  %v1287_v45 = vpop.f32.mrb[14].mxu1  ;;  %v691_v7 = vld [vmem:[#allocation2 + $0x50] sm:$0xff] (!%p1074_p8)  ;;  %v1155_v25 = vpack.c.bf16 (!%p1074_p8), %v757_v15, %v756_v10  ;;  %v697_v29 = vld [vmem:[#allocation2 + $0x80] sm:$0xff] (!%p1074_p8)  ;;  %v1160_v31 = vpack.c.bf16 (!%p1074_p8), %v759_v20, %v758_v16  ;;  %v700_v40 = vld [vmem:[#allocation2 + $0x98] sm:$0xff] (!%p1074_p8) }
 0x116   : > { %659 = vst [vmem:[#allocation2 + $0x70] sm:$0xff] %v627_v33  ;;  %v628_v44 = vadd.f32 %v1271_v41, %v269_v32  ;;  %v537_v46 = vpop.f32.mrb[15].mxu0  ;;  %675 = vst [vmem:[#allocation2 + $0xf0] sm:$0xff] %v643_v38  ;;  %v644_v47 = vadd.f32 %v1287_v45, %v285_v36  ;;  %v601_v49 = vpop.f32.mrb[15].mxu1  ;;  %v689_v5 = vld [vmem:[#allocation2 + $0x40] sm:$0xff] (!%p1074_p8)  ;;  %v730_v22 = vadd.f32 (!%p1074_p8), %v1497_v53, %v691_v7  ;;  %v699_v35 = vld [vmem:[#allocation2 + $0x90] sm:$0xff] (!%p1074_p8) }
 0x117   : > { %657 = vst [vmem:[#allocation2 + $0x60] sm:$0xff] %v625_v39  ;;  %v626_v48 = vadd.f32 %v537_v46, %v267_v37  ;;  %673 = vst [vmem:[#allocation2 + $0xe0] sm:$0xff] %v641_v43  ;;  %v642_v50 = vadd.f32 %v601_v49, %v283_v42  ;;  %v692_v12 = vld [vmem:[#allocation2 + $0x58] sm:$0xff] (!%p1074_p8)  ;;  %v728_v17 = vadd.f32 (!%p1074_p8), %v1497_v53, %v689_v5  ;;  %v701_v45 = vld [vmem:[#allocation2 + $0xa0] sm:$0xff] (!%p1074_p8) }
 0x118   : > { %660 = vst [vmem:[#allocation2 + $0x78] sm:$0xff] %v628_v44  ;;  %676 = vst [vmem:[#allocation2 + $0xf8] sm:$0xff] %v644_v47  ;;  %v690_v6 = vld [vmem:[#allocation2 + $0x48] sm:$0xff] (!%p1074_p8)  ;;  %v731_v27 = vadd.f32 (!%p1074_p8), %v1497_v53, %v692_v12  ;;  %v762_v33 = vmax.f32 (!%p1074_p8), %v730_v22, 0.0  ;;  %v736_v43 = vadd.f32 (!%p1074_p8), %v1497_v53, %v697_v29  ;;  %v737_v44 = vadd.f32 (!%p1074_p8), %v1497_v53, %v698_v30  ;;  %v705_v58 = vld [vmem:[#allocation2 + $0xc0] sm:$0xff] (!%p1074_p8) }
 0x119   : > { %658 = vst [vmem:[#allocation2 + $0x68] sm:$0xff] %v626_v48  ;;  %674 = vst [vmem:[#allocation2 + $0xe8] sm:$0xff] %v642_v50  ;;  %v729_v21 = vadd.f32 (!%p1074_p8), %v1497_v53, %v690_v6  ;;  %v760_v26 = vmax.f32 (!%p1074_p8), %v728_v17, 0.0  ;;  %v702_v46 = vld [vmem:[#allocation2 + $0xa8] sm:$0xff] (!%p1074_p8)  ;;  %v738_v50 = vadd.f32 (!%p1074_p8), %v1497_v53, %v699_v35  ;;  %v739_v57 = vadd.f32 (!%p1074_p8), %v1497_v53, %v700_v40  ;;  %v707_v0 = vld [vmem:[#allocation2 + $0xd0] sm:$0xff] (!%p1074_p8) }
 0x11a   : > { %1223 = vst [vmem:[%s1457_s7 + $0x10] sm:$0xff] %v1155_v25   ;;  %v763_v36 = vmax.f32 %v731_v27, 0.0  ;;  %1224 = vst [vmem:[%s1457_s7 + $0x18] sm:$0xff] %v1160_v31   ;;  %v768_v55 = vmax.f32 %v736_v43, 0.0  ;;  %v769_v56 = vmax.f32 %v737_v44, 0.0  ;;  %v706_v59 = vld [vmem:[#allocation2 + $0xc8] sm:$0xff]  ;;  %v740_v62 = vadd.f32 %v1497_v53, %v701_v45 }
 0x11b   : > { %v761_v32 = vmax.f32 %v729_v21, 0.0  ;;  %v770_v61 = vmax.f32 %v738_v50, 0.0  ;;  %v741_v63 = vadd.f32 %v1497_v53, %v702_v46  ;;  %v771_v2 = vmax.f32 %v739_v57, 0.0  ;;  %v708_v5 = vld [vmem:[#allocation2 + $0xd8] sm:$0xff] }
 0x11c   : > { %v1170_v47 = vpack.c.bf16 %v763_v36, %v762_v33  ;;  %v1185_v1 = vpack.c.bf16 %v769_v56, %v768_v55  ;;  %v772_v6 = vmax.f32 %v740_v62, 0.0  ;;  %v744_v8 = vadd.f32 %v1497_v53, %v705_v58 }
 0x11d   : > { %v695_v23 = vld [vmem:[#allocation2 + $0x70] sm:$0xff]  ;;  %v1165_v41 = vpack.c.bf16 %v761_v32, %v760_v26  ;;  %v773_v7 = vmax.f32 %v741_v63, 0.0  ;;  %v745_v9 = vadd.f32 %v1497_v53, %v706_v59  ;;  %v1190_v12 = vpack.c.bf16 %v771_v2, %v770_v61 }
 0x11e   : > { %v693_v13 = vld [vmem:[#allocation2 + $0x60] sm:$0xff]  ;;  %v734_v38 = vadd.f32 %v1497_v53, %v695_v23  ;;  %1226 = vst [vmem:[%s1457_s7 + $0x28] sm:$0xff] %v1170_v47   ;;  %1229 = vst [vmem:[%s1457_s7 + $0x40] sm:$0xff] %v1185_v1   ;;  %v746_v15 = vadd.f32 %v1497_v53, %v707_v0  ;;  %v711_v16 = vld [vmem:[#allocation2 + $0xf0] sm:$0xff]  ;;  %v776_v19 = vmax.f32 %v744_v8, 0.0  ;;  %v747_v21 = vadd.f32 %v1497_v53, %v708_v5 }
 0x11f   : > { %v696_v24 = vld [vmem:[#allocation2 + $0x78] sm:$0xff]  ;;  %v732_v28 = vadd.f32 %v1497_v53, %v693_v13  ;;  %1225 = vst [vmem:[%s1457_s7 + $0x20] sm:$0xff] %v1165_v41   ;;  %v709_v10 = vld [vmem:[#allocation2 + $0xe0] sm:$0xff]  ;;  %v774_v13 = vmax.f32 %v742_v3, 0.0  ;;  %v777_v20 = vmax.f32 %v745_v9, 0.0  ;;  %1230 = vst [vmem:[%s1457_s7 + $0x48] sm:$0xff] %v1190_v12  }
 0x120   : > { %v694_v18 = vld [vmem:[#allocation2 + $0x68] sm:$0xff]  ;;  %v735_v39 = vadd.f32 %v1497_v53, %v696_v24  ;;  %v766_v48 = vmax.f32 %v734_v38, 0.0  ;;  %v712_v17 = vld [vmem:[#allocation2 + $0xf8] sm:$0xff]  ;;  %v778_v23 = vmax.f32 %v746_v15, 0.0  ;;  %v748_v24 = vadd.f32 %v1497_v53, %v709_v10 }
 0x121   : > { %v733_v34 = vadd.f32 %v1497_v53, %v694_v18  ;;  %v764_v37 = vmax.f32 %v732_v28, 0.0  ;;  %v710_v11 = vld [vmem:[#allocation2 + $0xe8] sm:$0xff]  ;;  %v1195_v18 = vpack.c.bf16 %v773_v7, %v772_v6  ;;  %v1200_v22 = vpack.c.bf16 %v775_v14, %v774_v13 }
 0x122   : > { %v767_v49 = vmax.f32 %v735_v39, 0.0  ;;  %v749_v25 = vadd.f32 %v1497_v53, %v710_v11  ;;  %v1205_v26 = vpack.c.bf16 %v777_v20, %v776_v19  ;;  %v779_v27 = vmax.f32 %v747_v21, 0.0 }
 0x123   : > { %v765_v42 = vmax.f32 %v733_v34, 0.0  ;;  %1231 = vst [vmem:[%s1457_s7 + $0x50] sm:$0xff] %v1195_v18   ;;  %v750_v28 = vadd.f32 %v1497_v53, %v711_v16  ;;  %v751_v29 = vadd.f32 %v1497_v53, %v712_v17  ;;  %1232 = vst [vmem:[%s1457_s7 + $0x58] sm:$0xff] %v1200_v22   ;;  %v780_v30 = vmax.f32 %v748_v24, 0.0 }
 0x124   : > { %v1180_v60 = vpack.c.bf16 %v767_v49, %v766_v48  ;;  %v781_v31 = vmax.f32 %v749_v25, 0.0  ;;  %1233 = vst [vmem:[%s1457_s7 + $0x60] sm:$0xff] %v1205_v26   ;;  %v1210_v32 = vpack.c.bf16 %v779_v27, %v778_v23 }
 0x125   : > { %v1175_v54 = vpack.c.bf16 %v765_v42, %v764_v37  ;;  %v782_v33 = vmax.f32 %v750_v28, 0.0  ;;  %v783_v34 = vmax.f32 %v751_v29, 0.0 }
 0x126   : > { %1228 = vst [vmem:[%s1457_s7 + $0x38] sm:$0xff] %v1180_v60   ;;  %v1215_v35 = vpack.c.bf16 %v781_v31, %v780_v30  ;;  %1234 = vst [vmem:[%s1457_s7 + $0x68] sm:$0xff] %v1210_v32  }
 0x127   : > { %1227 = vst [vmem:[%s1457_s7 + $0x30] sm:$0xff] %v1175_v54   ;;  %v1220_v36 = vpack.c.bf16 %v783_v34, %v782_v33 }
 0x128   : > { %1235 = vst [vmem:[%s1457_s7 + $0x70] sm:$0xff] %v1215_v35  }
 0x129   : > { %1236 = vst [vmem:[%s1457_s7 + $0x78] sm:$0xff] %v1220_v36  }
 0x12a PF: > { %s13_s16 = sadd.s32 1, %s1387_s16   ;;  %s1566_s12 = smov %s1379_s14 }
 0x12b   : > { %p10_p9 = scmp.ge.s32.totalorder %s13_s16, 100   ;;  %s1567_s13 = smov %s1383_s15 }
 0x12c   : > { %s1568_s14 = smov %s1571_s17  ;;  %s1569_s15 = smov %s1575_s18 }
 0x12d   :  { %12 = sbr.rel (!%p10_p9) target bundleno = 3 (0x3), region = 73 }

// kernel: resnet_cifar100_forward.54
= control target key start
LH: loop header
LB: loop body
LE: loop exit
PB: predicated region body
PF: predicated region fallthrough
CT: control target
= control target key end

     0   :  { %s326_s6 = smov 0   ;;  %s462_s0 = inlined_call_operand.vmem [shape: bf16[9,128,128], index: 0, kind: input, shape index: {}]   ;;  %s463_s1 = inlined_call_operand.vmem [shape: bf16[128,128], index: 1, kind: output, shape index: {}]  }
   0x1 LB: > { %s234_s7 = sadd.s32 4294967295, %s314_s6   ;;  %p237_p0 = scmp.ge.s32.totalorder %s314_s6, 1  ;;  %s314_s6 = sphi %s326_s6, %s11_s6  }
   0x2   : > { %p82_p1 = scmp.lt.s32.totalorder %s314_s6, 10 }
   0x4   : > { %p83_p2 = pnand %p237_p0, %p82_p1 }
   0x5   : > { %p97_p3 = scmp.lt.s32.totalorder (!%p83_p2), %s234_s7, 8  ;;  %p240_p4 = scmp.ne.s32.totalorder (!%p83_p2), %s234_s7, 0 }
   0x6   : > { %86 = sbr.rel (%p83_p2) target bundleno = 40 (0x28), region = 24 }
   0xd   : > { %s98_s8 = scalar_select %p97_p3, %s234_s7, 8 }
   0xe   : > { %105 = sbr.rel (%p240_p4) target bundleno = 22 (0x16), region = 28 }
   0xf   : > { %s244_s9 = sshll.u32 %s98_s8, 6 }
  0x10   : > { %s337_s12 = scalar_lea.vmem %s462_s0, %s244_s9 }
  0x11   : > { %v106_v0 = vld [vmem:[%s337_s12] sm:$0xff] (!%p240_p4)   ;;  %v108_v1 = vld [vmem:[%s337_s12 + $0x8] sm:$0xff] (!%p240_p4)   ;;  %v110_v2 = vld [vmem:[%s337_s12 + $0x10] sm:$0xff] (!%p240_p4)  }
  0x12   : > { %122 = vst [vmem:[%s463_s1] sm:$0xff] (!%p240_p4), %v106_v0   ;;  %124 = vst [vmem:[%s463_s1 + $0x8] sm:$0xff] (!%p240_p4), %v108_v1   ;;  %v112_v3 = vld [vmem:[%s337_s12 + $0x18] sm:$0xff] (!%p240_p4)   ;;  %v114_v4 = vld [vmem:[%s337_s12 + $0x20] sm:$0xff] (!%p240_p4)  }
  0x13   : > { %126 = vst [vmem:[%s463_s1 + $0x10] sm:$0xff] (!%p240_p4), %v110_v2   ;;  %v116_v5 = vld [vmem:[%s337_s12 + $0x28] sm:$0xff] (!%p240_p4)   ;;  %128 = vst [vmem:[%s463_s1 + $0x18] sm:$0xff] (!%p240_p4), %v112_v3   ;;  %v118_v6 = vld [vmem:[%s337_s12 + $0x30] sm:$0xff] (!%p240_p4)  }
  0x14   : > { %130 = vst [vmem:[%s463_s1 + $0x20] sm:$0xff] (!%p240_p4), %v114_v4   ;;  %132 = vst [vmem:[%s463_s1 + $0x28] sm:$0xff] (!%p240_p4), %v116_v5   ;;  %v120_v7 = vld [vmem:[%s337_s12 + $0x38] sm:$0xff] (!%p240_p4)  }
  0x15   : > { %134 = vst [vmem:[%s463_s1 + $0x30] sm:$0xff] %v118_v6   ;;  %136 = vst [vmem:[%s463_s1 + $0x38] sm:$0xff] %v120_v7  }
  0x16 PF: > { %p241_p5 = scmp.le.s32.totalorder %s234_s7, 0 }
  0x17   : > { %v158_v10 = vld [vmem:[%s337_s12] sm:$0xf] (!%p241_p5)  ;;  %v159_v11 = vld [vmem:[%s337_s12 + $0x4] sm:$0xf] (!%p241_p5)  ;;  %v160_v16 = vld [vmem:[%s337_s12 + $0x8] sm:$0xf] (!%p241_p5) }
  0x18   : > { %141 = sbr.rel (%p241_p5) target bundleno = 40 (0x28), region = 32  ;;  %v161_v17 = vld [vmem:[%s337_s12 + $0xc] sm:$0xf] (!%p241_p5)  ;;  %v162_v22 = vld [vmem:[%s337_s12 + $0x10] sm:$0xf] (!%p241_p5) }
  0x19   : > { %v163_v23 = vld [vmem:[%s337_s12 + $0x14] sm:$0xf] (!%p241_p5)  ;;  %v164_v29 = vld [vmem:[%s337_s12 + $0x18] sm:$0xf] (!%p241_p5)  ;;  %v165_v31 = vld [vmem:[%s337_s12 + $0x1c] sm:$0xf] (!%p241_p5) }
  0x1a   : > { %v142_v8 = vld [vmem:[%s463_s1] sm:$0xf] (!%p241_p5)  ;;  %v143_v9 = vld [vmem:[%s463_s1 + $0x4] sm:$0xf] (!%p241_p5)  ;;  %v144_v13 = vld [vmem:[%s463_s1 + $0x8] sm:$0xf] (!%p241_p5) }
  0x1b   : > { %v174_v12 = vmax.bf16 (!%p241_p5), %v158_v10, %v142_v8  ;;  %v145_v14 = vld [vmem:[%s463_s1 + $0xc] sm:$0xf] (!%p241_p5)  ;;  %v175_v15 = vmax.bf16 (!%p241_p5), %v159_v11, %v143_v9  ;;  %v146_v18 = vld [vmem:[%s463_s1 + $0x10] sm:$0xf] (!%p241_p5)  ;;  %v176_v19 = vmax.bf16 (!%p241_p5), %v160_v16, %v144_v13  ;;  %v147_v21 = vld [vmem:[%s463_s1 + $0x14] sm:$0xf] (!%p241_p5) }
  0x1c   : > { %v177_v20 = vmax.bf16 (!%p241_p5), %v161_v17, %v145_v14  ;;  %v178_v25 = vmax.bf16 (!%p241_p5), %v162_v22, %v146_v18  ;;  %v179_v26 = vmax.bf16 (!%p241_p5), %v163_v23, %v147_v21  ;;  %v148_v27 = vld [vmem:[%s463_s1 + $0x18] sm:$0xf] (!%p241_p5)  ;;  %v149_v28 = vld [vmem:[%s463_s1 + $0x1c] sm:$0xf] (!%p241_p5)  ;;  %v150_v33 = vld [vmem:[%s463_s1 + $0x20] sm:$0xf] (!%p241_p5) }
  0x1d   : > { %v285_v24 = vcombine.low (!%p241_p5), %v174_v12, %v175_v15  ;;  %v180_v32 = vmax.bf16 (!%p241_p5), %v164_v29, %v148_v27  ;;  %v151_v34 = vld [vmem:[%s463_s1 + $0x24] sm:$0xf] (!%p241_p5)  ;;  %v181_v36 = vmax.bf16 (!%p241_p5), %v165_v31, %v149_v28  ;;  %v166_v37 = vld [vmem:[%s337_s12 + $0x20] sm:$0xf] (!%p241_p5)  ;;  %v152_v39 = vld [vmem:[%s463_s1 + $0x28] sm:$0xf] (!%p241_p5) }
  0x1e   : > { %v286_v30 = vcombine.low (!%p241_p5), %v176_v19, %v177_v20  ;;  %v288_v35 = vcombine.low (!%p241_p5), %v178_v25, %v179_v26  ;;  %v167_v38 = vld [vmem:[%s337_s12 + $0x24] sm:$0xf] (!%p241_p5)  ;;  %v182_v40 = vmax.bf16 (!%p241_p5), %v166_v37, %v150_v33  ;;  %v153_v42 = vld [vmem:[%s463_s1 + $0x2c] sm:$0xf] (!%p241_p5)  ;;  %v168_v43 = vld [vmem:[%s337_s12 + $0x28] sm:$0xf] (!%p241_p5) }
  0x1f   : > { %249 = vst [vmem:[%s463_s1] sm:$0xff] %v285_v24   ;;  %v183_v41 = vmax.bf16 %v167_v38, %v151_v34  ;;  %v169_v44 = vld [vmem:[%s337_s12 + $0x2c] sm:$0xf]  ;;  %v290_v45 = vcombine.low %v180_v32, %v181_v36  ;;  %v184_v46 = vmax.bf16 %v168_v43, %v152_v39  ;;  %v154_v48 = vld [vmem:[%s463_s1 + $0x30] sm:$0xf]  ;;  %v155_v49 = vld [vmem:[%s463_s1 + $0x34] sm:$0xf] }
  0x20   : > { %287 = vst [vmem:[%s463_s1 + $0x8] sm:$0xff] %v286_v30   ;;  %289 = vst [vmem:[%s463_s1 + $0x10] sm:$0xff] %v288_v35   ;;  %v185_v47 = vmax.bf16 %v169_v44, %v153_v42  ;;  %v170_v50 = vld [vmem:[%s337_s12 + $0x30] sm:$0xf]  ;;  %v171_v52 = vld [vmem:[%s337_s12 + $0x34] sm:$0xf] }
  0x21   : > { %v292_v51 = vcombine.low %v182_v40, %v183_v41  ;;  %v186_v53 = vmax.bf16 %v170_v50, %v154_v48  ;;  %v156_v54 = vld [vmem:[%s463_s1 + $0x38] sm:$0xf]  ;;  %v157_v55 = vld [vmem:[%s463_s1 + $0x3c] sm:$0xf]  ;;  %291 = vst [vmem:[%s463_s1 + $0x18] sm:$0xff] %v290_v45   ;;  %v187_v57 = vmax.bf16 %v171_v52, %v155_v49 }
  0x22   : > { %v294_v56 = vcombine.low %v184_v46, %v185_v47  ;;  %v172_v58 = vld [vmem:[%s337_s12 + $0x38] sm:$0xf]  ;;  %v173_v59 = vld [vmem:[%s337_s12 + $0x3c] sm:$0xf] }
  0x23   : > { %293 = vst [vmem:[%s463_s1 + $0x20] sm:$0xff] %v292_v51   ;;  %v188_v60 = vmax.bf16 %v172_v58, %v156_v54  ;;  %v189_v61 = vmax.bf16 %v173_v59, %v157_v55  ;;  %v296_v62 = vcombine.low %v186_v53, %v187_v57 }
  0x24   : > { %295 = vst [vmem:[%s463_s1 + $0x28] sm:$0xff] %v294_v56  }
  0x25   : > { %v298_v63 = vcombine.low %v188_v60, %v189_v61  ;;  %297 = vst [vmem:[%s463_s1 + $0x30] sm:$0xff] %v296_v62  }
  0x27   : > { %299 = vst [vmem:[%s463_s1 + $0x38] sm:$0xff] %v298_v63  }
  0x28 PF: > { %s11_s6 = sadd.s32 1, %s314_s6  }
  0x29   : > { %p8_p6 = scmp.ge.s32.totalorder %s11_s6, 11  }
  0x2b   :  { %10 = sbr.rel (!%p8_p6) target bundleno = 1 (0x1), region = 58 }

// kernel: resnet_cifar100_forward.55
= control target key start
LH: loop header
LB: loop body
LE: loop exit
PB: predicated region body
PF: predicated region fallthrough
CT: control target
= control target key end

     0   :  { %s721_s1 = inlined_call_operand.vmem [shape: bf16[1,128,128], index: 1, kind: input, shape index: {}]   ;;  %s722_s0 = inlined_call_operand.vmem [shape: bf16[1,128,128], index: 0, kind: input, shape index: {}]   ;;  %s723_s2 = inlined_call_operand.vmem [shape: f32[1,128], index: 2, kind: input, shape index: {}]   ;;  %s724_s3 = inlined_call_operand.vmem [shape: bf16[128,128], index: 3, kind: output, shape index: {}]  }
   0x1   :  { %v610_v0 = vld [vmem:[%s721_s1] sm:$0xff]   ;;  %v611_v1 = vld [vmem:[%s721_s1 + $0x8] sm:$0xff]   ;;  %v612_v2 = vld [vmem:[%s721_s1 + $0x10] sm:$0xff]  }
   0x2   :  { %562 = vmatprep.subr.bf16.mxu0 %v610_v0  ;;  %594 = vmatprep.subr.bf16.mxu1 %v610_v0  ;;  %v613_v3 = vld [vmem:[%s721_s1 + $0x18] sm:$0xff]   ;;  %v618_v4 = vld [vmem:[%s722_s0] sm:$0xff]   ;;  %v615_v7 = vld [vmem:[%s721_s1 + $0x28] sm:$0xff]  }
   0x3   :  { %563 = vmatpush3.bf16.msra.mxu0 %v610_v0  ;;  %602 = vmatpush3.bf16.msra.mxu1 %v610_v0  ;;  %v619_v5 = vld [vmem:[%s722_s0 + $0x20] sm:$0xff]   ;;  %v616_v8 = vld [vmem:[%s721_s1 + $0x30] sm:$0xff]   ;;  %v617_v9 = vld [vmem:[%s721_s1 + $0x38] sm:$0xff]  }
   0x4   :  { %564 = vmatprep.subr.bf16.mxu0 %v611_v1  ;;  %595 = vmatprep.subr.bf16.mxu1 %v611_v1  ;;  %v614_v6 = vld [vmem:[%s721_s1 + $0x20] sm:$0xff]   ;;  %v620_v10 = vld [vmem:[%s722_s0 + $0x8] sm:$0xff]   ;;  %v622_v12 = vld [vmem:[%s722_s0 + $0x10] sm:$0xff]  }
   0x5   :  { %578 = vmatprep.mubr.bf16.mxu0 %v618_v4  ;;  %586 = vmatprep.mubr.bf16.mxu1 %v619_v5  ;;  %v621_v11 = vld [vmem:[%s722_s0 + $0x28] sm:$0xff]   ;;  %v623_v13 = vld [vmem:[%s722_s0 + $0x30] sm:$0xff]   ;;  %v624_v14 = vld [vmem:[%s722_s0 + $0x18] sm:$0xff]  }
   0x6   :  { %v625_v15 = vld [vmem:[%s722_s0 + $0x38] sm:$0xff]   ;;  %v466_v16 = vld [vmem:[%s723_s2] ss:$0 sm:$0xff] }
   0x7   :  { %565 = vmatpush3.bf16.msra.mxu0 %v611_v1  ;;  %603 = vmatpush3.bf16.msra.mxu1 %v611_v1 }
   0x8   :  { %566 = vmatprep.subr.bf16.mxu0 %v612_v2  ;;  %596 = vmatprep.subr.bf16.mxu1 %v612_v2 }
   0xb   :  { %567 = vmatpush3.bf16.msra.mxu0 %v612_v2  ;;  %604 = vmatpush3.bf16.msra.mxu1 %v612_v2 }
   0xc   :  { %568 = vmatprep.subr.bf16.mxu0 %v613_v3  ;;  %597 = vmatprep.subr.bf16.mxu1 %v613_v3 }
   0xf   :  { %569 = vmatpush3.bf16.msra.mxu0 %v613_v3  ;;  %605 = vmatpush3.bf16.msra.mxu1 %v613_v3 }
  0x10   :  { %570 = vmatprep.subr.bf16.mxu0 %v614_v6  ;;  %598 = vmatprep.subr.bf16.mxu1 %v614_v6 }
  0x13   :  { %571 = vmatpush3.bf16.msra.mxu0 %v614_v6  ;;  %606 = vmatpush3.bf16.msra.mxu1 %v614_v6 }
  0x14   :  { %572 = vmatprep.subr.bf16.mxu0 %v615_v7  ;;  %599 = vmatprep.subr.bf16.mxu1 %v615_v7 }
  0x17   :  { %573 = vmatpush3.bf16.msra.mxu0 %v615_v7  ;;  %607 = vmatpush3.bf16.msra.mxu1 %v615_v7 }
  0x18   :  { %574 = vmatprep.subr.bf16.mxu0 %v616_v8  ;;  %600 = vmatprep.subr.bf16.mxu1 %v616_v8 }
  0x1b   :  { %575 = vmatpush3.bf16.msra.mxu0 %v616_v8  ;;  %608 = vmatpush3.bf16.msra.mxu1 %v616_v8 }
  0x1c   :  { %576 = vmatprep.subr.bf16.mxu0 %v617_v9  ;;  %601 = vmatprep.subr.bf16.mxu1 %v617_v9 }
  0x1f   :  { %577 = vmatpush3.bf16.msra.mxu0 %v617_v9  ;;  %609 = vmatpush3.bf16.msra.mxu1 %v617_v9 }
  0x22   :  { %579 = vmatmul.mubr.bf16.vlgmr.msra.gmra.mrb[0].mxu0 %v620_v10  ;;  %587 = vmatmul.mubr.bf16.vlgmr.msra.gmra.mrb[0].mxu1 %v621_v11 }
  0x23   :  { %582 = vmatprep.mubr.bf16.mxu0 %v622_v12  ;;  %590 = vmatprep.mubr.bf16.mxu1 %v623_v13 }
  0x2a   :  { %583 = vmatmul.mubr.bf16.gmra.mrb[4].mxu0 %v624_v14  ;;  %591 = vmatmul.mubr.bf16.gmra.mrb[4].mxu1 %v625_v15 }
  0xf5   :  { %v580_v17 = vpop.f32.mrb[0].mxu0  ;;  %v588_v18 = vpop.f32.mrb[0].mxu1 }
  0xf6   :  { %v336_v19 = vadd.f32 %v580_v17, %v466_v16  ;;  %v344_v20 = vadd.f32 %v588_v18, %v466_v16  ;;  %v213_v21 = vpop.f32.mrb[1].mxu0  ;;  %v245_v22 = vpop.f32.mrb[1].mxu1 }
  0xf7   :  { %v334_v23 = vadd.f32 %v466_v16, %v213_v21  ;;  %v342_v24 = vadd.f32 %v466_v16, %v245_v22  ;;  %v581_v25 = vpop.f32.mrb[2].mxu0  ;;  %v589_v26 = vpop.f32.mrb[2].mxu1 }
  0xf8   :  { %v337_v27 = vadd.f32 %v581_v25, %v466_v16  ;;  %v345_v28 = vadd.f32 %v589_v26, %v466_v16  ;;  %v216_v29 = vpop.f32.mrb[3].mxu0  ;;  %v248_v30 = vpop.f32.mrb[3].mxu1  ;;  %v352_v33 = vmax.f32 %v336_v19, 0.0  ;;  %v360_v34 = vmax.f32 %v344_v20, 0.0 }
  0xf9   :  { %v335_v31 = vadd.f32 %v466_v16, %v216_v29  ;;  %v343_v32 = vadd.f32 %v466_v16, %v248_v30  ;;  %v350_v37 = vmax.f32 %v334_v23, 0.0  ;;  %v358_v38 = vmax.f32 %v342_v24, 0.0 }
  0xfa   :  { %v353_v35 = vmax.f32 %v337_v27, 0.0  ;;  %v361_v36 = vmax.f32 %v345_v28, 0.0 }
  0xfb   :  { %v351_v39 = vmax.f32 %v335_v31, 0.0  ;;  %v359_v40 = vmax.f32 %v343_v32, 0.0 }
  0xfc   :  { %v507_v41 = vpack.c.bf16 %v353_v35, %v352_v33  ;;  %v527_v42 = vpack.c.bf16 %v361_v36, %v360_v34 }
  0xfd   :  { %v502_v43 = vpack.c.bf16 %v351_v39, %v350_v37  ;;  %v522_v44 = vpack.c.bf16 %v359_v40, %v358_v38  ;;  %v584_v45 = vpop.f32.mrb[4].mxu0  ;;  %v592_v46 = vpop.f32.mrb[4].mxu1 }
  0xfe   :  { %539 = vst [vmem:[%s724_s3 + $0x8] sm:$0xff] %v507_v41   ;;  %543 = vst [vmem:[%s724_s3 + $0x28] sm:$0xff] %v527_v42   ;;  %v340_v47 = vadd.f32 %v584_v45, %v466_v16  ;;  %v348_v48 = vadd.f32 %v592_v46, %v466_v16  ;;  %v229_v49 = vpop.f32.mrb[5].mxu0  ;;  %v261_v50 = vpop.f32.mrb[5].mxu1 }
  0xff   :  { %503 = vst [vmem:[%s724_s3] sm:$0xff] %v502_v43   ;;  %542 = vst [vmem:[%s724_s3 + $0x20] sm:$0xff] %v522_v44   ;;  %v338_v51 = vadd.f32 %v466_v16, %v229_v49  ;;  %v346_v52 = vadd.f32 %v466_v16, %v261_v50  ;;  %v585_v53 = vpop.f32.mrb[6].mxu0  ;;  %v593_v54 = vpop.f32.mrb[6].mxu1 }
 0x100   :  { %v341_v55 = vadd.f32 %v585_v53, %v466_v16  ;;  %v349_v56 = vadd.f32 %v593_v54, %v466_v16  ;;  %v232_v57 = vpop.f32.mrb[7].mxu0  ;;  %v264_v58 = vpop.f32.mrb[7].mxu1  ;;  %v356_v61 = vmax.f32 %v340_v47, 0.0  ;;  %v364_v62 = vmax.f32 %v348_v48, 0.0 }
 0x101   :  { %v339_v59 = vadd.f32 %v466_v16, %v232_v57  ;;  %v347_v60 = vadd.f32 %v466_v16, %v264_v58  ;;  %v354_v1 = vmax.f32 %v338_v51, 0.0  ;;  %v362_v2 = vmax.f32 %v346_v52, 0.0 }
 0x102   :  { %v357_v63 = vmax.f32 %v341_v55, 0.0  ;;  %v365_v0 = vmax.f32 %v349_v56, 0.0 }
 0x103   :  { %v355_v3 = vmax.f32 %v339_v59, 0.0  ;;  %v363_v4 = vmax.f32 %v347_v60, 0.0 }
 0x104   :  { %v517_v5 = vpack.c.bf16 %v357_v63, %v356_v61  ;;  %v537_v6 = vpack.c.bf16 %v365_v0, %v364_v62 }
 0x105   :  { %v512_v7 = vpack.c.bf16 %v355_v3, %v354_v1  ;;  %v532_v8 = vpack.c.bf16 %v363_v4, %v362_v2 }
 0x106   :  { %541 = vst [vmem:[%s724_s3 + $0x18] sm:$0xff] %v517_v5   ;;  %545 = vst [vmem:[%s724_s3 + $0x38] sm:$0xff] %v537_v6  }
 0x107   :  { %540 = vst [vmem:[%s724_s3 + $0x10] sm:$0xff] %v512_v7   ;;  %544 = vst [vmem:[%s724_s3 + $0x30] sm:$0xff] %v532_v8  }

// kernel: resnet_cifar100_forward.56
= control target key start
LH: loop header
LB: loop body
LE: loop exit
PB: predicated region body
PF: predicated region fallthrough
CT: control target
= control target key end

     0   :  { %8 = vsyncpa [#allocation4], 0  ;;  %s1066_s12 = smov 0   ;;  %s1068_s13 = smov 0   ;;  %s1188_s0 = inlined_call_operand.vmem [shape: bf16[9,128,128], index: 0, kind: input, shape index: {}]   ;;  %s1189_s1 = inlined_call_operand.vmem [shape: bf16[9,128,128], index: 1, kind: input, shape index: {}]   ;;  %s1190_s2 = inlined_call_operand.hbm [shape: f32[1,128], index: 2, kind: input, shape index: {}]   ;;  %s1191_s3 = inlined_call_operand.vmem [shape: bf16[128,128], index: 3, kind: output, shape index: {}]  }
   0x1   :  { %s1070_s14 = smov 0  }
   0x2 LB: > { %s758_s15 = sadd.s32 4294967295, %s1042_s14   ;;  %s23_s16 = sadd.s32 1, %s1038_s13  ;;  %s1042_s14 = sphi %s1070_s14, %s14_s14   ;;  %s1038_s13 = sphi %s1068_s13, %s1201_s13   ;;  %s1034_s12 = sphi %s1066_s12, %s1200_s12  }
   0x3   : > { %p24_p0 = scmp.ge.s32.totalorder %s23_s16, 9  ;;  %p759_p1 = scmp.ge.s32.totalorder %s1042_s14, 1 }
   0x4   : > { %p132_p2 = scmp.lt.s32.totalorder %s1042_s14, 10  ;;  %p1091_p4 = scmp.eq.s32.totalorder %s758_s15, 0 }
   0x5   : > { %s1203_s16 = smov (%p24_p0, %s23_s16), 0  ;;  %s1044_s19 = smov [#allocation3]  }
   0x6   : > { %p1087_p3 = pnand %p759_p1, %p132_p2  ;;  %s145_s20 = sshll.u32 %s1044_s19, 4  ;;  %s146_s20 = int_to_ptr.vmem [resolvable:$true] %s145_s20 }
   0x7   : > { %s1196_s18 = scalar_select %p1091_p4, 1, 0 }
   0x8   : > { %s1195_s17 = scalar_select %p1087_p3, 1, 0 }
   0x9   : > { %p940_p5 = pneg %p1087_p3  ;;  %s988_s24 = scalar_lea.hbm %s1190_s2, 16 }
   0xa   : > { %p989_p7 = scmp.ne.s32.totalorder %s1190_s2, %s988_s24  ;;  %p995_p11 = scmp.lt.u32.totalorder %s988_s24, %s1190_s2 }
   0xb   : > { %p1099_p6 = pnand %p1091_p4, %p940_p5 }
   0xd   : > { %p990_p8 = pneg %p1099_p6 }
   0xf   : > { %p991_p9 = pnand %p990_p8, %p989_p7 }
  0x11   : > { %p992_p10 = pneg %p991_p9 }
  0x13   : > { %p997_p12 = pnand %p995_p11, %p992_p10 }
  0x15   : > { %1000 = shalt.err (!%p997_p12)
}
  0x16   : > { %s1001_s29 = scalar_lea.vmem %s146_s20, 16  ;;  %s1008_s30 = scalar_lea.vmem %s146_s20, 32 }
  0x17   : > { %p1002_p13 = scmp.ne.s32.totalorder %s146_s20, %s1001_s29  ;;  %p1009_p2 = scmp.lt.s32.totalorder %s146_s20, %s146_s20 }
  0x18   : > { %p1010_p5 = scmp.lt.s32.totalorder %s1008_s30, %s1001_s29 }
  0x19   : > { %p1004_p0 = pnand %p1002_p13, %p990_p8 }
  0x1a   : > { %p1011_p4 = por %p1010_p5, %p1009_p2 }
  0x1b   : > { %p1005_p1 = pneg %p1004_p0 }
  0x1d   : > { %p1012_p3 = pnand %p1011_p4, %p1005_p1 }
  0x1f   : > { %1015 = shalt.err (!%p1012_p3)
}
  0x20   : > { %943 = dma.hbm_to_vmem [thread:$0]  (!%p1099_p6), %s1190_s2, 16, %s146_s20, [#allocation4]  }
  0x21   : > { %p1198_p7 = scmp.ne.s32.totalorder %s1195_s17, 0 }
  0x22   : > { %p1199_p9 = scmp.ne.s32.totalorder (!%p1198_p7), %s1196_s18, 0 }
  0x23   : > { %179 = sbr.rel (%p1198_p7) target bundleno = 328 (0x148), region = 32 }
  0x2a   : > { %1029 = dma.done.wait (%p1199_p9), [#allocation4], 16  }
  0x2b   : > { %1031 = vsyncadd (%p1199_p9), [#allocation4], 4294967280  ;;  %p213_p8 = scmp.lt.s32.totalorder %s1034_s12, 8  ;;  %p768_p3 = scmp.ne.s32.totalorder %s1034_s12, 0 }
  0x2c   : > { %v1045_v0 = vmov (!%p768_p3), 0.0  }
  0x2d   : > { %s214_s6 = scalar_select %p213_p8, %s1034_s12, 8 }
  0x2e   : > { %237 = sbr.rel (%p768_p3) target bundleno = 54 (0x36), region = 40  ;;  %238 = vst [vmem:[#allocation2] sm:$0xff] (!%p768_p3), %v1045_v0  ;;  %239 = vst [vmem:[#allocation2 + $0x8] sm:$0xff] (!%p768_p3), %v1045_v0 }
  0x2f   : > { %s807_s7 = sshll.u32 %s214_s6, 6  ;;  %240 = vst [vmem:[#allocation2 + $0x10] sm:$0xff] (!%p768_p3), %v1045_v0  ;;  %241 = vst [vmem:[#allocation2 + $0x18] sm:$0xff] (!%p768_p3), %v1045_v0 }
  0x30   : > { %s1130_s10 = scalar_lea.vmem %s1188_s0, %s807_s7  ;;  %s1135_s17 = scalar_lea.vmem %s1189_s1, %s807_s7  ;;  %242 = vst [vmem:[#allocation2 + $0x20] sm:$0xff] (!%p768_p3), %v1045_v0  ;;  %243 = vst [vmem:[#allocation2 + $0x28] sm:$0xff] (!%p768_p3), %v1045_v0 }
  0x31   : > { %244 = vst [vmem:[#allocation2 + $0x30] sm:$0xff] (!%p768_p3), %v1045_v0  ;;  %245 = vst [vmem:[#allocation2 + $0x38] sm:$0xff] (!%p768_p3), %v1045_v0 }
  0x32   : > { %246 = vst [vmem:[#allocation2 + $0x40] sm:$0xff] (!%p768_p3), %v1045_v0  ;;  %247 = vst [vmem:[#allocation2 + $0x48] sm:$0xff] (!%p768_p3), %v1045_v0 }
  0x33   : > { %248 = vst [vmem:[#allocation2 + $0x50] sm:$0xff] (!%p768_p3), %v1045_v0  ;;  %249 = vst [vmem:[#allocation2 + $0x58] sm:$0xff] (!%p768_p3), %v1045_v0 }
  0x34   : > { %250 = vst [vmem:[#allocation2 + $0x60] sm:$0xff] (!%p768_p3), %v1045_v0  ;;  %251 = vst [vmem:[#allocation2 + $0x68] sm:$0xff] (!%p768_p3), %v1045_v0 }
  0x35   : > { %252 = vst [vmem:[#allocation2 + $0x70] sm:$0xff] %v1045_v0  ;;  %253 = vst [vmem:[#allocation2 + $0x78] sm:$0xff] %v1045_v0 }
  0x36 PF: > { %v972_v1 = vld [vmem:[%s1135_s17] sm:$0xff]   ;;  %v973_v2 = vld [vmem:[%s1135_s17 + $0x8] sm:$0xff]   ;;  %v974_v3 = vld [vmem:[%s1135_s17 + $0x10] sm:$0xff]   ;;  %p785_p4 = scmp.ne.s32.totalorder %s1034_s12, 8 }
  0x37   : > { %888 = vmatprep.subr.bf16.mxu0 %v972_v1  ;;  %920 = vmatprep.subr.bf16.mxu1 %v972_v1  ;;  %v975_v4 = vld [vmem:[%s1135_s17 + $0x18] sm:$0xff]   ;;  %v980_v5 = vld [vmem:[%s1130_s10] sm:$0xff]   ;;  %v977_v8 = vld [vmem:[%s1135_s17 + $0x28] sm:$0xff]  }
  0x38   : > { %889 = vmatpush3.bf16.msra.mxu0 %v972_v1  ;;  %928 = vmatpush3.bf16.msra.mxu1 %v972_v1  ;;  %v981_v6 = vld [vmem:[%s1130_s10 + $0x20] sm:$0xff]   ;;  %v978_v9 = vld [vmem:[%s1135_s17 + $0x30] sm:$0xff]   ;;  %v979_v10 = vld [vmem:[%s1135_s17 + $0x38] sm:$0xff]  }
  0x39   : > { %890 = vmatprep.subr.bf16.mxu0 %v973_v2  ;;  %921 = vmatprep.subr.bf16.mxu1 %v973_v2  ;;  %v976_v7 = vld [vmem:[%s1135_s17 + $0x20] sm:$0xff]   ;;  %v982_v11 = vld [vmem:[%s1130_s10 + $0x8] sm:$0xff]   ;;  %v984_v13 = vld [vmem:[%s1130_s10 + $0x10] sm:$0xff]  }
  0x3a   : > { %904 = vmatprep.mubr.bf16.mxu0 %v980_v5  ;;  %912 = vmatprep.mubr.bf16.mxu1 %v981_v6  ;;  %v983_v12 = vld [vmem:[%s1130_s10 + $0x28] sm:$0xff]   ;;  %v985_v14 = vld [vmem:[%s1130_s10 + $0x30] sm:$0xff]   ;;  %v986_v15 = vld [vmem:[%s1130_s10 + $0x18] sm:$0xff]  }
  0x3b   : > { %v987_v16 = vld [vmem:[%s1130_s10 + $0x38] sm:$0xff]   ;;  %v256_v17 = vld [vmem:[#allocation2 + $0x10] sm:$0xff]  ;;  %v254_v19 = vld [vmem:[#allocation2] sm:$0xff] }
  0x3c   : > { %891 = vmatpush3.bf16.msra.mxu0 %v973_v2  ;;  %929 = vmatpush3.bf16.msra.mxu1 %v973_v2  ;;  %v264_v18 = vld [vmem:[#allocation2 + $0x50] sm:$0xff]  ;;  %v262_v20 = vld [vmem:[#allocation2 + $0x40] sm:$0xff]  ;;  %v257_v23 = vld [vmem:[#allocation2 + $0x18] sm:$0xff] }
  0x3d   : > { %892 = vmatprep.subr.bf16.mxu0 %v974_v3  ;;  %922 = vmatprep.subr.bf16.mxu1 %v974_v3  ;;  %v265_v24 = vld [vmem:[#allocation2 + $0x58] sm:$0xff]  ;;  %v255_v29 = vld [vmem:[#allocation2 + $0x8] sm:$0xff]  ;;  %v260_v41 = vld [vmem:[#allocation2 + $0x30] sm:$0xff] }
  0x3e   : > { %v263_v30 = vld [vmem:[#allocation2 + $0x48] sm:$0xff]  ;;  %v268_v42 = vld [vmem:[#allocation2 + $0x70] sm:$0xff]  ;;  %v258_v43 = vld [vmem:[#allocation2 + $0x20] sm:$0xff] }
  0x3f   : > { %v266_v44 = vld [vmem:[#allocation2 + $0x60] sm:$0xff]  ;;  %v261_v47 = vld [vmem:[#allocation2 + $0x38] sm:$0xff]  ;;  %v259_v53 = vld [vmem:[#allocation2 + $0x28] sm:$0xff] }
  0x40   : > { %893 = vmatpush3.bf16.msra.mxu0 %v974_v3  ;;  %930 = vmatpush3.bf16.msra.mxu1 %v974_v3  ;;  %v269_v48 = vld [vmem:[#allocation2 + $0x78] sm:$0xff]  ;;  %v267_v54 = vld [vmem:[#allocation2 + $0x68] sm:$0xff]  ;;  %v786_v3 = vld [vmem:[#allocation3] ss:$0 sm:$0xff] (!%p785_p4) }
  0x41   : > { %894 = vmatprep.subr.bf16.mxu0 %v975_v4  ;;  %923 = vmatprep.subr.bf16.mxu1 %v975_v4 }
  0x44   : > { %895 = vmatpush3.bf16.msra.mxu0 %v975_v4  ;;  %931 = vmatpush3.bf16.msra.mxu1 %v975_v4 }
  0x45   : > { %896 = vmatprep.subr.bf16.mxu0 %v976_v7  ;;  %924 = vmatprep.subr.bf16.mxu1 %v976_v7 }
  0x48   : > { %897 = vmatpush3.bf16.msra.mxu0 %v976_v7  ;;  %932 = vmatpush3.bf16.msra.mxu1 %v976_v7 }
  0x49   : > { %898 = vmatprep.subr.bf16.mxu0 %v977_v8  ;;  %925 = vmatprep.subr.bf16.mxu1 %v977_v8 }
  0x4c   : > { %899 = vmatpush3.bf16.msra.mxu0 %v977_v8  ;;  %933 = vmatpush3.bf16.msra.mxu1 %v977_v8 }
  0x4d   : > { %900 = vmatprep.subr.bf16.mxu0 %v978_v9  ;;  %926 = vmatprep.subr.bf16.mxu1 %v978_v9 }
  0x50   : > { %901 = vmatpush3.bf16.msra.mxu0 %v978_v9  ;;  %934 = vmatpush3.bf16.msra.mxu1 %v978_v9 }
  0x51   : > { %902 = vmatprep.subr.bf16.mxu0 %v979_v10  ;;  %927 = vmatprep.subr.bf16.mxu1 %v979_v10 }
  0x54   : > { %903 = vmatpush3.bf16.msra.mxu0 %v979_v10  ;;  %935 = vmatpush3.bf16.msra.mxu1 %v979_v10 }
  0x57   : > { %905 = vmatmul.mubr.bf16.vlgmr.msra.gmra.mrb[0].mxu0 %v982_v11  ;;  %913 = vmatmul.mubr.bf16.vlgmr.msra.gmra.mrb[0].mxu1 %v983_v12 }
  0x58   : > { %908 = vmatprep.mubr.bf16.mxu0 %v984_v13  ;;  %916 = vmatprep.mubr.bf16.mxu1 %v985_v14 }
  0x5f   : > { %909 = vmatmul.mubr.bf16.gmra.mrb[4].mxu0 %v986_v15  ;;  %917 = vmatmul.mubr.bf16.gmra.mrb[4].mxu1 %v987_v16 }
 0x12a   : > { %v906_v21 = vpop.f32.mrb[0].mxu0  ;;  %v914_v22 = vpop.f32.mrb[0].mxu1 }
 0x12b   : > { %v497_v25 = vadd.f32 %v906_v21, %v256_v17  ;;  %v505_v26 = vadd.f32 %v914_v22, %v264_v18  ;;  %v432_v27 = vpop.f32.mrb[1].mxu0  ;;  %v464_v28 = vpop.f32.mrb[1].mxu1 }
 0x12c   : > { %v495_v31 = vadd.f32 %v432_v27, %v254_v19  ;;  %v503_v32 = vadd.f32 %v464_v28, %v262_v20  ;;  %v907_v33 = vpop.f32.mrb[2].mxu0  ;;  %v915_v34 = vpop.f32.mrb[2].mxu1 }
 0x12d   : > { %513 = vst [vmem:[#allocation2 + $0x10] sm:$0xff] %v497_v25  ;;  %521 = vst [vmem:[#allocation2 + $0x50] sm:$0xff] %v505_v26  ;;  %v498_v35 = vadd.f32 %v907_v33, %v257_v23  ;;  %v506_v36 = vadd.f32 %v915_v34, %v265_v24  ;;  %v435_v37 = vpop.f32.mrb[3].mxu0  ;;  %v467_v38 = vpop.f32.mrb[3].mxu1 }
 0x12e   : > { %511 = vst [vmem:[#allocation2] sm:$0xff] %v495_v31  ;;  %519 = vst [vmem:[#allocation2 + $0x40] sm:$0xff] %v503_v32  ;;  %v496_v39 = vadd.f32 %v435_v37, %v255_v29  ;;  %v504_v40 = vadd.f32 %v467_v38, %v263_v30 }
 0x12f   : > { %514 = vst [vmem:[#allocation2 + $0x18] sm:$0xff] %v498_v35  ;;  %522 = vst [vmem:[#allocation2 + $0x58] sm:$0xff] %v506_v36 }
 0x130   : > { %512 = vst [vmem:[#allocation2 + $0x8] sm:$0xff] %v496_v39  ;;  %520 = vst [vmem:[#allocation2 + $0x48] sm:$0xff] %v504_v40 }
 0x132   : > { %v910_v45 = vpop.f32.mrb[4].mxu0  ;;  %v918_v46 = vpop.f32.mrb[4].mxu1  ;;  %530 = sbr.rel (%p785_p4) target bundleno = 328 (0x148), region = 44 }
 0x133   : > { %v501_v49 = vadd.f32 %v910_v45, %v260_v41  ;;  %v509_v50 = vadd.f32 %v918_v46, %v268_v42  ;;  %v448_v51 = vpop.f32.mrb[5].mxu0  ;;  %v480_v52 = vpop.f32.mrb[5].mxu1 }
 0x134   : > { %v499_v55 = vadd.f32 %v448_v51, %v258_v43  ;;  %v507_v56 = vadd.f32 %v480_v52, %v266_v44  ;;  %v911_v57 = vpop.f32.mrb[6].mxu0  ;;  %v919_v58 = vpop.f32.mrb[6].mxu1  ;;  %v533_v6 = vld [vmem:[#allocation2 + $0x10] sm:$0xff] (!%p785_p4) }
 0x135   : > { %517 = vst [vmem:[#allocation2 + $0x30] sm:$0xff] %v501_v49  ;;  %525 = vst [vmem:[#allocation2 + $0x70] sm:$0xff] %v509_v50  ;;  %v502_v59 = vadd.f32 %v911_v57, %v261_v47  ;;  %v510_v60 = vadd.f32 %v919_v58, %v269_v48  ;;  %v451_v61 = vpop.f32.mrb[7].mxu0  ;;  %v483_v62 = vpop.f32.mrb[7].mxu1  ;;  %v531_v1 = vld [vmem:[#allocation2] sm:$0xff] (!%p785_p4)  ;;  %v556_v9 = vadd.f32 (!%p785_p4), %v786_v3, %v533_v6  ;;  %v541_v21 = vld [vmem:[#allocation2 + $0x50] sm:$0xff] (!%p785_p4) }
 0x136   : > { %515 = vst [vmem:[#allocation2 + $0x20] sm:$0xff] %v499_v55  ;;  %523 = vst [vmem:[#allocation2 + $0x60] sm:$0xff] %v507_v56  ;;  %v500_v63 = vadd.f32 %v451_v61, %v259_v53  ;;  %v508_v0 = vadd.f32 %v483_v62, %v267_v54  ;;  %v554_v4 = vadd.f32 (!%p785_p4), %v786_v3, %v531_v1  ;;  %v534_v7 = vld [vmem:[#allocation2 + $0x18] sm:$0xff] (!%p785_p4)  ;;  %v539_v19 = vld [vmem:[#allocation2 + $0x40] sm:$0xff] (!%p785_p4) }
 0x137   : > { %518 = vst [vmem:[#allocation2 + $0x38] sm:$0xff] %v502_v59  ;;  %526 = vst [vmem:[#allocation2 + $0x78] sm:$0xff] %v510_v60  ;;  %v532_v2 = vld [vmem:[#allocation2 + $0x8] sm:$0xff] (!%p785_p4)  ;;  %v557_v10 = vadd.f32 (!%p785_p4), %v786_v3, %v534_v7  ;;  %v572_v22 = vmax.f32 (!%p785_p4), %v556_v9, 0.0  ;;  %v542_v26 = vld [vmem:[#allocation2 + $0x58] sm:$0xff] (!%p785_p4)  ;;  %v562_v31 = vadd.f32 (!%p785_p4), %v786_v3, %v539_v19  ;;  %v564_v36 = vadd.f32 (!%p785_p4), %v786_v3, %v541_v21 }
 0x138   : > { %516 = vst [vmem:[#allocation2 + $0x28] sm:$0xff] %v500_v63  ;;  %524 = vst [vmem:[#allocation2 + $0x68] sm:$0xff] %v508_v0  ;;  %v555_v5 = vadd.f32 (!%p785_p4), %v786_v3, %v532_v2  ;;  %v570_v15 = vmax.f32 (!%p785_p4), %v554_v4, 0.0  ;;  %v540_v20 = vld [vmem:[#allocation2 + $0x48] sm:$0xff] (!%p785_p4)  ;;  %v565_v41 = vadd.f32 (!%p785_p4), %v786_v3, %v542_v26 }
 0x139   : > { %v573_v23 = vmax.f32 %v557_v10, 0.0  ;;  %v563_v35 = vadd.f32 %v786_v3, %v540_v20  ;;  %v578_v40 = vmax.f32 %v562_v31, 0.0  ;;  %v580_v45 = vmax.f32 %v564_v36, 0.0 }
 0x13a   : > { %v571_v16 = vmax.f32 %v555_v5, 0.0  ;;  %v581_v47 = vmax.f32 %v565_v41, 0.0 }
 0x13b   : > { %v833_v33 = vpack.c.bf16 %v573_v23, %v572_v22  ;;  %v579_v44 = vmax.f32 %v563_v35, 0.0 }
 0x13c   : > { %v537_v13 = vld [vmem:[#allocation2 + $0x30] sm:$0xff]  ;;  %v828_v28 = vpack.c.bf16 %v571_v16, %v570_v15  ;;  %v853_v53 = vpack.c.bf16 %v581_v47, %v580_v45 }
 0x13d   : > { %v535_v8 = vld [vmem:[#allocation2 + $0x20] sm:$0xff]  ;;  %v560_v18 = vadd.f32 %v786_v3, %v537_v13  ;;  %v545_v37 = vld [vmem:[#allocation2 + $0x70] sm:$0xff]  ;;  %865 = vst [vmem:[%s1191_s3 + $0x8] sm:$0xff] %v833_v33   ;;  %v848_v51 = vpack.c.bf16 %v579_v44, %v578_v40 }
 0x13e   : > { %v558_v12 = vadd.f32 %v786_v3, %v535_v8  ;;  %v538_v14 = vld [vmem:[#allocation2 + $0x38] sm:$0xff]  ;;  %v543_v27 = vld [vmem:[#allocation2 + $0x60] sm:$0xff]  ;;  %829 = vst [vmem:[%s1191_s3] sm:$0xff] %v828_v28   ;;  %v568_v49 = vadd.f32 %v786_v3, %v545_v37  ;;  %869 = vst [vmem:[%s1191_s3 + $0x28] sm:$0xff] %v853_v53  }
 0x13f   : > { %v536_v11 = vld [vmem:[#allocation2 + $0x28] sm:$0xff]  ;;  %v561_v25 = vadd.f32 %v786_v3, %v538_v14  ;;  %v576_v30 = vmax.f32 %v560_v18, 0.0  ;;  %v546_v38 = vld [vmem:[#allocation2 + $0x78] sm:$0xff]  ;;  %v566_v42 = vadd.f32 %v786_v3, %v543_v27  ;;  %868 = vst [vmem:[%s1191_s3 + $0x20] sm:$0xff] %v848_v51  }
 0x140   : > { %v559_v17 = vadd.f32 %v786_v3, %v536_v11  ;;  %v574_v24 = vmax.f32 %v558_v12, 0.0  ;;  %v544_v32 = vld [vmem:[#allocation2 + $0x68] sm:$0xff]  ;;  %v569_v50 = vadd.f32 %v786_v3, %v546_v38  ;;  %v584_v54 = vmax.f32 %v568_v49, 0.0 }
 0x141   : > { %v577_v34 = vmax.f32 %v561_v25, 0.0  ;;  %v567_v46 = vadd.f32 %v786_v3, %v544_v32  ;;  %v582_v48 = vmax.f32 %v566_v42, 0.0 }
 0x142   : > { %v575_v29 = vmax.f32 %v559_v17, 0.0  ;;  %v585_v55 = vmax.f32 %v569_v50, 0.0 }
 0x143   : > { %v843_v43 = vpack.c.bf16 %v577_v34, %v576_v30  ;;  %v583_v52 = vmax.f32 %v567_v46, 0.0 }
 0x144   : > { %v838_v39 = vpack.c.bf16 %v575_v29, %v574_v24  ;;  %v863_v57 = vpack.c.bf16 %v585_v55, %v584_v54 }
 0x145   : > { %867 = vst [vmem:[%s1191_s3 + $0x18] sm:$0xff] %v843_v43   ;;  %v858_v56 = vpack.c.bf16 %v583_v52, %v582_v48 }
 0x146   : > { %866 = vst [vmem:[%s1191_s3 + $0x10] sm:$0xff] %v838_v39   ;;  %871 = vst [vmem:[%s1191_s3 + $0x38] sm:$0xff] %v863_v57  }
 0x147   : > { %870 = vst [vmem:[%s1191_s3 + $0x30] sm:$0xff] %v858_v56  }
 0x148 PF: > { %s14_s14 = sadd.s32 1, %s1042_s14   ;;  %s1200_s12 = smov %s1038_s13 }
 0x149   : > { %p11_p6 = scmp.ge.s32.totalorder %s14_s14, 11   ;;  %s1201_s13 = smov %s1203_s16 }
 0x14b   :  { %13 = sbr.rel (!%p11_p6) target bundleno = 2 (0x2), region = 78 }
 0x152   :  { %688 = vsyncpa [#allocation4], 1 }
 0x153   :  { %690 = vsyncpa [#allocation4 + $0x1], 1 }

// kernel: resnet_cifar100_forward.58
= control target key start
LH: loop header
LB: loop body
LE: loop exit
PB: predicated region body
PF: predicated region fallthrough
CT: control target
= control target key end

     0   :  { %8 = vsyncpa [#allocation4], 0  ;;  %s802_s0 = inlined_call_operand.vmem [shape: bf16[1,128,128], index: 0, kind: input, shape index: {}]   ;;  %s803_s1 = inlined_call_operand.hbm [shape: bf16[1,128,128], index: 1, kind: input, shape index: {}]   ;;  %s804_s2 = inlined_call_operand.hbm [shape: f32[1,128], index: 2, kind: input, shape index: {}]   ;;  %s805_s3 = inlined_call_operand.vmem [shape: bf16[128,128], index: 3, kind: output, shape index: {}]  }
   0x1   :  { %9 = vsyncpa [#allocation6], 0  ;;  %s706_s12 = smov [#allocation3]   ;;  %s658_s16 = scalar_lea.hbm %s803_s1, 1024 }
   0x2   :  { %s17_s13 = sshll.u32 %s706_s12, 4  ;;  %p659_p0 = scmp.ne.s32.totalorder %s803_s1, %s658_s16  ;;  %s18_s13 = int_to_ptr.vmem [resolvable:$true] %s17_s13 }
   0x3   :  { %p662_p1 = scmp.lt.u32.totalorder %s658_s16, %s803_s1 }
   0x5   :  { %p664_p2 = pnand %p662_p1, %p659_p0 }
   0x7   :  { %667 = shalt.err (!%p664_p2)
}
   0x8   :  { %s668_s21 = scalar_lea.vmem %s18_s13, 1024  ;;  %p673_p4 = scmp.lt.s32.totalorder %s18_s13, %s18_s13 }
   0x9   :  { %p669_p3 = scmp.ne.s32.totalorder %s18_s13, %s668_s21  ;;  %p674_p5 = scmp.lt.s32.totalorder %s668_s21, %s668_s21 }
   0xb   :  { %p675_p6 = por %p674_p5, %p673_p4 }
   0xd   :  { %p676_p7 = pnand %p675_p6, %p669_p3 }
   0xf   :  { %679 = shalt.err (!%p676_p7)
}
  0x10   :  { %s707_s22 = smov 64   ;;  %s708_s23 = smov 4  }
  0x11   :  { %23 = dma.hbm_to_vmem [thread:$0]  %s803_s1, 1024, %s18_s13, [#allocation4], %s707_s22, %s707_s22, %s708_s23  }
  0x12   :  { %s709_s26 = smov [#allocation5]   ;;  %s680_s30 = scalar_lea.hbm %s804_s2, 16 }
  0x13   :  { %s30_s27 = sshll.u32 %s709_s26, 4  ;;  %p681_p8 = scmp.ne.s32.totalorder %s804_s2, %s680_s30  ;;  %s31_s27 = int_to_ptr.vmem [resolvable:$true] %s30_s27 }
  0x14   :  { %p684_p9 = scmp.lt.u32.totalorder %s680_s30, %s804_s2 }
  0x16   :  { %p686_p10 = pnand %p684_p9, %p681_p8 }
  0x18   :  { %689 = shalt.err (!%p686_p10)
}
  0x19   :  { %s690_s8 = scalar_lea.vmem %s31_s27, 16  ;;  %s694_s1 = scalar_lea.vmem %s31_s27, 32 }
  0x1a   :  { %p691_p11 = scmp.ne.s32.totalorder %s31_s27, %s690_s8  ;;  %p695_p12 = scmp.lt.s32.totalorder %s31_s27, %s31_s27 }
  0x1b   :  { %p696_p13 = scmp.lt.s32.totalorder %s694_s1, %s690_s8 }
  0x1d   :  { %p697_p0 = por %p696_p13, %p695_p12 }
  0x1f   :  { %p698_p1 = pnand %p697_p0, %p691_p11 }
  0x21   :  { %701 = shalt.err (!%p698_p1)
}
  0x22   :  { %33 = dma.hbm_to_vmem [thread:$0]  %s804_s2, 16, %s31_s27, [#allocation6]  }
  0x23   :  { %702 = dma.done.wait [#allocation4], 1024  }
  0x24   :  { %703 = vsyncadd [#allocation4], 4294966272 }
  0x25   :  { %704 = dma.done.wait [#allocation6], 16  }
  0x26   :  { %705 = vsyncadd [#allocation6], 4294967280  ;;  %v642_v0 = vld [vmem:[#allocation3] sm:$0xff]   ;;  %v643_v1 = vld [vmem:[#allocation3 + $0x8] sm:$0xff]  }
  0x27   :  { %590 = vmatprep.subr.bf16.mxu0 %v642_v0  ;;  %622 = vmatprep.subr.bf16.mxu1 %v642_v0  ;;  %v644_v2 = vld [vmem:[#allocation3 + $0x10] sm:$0xff]   ;;  %v645_v3 = vld [vmem:[#allocation3 + $0x18] sm:$0xff]   ;;  %v650_v4 = vld [vmem:[%s802_s0] sm:$0xff]  }
  0x28   :  { %591 = vmatpush3.bf16.msra.mxu0 %v642_v0  ;;  %630 = vmatpush3.bf16.msra.mxu1 %v642_v0  ;;  %v651_v5 = vld [vmem:[%s802_s0 + $0x20] sm:$0xff]   ;;  %v647_v7 = vld [vmem:[#allocation3 + $0x28] sm:$0xff]   ;;  %v648_v8 = vld [vmem:[#allocation3 + $0x30] sm:$0xff]  }
  0x29   :  { %592 = vmatprep.subr.bf16.mxu0 %v643_v1  ;;  %623 = vmatprep.subr.bf16.mxu1 %v643_v1  ;;  %v646_v6 = vld [vmem:[#allocation3 + $0x20] sm:$0xff]   ;;  %v649_v9 = vld [vmem:[#allocation3 + $0x38] sm:$0xff]   ;;  %v652_v10 = vld [vmem:[%s802_s0 + $0x8] sm:$0xff]  }
  0x2a   :  { %606 = vmatprep.mubr.bf16.mxu0 %v650_v4  ;;  %614 = vmatprep.mubr.bf16.mxu1 %v651_v5  ;;  %v653_v11 = vld [vmem:[%s802_s0 + $0x28] sm:$0xff]   ;;  %v654_v12 = vld [vmem:[%s802_s0 + $0x10] sm:$0xff]   ;;  %v656_v14 = vld [vmem:[%s802_s0 + $0x18] sm:$0xff]  }
  0x2b   :  { %v655_v13 = vld [vmem:[%s802_s0 + $0x30] sm:$0xff]   ;;  %v657_v15 = vld [vmem:[%s802_s0 + $0x38] sm:$0xff]   ;;  %v494_v16 = vld [vmem:[#allocation5] ss:$0 sm:$0xff] }
  0x2c   :  { %593 = vmatpush3.bf16.msra.mxu0 %v643_v1  ;;  %631 = vmatpush3.bf16.msra.mxu1 %v643_v1 }
  0x2d   :  { %594 = vmatprep.subr.bf16.mxu0 %v644_v2  ;;  %624 = vmatprep.subr.bf16.mxu1 %v644_v2 }
  0x30   :  { %595 = vmatpush3.bf16.msra.mxu0 %v644_v2  ;;  %632 = vmatpush3.bf16.msra.mxu1 %v644_v2 }
  0x31   :  { %596 = vmatprep.subr.bf16.mxu0 %v645_v3  ;;  %625 = vmatprep.subr.bf16.mxu1 %v645_v3 }
  0x34   :  { %597 = vmatpush3.bf16.msra.mxu0 %v645_v3  ;;  %633 = vmatpush3.bf16.msra.mxu1 %v645_v3 }
  0x35   :  { %598 = vmatprep.subr.bf16.mxu0 %v646_v6  ;;  %626 = vmatprep.subr.bf16.mxu1 %v646_v6 }
  0x38   :  { %599 = vmatpush3.bf16.msra.mxu0 %v646_v6  ;;  %634 = vmatpush3.bf16.msra.mxu1 %v646_v6 }
  0x39   :  { %600 = vmatprep.subr.bf16.mxu0 %v647_v7  ;;  %627 = vmatprep.subr.bf16.mxu1 %v647_v7 }
  0x3c   :  { %601 = vmatpush3.bf16.msra.mxu0 %v647_v7  ;;  %635 = vmatpush3.bf16.msra.mxu1 %v647_v7 }
  0x3d   :  { %602 = vmatprep.subr.bf16.mxu0 %v648_v8  ;;  %628 = vmatprep.subr.bf16.mxu1 %v648_v8 }
  0x40   :  { %603 = vmatpush3.bf16.msra.mxu0 %v648_v8  ;;  %636 = vmatpush3.bf16.msra.mxu1 %v648_v8 }
  0x41   :  { %604 = vmatprep.subr.bf16.mxu0 %v649_v9  ;;  %629 = vmatprep.subr.bf16.mxu1 %v649_v9 }
  0x44   :  { %605 = vmatpush3.bf16.msra.mxu0 %v649_v9  ;;  %637 = vmatpush3.bf16.msra.mxu1 %v649_v9 }
  0x47   :  { %607 = vmatmul.mubr.bf16.vlgmr.msra.gmra.mrb[0].mxu0 %v652_v10  ;;  %615 = vmatmul.mubr.bf16.vlgmr.msra.gmra.mrb[0].mxu1 %v653_v11 }
  0x48   :  { %610 = vmatprep.mubr.bf16.mxu0 %v654_v12  ;;  %618 = vmatprep.mubr.bf16.mxu1 %v655_v13 }
  0x4f   :  { %611 = vmatmul.mubr.bf16.gmra.mrb[4].mxu0 %v656_v14  ;;  %619 = vmatmul.mubr.bf16.gmra.mrb[4].mxu1 %v657_v15 }
 0x11a   :  { %v608_v17 = vpop.f32.mrb[0].mxu0  ;;  %v616_v18 = vpop.f32.mrb[0].mxu1 }
 0x11b   :  { %v362_v19 = vadd.f32 %v608_v17, %v494_v16  ;;  %v370_v20 = vadd.f32 %v616_v18, %v494_v16  ;;  %v239_v21 = vpop.f32.mrb[1].mxu0  ;;  %v271_v22 = vpop.f32.mrb[1].mxu1 }
 0x11c   :  { %v360_v23 = vadd.f32 %v494_v16, %v239_v21  ;;  %v368_v24 = vadd.f32 %v494_v16, %v271_v22  ;;  %v609_v25 = vpop.f32.mrb[2].mxu0  ;;  %v617_v26 = vpop.f32.mrb[2].mxu1 }
 0x11d   :  { %v363_v27 = vadd.f32 %v609_v25, %v494_v16  ;;  %v371_v28 = vadd.f32 %v617_v26, %v494_v16  ;;  %v242_v29 = vpop.f32.mrb[3].mxu0  ;;  %v274_v30 = vpop.f32.mrb[3].mxu1  ;;  %v378_v33 = vmax.f32 %v362_v19, 0.0  ;;  %v386_v34 = vmax.f32 %v370_v20, 0.0 }
 0x11e   :  { %v361_v31 = vadd.f32 %v494_v16, %v242_v29  ;;  %v369_v32 = vadd.f32 %v494_v16, %v274_v30  ;;  %v376_v37 = vmax.f32 %v360_v23, 0.0  ;;  %v384_v38 = vmax.f32 %v368_v24, 0.0 }
 0x11f   :  { %v379_v35 = vmax.f32 %v363_v27, 0.0  ;;  %v387_v36 = vmax.f32 %v371_v28, 0.0 }
 0x120   :  { %v377_v39 = vmax.f32 %v361_v31, 0.0  ;;  %v385_v40 = vmax.f32 %v369_v32, 0.0 }
 0x121   :  { %v535_v41 = vpack.c.bf16 %v379_v35, %v378_v33  ;;  %v555_v42 = vpack.c.bf16 %v387_v36, %v386_v34 }
 0x122   :  { %v530_v43 = vpack.c.bf16 %v377_v39, %v376_v37  ;;  %v550_v44 = vpack.c.bf16 %v385_v40, %v384_v38  ;;  %v612_v45 = vpop.f32.mrb[4].mxu0  ;;  %v620_v46 = vpop.f32.mrb[4].mxu1 }
 0x123   :  { %567 = vst [vmem:[%s805_s3 + $0x8] sm:$0xff] %v535_v41   ;;  %571 = vst [vmem:[%s805_s3 + $0x28] sm:$0xff] %v555_v42   ;;  %v366_v47 = vadd.f32 %v612_v45, %v494_v16  ;;  %v374_v48 = vadd.f32 %v620_v46, %v494_v16  ;;  %v255_v49 = vpop.f32.mrb[5].mxu0  ;;  %v287_v50 = vpop.f32.mrb[5].mxu1 }
 0x124   :  { %531 = vst [vmem:[%s805_s3] sm:$0xff] %v530_v43   ;;  %570 = vst [vmem:[%s805_s3 + $0x20] sm:$0xff] %v550_v44   ;;  %v364_v51 = vadd.f32 %v494_v16, %v255_v49  ;;  %v372_v52 = vadd.f32 %v494_v16, %v287_v50  ;;  %v613_v53 = vpop.f32.mrb[6].mxu0  ;;  %v621_v54 = vpop.f32.mrb[6].mxu1 }
 0x125   :  { %v367_v55 = vadd.f32 %v613_v53, %v494_v16  ;;  %v375_v56 = vadd.f32 %v621_v54, %v494_v16  ;;  %v258_v57 = vpop.f32.mrb[7].mxu0  ;;  %v290_v58 = vpop.f32.mrb[7].mxu1  ;;  %v382_v61 = vmax.f32 %v366_v47, 0.0  ;;  %v390_v62 = vmax.f32 %v374_v48, 0.0 }
 0x126   :  { %v365_v59 = vadd.f32 %v494_v16, %v258_v57  ;;  %v373_v60 = vadd.f32 %v494_v16, %v290_v58  ;;  %v380_v1 = vmax.f32 %v364_v51, 0.0  ;;  %v388_v2 = vmax.f32 %v372_v52, 0.0 }
 0x127   :  { %v383_v63 = vmax.f32 %v367_v55, 0.0  ;;  %v391_v0 = vmax.f32 %v375_v56, 0.0 }
 0x128   :  { %v381_v3 = vmax.f32 %v365_v59, 0.0  ;;  %v389_v4 = vmax.f32 %v373_v60, 0.0 }
 0x129   :  { %v545_v5 = vpack.c.bf16 %v383_v63, %v382_v61  ;;  %v565_v6 = vpack.c.bf16 %v391_v0, %v390_v62 }
 0x12a   :  { %v540_v7 = vpack.c.bf16 %v381_v3, %v380_v1  ;;  %v560_v8 = vpack.c.bf16 %v389_v4, %v388_v2 }
 0x12b   :  { %569 = vst [vmem:[%s805_s3 + $0x18] sm:$0xff] %v545_v5   ;;  %573 = vst [vmem:[%s805_s3 + $0x38] sm:$0xff] %v565_v6  }
 0x12c   :  { %568 = vst [vmem:[%s805_s3 + $0x10] sm:$0xff] %v540_v7   ;;  %572 = vst [vmem:[%s805_s3 + $0x30] sm:$0xff] %v560_v8  }
 0x12d   :  { %476 = vsyncpa [#allocation4], 1 }
 0x12e   :  { %477 = vsyncpa [#allocation6], 1 }

// kernel: resnet_cifar100_forward.57
= control target key start
LH: loop header
LB: loop body
LE: loop exit
PB: predicated region body
PF: predicated region fallthrough
CT: control target
= control target key end

     0   :  { %11 = vsyncpa [#allocation4], 0  ;;  %s1257_s0 = inlined_call_operand.vmem [shape: bf16[1,128,128], index: 0, kind: input, shape index: {}]   ;;  %s1258_s1 = inlined_call_operand.vmem [shape: bf16[1,128,128], index: 1, kind: input, shape index: {}]   ;;  %s1259_s2 = inlined_call_operand.hbm [shape: f32[1,128], index: 2, kind: input, shape index: {}]   ;;  %s1260_s3 = inlined_call_operand.vmem [shape: bf16[1,128,128], index: 3, kind: input, shape index: {}]   ;;  %s1261_s4 = inlined_call_operand.vmem [shape: bf16[1,128,128], index: 4, kind: input, shape index: {}]   ;;  %s1262_s5 = inlined_call_operand.hbm [shape: f32[1,128], index: 5, kind: input, shape index: {}]   ;;  %s1263_s6 = inlined_call_operand.vmem [shape: bf16[128,128], index: 6, kind: output, shape index: {}]  }
   0x1   :  { %12 = vsyncpa [#allocation6], 0  ;;  %s1040_s21 = smov [#allocation3]   ;;  %s1041_s23 = smov [#allocation5]  }
   0x2   :  { %s23_s22 = sshll.u32 %s1040_s21, 4  ;;  %s37_s24 = sshll.u32 %s1041_s23, 4  ;;  %s24_s22 = int_to_ptr.vmem [resolvable:$true] %s23_s22  ;;  %s38_s24 = int_to_ptr.vmem [resolvable:$true] %s37_s24 }
   0x3   :  { %s992_s27 = scalar_lea.hbm %s1259_s2, 16 }
   0x4   :  { %p993_p0 = scmp.ne.s32.totalorder %s1259_s2, %s992_s27  ;;  %p996_p1 = scmp.lt.u32.totalorder %s992_s27, %s1259_s2 }
   0x6   :  { %p998_p2 = pnand %p996_p1, %p993_p0 }
   0x8   :  { %1001 = shalt.err (!%p998_p2)
}
   0x9   :  { %s1002_s8 = scalar_lea.vmem %s24_s22, 16  ;;  %s1006_s9 = scalar_lea.vmem %s24_s22, 32 }
   0xa   :  { %p1003_p3 = scmp.ne.s32.totalorder %s24_s22, %s1002_s8  ;;  %p1007_p4 = scmp.lt.s32.totalorder %s24_s22, %s24_s22 }
   0xb   :  { %p1008_p5 = scmp.lt.s32.totalorder %s1006_s9, %s1002_s8 }
   0xd   :  { %p1009_p6 = por %p1008_p5, %p1007_p4 }
   0xf   :  { %p1010_p7 = pnand %p1009_p6, %p1003_p3 }
  0x11   :  { %1013 = shalt.err (!%p1010_p7)
}
  0x12   :  { %26 = dma.hbm_to_vmem [thread:$0]  %s1259_s2, 16, %s24_s22, [#allocation4]  }
  0x13   :  { %s1014_s14 = scalar_lea.hbm %s1262_s5, 16 }
  0x14   :  { %p1015_p8 = scmp.ne.s32.totalorder %s1262_s5, %s1014_s14  ;;  %p1018_p9 = scmp.lt.u32.totalorder %s1014_s14, %s1262_s5 }
  0x16   :  { %p1020_p10 = pnand %p1018_p9, %p1015_p8 }
  0x18   :  { %1023 = shalt.err (!%p1020_p10)
}
  0x19   :  { %s1024_s19 = scalar_lea.vmem %s38_s24, 16  ;;  %s1028_s20 = scalar_lea.vmem %s38_s24, 32 }
  0x1a   :  { %p1025_p11 = scmp.ne.s32.totalorder %s38_s24, %s1024_s19  ;;  %p1029_p12 = scmp.lt.s32.totalorder %s38_s24, %s38_s24 }
  0x1b   :  { %p1030_p13 = scmp.lt.s32.totalorder %s1028_s20, %s1024_s19 }
  0x1d   :  { %p1031_p0 = por %p1030_p13, %p1029_p12 }
  0x1f   :  { %p1032_p1 = pnand %p1031_p0, %p1025_p11 }
  0x21   :  { %1035 = shalt.err (!%p1032_p1)
}
  0x22   :  { %40 = dma.hbm_to_vmem [thread:$0]  %s1262_s5, 16, %s38_s24, [#allocation6]  }
  0x23   :  { %1036 = dma.done.wait [#allocation4], 16  }
  0x24   :  { %1037 = vsyncadd [#allocation4], 4294967280 }
  0x25   :  { %1038 = dma.done.wait [#allocation6], 16  }
  0x26   :  { %1039 = vsyncadd [#allocation6], 4294967280  ;;  %v960_v0 = vld [vmem:[%s1261_s4] sm:$0xff]   ;;  %v962_v2 = vld [vmem:[%s1261_s4 + $0x8] sm:$0xff]  }
  0x27   :  { %v961_v1 = vld [vmem:[%s1258_s1] sm:$0xff]   ;;  %862 = vmatprep.subr.bf16.mxu1 %v960_v0  ;;  %v963_v3 = vld [vmem:[%s1258_s1 + $0x8] sm:$0xff]   ;;  %v964_v4 = vld [vmem:[%s1261_s4 + $0x10] sm:$0xff]  }
  0x28   :  { %894 = vmatprep.subr.bf16.mxu0 %v961_v1  ;;  %863 = vmatpush3.bf16.msra.mxu1 %v960_v0  ;;  %v965_v5 = vld [vmem:[%s1258_s1 + $0x10] sm:$0xff]   ;;  %v966_v6 = vld [vmem:[%s1261_s4 + $0x18] sm:$0xff]   ;;  %v968_v8 = vld [vmem:[%s1261_s4 + $0x20] sm:$0xff]  }
  0x29   :  { %895 = vmatpush3.bf16.msra.mxu0 %v961_v1  ;;  %864 = vmatprep.subr.bf16.mxu1 %v962_v2  ;;  %v967_v7 = vld [vmem:[%s1258_s1 + $0x18] sm:$0xff]   ;;  %v969_v9 = vld [vmem:[%s1258_s1 + $0x20] sm:$0xff]   ;;  %v970_v10 = vld [vmem:[%s1261_s4 + $0x28] sm:$0xff]  }
  0x2a   :  { %896 = vmatprep.subr.bf16.mxu0 %v963_v3  ;;  %v971_v11 = vld [vmem:[%s1258_s1 + $0x28] sm:$0xff]   ;;  %v976_v12 = vld [vmem:[%s1260_s3] sm:$0xff]   ;;  %v972_v14 = vld [vmem:[%s1261_s4 + $0x30] sm:$0xff]  }
  0x2b   :  { %v977_v13 = vld [vmem:[%s1257_s0] sm:$0xff]   ;;  %878 = vmatprep.mubr.bf16.mxu1 %v976_v12  ;;  %v973_v15 = vld [vmem:[%s1258_s1 + $0x30] sm:$0xff]   ;;  %v974_v16 = vld [vmem:[%s1261_s4 + $0x38] sm:$0xff]  }
  0x2c   :  { %865 = vmatpush3.bf16.msra.mxu1 %v962_v2  ;;  %910 = vmatprep.mubr.bf16.mxu0 %v977_v13  ;;  %v975_v17 = vld [vmem:[%s1258_s1 + $0x38] sm:$0xff]   ;;  %v978_v18 = vld [vmem:[%s1260_s3 + $0x8] sm:$0xff]   ;;  %v980_v20 = vld [vmem:[%s1260_s3 + $0x10] sm:$0xff]  }
  0x2d   :  { %897 = vmatpush3.bf16.msra.mxu0 %v963_v3  ;;  %866 = vmatprep.subr.bf16.mxu1 %v964_v4  ;;  %v979_v19 = vld [vmem:[%s1257_s0 + $0x8] sm:$0xff]   ;;  %v981_v21 = vld [vmem:[%s1257_s0 + $0x10] sm:$0xff]   ;;  %v982_v22 = vld [vmem:[%s1260_s3 + $0x18] sm:$0xff]  }
  0x2e   :  { %898 = vmatprep.subr.bf16.mxu0 %v965_v5  ;;  %v983_v23 = vld [vmem:[%s1257_s0 + $0x18] sm:$0xff]   ;;  %v984_v24 = vld [vmem:[%s1260_s3 + $0x20] sm:$0xff]   ;;  %v986_v26 = vld [vmem:[%s1260_s3 + $0x28] sm:$0xff]  }
  0x2f   :  { %v985_v25 = vld [vmem:[%s1257_s0 + $0x20] sm:$0xff]   ;;  %v987_v27 = vld [vmem:[%s1257_s0 + $0x28] sm:$0xff]   ;;  %v988_v28 = vld [vmem:[%s1260_s3 + $0x30] sm:$0xff]  }
  0x30   :  { %867 = vmatpush3.bf16.msra.mxu1 %v964_v4  ;;  %v989_v29 = vld [vmem:[%s1257_s0 + $0x30] sm:$0xff]   ;;  %v990_v30 = vld [vmem:[%s1260_s3 + $0x38] sm:$0xff]   ;;  %v1197_v32 = vld [vmem:[#allocation5] ss:$0 sm:$0xff] }
  0x31   :  { %899 = vmatpush3.bf16.msra.mxu0 %v965_v5  ;;  %868 = vmatprep.subr.bf16.mxu1 %v966_v6  ;;  %v991_v31 = vld [vmem:[%s1257_s0 + $0x38] sm:$0xff]   ;;  %v1200_v37 = vld [vmem:[#allocation3] ss:$0 sm:$0xff] }
  0x32   :  { %900 = vmatprep.subr.bf16.mxu0 %v967_v7 }
  0x34   :  { %869 = vmatpush3.bf16.msra.mxu1 %v966_v6 }
  0x35   :  { %901 = vmatpush3.bf16.msra.mxu0 %v967_v7  ;;  %870 = vmatprep.subr.bf16.mxu1 %v968_v8 }
  0x36   :  { %902 = vmatprep.subr.bf16.mxu0 %v969_v9 }
  0x38   :  { %871 = vmatpush3.bf16.msra.mxu1 %v968_v8 }
  0x39   :  { %903 = vmatpush3.bf16.msra.mxu0 %v969_v9  ;;  %872 = vmatprep.subr.bf16.mxu1 %v970_v10 }
  0x3a   :  { %904 = vmatprep.subr.bf16.mxu0 %v971_v11 }
  0x3c   :  { %873 = vmatpush3.bf16.msra.mxu1 %v970_v10 }
  0x3d   :  { %905 = vmatpush3.bf16.msra.mxu0 %v971_v11  ;;  %874 = vmatprep.subr.bf16.mxu1 %v972_v14 }
  0x3e   :  { %906 = vmatprep.subr.bf16.mxu0 %v973_v15 }
  0x40   :  { %875 = vmatpush3.bf16.msra.mxu1 %v972_v14 }
  0x41   :  { %907 = vmatpush3.bf16.msra.mxu0 %v973_v15  ;;  %876 = vmatprep.subr.bf16.mxu1 %v974_v16 }
  0x42   :  { %908 = vmatprep.subr.bf16.mxu0 %v975_v17 }
  0x44   :  { %877 = vmatpush3.bf16.msra.mxu1 %v974_v16 }
  0x45   :  { %909 = vmatpush3.bf16.msra.mxu0 %v975_v17 }
  0x47   :  { %879 = vmatmul.mubr.bf16.vlgmr.msra.gmra.mrb[0].mxu1 %v978_v18 }
  0x48   :  { %911 = vmatmul.mubr.bf16.vlgmr.msra.gmra.mrb[0].mxu0 %v979_v19  ;;  %882 = vmatprep.mubr.bf16.mxu1 %v980_v20 }
  0x49   :  { %914 = vmatprep.mubr.bf16.mxu0 %v981_v21 }
  0x4f   :  { %883 = vmatmul.mubr.bf16.gmra.mrb[4].mxu1 %v982_v22 }
  0x50   :  { %915 = vmatmul.mubr.bf16.gmra.mrb[4].mxu0 %v983_v23  ;;  %886 = vmatprep.mubr.bf16.mxu1 %v984_v24 }
  0x51   :  { %918 = vmatprep.mubr.bf16.mxu0 %v985_v25 }
  0x57   :  { %887 = vmatmul.mubr.bf16.gmra.mrb[8].mxu1 %v986_v26 }
  0x58   :  { %919 = vmatmul.mubr.bf16.gmra.mrb[8].mxu0 %v987_v27  ;;  %890 = vmatprep.mubr.bf16.mxu1 %v988_v28 }
  0x59   :  { %922 = vmatprep.mubr.bf16.mxu0 %v989_v29 }
  0x5f   :  { %891 = vmatmul.mubr.bf16.gmra.mrb[12].mxu1 %v990_v30 }
  0x60   :  { %923 = vmatmul.mubr.bf16.gmra.mrb[12].mxu0 %v991_v31 }
 0x11a   :  { %v880_v33 = vpop.f32.mrb[0].mxu1 }
 0x11b   :  { %v230_v34 = vadd.f32 %v880_v33, %v1197_v32  ;;  %v912_v35 = vpop.f32.mrb[0].mxu0  ;;  %v221_v36 = vpop.f32.mrb[1].mxu1 }
 0x11c   :  { %v222_v38 = vadd.f32 %v1197_v32, %v221_v36  ;;  %v478_v39 = vpop.f32.mrb[1].mxu0  ;;  %v881_v40 = vpop.f32.mrb[2].mxu1 }
 0x11d   :  { %v543_v41 = vadd.f32 %v912_v35, %v230_v34  ;;  %v233_v42 = vadd.f32 %v881_v40, %v1197_v32  ;;  %v913_v43 = vpop.f32.mrb[2].mxu0  ;;  %v224_v44 = vpop.f32.mrb[3].mxu1 }
 0x11e   :  { %v541_v45 = vadd.f32 %v478_v39, %v222_v38  ;;  %v225_v46 = vadd.f32 %v1197_v32, %v224_v44  ;;  %v481_v47 = vpop.f32.mrb[3].mxu0 }
 0x11f   :  { %v601_v48 = vadd.f32 %v1200_v37, %v543_v41  ;;  %v544_v49 = vadd.f32 %v913_v43, %v233_v42 }
 0x120   :  { %v599_v50 = vadd.f32 %v1200_v37, %v541_v45  ;;  %v542_v51 = vadd.f32 %v481_v47, %v225_v46 }
 0x121   :  { %v602_v52 = vadd.f32 %v1200_v37, %v544_v49  ;;  %v617_v55 = vmax.f32 %v601_v48, 0.0 }
 0x122   :  { %v600_v53 = vadd.f32 %v1200_v37, %v542_v51  ;;  %v884_v54 = vpop.f32.mrb[4].mxu1  ;;  %v615_v60 = vmax.f32 %v599_v50, 0.0 }
 0x123   :  { %v618_v56 = vmax.f32 %v602_v52, 0.0  ;;  %v246_v57 = vadd.f32 %v884_v54, %v1197_v32  ;;  %v916_v58 = vpop.f32.mrb[4].mxu0  ;;  %v237_v59 = vpop.f32.mrb[5].mxu1 }
 0x124   :  { %v616_v61 = vmax.f32 %v600_v53, 0.0  ;;  %v238_v62 = vadd.f32 %v1197_v32, %v237_v59  ;;  %v494_v63 = vpop.f32.mrb[5].mxu0  ;;  %v885_v0 = vpop.f32.mrb[6].mxu1 }
 0x125   :  { %v791_v1 = vpack.c.bf16 %v618_v56, %v617_v55  ;;  %v547_v2 = vadd.f32 %v916_v58, %v246_v57  ;;  %v249_v3 = vadd.f32 %v885_v0, %v1197_v32  ;;  %v917_v4 = vpop.f32.mrb[6].mxu0  ;;  %v240_v5 = vpop.f32.mrb[7].mxu1 }
 0x126   :  { %v786_v6 = vpack.c.bf16 %v616_v61, %v615_v60  ;;  %v545_v7 = vadd.f32 %v494_v63, %v238_v62  ;;  %v241_v8 = vadd.f32 %v1197_v32, %v240_v5  ;;  %v497_v9 = vpop.f32.mrb[7].mxu0 }
 0x127   :  { %823 = vst [vmem:[%s1263_s6 + $0x8] sm:$0xff] %v791_v1   ;;  %v605_v10 = vadd.f32 %v1200_v37, %v547_v2  ;;  %v548_v11 = vadd.f32 %v917_v4, %v249_v3 }
 0x128   :  { %787 = vst [vmem:[%s1263_s6] sm:$0xff] %v786_v6   ;;  %v603_v12 = vadd.f32 %v1200_v37, %v545_v7  ;;  %v546_v13 = vadd.f32 %v497_v9, %v241_v8 }
 0x129   :  { %v606_v14 = vadd.f32 %v1200_v37, %v548_v11  ;;  %v621_v17 = vmax.f32 %v605_v10, 0.0 }
 0x12a   :  { %v604_v15 = vadd.f32 %v1200_v37, %v546_v13  ;;  %v888_v16 = vpop.f32.mrb[8].mxu1  ;;  %v619_v22 = vmax.f32 %v603_v12, 0.0 }
 0x12b   :  { %v622_v18 = vmax.f32 %v606_v14, 0.0  ;;  %v262_v19 = vadd.f32 %v888_v16, %v1197_v32  ;;  %v920_v20 = vpop.f32.mrb[8].mxu0  ;;  %v253_v21 = vpop.f32.mrb[9].mxu1 }
 0x12c   :  { %v620_v23 = vmax.f32 %v604_v15, 0.0  ;;  %v254_v24 = vadd.f32 %v1197_v32, %v253_v21  ;;  %v510_v25 = vpop.f32.mrb[9].mxu0  ;;  %v889_v26 = vpop.f32.mrb[10].mxu1 }
 0x12d   :  { %v801_v27 = vpack.c.bf16 %v622_v18, %v621_v17  ;;  %v551_v28 = vadd.f32 %v920_v20, %v262_v19  ;;  %v265_v29 = vadd.f32 %v889_v26, %v1197_v32  ;;  %v921_v30 = vpop.f32.mrb[10].mxu0  ;;  %v256_v31 = vpop.f32.mrb[11].mxu1 }
 0x12e   :  { %v796_v33 = vpack.c.bf16 %v620_v23, %v619_v22  ;;  %v549_v34 = vadd.f32 %v510_v25, %v254_v24  ;;  %v257_v35 = vadd.f32 %v1197_v32, %v256_v31  ;;  %v513_v36 = vpop.f32.mrb[11].mxu0 }
 0x12f   :  { %825 = vst [vmem:[%s1263_s6 + $0x18] sm:$0xff] %v801_v27   ;;  %v609_v38 = vadd.f32 %v1200_v37, %v551_v28  ;;  %v552_v39 = vadd.f32 %v921_v30, %v265_v29 }
 0x130   :  { %824 = vst [vmem:[%s1263_s6 + $0x10] sm:$0xff] %v796_v33   ;;  %v607_v40 = vadd.f32 %v1200_v37, %v549_v34  ;;  %v550_v41 = vadd.f32 %v513_v36, %v257_v35 }
 0x131   :  { %v610_v42 = vadd.f32 %v1200_v37, %v552_v39  ;;  %v625_v45 = vmax.f32 %v609_v38, 0.0 }
 0x132   :  { %v608_v43 = vadd.f32 %v1200_v37, %v550_v41  ;;  %v892_v44 = vpop.f32.mrb[12].mxu1  ;;  %v623_v50 = vmax.f32 %v607_v40, 0.0 }
 0x133   :  { %v626_v46 = vmax.f32 %v610_v42, 0.0  ;;  %v278_v47 = vadd.f32 %v892_v44, %v1197_v32  ;;  %v924_v48 = vpop.f32.mrb[12].mxu0  ;;  %v269_v49 = vpop.f32.mrb[13].mxu1 }
 0x134   :  { %v624_v51 = vmax.f32 %v608_v43, 0.0  ;;  %v270_v52 = vadd.f32 %v1197_v32, %v269_v49  ;;  %v526_v53 = vpop.f32.mrb[13].mxu0  ;;  %v893_v54 = vpop.f32.mrb[14].mxu1 }
 0x135   :  { %v811_v55 = vpack.c.bf16 %v626_v46, %v625_v45  ;;  %v555_v56 = vadd.f32 %v924_v48, %v278_v47  ;;  %v281_v57 = vadd.f32 %v893_v54, %v1197_v32  ;;  %v925_v58 = vpop.f32.mrb[14].mxu0  ;;  %v272_v59 = vpop.f32.mrb[15].mxu1 }
 0x136   :  { %v806_v60 = vpack.c.bf16 %v624_v51, %v623_v50  ;;  %v553_v61 = vadd.f32 %v526_v53, %v270_v52  ;;  %v273_v62 = vadd.f32 %v1197_v32, %v272_v59  ;;  %v529_v63 = vpop.f32.mrb[15].mxu0 }
 0x137   :  { %827 = vst [vmem:[%s1263_s6 + $0x28] sm:$0xff] %v811_v55   ;;  %v613_v0 = vadd.f32 %v1200_v37, %v555_v56  ;;  %v556_v1 = vadd.f32 %v925_v58, %v281_v57 }
 0x138   :  { %826 = vst [vmem:[%s1263_s6 + $0x20] sm:$0xff] %v806_v60   ;;  %v611_v2 = vadd.f32 %v1200_v37, %v553_v61  ;;  %v554_v3 = vadd.f32 %v529_v63, %v273_v62 }
 0x139   :  { %v614_v4 = vadd.f32 %v1200_v37, %v556_v1  ;;  %v629_v32 = vmax.f32 %v613_v0, 0.0 }
 0x13a   :  { %v612_v5 = vadd.f32 %v1200_v37, %v554_v3  ;;  %v627_v7 = vmax.f32 %v611_v2, 0.0 }
 0x13b   :  { %v630_v6 = vmax.f32 %v614_v4, 0.0 }
 0x13c   :  { %v628_v8 = vmax.f32 %v612_v5, 0.0 }
 0x13d   :  { %v821_v9 = vpack.c.bf16 %v630_v6, %v629_v32 }
 0x13e   :  { %v816_v10 = vpack.c.bf16 %v628_v8, %v627_v7 }
 0x13f   :  { %829 = vst [vmem:[%s1263_s6 + $0x38] sm:$0xff] %v821_v9  }
 0x140   :  { %828 = vst [vmem:[%s1263_s6 + $0x30] sm:$0xff] %v816_v10  }
 0x141   :  { %715 = vsyncpa [#allocation4], 1 }
 0x142   :  { %716 = vsyncpa [#allocation6], 1 }

// kernel: resnet_cifar100_forward.60
= control target key start
LH: loop header
LB: loop body
LE: loop exit
PB: predicated region body
PF: predicated region fallthrough
CT: control target
= control target key end

     0   :  { %9 = vsyncpa [#allocation4], 0  ;;  %s955_s0 = inlined_call_operand.vmem [shape: bf16[1,128,128], index: 0, kind: input, shape index: {}]   ;;  %s956_s1 = inlined_call_operand.hbm [shape: bf16[1,128,128], index: 1, kind: input, shape index: {}]   ;;  %s957_s2 = inlined_call_operand.hbm [shape: f32[1,128], index: 2, kind: input, shape index: {}]   ;;  %s958_s3 = inlined_call_operand.vmem [shape: bf16[128,128], index: 3, kind: input, shape index: {}]   ;;  %s959_s4 = inlined_call_operand.vmem [shape: bf16[128,128], index: 4, kind: output, shape index: {}]  }
   0x1   :  { %10 = vsyncpa [#allocation6], 0  ;;  %s796_s15 = smov [#allocation3]   ;;  %s748_s19 = scalar_lea.hbm %s956_s1, 1024 }
   0x2   :  { %s18_s16 = sshll.u32 %s796_s15, 4  ;;  %p749_p0 = scmp.ne.s32.totalorder %s956_s1, %s748_s19  ;;  %s19_s16 = int_to_ptr.vmem [resolvable:$true] %s18_s16 }
   0x3   :  { %p752_p1 = scmp.lt.u32.totalorder %s748_s19, %s956_s1 }
   0x5   :  { %p754_p2 = pnand %p752_p1, %p749_p0 }
   0x7   :  { %757 = shalt.err (!%p754_p2)
}
   0x8   :  { %s758_s24 = scalar_lea.vmem %s19_s16, 1024  ;;  %p763_p4 = scmp.lt.s32.totalorder %s19_s16, %s19_s16 }
   0x9   :  { %p759_p3 = scmp.ne.s32.totalorder %s19_s16, %s758_s24  ;;  %p764_p5 = scmp.lt.s32.totalorder %s758_s24, %s758_s24 }
   0xb   :  { %p765_p6 = por %p764_p5, %p763_p4 }
   0xd   :  { %p766_p7 = pnand %p765_p6, %p759_p3 }
   0xf   :  { %769 = shalt.err (!%p766_p7)
}
  0x10   :  { %s797_s25 = smov 64   ;;  %s798_s26 = smov 4  }
  0x11   :  { %24 = dma.hbm_to_vmem [thread:$0]  %s956_s1, 1024, %s19_s16, [#allocation4], %s797_s25, %s797_s25, %s798_s26  }
  0x12   :  { %s799_s29 = smov [#allocation5]   ;;  %s770_s7 = scalar_lea.hbm %s957_s2, 16 }
  0x13   :  { %s31_s30 = sshll.u32 %s799_s29, 4  ;;  %p771_p8 = scmp.ne.s32.totalorder %s957_s2, %s770_s7  ;;  %s32_s30 = int_to_ptr.vmem [resolvable:$true] %s31_s30 }
  0x14   :  { %p774_p9 = scmp.lt.u32.totalorder %s770_s7, %s957_s2 }
  0x16   :  { %p776_p10 = pnand %p774_p9, %p771_p8 }
  0x18   :  { %779 = shalt.err (!%p776_p10)
}
  0x19   :  { %s780_s12 = scalar_lea.vmem %s32_s30, 16  ;;  %s784_s1 = scalar_lea.vmem %s32_s30, 32 }
  0x1a   :  { %p781_p11 = scmp.ne.s32.totalorder %s32_s30, %s780_s12  ;;  %p785_p12 = scmp.lt.s32.totalorder %s32_s30, %s32_s30 }
  0x1b   :  { %p786_p13 = scmp.lt.s32.totalorder %s784_s1, %s780_s12 }
  0x1d   :  { %p787_p0 = por %p786_p13, %p785_p12 }
  0x1f   :  { %p788_p1 = pnand %p787_p0, %p781_p11 }
  0x21   :  { %791 = shalt.err (!%p788_p1)
}
  0x22   :  { %34 = dma.hbm_to_vmem [thread:$0]  %s957_s2, 16, %s32_s30, [#allocation6]  }
  0x23   :  { %792 = dma.done.wait [#allocation4], 1024  }
  0x24   :  { %793 = vsyncadd [#allocation4], 4294966272 }
  0x25   :  { %794 = dma.done.wait [#allocation6], 16  }
  0x26   :  { %795 = vsyncadd [#allocation6], 4294967280  ;;  %v732_v0 = vld [vmem:[#allocation3] sm:$0xff]   ;;  %v733_v1 = vld [vmem:[#allocation3 + $0x8] sm:$0xff]  }
  0x27   :  { %680 = vmatprep.subr.bf16.mxu0 %v732_v0  ;;  %712 = vmatprep.subr.bf16.mxu1 %v732_v0  ;;  %v734_v2 = vld [vmem:[#allocation3 + $0x10] sm:$0xff]   ;;  %v735_v3 = vld [vmem:[#allocation3 + $0x18] sm:$0xff]   ;;  %v740_v4 = vld [vmem:[%s955_s0] sm:$0xff]  }
  0x28   :  { %681 = vmatpush3.bf16.msra.mxu0 %v732_v0  ;;  %720 = vmatpush3.bf16.msra.mxu1 %v732_v0  ;;  %v741_v5 = vld [vmem:[%s955_s0 + $0x20] sm:$0xff]   ;;  %v737_v7 = vld [vmem:[#allocation3 + $0x28] sm:$0xff]   ;;  %v738_v8 = vld [vmem:[#allocation3 + $0x30] sm:$0xff]  }
  0x29   :  { %682 = vmatprep.subr.bf16.mxu0 %v733_v1  ;;  %713 = vmatprep.subr.bf16.mxu1 %v733_v1  ;;  %v736_v6 = vld [vmem:[#allocation3 + $0x20] sm:$0xff]   ;;  %v739_v9 = vld [vmem:[#allocation3 + $0x38] sm:$0xff]   ;;  %v742_v10 = vld [vmem:[%s955_s0 + $0x8] sm:$0xff]  }
  0x2a   :  { %696 = vmatprep.mubr.bf16.mxu0 %v740_v4  ;;  %704 = vmatprep.mubr.bf16.mxu1 %v741_v5  ;;  %v743_v11 = vld [vmem:[%s955_s0 + $0x28] sm:$0xff]   ;;  %v744_v12 = vld [vmem:[%s955_s0 + $0x10] sm:$0xff]   ;;  %v746_v14 = vld [vmem:[%s955_s0 + $0x18] sm:$0xff]  }
  0x2b   :  { %v745_v13 = vld [vmem:[%s955_s0 + $0x30] sm:$0xff]   ;;  %v747_v15 = vld [vmem:[%s955_s0 + $0x38] sm:$0xff]   ;;  %v650_v16 = vld [vmem:[%s958_s3 + $0x8] sm:$0xff]  }
  0x2c   :  { %683 = vmatpush3.bf16.msra.mxu0 %v733_v1  ;;  %721 = vmatpush3.bf16.msra.mxu1 %v733_v1  ;;  %v654_v17 = vld [vmem:[%s958_s3 + $0x28] sm:$0xff]   ;;  %v579_v18 = vld [vmem:[%s958_s3] sm:$0xff]   ;;  %v890_v21 = vld [vmem:[%s958_s3 + $0x18] sm:$0xff]   ;;  %v584_v23 = vunpack.c.l.bf16 %v650_v16  ;;  %v585_v31 = vunpack.c.h.bf16 %v650_v16 }
  0x2d   :  { %684 = vmatprep.subr.bf16.mxu0 %v734_v2  ;;  %714 = vmatprep.subr.bf16.mxu1 %v734_v2  ;;  %v653_v19 = vld [vmem:[%s958_s3 + $0x20] sm:$0xff]   ;;  %v895_v22 = vld [vmem:[%s958_s3 + $0x38] sm:$0xff]   ;;  %v600_v24 = vunpack.c.l.bf16 %v654_v17  ;;  %v580_v25 = vunpack.c.l.bf16 %v579_v18  ;;  %v900_v27 = vld [vmem:[%s958_s3 + $0x10] sm:$0xff]   ;;  %v601_v32 = vunpack.c.h.bf16 %v654_v17  ;;  %v581_v33 = vunpack.c.h.bf16 %v579_v18 }
  0x2e   :  { %v885_v20 = vld [vmem:[#allocation5] ss:$0 sm:$0xff]  ;;  %v596_v26 = vunpack.c.l.bf16 %v653_v19  ;;  %v905_v28 = vld [vmem:[%s958_s3 + $0x30] sm:$0xff]   ;;  %v597_v34 = vunpack.c.h.bf16 %v653_v19  ;;  %v592_v39 = vunpack.c.l.bf16 %v890_v21  ;;  %v608_v40 = vunpack.c.l.bf16 %v895_v22 }
  0x2f   :  { %v588_v45 = vunpack.c.l.bf16 %v900_v27  ;;  %v604_v46 = vunpack.c.l.bf16 %v905_v28  ;;  %v593_v59 = vunpack.c.h.bf16 %v890_v21  ;;  %v609_v60 = vunpack.c.h.bf16 %v895_v22 }
  0x30   :  { %685 = vmatpush3.bf16.msra.mxu0 %v734_v2  ;;  %722 = vmatpush3.bf16.msra.mxu1 %v734_v2  ;;  %v589_v63 = vunpack.c.h.bf16 %v900_v27  ;;  %v605_v0 = vunpack.c.h.bf16 %v905_v28 }
  0x31   :  { %686 = vmatprep.subr.bf16.mxu0 %v735_v3  ;;  %715 = vmatprep.subr.bf16.mxu1 %v735_v3 }
  0x34   :  { %687 = vmatpush3.bf16.msra.mxu0 %v735_v3  ;;  %723 = vmatpush3.bf16.msra.mxu1 %v735_v3 }
  0x35   :  { %688 = vmatprep.subr.bf16.mxu0 %v736_v6  ;;  %716 = vmatprep.subr.bf16.mxu1 %v736_v6 }
  0x38   :  { %689 = vmatpush3.bf16.msra.mxu0 %v736_v6  ;;  %724 = vmatpush3.bf16.msra.mxu1 %v736_v6 }
  0x39   :  { %690 = vmatprep.subr.bf16.mxu0 %v737_v7  ;;  %717 = vmatprep.subr.bf16.mxu1 %v737_v7 }
  0x3c   :  { %691 = vmatpush3.bf16.msra.mxu0 %v737_v7  ;;  %725 = vmatpush3.bf16.msra.mxu1 %v737_v7 }
  0x3d   :  { %692 = vmatprep.subr.bf16.mxu0 %v738_v8  ;;  %718 = vmatprep.subr.bf16.mxu1 %v738_v8 }
  0x40   :  { %693 = vmatpush3.bf16.msra.mxu0 %v738_v8  ;;  %726 = vmatpush3.bf16.msra.mxu1 %v738_v8 }
  0x41   :  { %694 = vmatprep.subr.bf16.mxu0 %v739_v9  ;;  %719 = vmatprep.subr.bf16.mxu1 %v739_v9 }
  0x44   :  { %695 = vmatpush3.bf16.msra.mxu0 %v739_v9  ;;  %727 = vmatpush3.bf16.msra.mxu1 %v739_v9 }
  0x47   :  { %697 = vmatmul.mubr.bf16.vlgmr.msra.gmra.mrb[0].mxu0 %v742_v10  ;;  %705 = vmatmul.mubr.bf16.vlgmr.msra.gmra.mrb[0].mxu1 %v743_v11 }
  0x48   :  { %700 = vmatprep.mubr.bf16.mxu0 %v744_v12  ;;  %708 = vmatprep.mubr.bf16.mxu1 %v745_v13 }
  0x4f   :  { %701 = vmatmul.mubr.bf16.gmra.mrb[4].mxu0 %v746_v14  ;;  %709 = vmatmul.mubr.bf16.gmra.mrb[4].mxu1 %v747_v15 }
 0x11a   :  { %v698_v29 = vpop.f32.mrb[0].mxu0  ;;  %v706_v30 = vpop.f32.mrb[0].mxu1 }
 0x11b   :  { %v365_v35 = vadd.f32 %v698_v29, %v885_v20  ;;  %v373_v36 = vadd.f32 %v706_v30, %v885_v20  ;;  %v242_v37 = vpop.f32.mrb[1].mxu0  ;;  %v274_v38 = vpop.f32.mrb[1].mxu1 }
 0x11c   :  { %v363_v41 = vadd.f32 %v885_v20, %v242_v37  ;;  %v371_v42 = vadd.f32 %v885_v20, %v274_v38  ;;  %v699_v43 = vpop.f32.mrb[2].mxu0  ;;  %v707_v44 = vpop.f32.mrb[2].mxu1 }
 0x11d   :  { %v413_v47 = vadd.f32 %v584_v23, %v365_v35  ;;  %v421_v48 = vadd.f32 %v600_v24, %v373_v36  ;;  %v366_v49 = vadd.f32 %v699_v43, %v885_v20  ;;  %v374_v50 = vadd.f32 %v707_v44, %v885_v20  ;;  %v245_v51 = vpop.f32.mrb[3].mxu0  ;;  %v277_v52 = vpop.f32.mrb[3].mxu1 }
 0x11e   :  { %v411_v53 = vadd.f32 %v580_v25, %v363_v41  ;;  %v419_v54 = vadd.f32 %v596_v26, %v371_v42  ;;  %v364_v55 = vadd.f32 %v885_v20, %v245_v51  ;;  %v372_v56 = vadd.f32 %v885_v20, %v277_v52 }
 0x11f   :  { %v414_v57 = vadd.f32 %v585_v31, %v366_v49  ;;  %v422_v58 = vadd.f32 %v601_v32, %v374_v50  ;;  %v429_v1 = vmax.f32 %v413_v47, 0.0  ;;  %v437_v2 = vmax.f32 %v421_v48, 0.0 }
 0x120   :  { %v412_v61 = vadd.f32 %v581_v33, %v364_v55  ;;  %v420_v62 = vadd.f32 %v597_v34, %v372_v56  ;;  %v427_v5 = vmax.f32 %v411_v53, 0.0  ;;  %v435_v6 = vmax.f32 %v419_v54, 0.0 }
 0x121   :  { %v430_v3 = vmax.f32 %v414_v57, 0.0  ;;  %v438_v4 = vmax.f32 %v422_v58, 0.0 }
 0x122   :  { %v428_v7 = vmax.f32 %v412_v61, 0.0  ;;  %v436_v8 = vmax.f32 %v420_v62, 0.0  ;;  %v702_v9 = vpop.f32.mrb[4].mxu0  ;;  %v710_v10 = vpop.f32.mrb[4].mxu1 }
 0x123   :  { %v618_v11 = vpack.c.bf16 %v430_v3, %v429_v1  ;;  %v638_v12 = vpack.c.bf16 %v438_v4, %v437_v2  ;;  %v369_v13 = vadd.f32 %v702_v9, %v885_v20  ;;  %v377_v14 = vadd.f32 %v710_v10, %v885_v20  ;;  %v258_v15 = vpop.f32.mrb[5].mxu0  ;;  %v290_v16 = vpop.f32.mrb[5].mxu1 }
 0x124   :  { %v613_v17 = vpack.c.bf16 %v428_v7, %v427_v5  ;;  %v633_v18 = vpack.c.bf16 %v436_v8, %v435_v6  ;;  %v367_v19 = vadd.f32 %v885_v20, %v258_v15  ;;  %v375_v21 = vadd.f32 %v885_v20, %v290_v16  ;;  %v703_v22 = vpop.f32.mrb[6].mxu0  ;;  %v711_v23 = vpop.f32.mrb[6].mxu1 }
 0x125   :  { %657 = vst [vmem:[%s959_s4 + $0x8] sm:$0xff] %v618_v11   ;;  %661 = vst [vmem:[%s959_s4 + $0x28] sm:$0xff] %v638_v12   ;;  %v417_v24 = vadd.f32 %v592_v39, %v369_v13  ;;  %v425_v25 = vadd.f32 %v608_v40, %v377_v14  ;;  %v370_v26 = vadd.f32 %v703_v22, %v885_v20  ;;  %v261_v28 = vpop.f32.mrb[7].mxu0  ;;  %v293_v29 = vpop.f32.mrb[7].mxu1 }
 0x126   :  { %v378_v27 = vadd.f32 %v711_v23, %v885_v20  ;;  %614 = vst [vmem:[%s959_s4] sm:$0xff] %v613_v17   ;;  %660 = vst [vmem:[%s959_s4 + $0x20] sm:$0xff] %v633_v18   ;;  %v415_v30 = vadd.f32 %v588_v45, %v367_v19  ;;  %v423_v31 = vadd.f32 %v604_v46, %v375_v21 }
 0x127   :  { %v368_v32 = vadd.f32 %v885_v20, %v261_v28  ;;  %v376_v33 = vadd.f32 %v885_v20, %v293_v29  ;;  %v418_v34 = vadd.f32 %v593_v59, %v370_v26  ;;  %v433_v38 = vmax.f32 %v417_v24, 0.0 }
 0x128   :  { %v426_v35 = vadd.f32 %v609_v60, %v378_v27  ;;  %v441_v39 = vmax.f32 %v425_v25, 0.0  ;;  %v431_v42 = vmax.f32 %v415_v30, 0.0  ;;  %v439_v43 = vmax.f32 %v423_v31, 0.0 }
 0x129   :  { %v416_v36 = vadd.f32 %v589_v63, %v368_v32  ;;  %v424_v37 = vadd.f32 %v605_v0, %v376_v33  ;;  %v434_v40 = vmax.f32 %v418_v34, 0.0 }
 0x12a   :  { %v442_v41 = vmax.f32 %v426_v35, 0.0 }
 0x12b   :  { %v432_v44 = vmax.f32 %v416_v36, 0.0  ;;  %v440_v47 = vmax.f32 %v424_v37, 0.0  ;;  %v628_v48 = vpack.c.bf16 %v434_v40, %v433_v38 }
 0x12c   :  { %v648_v49 = vpack.c.bf16 %v442_v41, %v441_v39 }
 0x12d   :  { %v623_v45 = vpack.c.bf16 %v432_v44, %v431_v42  ;;  %v643_v46 = vpack.c.bf16 %v440_v47, %v439_v43  ;;  %659 = vst [vmem:[%s959_s4 + $0x18] sm:$0xff] %v628_v48  }
 0x12e   :  { %663 = vst [vmem:[%s959_s4 + $0x38] sm:$0xff] %v648_v49  }
 0x12f   :  { %658 = vst [vmem:[%s959_s4 + $0x10] sm:$0xff] %v623_v45   ;;  %662 = vst [vmem:[%s959_s4 + $0x30] sm:$0xff] %v643_v46  }
 0x130   :  { %527 = vsyncpa [#allocation4], 1 }
 0x131   :  { %528 = vsyncpa [#allocation6], 1 }

// kernel: resnet_cifar100_forward.64
= control target key start
LH: loop header
LB: loop body
LE: loop exit
PB: predicated region body
PF: predicated region fallthrough
CT: control target
= control target key end

     0   :  { %8 = vsyncpa [#allocation4], 0  ;;  %s664_s12 = smov [#allocation3]   ;;  %s769_s0 = inlined_call_operand.vmem [shape: bf16[1,128,128], index: 0, kind: input, shape index: {}]   ;;  %s770_s1 = inlined_call_operand.vmem [shape: bf16[1,128,128], index: 1, kind: input, shape index: {}]   ;;  %s771_s2 = inlined_call_operand.hbm [shape: f32[1,128], index: 2, kind: input, shape index: {}]   ;;  %s772_s3 = inlined_call_operand.vmem [shape: bf16[128,128], index: 3, kind: output, shape index: {}]  }
   0x1   :  { %s19_s13 = sshll.u32 %s664_s12, 4  ;;  %s640_s16 = scalar_lea.hbm %s771_s2, 16  ;;  %s20_s13 = int_to_ptr.vmem [resolvable:$true] %s19_s13 }
   0x2   :  { %p641_p0 = scmp.ne.s32.totalorder %s771_s2, %s640_s16  ;;  %p644_p1 = scmp.lt.u32.totalorder %s640_s16, %s771_s2 }
   0x4   :  { %p646_p2 = pnand %p644_p1, %p641_p0 }
   0x6   :  { %649 = shalt.err (!%p646_p2)
}
   0x7   :  { %s650_s21 = scalar_lea.vmem %s20_s13, 16  ;;  %s654_s22 = scalar_lea.vmem %s20_s13, 32 }
   0x8   :  { %p651_p3 = scmp.ne.s32.totalorder %s20_s13, %s650_s21  ;;  %p655_p4 = scmp.lt.s32.totalorder %s20_s13, %s20_s13 }
   0x9   :  { %p656_p5 = scmp.lt.s32.totalorder %s654_s22, %s650_s21 }
   0xb   :  { %p657_p6 = por %p656_p5, %p655_p4 }
   0xd   :  { %p658_p7 = pnand %p657_p6, %p651_p3 }
   0xf   :  { %661 = shalt.err (!%p658_p7)
}
  0x10   :  { %22 = dma.hbm_to_vmem [thread:$0]  %s771_s2, 16, %s20_s13, [#allocation4]  }
  0x11   :  { %662 = dma.done.wait [#allocation4], 16  }
  0x12   :  { %663 = vsyncadd [#allocation4], 4294967280  ;;  %v624_v0 = vld [vmem:[%s770_s1] sm:$0xff]   ;;  %v625_v1 = vld [vmem:[%s770_s1 + $0x8] sm:$0xff]  }
  0x13   :  { %575 = vmatprep.subr.bf16.mxu0 %v624_v0  ;;  %607 = vmatprep.subr.bf16.mxu1 %v624_v0  ;;  %v626_v2 = vld [vmem:[%s770_s1 + $0x10] sm:$0xff]   ;;  %v627_v3 = vld [vmem:[%s770_s1 + $0x18] sm:$0xff]   ;;  %v632_v4 = vld [vmem:[%s769_s0] sm:$0xff]  }
  0x14   :  { %576 = vmatpush3.bf16.msra.mxu0 %v624_v0  ;;  %615 = vmatpush3.bf16.msra.mxu1 %v624_v0  ;;  %v633_v5 = vld [vmem:[%s769_s0 + $0x20] sm:$0xff]   ;;  %v629_v7 = vld [vmem:[%s770_s1 + $0x28] sm:$0xff]   ;;  %v630_v8 = vld [vmem:[%s770_s1 + $0x30] sm:$0xff]  }
  0x15   :  { %577 = vmatprep.subr.bf16.mxu0 %v625_v1  ;;  %608 = vmatprep.subr.bf16.mxu1 %v625_v1  ;;  %v628_v6 = vld [vmem:[%s770_s1 + $0x20] sm:$0xff]   ;;  %v631_v9 = vld [vmem:[%s770_s1 + $0x38] sm:$0xff]   ;;  %v634_v10 = vld [vmem:[%s769_s0 + $0x8] sm:$0xff]  }
  0x16   :  { %591 = vmatprep.mubr.bf16.mxu0 %v632_v4  ;;  %599 = vmatprep.mubr.bf16.mxu1 %v633_v5  ;;  %v635_v11 = vld [vmem:[%s769_s0 + $0x28] sm:$0xff]   ;;  %v636_v12 = vld [vmem:[%s769_s0 + $0x10] sm:$0xff]   ;;  %v638_v14 = vld [vmem:[%s769_s0 + $0x18] sm:$0xff]  }
  0x17   :  { %v637_v13 = vld [vmem:[%s769_s0 + $0x30] sm:$0xff]   ;;  %v639_v15 = vld [vmem:[%s769_s0 + $0x38] sm:$0xff]   ;;  %v479_v16 = vld [vmem:[#allocation3] ss:$0 sm:$0xff] }
  0x18   :  { %578 = vmatpush3.bf16.msra.mxu0 %v625_v1  ;;  %616 = vmatpush3.bf16.msra.mxu1 %v625_v1 }
  0x19   :  { %579 = vmatprep.subr.bf16.mxu0 %v626_v2  ;;  %609 = vmatprep.subr.bf16.mxu1 %v626_v2 }
  0x1c   :  { %580 = vmatpush3.bf16.msra.mxu0 %v626_v2  ;;  %617 = vmatpush3.bf16.msra.mxu1 %v626_v2 }
  0x1d   :  { %581 = vmatprep.subr.bf16.mxu0 %v627_v3  ;;  %610 = vmatprep.subr.bf16.mxu1 %v627_v3 }
  0x20   :  { %582 = vmatpush3.bf16.msra.mxu0 %v627_v3  ;;  %618 = vmatpush3.bf16.msra.mxu1 %v627_v3 }
  0x21   :  { %583 = vmatprep.subr.bf16.mxu0 %v628_v6  ;;  %611 = vmatprep.subr.bf16.mxu1 %v628_v6 }
  0x24   :  { %584 = vmatpush3.bf16.msra.mxu0 %v628_v6  ;;  %619 = vmatpush3.bf16.msra.mxu1 %v628_v6 }
  0x25   :  { %585 = vmatprep.subr.bf16.mxu0 %v629_v7  ;;  %612 = vmatprep.subr.bf16.mxu1 %v629_v7 }
  0x28   :  { %586 = vmatpush3.bf16.msra.mxu0 %v629_v7  ;;  %620 = vmatpush3.bf16.msra.mxu1 %v629_v7 }
  0x29   :  { %587 = vmatprep.subr.bf16.mxu0 %v630_v8  ;;  %613 = vmatprep.subr.bf16.mxu1 %v630_v8 }
  0x2c   :  { %588 = vmatpush3.bf16.msra.mxu0 %v630_v8  ;;  %621 = vmatpush3.bf16.msra.mxu1 %v630_v8 }
  0x2d   :  { %589 = vmatprep.subr.bf16.mxu0 %v631_v9  ;;  %614 = vmatprep.subr.bf16.mxu1 %v631_v9 }
  0x30   :  { %590 = vmatpush3.bf16.msra.mxu0 %v631_v9  ;;  %622 = vmatpush3.bf16.msra.mxu1 %v631_v9 }
  0x33   :  { %592 = vmatmul.mubr.bf16.vlgmr.msra.gmra.mrb[0].mxu0 %v634_v10  ;;  %600 = vmatmul.mubr.bf16.vlgmr.msra.gmra.mrb[0].mxu1 %v635_v11 }
  0x34   :  { %595 = vmatprep.mubr.bf16.mxu0 %v636_v12  ;;  %603 = vmatprep.mubr.bf16.mxu1 %v637_v13 }
  0x3b   :  { %596 = vmatmul.mubr.bf16.gmra.mrb[4].mxu0 %v638_v14  ;;  %604 = vmatmul.mubr.bf16.gmra.mrb[4].mxu1 %v639_v15 }
 0x106   :  { %v593_v17 = vpop.f32.mrb[0].mxu0  ;;  %v601_v18 = vpop.f32.mrb[0].mxu1 }
 0x107   :  { %v348_v19 = vadd.f32 %v593_v17, %v479_v16  ;;  %v356_v20 = vadd.f32 %v601_v18, %v479_v16  ;;  %v225_v21 = vpop.f32.mrb[1].mxu0  ;;  %v257_v22 = vpop.f32.mrb[1].mxu1 }
 0x108   :  { %v346_v23 = vadd.f32 %v479_v16, %v225_v21  ;;  %v354_v24 = vadd.f32 %v479_v16, %v257_v22  ;;  %v594_v25 = vpop.f32.mrb[2].mxu0  ;;  %v602_v26 = vpop.f32.mrb[2].mxu1 }
 0x109   :  { %v349_v27 = vadd.f32 %v594_v25, %v479_v16  ;;  %v357_v28 = vadd.f32 %v602_v26, %v479_v16  ;;  %v228_v29 = vpop.f32.mrb[3].mxu0  ;;  %v260_v30 = vpop.f32.mrb[3].mxu1  ;;  %v364_v33 = vmax.f32 %v348_v19, 0.0  ;;  %v372_v34 = vmax.f32 %v356_v20, 0.0 }
 0x10a   :  { %v347_v31 = vadd.f32 %v479_v16, %v228_v29  ;;  %v355_v32 = vadd.f32 %v479_v16, %v260_v30  ;;  %v362_v37 = vmax.f32 %v346_v23, 0.0  ;;  %v370_v38 = vmax.f32 %v354_v24, 0.0 }
 0x10b   :  { %v365_v35 = vmax.f32 %v349_v27, 0.0  ;;  %v373_v36 = vmax.f32 %v357_v28, 0.0 }
 0x10c   :  { %v363_v39 = vmax.f32 %v347_v31, 0.0  ;;  %v371_v40 = vmax.f32 %v355_v32, 0.0 }
 0x10d   :  { %v520_v41 = vpack.c.bf16 %v365_v35, %v364_v33  ;;  %v540_v42 = vpack.c.bf16 %v373_v36, %v372_v34 }
 0x10e   :  { %v515_v43 = vpack.c.bf16 %v363_v39, %v362_v37  ;;  %v535_v44 = vpack.c.bf16 %v371_v40, %v370_v38  ;;  %v597_v45 = vpop.f32.mrb[4].mxu0  ;;  %v605_v46 = vpop.f32.mrb[4].mxu1 }
 0x10f   :  { %552 = vst [vmem:[%s772_s3 + $0x8] sm:$0xff] %v520_v41   ;;  %556 = vst [vmem:[%s772_s3 + $0x28] sm:$0xff] %v540_v42   ;;  %v352_v47 = vadd.f32 %v597_v45, %v479_v16  ;;  %v360_v48 = vadd.f32 %v605_v46, %v479_v16  ;;  %v241_v49 = vpop.f32.mrb[5].mxu0  ;;  %v273_v50 = vpop.f32.mrb[5].mxu1 }
 0x110   :  { %516 = vst [vmem:[%s772_s3] sm:$0xff] %v515_v43   ;;  %555 = vst [vmem:[%s772_s3 + $0x20] sm:$0xff] %v535_v44   ;;  %v350_v51 = vadd.f32 %v479_v16, %v241_v49  ;;  %v358_v52 = vadd.f32 %v479_v16, %v273_v50  ;;  %v598_v53 = vpop.f32.mrb[6].mxu0  ;;  %v606_v54 = vpop.f32.mrb[6].mxu1 }
 0x111   :  { %v353_v55 = vadd.f32 %v598_v53, %v479_v16  ;;  %v361_v56 = vadd.f32 %v606_v54, %v479_v16  ;;  %v244_v57 = vpop.f32.mrb[7].mxu0  ;;  %v276_v58 = vpop.f32.mrb[7].mxu1  ;;  %v368_v61 = vmax.f32 %v352_v47, 0.0  ;;  %v376_v62 = vmax.f32 %v360_v48, 0.0 }
 0x112   :  { %v351_v59 = vadd.f32 %v479_v16, %v244_v57  ;;  %v359_v60 = vadd.f32 %v479_v16, %v276_v58  ;;  %v366_v1 = vmax.f32 %v350_v51, 0.0  ;;  %v374_v2 = vmax.f32 %v358_v52, 0.0 }
 0x113   :  { %v369_v63 = vmax.f32 %v353_v55, 0.0  ;;  %v377_v0 = vmax.f32 %v361_v56, 0.0 }
 0x114   :  { %v367_v3 = vmax.f32 %v351_v59, 0.0  ;;  %v375_v4 = vmax.f32 %v359_v60, 0.0 }
 0x115   :  { %v530_v5 = vpack.c.bf16 %v369_v63, %v368_v61  ;;  %v550_v6 = vpack.c.bf16 %v377_v0, %v376_v62 }
 0x116   :  { %v525_v7 = vpack.c.bf16 %v367_v3, %v366_v1  ;;  %v545_v8 = vpack.c.bf16 %v375_v4, %v374_v2 }
 0x117   :  { %554 = vst [vmem:[%s772_s3 + $0x18] sm:$0xff] %v530_v5   ;;  %558 = vst [vmem:[%s772_s3 + $0x38] sm:$0xff] %v550_v6  }
 0x118   :  { %553 = vst [vmem:[%s772_s3 + $0x10] sm:$0xff] %v525_v7   ;;  %557 = vst [vmem:[%s772_s3 + $0x30] sm:$0xff] %v545_v8  }
 0x119   :  { %462 = vsyncpa [#allocation4], 1 }

// kernel: resnet_cifar100_forward.65
= control target key start
LH: loop header
LB: loop body
LE: loop exit
PB: predicated region body
PF: predicated region fallthrough
CT: control target
= control target key end

     0   :  { %8 = vsyncpa [#allocation4], 0  ;;  %s720_s12 = smov 0   ;;  %s722_s13 = smov 0   ;;  %s818_s0 = inlined_call_operand.vmem [shape: bf16[9,32,128], index: 0, kind: input, shape index: {}]   ;;  %s819_s1 = inlined_call_operand.vmem [shape: bf16[9,128,128], index: 1, kind: input, shape index: {}]   ;;  %s820_s2 = inlined_call_operand.hbm [shape: f32[1,128], index: 2, kind: input, shape index: {}]   ;;  %s821_s3 = inlined_call_operand.vmem [shape: bf16[32,128], index: 3, kind: output, shape index: {}]  }
   0x1   :  { %s724_s14 = smov 0  }
   0x2 LB: > { %s518_s15 = sadd.s32 4294967295, %s696_s14   ;;  %s23_s16 = sadd.s32 1, %s692_s13  ;;  %s696_s14 = sphi %s724_s14, %s14_s14   ;;  %s692_s13 = sphi %s722_s13, %s831_s13   ;;  %s688_s12 = sphi %s720_s12, %s830_s12  }
   0x3   : > { %p24_p0 = scmp.ge.s32.totalorder %s23_s16, 9  ;;  %p519_p1 = scmp.ge.s32.totalorder %s696_s14, 1 }
   0x4   : > { %p132_p2 = scmp.lt.s32.totalorder %s696_s14, 10  ;;  %p745_p4 = scmp.eq.s32.totalorder %s518_s15, 0 }
   0x5   : > { %s833_s16 = smov (%p24_p0, %s23_s16), 0  ;;  %s698_s19 = smov [#allocation3]  }
   0x6   : > { %p741_p3 = pnand %p519_p1, %p132_p2  ;;  %s145_s20 = sshll.u32 %s698_s19, 4  ;;  %s146_s20 = int_to_ptr.vmem [resolvable:$true] %s145_s20 }
   0x7   : > { %s826_s18 = scalar_select %p745_p4, 1, 0 }
   0x8   : > { %s825_s17 = scalar_select %p741_p3, 1, 0 }
   0x9   : > { %p600_p5 = pneg %p741_p3  ;;  %s642_s24 = scalar_lea.hbm %s820_s2, 16 }
   0xa   : > { %p643_p7 = scmp.ne.s32.totalorder %s820_s2, %s642_s24  ;;  %p649_p11 = scmp.lt.u32.totalorder %s642_s24, %s820_s2 }
   0xb   : > { %p753_p6 = pnand %p745_p4, %p600_p5 }
   0xd   : > { %p644_p8 = pneg %p753_p6 }
   0xf   : > { %p645_p9 = pnand %p644_p8, %p643_p7 }
  0x11   : > { %p646_p10 = pneg %p645_p9 }
  0x13   : > { %p651_p12 = pnand %p649_p11, %p646_p10 }
  0x15   : > { %654 = shalt.err (!%p651_p12)
}
  0x16   : > { %s655_s29 = scalar_lea.vmem %s146_s20, 16  ;;  %s662_s30 = scalar_lea.vmem %s146_s20, 32 }
  0x17   : > { %p656_p13 = scmp.ne.s32.totalorder %s146_s20, %s655_s29  ;;  %p663_p2 = scmp.lt.s32.totalorder %s146_s20, %s146_s20 }
  0x18   : > { %p664_p5 = scmp.lt.s32.totalorder %s662_s30, %s655_s29 }
  0x19   : > { %p658_p0 = pnand %p656_p13, %p644_p8 }
  0x1a   : > { %p665_p4 = por %p664_p5, %p663_p2 }
  0x1b   : > { %p659_p1 = pneg %p658_p0 }
  0x1d   : > { %p666_p3 = pnand %p665_p4, %p659_p1 }
  0x1f   : > { %669 = shalt.err (!%p666_p3)
}
  0x20   : > { %603 = dma.hbm_to_vmem [thread:$0]  (!%p753_p6), %s820_s2, 16, %s146_s20, [#allocation4]  }
  0x21   : > { %p828_p7 = scmp.ne.s32.totalorder %s825_s17, 0 }
  0x22   : > { %p829_p9 = scmp.ne.s32.totalorder (!%p828_p7), %s826_s18, 0 }
  0x23   : > { %179 = sbr.rel (%p828_p7) target bundleno = 318 (0x13e), region = 32 }
  0x2a   : > { %683 = dma.done.wait (%p829_p9), [#allocation4], 16  }
  0x2b   : > { %685 = vsyncadd (%p829_p9), [#allocation4], 4294967280  ;;  %p213_p8 = scmp.lt.s32.totalorder %s688_s12, 8  ;;  %p528_p3 = scmp.ne.s32.totalorder %s688_s12, 0 }
  0x2c   : > { %v699_v0 = vmov (!%p528_p3), 0.0  }
  0x2d   : > { %s214_s6 = scalar_select %p213_p8, %s688_s12, 8 }
  0x2e   : > { %237 = sbr.rel (%p528_p3) target bundleno = 53 (0x35), region = 40  ;;  %238 = vst [vmem:[#allocation2] sm:$0xff] (!%p528_p3), %v699_v0  ;;  %239 = vst [vmem:[#allocation2 + $0x8] sm:$0xff] (!%p528_p3), %v699_v0 }
  0x2f   : > { %s549_s7 = sshll.u32 %s214_s6, 4  ;;  %s550_s8 = sshll.u32 %s214_s6, 6  ;;  %240 = vst [vmem:[#allocation2 + $0x10] sm:$0xff] (!%p528_p3), %v699_v0  ;;  %241 = vst [vmem:[#allocation2 + $0x18] sm:$0xff] (!%p528_p3), %v699_v0 }
  0x30   : > { %s784_s11 = scalar_lea.vmem %s818_s0, %s549_s7  ;;  %s789_s19 = scalar_lea.vmem %s819_s1, %s550_s8 }
  0x35 PF: > { %v632_v1 = vld [vmem:[%s789_s19] sm:$0xff]   ;;  %v633_v2 = vld [vmem:[%s789_s19 + $0x8] sm:$0xff]   ;;  %v634_v3 = vld [vmem:[%s789_s19 + $0x10] sm:$0xff]   ;;  %p539_p4 = scmp.ne.s32.totalorder %s688_s12, 8 }
  0x36   : > { %576 = vmatprep.subr.bf16.mxu0 %v632_v1  ;;  %v635_v4 = vld [vmem:[%s789_s19 + $0x18] sm:$0xff]   ;;  %v640_v5 = vld [vmem:[%s784_s11] sm:$0xff]   ;;  %v637_v7 = vld [vmem:[%s789_s19 + $0x28] sm:$0xff]  }
  0x37   : > { %577 = vmatpush3.bf16.msra.mxu0 %v632_v1  ;;  %592 = vmatprep.mubr.bf16.mxu0 %v640_v5  ;;  %v636_v6 = vld [vmem:[%s789_s19 + $0x20] sm:$0xff]   ;;  %v638_v8 = vld [vmem:[%s789_s19 + $0x30] sm:$0xff]   ;;  %v639_v9 = vld [vmem:[%s789_s19 + $0x38] sm:$0xff]  }
  0x38   : > { %578 = vmatprep.subr.bf16.mxu0 %v633_v2  ;;  %v641_v10 = vld [vmem:[%s784_s11 + $0x8] sm:$0xff]   ;;  %v244_v11 = vld [vmem:[#allocation2 + $0x10] sm:$0xff]  ;;  %v242_v12 = vld [vmem:[#allocation2] sm:$0xff] }
  0x39   : > { %v245_v14 = vld [vmem:[#allocation2 + $0x18] sm:$0xff]  ;;  %v243_v17 = vld [vmem:[#allocation2 + $0x8] sm:$0xff]  ;;  %v540_v25 = vld [vmem:[#allocation3] ss:$0 sm:$0xff] (!%p539_p4) }
  0x3b   : > { %579 = vmatpush3.bf16.msra.mxu0 %v633_v2 }
  0x3c   : > { %580 = vmatprep.subr.bf16.mxu0 %v634_v3 }
  0x3f   : > { %581 = vmatpush3.bf16.msra.mxu0 %v634_v3 }
  0x40   : > { %582 = vmatprep.subr.bf16.mxu0 %v635_v4 }
  0x43   : > { %583 = vmatpush3.bf16.msra.mxu0 %v635_v4 }
  0x44   : > { %584 = vmatprep.subr.bf16.mxu0 %v636_v6 }
  0x47   : > { %585 = vmatpush3.bf16.msra.mxu0 %v636_v6 }
  0x48   : > { %586 = vmatprep.subr.bf16.mxu0 %v637_v7 }
  0x4b   : > { %587 = vmatpush3.bf16.msra.mxu0 %v637_v7 }
  0x4c   : > { %588 = vmatprep.subr.bf16.mxu0 %v638_v8 }
  0x4f   : > { %589 = vmatpush3.bf16.msra.mxu0 %v638_v8 }
  0x50   : > { %590 = vmatprep.subr.bf16.mxu0 %v639_v9 }
  0x53   : > { %591 = vmatpush3.bf16.msra.mxu0 %v639_v9 }
  0x56   : > { %593 = vmatmul.mubr.bf16.vlgmr.msra.gmra.mrb[0].mxu0 %v641_v10 }
 0x129   : > { %v594_v13 = vpop.f32.mrb[0].mxu0  ;;  %386 = sbr.rel (%p539_p4) target bundleno = 318 (0x13e), region = 44 }
 0x12a   : > { %v377_v15 = vadd.f32 %v594_v13, %v244_v11  ;;  %v360_v16 = vpop.f32.mrb[1].mxu0 }
 0x12b   : > { %v375_v18 = vadd.f32 %v360_v16, %v242_v12  ;;  %v595_v19 = vpop.f32.mrb[2].mxu0 }
 0x12c   : > { %381 = vst [vmem:[#allocation2 + $0x10] sm:$0xff] %v377_v15  ;;  %v378_v20 = vadd.f32 %v595_v19, %v245_v14  ;;  %v363_v21 = vpop.f32.mrb[3].mxu0 }
 0x12d   : > { %379 = vst [vmem:[#allocation2] sm:$0xff] %v375_v18  ;;  %v376_v22 = vadd.f32 %v363_v21, %v243_v17 }
 0x12e   : > { %382 = vst [vmem:[#allocation2 + $0x18] sm:$0xff] %v378_v20 }
 0x12f   : > { %380 = vst [vmem:[#allocation2 + $0x8] sm:$0xff] %v376_v22 }
 0x133   : > { %v389_v28 = vld [vmem:[#allocation2 + $0x10] sm:$0xff] }
 0x134   : > { %v387_v23 = vld [vmem:[#allocation2] sm:$0xff]  ;;  %v400_v30 = vadd.f32 %v540_v25, %v389_v28 }
 0x135   : > { %v398_v26 = vadd.f32 %v540_v25, %v387_v23  ;;  %v390_v29 = vld [vmem:[#allocation2 + $0x18] sm:$0xff] }
 0x136   : > { %v388_v24 = vld [vmem:[#allocation2 + $0x8] sm:$0xff]  ;;  %v401_v31 = vadd.f32 %v540_v25, %v390_v29  ;;  %v404_v34 = vmax.f32 %v400_v30, 0.0 }
 0x137   : > { %v399_v27 = vadd.f32 %v540_v25, %v388_v24  ;;  %v402_v32 = vmax.f32 %v398_v26, 0.0 }
 0x138   : > { %v405_v35 = vmax.f32 %v401_v31, 0.0 }
 0x139   : > { %v403_v33 = vmax.f32 %v399_v27, 0.0 }
 0x13a   : > { %v563_v37 = vpack.c.bf16 %v405_v35, %v404_v34 }
 0x13b   : > { %v558_v36 = vpack.c.bf16 %v403_v33, %v402_v32 }
 0x13c   : > { %565 = vst [vmem:[%s821_s3 + $0x8] sm:$0xff] %v563_v37  }
 0x13d   : > { %559 = vst [vmem:[%s821_s3] sm:$0xff] %v558_v36  }
 0x13e PF: > { %s14_s14 = sadd.s32 1, %s696_s14   ;;  %s830_s12 = smov %s692_s13 }
 0x13f   : > { %p11_p6 = scmp.ge.s32.totalorder %s14_s14, 11   ;;  %s831_s13 = smov %s833_s16 }
 0x141   :  { %13 = sbr.rel (!%p11_p6) target bundleno = 2 (0x2), region = 78 }
 0x148   :  { %448 = vsyncpa [#allocation4], 1 }
 0x149   :  { %450 = vsyncpa [#allocation4 + $0x1], 1 }

// kernel: resnet_cifar100_forward.67
= control target key start
LH: loop header
LB: loop body
LE: loop exit
PB: predicated region body
PF: predicated region fallthrough
CT: control target
= control target key end

     0   :  { %8 = vsyncpa [#allocation4], 0  ;;  %s420_s0 = inlined_call_operand.vmem [shape: bf16[1,32,128], index: 0, kind: input, shape index: {}]   ;;  %s421_s1 = inlined_call_operand.hbm [shape: bf16[1,128,128], index: 1, kind: input, shape index: {}]   ;;  %s422_s2 = inlined_call_operand.hbm [shape: f32[1,128], index: 2, kind: input, shape index: {}]   ;;  %s423_s3 = inlined_call_operand.vmem [shape: bf16[32,128], index: 3, kind: output, shape index: {}]  }
   0x1   :  { %9 = vsyncpa [#allocation6], 0  ;;  %s360_s12 = smov [#allocation3]   ;;  %s312_s16 = scalar_lea.hbm %s421_s1, 1024 }
   0x2   :  { %s17_s13 = sshll.u32 %s360_s12, 4  ;;  %p313_p0 = scmp.ne.s32.totalorder %s421_s1, %s312_s16  ;;  %s18_s13 = int_to_ptr.vmem [resolvable:$true] %s17_s13 }
   0x3   :  { %p316_p1 = scmp.lt.u32.totalorder %s312_s16, %s421_s1 }
   0x5   :  { %p318_p2 = pnand %p316_p1, %p313_p0 }
   0x7   :  { %321 = shalt.err (!%p318_p2)
}
   0x8   :  { %s322_s21 = scalar_lea.vmem %s18_s13, 1024  ;;  %p327_p4 = scmp.lt.s32.totalorder %s18_s13, %s18_s13 }
   0x9   :  { %p323_p3 = scmp.ne.s32.totalorder %s18_s13, %s322_s21  ;;  %p328_p5 = scmp.lt.s32.totalorder %s322_s21, %s322_s21 }
   0xb   :  { %p329_p6 = por %p328_p5, %p327_p4 }
   0xd   :  { %p330_p7 = pnand %p329_p6, %p323_p3 }
   0xf   :  { %333 = shalt.err (!%p330_p7)
}
  0x10   :  { %s361_s22 = smov 64   ;;  %s362_s23 = smov 4  }
  0x11   :  { %23 = dma.hbm_to_vmem [thread:$0]  %s421_s1, 1024, %s18_s13, [#allocation4], %s361_s22, %s361_s22, %s362_s23  }
  0x12   :  { %s363_s26 = smov [#allocation5]   ;;  %s334_s30 = scalar_lea.hbm %s422_s2, 16 }
  0x13   :  { %s30_s27 = sshll.u32 %s363_s26, 4  ;;  %p335_p8 = scmp.ne.s32.totalorder %s422_s2, %s334_s30  ;;  %s31_s27 = int_to_ptr.vmem [resolvable:$true] %s30_s27 }
  0x14   :  { %p338_p9 = scmp.lt.u32.totalorder %s334_s30, %s422_s2 }
  0x16   :  { %p340_p10 = pnand %p338_p9, %p335_p8 }
  0x18   :  { %343 = shalt.err (!%p340_p10)
}
  0x19   :  { %s344_s8 = scalar_lea.vmem %s31_s27, 16  ;;  %s348_s1 = scalar_lea.vmem %s31_s27, 32 }
  0x1a   :  { %p345_p11 = scmp.ne.s32.totalorder %s31_s27, %s344_s8  ;;  %p349_p12 = scmp.lt.s32.totalorder %s31_s27, %s31_s27 }
  0x1b   :  { %p350_p13 = scmp.lt.s32.totalorder %s348_s1, %s344_s8 }
  0x1d   :  { %p351_p0 = por %p350_p13, %p349_p12 }
  0x1f   :  { %p352_p1 = pnand %p351_p0, %p345_p11 }
  0x21   :  { %355 = shalt.err (!%p352_p1)
}
  0x22   :  { %33 = dma.hbm_to_vmem [thread:$0]  %s422_s2, 16, %s31_s27, [#allocation6]  }
  0x23   :  { %356 = dma.done.wait [#allocation4], 1024  }
  0x24   :  { %357 = vsyncadd [#allocation4], 4294966272 }
  0x25   :  { %358 = dma.done.wait [#allocation6], 16  }
  0x26   :  { %359 = vsyncadd [#allocation6], 4294967280  ;;  %v302_v0 = vld [vmem:[#allocation3] sm:$0xff]   ;;  %v303_v1 = vld [vmem:[#allocation3 + $0x8] sm:$0xff]  }
  0x27   :  { %278 = vmatprep.subr.bf16.mxu0 %v302_v0  ;;  %v304_v2 = vld [vmem:[#allocation3 + $0x10] sm:$0xff]   ;;  %v305_v3 = vld [vmem:[#allocation3 + $0x18] sm:$0xff]   ;;  %v310_v4 = vld [vmem:[%s420_s0] sm:$0xff]  }
  0x28   :  { %279 = vmatpush3.bf16.msra.mxu0 %v302_v0  ;;  %294 = vmatprep.mubr.bf16.mxu0 %v310_v4  ;;  %v306_v5 = vld [vmem:[#allocation3 + $0x20] sm:$0xff]   ;;  %v307_v6 = vld [vmem:[#allocation3 + $0x28] sm:$0xff]   ;;  %v308_v7 = vld [vmem:[#allocation3 + $0x30] sm:$0xff]  }
  0x29   :  { %280 = vmatprep.subr.bf16.mxu0 %v303_v1  ;;  %v309_v8 = vld [vmem:[#allocation3 + $0x38] sm:$0xff]   ;;  %v311_v9 = vld [vmem:[%s420_s0 + $0x8] sm:$0xff]   ;;  %v248_v10 = vld [vmem:[#allocation5] ss:$0 sm:$0xff] }
  0x2c   :  { %281 = vmatpush3.bf16.msra.mxu0 %v303_v1 }
  0x2d   :  { %282 = vmatprep.subr.bf16.mxu0 %v304_v2 }
  0x30   :  { %283 = vmatpush3.bf16.msra.mxu0 %v304_v2 }
  0x31   :  { %284 = vmatprep.subr.bf16.mxu0 %v305_v3 }
  0x34   :  { %285 = vmatpush3.bf16.msra.mxu0 %v305_v3 }
  0x35   :  { %286 = vmatprep.subr.bf16.mxu0 %v306_v5 }
  0x38   :  { %287 = vmatpush3.bf16.msra.mxu0 %v306_v5 }
  0x39   :  { %288 = vmatprep.subr.bf16.mxu0 %v307_v6 }
  0x3c   :  { %289 = vmatpush3.bf16.msra.mxu0 %v307_v6 }
  0x3d   :  { %290 = vmatprep.subr.bf16.mxu0 %v308_v7 }
  0x40   :  { %291 = vmatpush3.bf16.msra.mxu0 %v308_v7 }
  0x41   :  { %292 = vmatprep.subr.bf16.mxu0 %v309_v8 }
  0x44   :  { %293 = vmatpush3.bf16.msra.mxu0 %v309_v8 }
  0x47   :  { %295 = vmatmul.mubr.bf16.vlgmr.msra.gmra.mrb[0].mxu0 %v311_v9 }
 0x11a   :  { %v296_v11 = vpop.f32.mrb[0].mxu0 }
 0x11b   :  { %v206_v12 = vadd.f32 %v296_v11, %v248_v10  ;;  %v167_v13 = vpop.f32.mrb[1].mxu0 }
 0x11c   :  { %v204_v14 = vadd.f32 %v248_v10, %v167_v13  ;;  %v297_v15 = vpop.f32.mrb[2].mxu0 }
 0x11d   :  { %v207_v16 = vadd.f32 %v297_v15, %v248_v10  ;;  %v170_v17 = vpop.f32.mrb[3].mxu0  ;;  %v210_v19 = vmax.f32 %v206_v12, 0.0 }
 0x11e   :  { %v205_v18 = vadd.f32 %v248_v10, %v170_v17  ;;  %v208_v21 = vmax.f32 %v204_v14, 0.0 }
 0x11f   :  { %v211_v20 = vmax.f32 %v207_v16, 0.0 }
 0x120   :  { %v209_v22 = vmax.f32 %v205_v18, 0.0 }
 0x121   :  { %v265_v23 = vpack.c.bf16 %v211_v20, %v210_v19 }
 0x122   :  { %v260_v24 = vpack.c.bf16 %v209_v22, %v208_v21 }
 0x123   :  { %267 = vst [vmem:[%s423_s3 + $0x8] sm:$0xff] %v265_v23  }
 0x124   :  { %261 = vst [vmem:[%s423_s3] sm:$0xff] %v260_v24  }
 0x125   :  { %236 = vsyncpa [#allocation4], 1 }
 0x126   :  { %237 = vsyncpa [#allocation6], 1 }

// kernel: resnet_cifar100_forward.66
= control target key start
LH: loop header
LB: loop body
LE: loop exit
PB: predicated region body
PF: predicated region fallthrough
CT: control target
= control target key end

     0   :  { %11 = vsyncpa [#allocation4], 0  ;;  %s752_s0 = inlined_call_operand.vmem [shape: bf16[1,32,128], index: 0, kind: input, shape index: {}]   ;;  %s753_s1 = inlined_call_operand.hbm [shape: bf16[1,128,128], index: 1, kind: input, shape index: {}]   ;;  %s754_s2 = inlined_call_operand.hbm [shape: f32[1,128], index: 2, kind: input, shape index: {}]   ;;  %s755_s3 = inlined_call_operand.vmem [shape: bf16[1,32,128], index: 3, kind: input, shape index: {}]   ;;  %s756_s4 = inlined_call_operand.hbm [shape: bf16[1,128,128], index: 4, kind: input, shape index: {}]   ;;  %s757_s5 = inlined_call_operand.hbm [shape: f32[1,128], index: 5, kind: input, shape index: {}]   ;;  %s758_s6 = inlined_call_operand.vmem [shape: bf16[32,128], index: 6, kind: output, shape index: {}]  }
   0x1   :  { %12 = vsyncpa [#allocation6], 0 }
   0x2   :  { %13 = vsyncpa [#allocation9], 0  ;;  %s638_s21 = smov [#allocation5]   ;;  %s639_s23 = smov [#allocation3]  }
   0x3   :  { %s34_s22 = sshll.u32 %s638_s21, 4  ;;  %s21_s24 = sshll.u32 %s639_s23, 4  ;;  %s35_s22 = int_to_ptr.vmem [resolvable:$true] %s34_s22  ;;  %s679_s24 = int_to_ptr.vmem [resolvable:$true] %s21_s24 }
   0x4   :  { %s544_s27 = scalar_lea.hbm %s754_s2, 16 }
   0x5   :  { %p545_p0 = scmp.ne.s32.totalorder %s754_s2, %s544_s27  ;;  %p548_p1 = scmp.lt.u32.totalorder %s544_s27, %s754_s2 }
   0x7   :  { %p550_p2 = pnand %p548_p1, %p545_p0 }
   0x9   :  { %553 = shalt.err (!%p550_p2)
}
   0xa   :  { %s554_s8 = scalar_lea.vmem %s35_s22, 16  ;;  %s558_s9 = scalar_lea.vmem %s35_s22, 32 }
   0xb   :  { %p555_p3 = scmp.ne.s32.totalorder %s35_s22, %s554_s8  ;;  %p559_p4 = scmp.lt.s32.totalorder %s35_s22, %s35_s22 }
   0xc   :  { %p560_p5 = scmp.lt.s32.totalorder %s558_s9, %s554_s8 }
   0xe   :  { %p561_p6 = por %p560_p5, %p559_p4 }
  0x10   :  { %p562_p7 = pnand %p561_p6, %p555_p3 }
  0x12   :  { %565 = shalt.err (!%p562_p7)
}
  0x13   :  { %37 = dma.hbm_to_vmem [thread:$0]  %s754_s2, 16, %s35_s22, [#allocation6]  }
  0x14   :  { %s566_s14 = scalar_lea.hbm %s753_s1, 1024 }
  0x15   :  { %p567_p8 = scmp.ne.s32.totalorder %s753_s1, %s566_s14  ;;  %p570_p9 = scmp.lt.u32.totalorder %s566_s14, %s753_s1 }
  0x17   :  { %p572_p10 = pnand %p570_p9, %p567_p8 }
  0x19   :  { %575 = shalt.err (!%p572_p10)
}
  0x1a   :  { %s576_s19 = scalar_lea.vmem %s679_s24, 1024  ;;  %p581_p12 = scmp.lt.s32.totalorder %s679_s24, %s679_s24 }
  0x1b   :  { %p577_p11 = scmp.ne.s32.totalorder %s679_s24, %s576_s19  ;;  %p582_p13 = scmp.lt.s32.totalorder %s576_s19, %s576_s19 }
  0x1d   :  { %p583_p0 = por %p582_p13, %p581_p12 }
  0x1f   :  { %p584_p1 = pnand %p583_p0, %p577_p11 }
  0x21   :  { %587 = shalt.err (!%p584_p1)
}
  0x22   :  { %s640_s2 = smov 64   ;;  %s641_s20 = smov 4  }
  0x23   :  { %27 = dma.hbm_to_vmem [thread:$0]  %s753_s1, 1024, %s679_s24, [#allocation4], %s640_s2, %s640_s2, %s641_s20  }
  0x24   :  { %s642_s23 = smov [#allocation7]   ;;  %s643_s26 = smov [#allocation8]  }
  0x25   :  { %s45_s25 = sshll.u32 %s642_s23, 4  ;;  %s58_s27 = sshll.u32 %s643_s26, 4  ;;  %s46_s25 = int_to_ptr.vmem [resolvable:$true] %s45_s25  ;;  %s59_s27 = int_to_ptr.vmem [resolvable:$true] %s58_s27 }
  0x26   :  { %s588_s30 = scalar_lea.hbm %s756_s4, 1024 }
  0x27   :  { %p589_p2 = scmp.ne.s32.totalorder %s756_s4, %s588_s30  ;;  %p592_p3 = scmp.lt.u32.totalorder %s588_s30, %s756_s4 }
  0x29   :  { %p594_p4 = pnand %p592_p3, %p589_p2 }
  0x2b   :  { %597 = shalt.err (!%p594_p4)
}
  0x2c   :  { %s598_s1 = scalar_lea.vmem %s46_s25, 1024  ;;  %p603_p6 = scmp.lt.s32.totalorder %s46_s25, %s46_s25 }
  0x2d   :  { %p599_p5 = scmp.ne.s32.totalorder %s46_s25, %s598_s1  ;;  %p604_p7 = scmp.lt.s32.totalorder %s598_s1, %s598_s1 }
  0x2f   :  { %p605_p8 = por %p604_p7, %p603_p6 }
  0x31   :  { %p606_p9 = pnand %p605_p8, %p599_p5 }
  0x33   :  { %609 = shalt.err (!%p606_p9)
}
  0x34   :  { %51 = dma.hbm_to_vmem [thread:$0]  %s756_s4, 1024, %s46_s25, [#allocation6], %s640_s2, %s640_s2, %s641_s20  }
  0x35   :  { %s610_s14 = scalar_lea.hbm %s757_s5, 16 }
  0x36   :  { %p611_p10 = scmp.ne.s32.totalorder %s757_s5, %s610_s14  ;;  %p614_p11 = scmp.lt.u32.totalorder %s610_s14, %s757_s5 }
  0x38   :  { %p616_p12 = pnand %p614_p11, %p611_p10 }
  0x3a   :  { %619 = shalt.err (!%p616_p12)
}
  0x3b   :  { %s620_s19 = scalar_lea.vmem %s59_s27, 16  ;;  %s624_s21 = scalar_lea.vmem %s59_s27, 32 }
  0x3c   :  { %p621_p13 = scmp.ne.s32.totalorder %s59_s27, %s620_s19  ;;  %p625_p0 = scmp.lt.s32.totalorder %s59_s27, %s59_s27 }
  0x3d   :  { %p626_p1 = scmp.lt.s32.totalorder %s624_s21, %s620_s19 }
  0x3f   :  { %p627_p2 = por %p626_p1, %p625_p0 }
  0x41   :  { %p628_p3 = pnand %p627_p2, %p621_p13 }
  0x43   :  { %631 = shalt.err (!%p628_p3)
}
  0x44   :  { %61 = dma.hbm_to_vmem [thread:$0]  %s757_s5, 16, %s59_s27, [#allocation9]  }
  0x45   :  { %632 = dma.done.wait [#allocation4], 1024  }
  0x46   :  { %633 = vsyncadd [#allocation4], 4294966272 }
  0x47   :  { %634 = dma.done.wait [#allocation6], 1040  }
  0x48   :  { %635 = vsyncadd [#allocation6], 4294966256 }
  0x49   :  { %636 = dma.done.wait [#allocation9], 16  }
  0x4a   :  { %637 = vsyncadd [#allocation9], 4294967280  ;;  %v524_v0 = vld [vmem:[#allocation7] sm:$0xff]   ;;  %v526_v2 = vld [vmem:[#allocation7 + $0x8] sm:$0xff]  }
  0x4b   :  { %v525_v1 = vld [vmem:[#allocation3] sm:$0xff]   ;;  %470 = vmatprep.subr.bf16.mxu1 %v524_v0  ;;  %v527_v3 = vld [vmem:[#allocation3 + $0x8] sm:$0xff]   ;;  %v528_v4 = vld [vmem:[#allocation7 + $0x10] sm:$0xff]  }
  0x4c   :  { %490 = vmatprep.subr.bf16.mxu0 %v525_v1  ;;  %471 = vmatpush3.bf16.msra.mxu1 %v524_v0  ;;  %v529_v5 = vld [vmem:[#allocation3 + $0x10] sm:$0xff]   ;;  %v530_v6 = vld [vmem:[#allocation7 + $0x18] sm:$0xff]   ;;  %v532_v8 = vld [vmem:[#allocation7 + $0x20] sm:$0xff]  }
  0x4d   :  { %491 = vmatpush3.bf16.msra.mxu0 %v525_v1  ;;  %472 = vmatprep.subr.bf16.mxu1 %v526_v2  ;;  %v531_v7 = vld [vmem:[#allocation3 + $0x18] sm:$0xff]   ;;  %v533_v9 = vld [vmem:[#allocation3 + $0x20] sm:$0xff]   ;;  %v534_v10 = vld [vmem:[#allocation7 + $0x28] sm:$0xff]  }
  0x4e   :  { %492 = vmatprep.subr.bf16.mxu0 %v527_v3  ;;  %v535_v11 = vld [vmem:[#allocation3 + $0x28] sm:$0xff]   ;;  %v540_v12 = vld [vmem:[%s755_s3] sm:$0xff]   ;;  %v536_v14 = vld [vmem:[#allocation7 + $0x30] sm:$0xff]  }
  0x4f   :  { %v541_v13 = vld [vmem:[%s752_s0] sm:$0xff]   ;;  %486 = vmatprep.mubr.bf16.mxu1 %v540_v12  ;;  %v537_v15 = vld [vmem:[#allocation3 + $0x30] sm:$0xff]   ;;  %v539_v17 = vld [vmem:[#allocation3 + $0x38] sm:$0xff]  }
  0x50   :  { %473 = vmatpush3.bf16.msra.mxu1 %v526_v2  ;;  %506 = vmatprep.mubr.bf16.mxu0 %v541_v13  ;;  %v538_v16 = vld [vmem:[#allocation7 + $0x38] sm:$0xff]   ;;  %v542_v18 = vld [vmem:[%s755_s3 + $0x8] sm:$0xff]   ;;  %v409_v20 = vld [vmem:[#allocation8] ss:$0 sm:$0xff] }
  0x51   :  { %493 = vmatpush3.bf16.msra.mxu0 %v527_v3  ;;  %474 = vmatprep.subr.bf16.mxu1 %v528_v4  ;;  %v543_v19 = vld [vmem:[%s752_s0 + $0x8] sm:$0xff]   ;;  %v430_v25 = vld [vmem:[#allocation5] ss:$0 sm:$0xff] }
  0x52   :  { %494 = vmatprep.subr.bf16.mxu0 %v529_v5 }
  0x54   :  { %475 = vmatpush3.bf16.msra.mxu1 %v528_v4 }
  0x55   :  { %495 = vmatpush3.bf16.msra.mxu0 %v529_v5  ;;  %476 = vmatprep.subr.bf16.mxu1 %v530_v6 }
  0x56   :  { %496 = vmatprep.subr.bf16.mxu0 %v531_v7 }
  0x58   :  { %477 = vmatpush3.bf16.msra.mxu1 %v530_v6 }
  0x59   :  { %497 = vmatpush3.bf16.msra.mxu0 %v531_v7  ;;  %478 = vmatprep.subr.bf16.mxu1 %v532_v8 }
  0x5a   :  { %498 = vmatprep.subr.bf16.mxu0 %v533_v9 }
  0x5c   :  { %479 = vmatpush3.bf16.msra.mxu1 %v532_v8 }
  0x5d   :  { %499 = vmatpush3.bf16.msra.mxu0 %v533_v9  ;;  %480 = vmatprep.subr.bf16.mxu1 %v534_v10 }
  0x5e   :  { %500 = vmatprep.subr.bf16.mxu0 %v535_v11 }
  0x60   :  { %481 = vmatpush3.bf16.msra.mxu1 %v534_v10 }
  0x61   :  { %501 = vmatpush3.bf16.msra.mxu0 %v535_v11  ;;  %482 = vmatprep.subr.bf16.mxu1 %v536_v14 }
  0x62   :  { %502 = vmatprep.subr.bf16.mxu0 %v537_v15 }
  0x64   :  { %483 = vmatpush3.bf16.msra.mxu1 %v536_v14 }
  0x65   :  { %503 = vmatpush3.bf16.msra.mxu0 %v537_v15  ;;  %484 = vmatprep.subr.bf16.mxu1 %v538_v16 }
  0x66   :  { %504 = vmatprep.subr.bf16.mxu0 %v539_v17 }
  0x68   :  { %485 = vmatpush3.bf16.msra.mxu1 %v538_v16 }
  0x69   :  { %505 = vmatpush3.bf16.msra.mxu0 %v539_v17 }
  0x6b   :  { %487 = vmatmul.mubr.bf16.vlgmr.msra.gmra.mrb[0].mxu1 %v542_v18 }
  0x6c   :  { %507 = vmatmul.mubr.bf16.vlgmr.msra.gmra.mrb[0].mxu0 %v543_v19 }
 0x13e   :  { %v488_v21 = vpop.f32.mrb[0].mxu1 }
 0x13f   :  { %v209_v22 = vadd.f32 %v488_v21, %v409_v20  ;;  %v508_v23 = vpop.f32.mrb[0].mxu0  ;;  %v200_v24 = vpop.f32.mrb[1].mxu1 }
 0x140   :  { %v201_v26 = vadd.f32 %v409_v20, %v200_v24  ;;  %v337_v27 = vpop.f32.mrb[1].mxu0  ;;  %v489_v28 = vpop.f32.mrb[2].mxu1 }
 0x141   :  { %v354_v29 = vadd.f32 %v508_v23, %v209_v22  ;;  %v212_v30 = vadd.f32 %v489_v28, %v409_v20  ;;  %v509_v31 = vpop.f32.mrb[2].mxu0  ;;  %v203_v32 = vpop.f32.mrb[3].mxu1 }
 0x142   :  { %v352_v33 = vadd.f32 %v337_v27, %v201_v26  ;;  %v204_v34 = vadd.f32 %v409_v20, %v203_v32  ;;  %v340_v35 = vpop.f32.mrb[3].mxu0 }
 0x143   :  { %v376_v36 = vadd.f32 %v430_v25, %v354_v29  ;;  %v355_v37 = vadd.f32 %v509_v31, %v212_v30 }
 0x144   :  { %v374_v38 = vadd.f32 %v430_v25, %v352_v33  ;;  %v353_v39 = vadd.f32 %v340_v35, %v204_v34 }
 0x145   :  { %v377_v40 = vadd.f32 %v430_v25, %v355_v37  ;;  %v380_v42 = vmax.f32 %v376_v36, 0.0 }
 0x146   :  { %v375_v41 = vadd.f32 %v430_v25, %v353_v39  ;;  %v378_v44 = vmax.f32 %v374_v38, 0.0 }
 0x147   :  { %v381_v43 = vmax.f32 %v377_v40, 0.0 }
 0x148   :  { %v379_v45 = vmax.f32 %v375_v41, 0.0 }
 0x149   :  { %v447_v46 = vpack.c.bf16 %v381_v43, %v380_v42 }
 0x14a   :  { %v442_v47 = vpack.c.bf16 %v379_v45, %v378_v44 }
 0x14b   :  { %449 = vst [vmem:[%s758_s6 + $0x8] sm:$0xff] %v447_v46  }
 0x14c   :  { %443 = vst [vmem:[%s758_s6] sm:$0xff] %v442_v47  }
 0x14d   :  { %406 = vsyncpa [#allocation4], 1 }
 0x14e   :  { %407 = vsyncpa [#allocation6], 1 }
 0x14f   :  { %408 = vsyncpa [#allocation9], 1 }

// kernel: resnet_cifar100_forward.72
= control target key start
LH: loop header
LB: loop body
LE: loop exit
PB: predicated region body
PF: predicated region fallthrough
CT: control target
= control target key end

     0   :  { %9 = vsyncpa [#allocation4], 0  ;;  %s455_s0 = inlined_call_operand.vmem [shape: bf16[1,32,128], index: 0, kind: input, shape index: {}]   ;;  %s456_s1 = inlined_call_operand.hbm [shape: bf16[1,128,128], index: 1, kind: input, shape index: {}]   ;;  %s457_s2 = inlined_call_operand.hbm [shape: f32[1,128], index: 2, kind: input, shape index: {}]   ;;  %s458_s3 = inlined_call_operand.vmem [shape: bf16[32,128], index: 3, kind: input, shape index: {}]   ;;  %s459_s4 = inlined_call_operand.vmem [shape: bf16[32,128], index: 4, kind: output, shape index: {}]  }
   0x1   :  { %10 = vsyncpa [#allocation6], 0  ;;  %s384_s15 = smov [#allocation3]   ;;  %s336_s19 = scalar_lea.hbm %s456_s1, 1024 }
   0x2   :  { %s18_s16 = sshll.u32 %s384_s15, 4  ;;  %p337_p0 = scmp.ne.s32.totalorder %s456_s1, %s336_s19  ;;  %s19_s16 = int_to_ptr.vmem [resolvable:$true] %s18_s16 }
   0x3   :  { %p340_p1 = scmp.lt.u32.totalorder %s336_s19, %s456_s1 }
   0x5   :  { %p342_p2 = pnand %p340_p1, %p337_p0 }
   0x7   :  { %345 = shalt.err (!%p342_p2)
}
   0x8   :  { %s346_s24 = scalar_lea.vmem %s19_s16, 1024  ;;  %p351_p4 = scmp.lt.s32.totalorder %s19_s16, %s19_s16 }
   0x9   :  { %p347_p3 = scmp.ne.s32.totalorder %s19_s16, %s346_s24  ;;  %p352_p5 = scmp.lt.s32.totalorder %s346_s24, %s346_s24 }
   0xb   :  { %p353_p6 = por %p352_p5, %p351_p4 }
   0xd   :  { %p354_p7 = pnand %p353_p6, %p347_p3 }
   0xf   :  { %357 = shalt.err (!%p354_p7)
}
  0x10   :  { %s385_s25 = smov 64   ;;  %s386_s26 = smov 4  }
  0x11   :  { %24 = dma.hbm_to_vmem [thread:$0]  %s456_s1, 1024, %s19_s16, [#allocation4], %s385_s25, %s385_s25, %s386_s26  }
  0x12   :  { %s387_s29 = smov [#allocation5]   ;;  %s358_s7 = scalar_lea.hbm %s457_s2, 16 }
  0x13   :  { %s31_s30 = sshll.u32 %s387_s29, 4  ;;  %p359_p8 = scmp.ne.s32.totalorder %s457_s2, %s358_s7  ;;  %s32_s30 = int_to_ptr.vmem [resolvable:$true] %s31_s30 }
  0x14   :  { %p362_p9 = scmp.lt.u32.totalorder %s358_s7, %s457_s2 }
  0x16   :  { %p364_p10 = pnand %p362_p9, %p359_p8 }
  0x18   :  { %367 = shalt.err (!%p364_p10)
}
  0x19   :  { %s368_s12 = scalar_lea.vmem %s32_s30, 16  ;;  %s372_s1 = scalar_lea.vmem %s32_s30, 32 }
  0x1a   :  { %p369_p11 = scmp.ne.s32.totalorder %s32_s30, %s368_s12  ;;  %p373_p12 = scmp.lt.s32.totalorder %s32_s30, %s32_s30 }
  0x1b   :  { %p374_p13 = scmp.lt.s32.totalorder %s372_s1, %s368_s12 }
  0x1d   :  { %p375_p0 = por %p374_p13, %p373_p12 }
  0x1f   :  { %p376_p1 = pnand %p375_p0, %p369_p11 }
  0x21   :  { %379 = shalt.err (!%p376_p1)
}
  0x22   :  { %34 = dma.hbm_to_vmem [thread:$0]  %s457_s2, 16, %s32_s30, [#allocation6]  }
  0x23   :  { %380 = dma.done.wait [#allocation4], 1024  }
  0x24   :  { %381 = vsyncadd [#allocation4], 4294966272 }
  0x25   :  { %382 = dma.done.wait [#allocation6], 16  }
  0x26   :  { %383 = vsyncadd [#allocation6], 4294967280  ;;  %v326_v0 = vld [vmem:[#allocation3] sm:$0xff]   ;;  %v327_v1 = vld [vmem:[#allocation3 + $0x8] sm:$0xff]  }
  0x27   :  { %302 = vmatprep.subr.bf16.mxu0 %v326_v0  ;;  %v328_v2 = vld [vmem:[#allocation3 + $0x10] sm:$0xff]   ;;  %v329_v3 = vld [vmem:[#allocation3 + $0x18] sm:$0xff]   ;;  %v334_v4 = vld [vmem:[%s455_s0] sm:$0xff]  }
  0x28   :  { %303 = vmatpush3.bf16.msra.mxu0 %v326_v0  ;;  %318 = vmatprep.mubr.bf16.mxu0 %v334_v4  ;;  %v330_v5 = vld [vmem:[#allocation3 + $0x20] sm:$0xff]   ;;  %v331_v6 = vld [vmem:[#allocation3 + $0x28] sm:$0xff]   ;;  %v332_v7 = vld [vmem:[#allocation3 + $0x30] sm:$0xff]  }
  0x29   :  { %304 = vmatprep.subr.bf16.mxu0 %v327_v1  ;;  %v333_v8 = vld [vmem:[#allocation3 + $0x38] sm:$0xff]   ;;  %v335_v9 = vld [vmem:[%s455_s0 + $0x8] sm:$0xff]   ;;  %v273_v11 = vld [vmem:[%s458_s3] sm:$0xff]  }
  0x2a   :  { %v290_v10 = vld [vmem:[%s458_s3 + $0x8] sm:$0xff]   ;;  %v263_v12 = vld [vmem:[#allocation5] ss:$0 sm:$0xff]  ;;  %v274_v15 = vunpack.c.l.bf16 %v273_v11  ;;  %v275_v21 = vunpack.c.h.bf16 %v273_v11 }
  0x2b   :  { %v278_v13 = vunpack.c.l.bf16 %v290_v10  ;;  %v279_v18 = vunpack.c.h.bf16 %v290_v10 }
  0x2c   :  { %305 = vmatpush3.bf16.msra.mxu0 %v327_v1 }
  0x2d   :  { %306 = vmatprep.subr.bf16.mxu0 %v328_v2 }
  0x30   :  { %307 = vmatpush3.bf16.msra.mxu0 %v328_v2 }
  0x31   :  { %308 = vmatprep.subr.bf16.mxu0 %v329_v3 }
  0x34   :  { %309 = vmatpush3.bf16.msra.mxu0 %v329_v3 }
  0x35   :  { %310 = vmatprep.subr.bf16.mxu0 %v330_v5 }
  0x38   :  { %311 = vmatpush3.bf16.msra.mxu0 %v330_v5 }
  0x39   :  { %312 = vmatprep.subr.bf16.mxu0 %v331_v6 }
  0x3c   :  { %313 = vmatpush3.bf16.msra.mxu0 %v331_v6 }
  0x3d   :  { %314 = vmatprep.subr.bf16.mxu0 %v332_v7 }
  0x40   :  { %315 = vmatpush3.bf16.msra.mxu0 %v332_v7 }
  0x41   :  { %316 = vmatprep.subr.bf16.mxu0 %v333_v8 }
  0x44   :  { %317 = vmatpush3.bf16.msra.mxu0 %v333_v8 }
  0x47   :  { %319 = vmatmul.mubr.bf16.vlgmr.msra.gmra.mrb[0].mxu0 %v335_v9 }
 0x11a   :  { %v320_v14 = vpop.f32.mrb[0].mxu0 }
 0x11b   :  { %v209_v16 = vadd.f32 %v320_v14, %v263_v12  ;;  %v170_v17 = vpop.f32.mrb[1].mxu0 }
 0x11c   :  { %v207_v19 = vadd.f32 %v263_v12, %v170_v17  ;;  %v321_v20 = vpop.f32.mrb[2].mxu0 }
 0x11d   :  { %v221_v22 = vadd.f32 %v278_v13, %v209_v16  ;;  %v210_v23 = vadd.f32 %v321_v20, %v263_v12  ;;  %v173_v24 = vpop.f32.mrb[3].mxu0 }
 0x11e   :  { %v219_v25 = vadd.f32 %v274_v15, %v207_v19  ;;  %v208_v26 = vadd.f32 %v263_v12, %v173_v24 }
 0x11f   :  { %v222_v27 = vadd.f32 %v279_v18, %v210_v23  ;;  %v225_v29 = vmax.f32 %v221_v22, 0.0 }
 0x120   :  { %v220_v28 = vadd.f32 %v275_v21, %v208_v26  ;;  %v223_v31 = vmax.f32 %v219_v25, 0.0 }
 0x121   :  { %v226_v30 = vmax.f32 %v222_v27, 0.0 }
 0x122   :  { %v224_v32 = vmax.f32 %v220_v28, 0.0 }
 0x123   :  { %v288_v33 = vpack.c.bf16 %v226_v30, %v225_v29 }
 0x124   :  { %v283_v34 = vpack.c.bf16 %v224_v32, %v223_v31 }
 0x125   :  { %291 = vst [vmem:[%s459_s4 + $0x8] sm:$0xff] %v288_v33  }
 0x126   :  { %284 = vst [vmem:[%s459_s4] sm:$0xff] %v283_v34  }
 0x127   :  { %251 = vsyncpa [#allocation4], 1 }
 0x128   :  { %252 = vsyncpa [#allocation6], 1 }

// kernel: resnet_cifar100_forward.69
= control target key start
LH: loop header
LB: loop body
LE: loop exit
PB: predicated region body
PF: predicated region fallthrough
CT: control target
= control target key end

     0   :  { %9 = vsyncpa [#allocation4], 0  ;;  %s342_s15 = smov [#allocation3]   ;;  %s422_s0 = inlined_call_operand.vmem [shape: bf16[1,32,128], index: 0, kind: input, shape index: {}]   ;;  %s423_s1 = inlined_call_operand.vmem [shape: bf16[1,128,128], index: 1, kind: input, shape index: {}]   ;;  %s424_s2 = inlined_call_operand.hbm [shape: f32[1,128], index: 2, kind: input, shape index: {}]   ;;  %s425_s3 = inlined_call_operand.vmem [shape: bf16[32,128], index: 3, kind: input, shape index: {}]   ;;  %s426_s4 = inlined_call_operand.vmem [shape: bf16[32,128], index: 4, kind: output, shape index: {}]  }
   0x1   :  { %s20_s16 = sshll.u32 %s342_s15, 4  ;;  %s318_s19 = scalar_lea.hbm %s424_s2, 16  ;;  %s21_s16 = int_to_ptr.vmem [resolvable:$true] %s20_s16 }
   0x2   :  { %p319_p0 = scmp.ne.s32.totalorder %s424_s2, %s318_s19  ;;  %p322_p1 = scmp.lt.u32.totalorder %s318_s19, %s424_s2 }
   0x4   :  { %p324_p2 = pnand %p322_p1, %p319_p0 }
   0x6   :  { %327 = shalt.err (!%p324_p2)
}
   0x7   :  { %s328_s24 = scalar_lea.vmem %s21_s16, 16  ;;  %s332_s25 = scalar_lea.vmem %s21_s16, 32 }
   0x8   :  { %p329_p3 = scmp.ne.s32.totalorder %s21_s16, %s328_s24  ;;  %p333_p4 = scmp.lt.s32.totalorder %s21_s16, %s21_s16 }
   0x9   :  { %p334_p5 = scmp.lt.s32.totalorder %s332_s25, %s328_s24 }
   0xb   :  { %p335_p6 = por %p334_p5, %p333_p4 }
   0xd   :  { %p336_p7 = pnand %p335_p6, %p329_p3 }
   0xf   :  { %339 = shalt.err (!%p336_p7)
}
  0x10   :  { %23 = dma.hbm_to_vmem [thread:$0]  %s424_s2, 16, %s21_s16, [#allocation4]  }
  0x11   :  { %340 = dma.done.wait [#allocation4], 16  }
  0x12   :  { %341 = vsyncadd [#allocation4], 4294967280  ;;  %v308_v0 = vld [vmem:[%s423_s1] sm:$0xff]   ;;  %v309_v1 = vld [vmem:[%s423_s1 + $0x8] sm:$0xff]  }
  0x13   :  { %287 = vmatprep.subr.bf16.mxu0 %v308_v0  ;;  %v310_v2 = vld [vmem:[%s423_s1 + $0x10] sm:$0xff]   ;;  %v311_v3 = vld [vmem:[%s423_s1 + $0x18] sm:$0xff]   ;;  %v316_v4 = vld [vmem:[%s422_s0] sm:$0xff]  }
  0x14   :  { %288 = vmatpush3.bf16.msra.mxu0 %v308_v0  ;;  %303 = vmatprep.mubr.bf16.mxu0 %v316_v4  ;;  %v312_v5 = vld [vmem:[%s423_s1 + $0x20] sm:$0xff]   ;;  %v313_v6 = vld [vmem:[%s423_s1 + $0x28] sm:$0xff]   ;;  %v314_v7 = vld [vmem:[%s423_s1 + $0x30] sm:$0xff]  }
  0x15   :  { %289 = vmatprep.subr.bf16.mxu0 %v309_v1  ;;  %v315_v8 = vld [vmem:[%s423_s1 + $0x38] sm:$0xff]   ;;  %v317_v9 = vld [vmem:[%s422_s0 + $0x8] sm:$0xff]   ;;  %v258_v11 = vld [vmem:[%s425_s3] sm:$0xff]  }
  0x16   :  { %v275_v10 = vld [vmem:[%s425_s3 + $0x8] sm:$0xff]   ;;  %v248_v12 = vld [vmem:[#allocation3] ss:$0 sm:$0xff]  ;;  %v259_v15 = vunpack.c.l.bf16 %v258_v11  ;;  %v260_v21 = vunpack.c.h.bf16 %v258_v11 }
  0x17   :  { %v263_v13 = vunpack.c.l.bf16 %v275_v10  ;;  %v264_v18 = vunpack.c.h.bf16 %v275_v10 }
  0x18   :  { %290 = vmatpush3.bf16.msra.mxu0 %v309_v1 }
  0x19   :  { %291 = vmatprep.subr.bf16.mxu0 %v310_v2 }
  0x1c   :  { %292 = vmatpush3.bf16.msra.mxu0 %v310_v2 }
  0x1d   :  { %293 = vmatprep.subr.bf16.mxu0 %v311_v3 }
  0x20   :  { %294 = vmatpush3.bf16.msra.mxu0 %v311_v3 }
  0x21   :  { %295 = vmatprep.subr.bf16.mxu0 %v312_v5 }
  0x24   :  { %296 = vmatpush3.bf16.msra.mxu0 %v312_v5 }
  0x25   :  { %297 = vmatprep.subr.bf16.mxu0 %v313_v6 }
  0x28   :  { %298 = vmatpush3.bf16.msra.mxu0 %v313_v6 }
  0x29   :  { %299 = vmatprep.subr.bf16.mxu0 %v314_v7 }
  0x2c   :  { %300 = vmatpush3.bf16.msra.mxu0 %v314_v7 }
  0x2d   :  { %301 = vmatprep.subr.bf16.mxu0 %v315_v8 }
  0x30   :  { %302 = vmatpush3.bf16.msra.mxu0 %v315_v8 }
  0x33   :  { %304 = vmatmul.mubr.bf16.vlgmr.msra.gmra.mrb[0].mxu0 %v317_v9 }
 0x106   :  { %v305_v14 = vpop.f32.mrb[0].mxu0 }
 0x107   :  { %v195_v16 = vadd.f32 %v305_v14, %v248_v12  ;;  %v156_v17 = vpop.f32.mrb[1].mxu0 }
 0x108   :  { %v193_v19 = vadd.f32 %v248_v12, %v156_v17  ;;  %v306_v20 = vpop.f32.mrb[2].mxu0 }
 0x109   :  { %v207_v22 = vadd.f32 %v263_v13, %v195_v16  ;;  %v196_v23 = vadd.f32 %v306_v20, %v248_v12  ;;  %v159_v24 = vpop.f32.mrb[3].mxu0 }
 0x10a   :  { %v205_v25 = vadd.f32 %v259_v15, %v193_v19  ;;  %v194_v26 = vadd.f32 %v248_v12, %v159_v24 }
 0x10b   :  { %v208_v27 = vadd.f32 %v264_v18, %v196_v23  ;;  %v211_v29 = vmax.f32 %v207_v22, 0.0 }
 0x10c   :  { %v206_v28 = vadd.f32 %v260_v21, %v194_v26  ;;  %v209_v31 = vmax.f32 %v205_v25, 0.0 }
 0x10d   :  { %v212_v30 = vmax.f32 %v208_v27, 0.0 }
 0x10e   :  { %v210_v32 = vmax.f32 %v206_v28, 0.0 }
 0x10f   :  { %v273_v33 = vpack.c.bf16 %v212_v30, %v211_v29 }
 0x110   :  { %v268_v34 = vpack.c.bf16 %v210_v32, %v209_v31 }
 0x111   :  { %276 = vst [vmem:[%s426_s4 + $0x8] sm:$0xff] %v273_v33  }
 0x112   :  { %269 = vst [vmem:[%s426_s4] sm:$0xff] %v268_v34  }
 0x113   :  { %237 = vsyncpa [#allocation4], 1 }

// kernel: resnet_cifar100_forward.76
= control target key start
LH: loop header
LB: loop body
LE: loop exit
PB: predicated region body
PF: predicated region fallthrough
CT: control target
= control target key end

     0   :  { %8 = vsyncpa [#allocation4], 0  ;;  %s318_s12 = smov [#allocation3]   ;;  %s387_s0 = inlined_call_operand.vmem [shape: bf16[1,32,128], index: 0, kind: input, shape index: {}]   ;;  %s388_s1 = inlined_call_operand.vmem [shape: bf16[1,128,128], index: 1, kind: input, shape index: {}]   ;;  %s389_s2 = inlined_call_operand.hbm [shape: f32[1,128], index: 2, kind: input, shape index: {}]   ;;  %s390_s3 = inlined_call_operand.vmem [shape: bf16[32,128], index: 3, kind: output, shape index: {}]  }
   0x1   :  { %s19_s13 = sshll.u32 %s318_s12, 4  ;;  %s294_s16 = scalar_lea.hbm %s389_s2, 16  ;;  %s20_s13 = int_to_ptr.vmem [resolvable:$true] %s19_s13 }
   0x2   :  { %p295_p0 = scmp.ne.s32.totalorder %s389_s2, %s294_s16  ;;  %p298_p1 = scmp.lt.u32.totalorder %s294_s16, %s389_s2 }
   0x4   :  { %p300_p2 = pnand %p298_p1, %p295_p0 }
   0x6   :  { %303 = shalt.err (!%p300_p2)
}
   0x7   :  { %s304_s21 = scalar_lea.vmem %s20_s13, 16  ;;  %s308_s22 = scalar_lea.vmem %s20_s13, 32 }
   0x8   :  { %p305_p3 = scmp.ne.s32.totalorder %s20_s13, %s304_s21  ;;  %p309_p4 = scmp.lt.s32.totalorder %s20_s13, %s20_s13 }
   0x9   :  { %p310_p5 = scmp.lt.s32.totalorder %s308_s22, %s304_s21 }
   0xb   :  { %p311_p6 = por %p310_p5, %p309_p4 }
   0xd   :  { %p312_p7 = pnand %p311_p6, %p305_p3 }
   0xf   :  { %315 = shalt.err (!%p312_p7)
}
  0x10   :  { %22 = dma.hbm_to_vmem [thread:$0]  %s389_s2, 16, %s20_s13, [#allocation4]  }
  0x11   :  { %316 = dma.done.wait [#allocation4], 16  }
  0x12   :  { %317 = vsyncadd [#allocation4], 4294967280  ;;  %v284_v0 = vld [vmem:[%s388_s1] sm:$0xff]   ;;  %v285_v1 = vld [vmem:[%s388_s1 + $0x8] sm:$0xff]  }
  0x13   :  { %263 = vmatprep.subr.bf16.mxu0 %v284_v0  ;;  %v286_v2 = vld [vmem:[%s388_s1 + $0x10] sm:$0xff]   ;;  %v287_v3 = vld [vmem:[%s388_s1 + $0x18] sm:$0xff]   ;;  %v292_v4 = vld [vmem:[%s387_s0] sm:$0xff]  }
  0x14   :  { %264 = vmatpush3.bf16.msra.mxu0 %v284_v0  ;;  %279 = vmatprep.mubr.bf16.mxu0 %v292_v4  ;;  %v288_v5 = vld [vmem:[%s388_s1 + $0x20] sm:$0xff]   ;;  %v289_v6 = vld [vmem:[%s388_s1 + $0x28] sm:$0xff]   ;;  %v290_v7 = vld [vmem:[%s388_s1 + $0x30] sm:$0xff]  }
  0x15   :  { %265 = vmatprep.subr.bf16.mxu0 %v285_v1  ;;  %v291_v8 = vld [vmem:[%s388_s1 + $0x38] sm:$0xff]   ;;  %v293_v9 = vld [vmem:[%s387_s0 + $0x8] sm:$0xff]   ;;  %v233_v10 = vld [vmem:[#allocation3] ss:$0 sm:$0xff] }
  0x18   :  { %266 = vmatpush3.bf16.msra.mxu0 %v285_v1 }
  0x19   :  { %267 = vmatprep.subr.bf16.mxu0 %v286_v2 }
  0x1c   :  { %268 = vmatpush3.bf16.msra.mxu0 %v286_v2 }
  0x1d   :  { %269 = vmatprep.subr.bf16.mxu0 %v287_v3 }
  0x20   :  { %270 = vmatpush3.bf16.msra.mxu0 %v287_v3 }
  0x21   :  { %271 = vmatprep.subr.bf16.mxu0 %v288_v5 }
  0x24   :  { %272 = vmatpush3.bf16.msra.mxu0 %v288_v5 }
  0x25   :  { %273 = vmatprep.subr.bf16.mxu0 %v289_v6 }
  0x28   :  { %274 = vmatpush3.bf16.msra.mxu0 %v289_v6 }
  0x29   :  { %275 = vmatprep.subr.bf16.mxu0 %v290_v7 }
  0x2c   :  { %276 = vmatpush3.bf16.msra.mxu0 %v290_v7 }
  0x2d   :  { %277 = vmatprep.subr.bf16.mxu0 %v291_v8 }
  0x30   :  { %278 = vmatpush3.bf16.msra.mxu0 %v291_v8 }
  0x33   :  { %280 = vmatmul.mubr.bf16.vlgmr.msra.gmra.mrb[0].mxu0 %v293_v9 }
 0x106   :  { %v281_v11 = vpop.f32.mrb[0].mxu0 }
 0x107   :  { %v192_v12 = vadd.f32 %v281_v11, %v233_v10  ;;  %v153_v13 = vpop.f32.mrb[1].mxu0 }
 0x108   :  { %v190_v14 = vadd.f32 %v233_v10, %v153_v13  ;;  %v282_v15 = vpop.f32.mrb[2].mxu0 }
 0x109   :  { %v193_v16 = vadd.f32 %v282_v15, %v233_v10  ;;  %v156_v17 = vpop.f32.mrb[3].mxu0  ;;  %v196_v19 = vmax.f32 %v192_v12, 0.0 }
 0x10a   :  { %v191_v18 = vadd.f32 %v233_v10, %v156_v17  ;;  %v194_v21 = vmax.f32 %v190_v14, 0.0 }
 0x10b   :  { %v197_v20 = vmax.f32 %v193_v16, 0.0 }
 0x10c   :  { %v195_v22 = vmax.f32 %v191_v18, 0.0 }
 0x10d   :  { %v250_v23 = vpack.c.bf16 %v197_v20, %v196_v19 }
 0x10e   :  { %v245_v24 = vpack.c.bf16 %v195_v22, %v194_v21 }
 0x10f   :  { %252 = vst [vmem:[%s390_s3 + $0x8] sm:$0xff] %v250_v23  }
 0x110   :  { %246 = vst [vmem:[%s390_s3] sm:$0xff] %v245_v24  }
 0x111   :  { %222 = vsyncpa [#allocation4], 1 }

// kernel: resnet_cifar100_forward.77
= control target key start
LH: loop header
LB: loop body
LE: loop exit
PB: predicated region body
PF: predicated region fallthrough
CT: control target
= control target key end

     0   :  { %8 = vsyncpa [#allocation4], 0  ;;  %s617_s12 = smov 0   ;;  %s619_s13 = smov 0   ;;  %s701_s0 = inlined_call_operand.vmem [shape: bf16[9,8,128], index: 0, kind: input, shape index: {}]   ;;  %s702_s1 = inlined_call_operand.vmem [shape: bf16[9,128,128], index: 1, kind: input, shape index: {}]   ;;  %s703_s2 = inlined_call_operand.hbm [shape: f32[1,128], index: 2, kind: input, shape index: {}]   ;;  %s704_s3 = inlined_call_operand.vmem [shape: bf16[8,128], index: 3, kind: output, shape index: {}]  }
   0x1   :  { %s621_s14 = smov 0  }
   0x2 LB: > { %s438_s15 = sadd.s32 4294967295, %s591_s14   ;;  %s23_s16 = sadd.s32 1, %s587_s13  ;;  %s591_s14 = sphi %s621_s14, %s14_s14   ;;  %s587_s13 = sphi %s619_s13, %s714_s13   ;;  %s583_s12 = sphi %s617_s12, %s713_s12  }
   0x3   : > { %p24_p0 = scmp.ge.s32.totalorder %s23_s16, 9  ;;  %p439_p1 = scmp.ge.s32.totalorder %s591_s14, 1 }
   0x4   : > { %p132_p2 = scmp.lt.s32.totalorder %s591_s14, 10  ;;  %p642_p4 = scmp.eq.s32.totalorder %s438_s15, 0 }
   0x5   : > { %s716_s16 = smov (%p24_p0, %s23_s16), 0  ;;  %s593_s19 = smov [#allocation3]  }
   0x6   : > { %p638_p3 = pnand %p439_p1, %p132_p2  ;;  %s145_s20 = sshll.u32 %s593_s19, 4  ;;  %s146_s20 = int_to_ptr.vmem [resolvable:$true] %s145_s20 }
   0x7   : > { %s709_s18 = scalar_select %p642_p4, 1, 0 }
   0x8   : > { %s708_s17 = scalar_select %p638_p3, 1, 0 }
   0x9   : > { %p495_p5 = pneg %p638_p3  ;;  %s537_s24 = scalar_lea.hbm %s703_s2, 16 }
   0xa   : > { %p538_p7 = scmp.ne.s32.totalorder %s703_s2, %s537_s24  ;;  %p544_p11 = scmp.lt.u32.totalorder %s537_s24, %s703_s2 }
   0xb   : > { %p650_p6 = pnand %p642_p4, %p495_p5 }
   0xd   : > { %p539_p8 = pneg %p650_p6 }
   0xf   : > { %p540_p9 = pnand %p539_p8, %p538_p7 }
  0x11   : > { %p541_p10 = pneg %p540_p9 }
  0x13   : > { %p546_p12 = pnand %p544_p11, %p541_p10 }
  0x15   : > { %549 = shalt.err (!%p546_p12)
}
  0x16   : > { %s550_s29 = scalar_lea.vmem %s146_s20, 16  ;;  %s557_s30 = scalar_lea.vmem %s146_s20, 32 }
  0x17   : > { %p551_p13 = scmp.ne.s32.totalorder %s146_s20, %s550_s29  ;;  %p558_p2 = scmp.lt.s32.totalorder %s146_s20, %s146_s20 }
  0x18   : > { %p559_p5 = scmp.lt.s32.totalorder %s557_s30, %s550_s29 }
  0x19   : > { %p553_p0 = pnand %p551_p13, %p539_p8 }
  0x1a   : > { %p560_p4 = por %p559_p5, %p558_p2 }
  0x1b   : > { %p554_p1 = pneg %p553_p0 }
  0x1d   : > { %p561_p3 = pnand %p560_p4, %p554_p1 }
  0x1f   : > { %564 = shalt.err (!%p561_p3)
}
  0x20   : > { %498 = dma.hbm_to_vmem [thread:$0]  (!%p650_p6), %s703_s2, 16, %s146_s20, [#allocation4]  }
  0x21   : > { %p711_p7 = scmp.ne.s32.totalorder %s708_s17, 0 }
  0x22   : > { %p712_p9 = scmp.ne.s32.totalorder (!%p711_p7), %s709_s18, 0 }
  0x23   : > { %176 = sbr.rel (%p711_p7) target bundleno = 315 (0x13b), region = 32 }
  0x2a   : > { %578 = dma.done.wait (%p712_p9), [#allocation4], 16  }
  0x2b   : > { %580 = vsyncadd (%p712_p9), [#allocation4], 4294967280  ;;  %p206_p8 = scmp.lt.s32.totalorder %s583_s12, 8  ;;  %p447_p3 = scmp.ne.s32.totalorder %s583_s12, 0 }
  0x2c   : > { %v594_v0 = vmov (!%p447_p3), 0.0  }
  0x2d   : > { %s207_s6 = scalar_select %p206_p8, %s583_s12, 8 }
  0x2e   : > { %226 = sbr.rel (%p447_p3) target bundleno = 53 (0x35), region = 40  ;;  %227 = vst [vmem:[#allocation2] sm:$0xff] (!%p447_p3), %v594_v0 }
  0x2f   : > { %s444_s7 = sshll.u32 %s207_s6, 2  ;;  %s461_s8 = sshll.u32 %s207_s6, 6 }
  0x30   : > { %s681_s11 = scalar_lea.vmem %s701_s0, %s444_s7  ;;  %s217_s19 = scalar_lea.vmem %s702_s1, %s461_s8 }
  0x35 PF: > { %v529_v1 = vld [vmem:[%s217_s19] sm:$0xff]   ;;  %v595_v2 = vmov 0.0   ;;  %v530_v3 = vld [vmem:[%s217_s19 + $0x8] sm:$0xff]   ;;  %vm596_vm0 = vmmov 0   ;;  %v531_v4 = vld [vmem:[%s217_s19 + $0x10] sm:$0xff]   ;;  %p456_p4 = scmp.ne.s32.totalorder %s583_s12, 8 }
  0x36   : > { %471 = vmatprep.subr.bf16.mxu0 %v595_v2  ;;  %487 = vmatprep.mubr.msk.bf16.mxu0 %vm596_vm0, %v595_v2  ;;  %v532_v5 = vld [vmem:[%s217_s19 + $0x18] sm:$0xff]   ;;  %v533_v6 = vld [vmem:[%s217_s19 + $0x20] sm:$0xff]   ;;  %v534_v7 = vld [vmem:[%s217_s19 + $0x28] sm:$0xff]  }
  0x37   : > { %472 = vmatpush3.bf16.msra.mxu0 %v529_v1  ;;  %v535_v8 = vld [vmem:[%s217_s19 + $0x30] sm:$0xff]   ;;  %v536_v9 = vld [vmem:[%s217_s19 + $0x38] sm:$0xff]   ;;  %v229_v10 = vld [vmem:[%s681_s11] sm:$0xf] }
  0x38   : > { %473 = vmatprep.subr.bf16.mxu0 %v595_v2  ;;  %v228_v11 = vld [vmem:[#allocation2] sm:$0xff]  ;;  %v457_v18 = vld [vmem:[#allocation3] ss:$0 sm:$0xff] (!%p456_p4) }
  0x3b   : > { %474 = vmatpush3.bf16.msra.mxu0 %v530_v3 }
  0x3c   : > { %475 = vmatprep.subr.bf16.mxu0 %v595_v2 }
  0x3f   : > { %476 = vmatpush3.bf16.msra.mxu0 %v531_v4 }
  0x40   : > { %477 = vmatprep.subr.bf16.mxu0 %v595_v2 }
  0x43   : > { %478 = vmatpush3.bf16.msra.mxu0 %v532_v5 }
  0x44   : > { %479 = vmatprep.subr.bf16.mxu0 %v595_v2 }
  0x47   : > { %480 = vmatpush3.bf16.msra.mxu0 %v533_v6 }
  0x48   : > { %481 = vmatprep.subr.bf16.mxu0 %v595_v2 }
  0x4b   : > { %482 = vmatpush3.bf16.msra.mxu0 %v534_v7 }
  0x4c   : > { %483 = vmatprep.subr.bf16.mxu0 %v595_v2 }
  0x4f   : > { %484 = vmatpush3.bf16.msra.mxu0 %v535_v8 }
  0x50   : > { %485 = vmatprep.subr.bf16.mxu0 %v595_v2 }
  0x53   : > { %486 = vmatpush3.bf16.msra.mxu0 %v536_v9 }
  0x56   : > { %488 = vmatmul.mubr.bf16.vlgmr.msra.gmra.mrb[0].mxu0 %v229_v10 }
 0x126   : > { %339 = sbr.rel (%p456_p4) target bundleno = 315 (0x13b), region = 44 }
 0x129   : > { %v328_v12 = vpop.f32.mrb[0].mxu0 }
 0x12a   : > { %v334_v13 = vadd.f32 %v328_v12, %v228_v11  ;;  %v489_v14 = vpop.f32.mrb[1].mxu0 }
 0x12b   : > { %v331_v15 = vpop.f32.mrb[2].mxu0 }
 0x12c   : > { %335 = vst [vmem:[#allocation2] sm:$0xff] %v334_v13  ;;  %v490_v16 = vpop.f32.mrb[3].mxu0 }
 0x133   : > { %v340_v17 = vld [vmem:[#allocation2] sm:$0xff] }
 0x134   : > { %v348_v19 = vadd.f32 %v457_v18, %v340_v17 }
 0x136   : > { %v349_v20 = vmax.f32 %v348_v19, 0.0 }
 0x138   : > { %v350_v21 = vpack.c.bf16 %v349_v20, %v349_v20 }
 0x13a   : > { %351 = vst [vmem:[%s704_s3] sm:$0xf] %v350_v21 }
 0x13b PF: > { %s14_s14 = sadd.s32 1, %s591_s14   ;;  %s713_s12 = smov %s587_s13 }
 0x13c   : > { %p11_p6 = scmp.ge.s32.totalorder %s14_s14, 11   ;;  %s714_s13 = smov %s716_s16 }
 0x13e   :  { %13 = sbr.rel (!%p11_p6) target bundleno = 2 (0x2), region = 78 }
 0x145   :  { %371 = vsyncpa [#allocation4], 1 }
 0x146   :  { %373 = vsyncpa [#allocation4 + $0x1], 1 }

// kernel: resnet_cifar100_forward.79
= control target key start
LH: loop header
LB: loop body
LE: loop exit
PB: predicated region body
PF: predicated region fallthrough
CT: control target
= control target key end

     0   :  { %8 = vsyncpa [#allocation4], 0  ;;  %s315_s12 = smov [#allocation3]   ;;  %s402_s0 = inlined_call_operand.vmem [shape: bf16[1,8,256], index: 0, kind: input, shape index: {}]   ;;  %s403_s1 = inlined_call_operand.vmem [shape: bf16[1,256,128], index: 1, kind: input, shape index: {}]   ;;  %s404_s2 = inlined_call_operand.hbm [shape: f32[1,128], index: 2, kind: input, shape index: {}]   ;;  %s405_s3 = inlined_call_operand.vmem [shape: bf16[8,128], index: 3, kind: output, shape index: {}]  }
   0x1   :  { %s19_s13 = sshll.u32 %s315_s12, 4  ;;  %s291_s16 = scalar_lea.hbm %s404_s2, 16  ;;  %s20_s13 = int_to_ptr.vmem [resolvable:$true] %s19_s13 }
   0x2   :  { %p292_p0 = scmp.ne.s32.totalorder %s404_s2, %s291_s16  ;;  %p295_p1 = scmp.lt.u32.totalorder %s291_s16, %s404_s2 }
   0x4   :  { %p297_p2 = pnand %p295_p1, %p292_p0 }
   0x6   :  { %300 = shalt.err (!%p297_p2)
}
   0x7   :  { %s301_s21 = scalar_lea.vmem %s20_s13, 16  ;;  %s305_s22 = scalar_lea.vmem %s20_s13, 32 }
   0x8   :  { %p302_p3 = scmp.ne.s32.totalorder %s20_s13, %s301_s21  ;;  %p306_p4 = scmp.lt.s32.totalorder %s20_s13, %s20_s13 }
   0x9   :  { %p307_p5 = scmp.lt.s32.totalorder %s305_s22, %s301_s21 }
   0xb   :  { %p308_p6 = por %p307_p5, %p306_p4 }
   0xd   :  { %p309_p7 = pnand %p308_p6, %p302_p3 }
   0xf   :  { %312 = shalt.err (!%p309_p7)
}
  0x10   :  { %22 = dma.hbm_to_vmem [thread:$0]  %s404_s2, 16, %s20_s13, [#allocation4]  }
  0x11   :  { %313 = dma.done.wait [#allocation4], 16  }
  0x12   :  { %314 = vsyncadd [#allocation4], 4294967280  ;;  %v273_v0 = vld [vmem:[%s403_s1 + $0x40] sm:$0xff]   ;;  %v275_v2 = vld [vmem:[%s403_s1 + $0x48] sm:$0xff]  }
  0x13   :  { %v274_v1 = vld [vmem:[%s403_s1] sm:$0xff]   ;;  %250 = vmatprep.subr.bf16.mxu0 %v273_v0  ;;  %v276_v3 = vld [vmem:[%s403_s1 + $0x8] sm:$0xff]   ;;  %v277_v4 = vld [vmem:[%s403_s1 + $0x50] sm:$0xff]  }
  0x14   :  { %251 = vmatpush3.bf16.msra.mxu0 %v274_v1  ;;  %v278_v5 = vld [vmem:[%s403_s1 + $0x10] sm:$0xff]   ;;  %v279_v6 = vld [vmem:[%s403_s1 + $0x58] sm:$0xff]   ;;  %v281_v8 = vld [vmem:[%s403_s1 + $0x60] sm:$0xff]  }
  0x15   :  { %252 = vmatprep.subr.bf16.mxu0 %v275_v2  ;;  %v280_v7 = vld [vmem:[%s403_s1 + $0x18] sm:$0xff]   ;;  %v282_v9 = vld [vmem:[%s403_s1 + $0x20] sm:$0xff]   ;;  %v283_v10 = vld [vmem:[%s403_s1 + $0x68] sm:$0xff]  }
  0x16   :  { %v33_v11 = vld [vmem:[%s402_s0] sm:$0xff]  ;;  %v284_v13 = vld [vmem:[%s403_s1 + $0x28] sm:$0xff]   ;;  %v285_v14 = vld [vmem:[%s403_s1 + $0x70] sm:$0xff]  }
  0x17   :  { %v232_v12 = vcombine.high %v33_v11, %v33_v11  ;;  %v286_v15 = vld [vmem:[%s403_s1 + $0x30] sm:$0xff]   ;;  %v287_v16 = vld [vmem:[%s403_s1 + $0x78] sm:$0xff]   ;;  %v231_v18 = vcombine.low %v33_v11, %v33_v11  ;;  %v249_v21 = vld [vmem:[#allocation3] ss:$0 sm:$0xff] }
  0x18   :  { %253 = vmatpush3.bf16.msra.mxu0 %v276_v3  ;;  %v288_v17 = vld [vmem:[%s403_s1 + $0x38] sm:$0xff]  }
  0x19   :  { %254 = vmatprep.subr.bf16.mxu0 %v277_v4  ;;  %201 = vmatprep.mubr.bf16.mxu0 %v232_v12 }
  0x1c   :  { %255 = vmatpush3.bf16.msra.mxu0 %v278_v5 }
  0x1d   :  { %256 = vmatprep.subr.bf16.mxu0 %v279_v6 }
  0x20   :  { %257 = vmatpush3.bf16.msra.mxu0 %v280_v7 }
  0x21   :  { %258 = vmatprep.subr.bf16.mxu0 %v281_v8 }
  0x24   :  { %259 = vmatpush3.bf16.msra.mxu0 %v282_v9 }
  0x25   :  { %260 = vmatprep.subr.bf16.mxu0 %v283_v10 }
  0x28   :  { %261 = vmatpush3.bf16.msra.mxu0 %v284_v13 }
  0x29   :  { %262 = vmatprep.subr.bf16.mxu0 %v285_v14 }
  0x2c   :  { %263 = vmatpush3.bf16.msra.mxu0 %v286_v15 }
  0x2d   :  { %264 = vmatprep.subr.bf16.mxu0 %v287_v16 }
  0x30   :  { %265 = vmatpush3.bf16.msra.mxu0 %v288_v17 }
  0x33   :  { %202 = vmatmul.mubr.bf16.vlgmr.msra.gmra.mrb[0].mxu0 %v231_v18 }
 0x106   :  { %v266_v19 = vpop.f32.mrb[0].mxu0 }
 0x107   :  { %v267_v20 = vpop.f32.mrb[1].mxu0 }
 0x108   :  { %v268_v22 = vadd.f32 %v267_v20, %v266_v19  ;;  %v269_v23 = vpop.f32.mrb[2].mxu0 }
 0x109   :  { %v270_v24 = vpop.f32.mrb[3].mxu0 }
 0x10a   :  { %v222_v25 = vadd.f32 %v268_v22, %v249_v21 }
 0x10c   :  { %v223_v26 = vmax.f32 %v222_v25, 0.0 }
 0x10e   :  { %v224_v27 = vpack.c.bf16 %v223_v26, %v223_v26 }
 0x110   :  { %225 = vst [vmem:[%s405_s3] sm:$0xf] %v224_v27 }
 0x111   :  { %230 = vsyncpa [#allocation4], 1 }

// kernel: resnet_cifar100_forward.81
= control target key start
LH: loop header
LB: loop body
LE: loop exit
PB: predicated region body
PF: predicated region fallthrough
CT: control target
= control target key end

     0   :  { %9 = vsyncpa [#allocation4], 0  ;;  %s288_s15 = smov [#allocation3]   ;;  %s384_s0 = inlined_call_operand.vmem [shape: bf16[1,8,128], index: 0, kind: input, shape index: {}]   ;;  %s385_s1 = inlined_call_operand.vmem [shape: bf16[1,128,256], index: 1, kind: input, shape index: {}]   ;;  %s386_s2 = inlined_call_operand.hbm [shape: f32[1,256], index: 2, kind: input, shape index: {}]   ;;  %s387_s3 = inlined_call_operand.vmem [shape: bf16[8,256], index: 3, kind: input, shape index: {}]   ;;  %s388_s4 = inlined_call_operand.vmem [shape: bf16[8,256], index: 4, kind: output, shape index: {}]  }
   0x1   :  { %s20_s16 = sshll.u32 %s288_s15, 4  ;;  %s264_s19 = scalar_lea.hbm %s386_s2, 32  ;;  %s21_s16 = int_to_ptr.vmem [resolvable:$true] %s20_s16 }
   0x2   :  { %p265_p0 = scmp.ne.s32.totalorder %s386_s2, %s264_s19  ;;  %p268_p1 = scmp.lt.u32.totalorder %s264_s19, %s386_s2 }
   0x4   :  { %p270_p2 = pnand %p268_p1, %p265_p0 }
   0x6   :  { %273 = shalt.err (!%p270_p2)
}
   0x7   :  { %s274_s24 = scalar_lea.vmem %s21_s16, 32  ;;  %p279_p4 = scmp.lt.s32.totalorder %s21_s16, %s21_s16 }
   0x8   :  { %p275_p3 = scmp.ne.s32.totalorder %s21_s16, %s274_s24  ;;  %p280_p5 = scmp.lt.s32.totalorder %s274_s24, %s274_s24 }
   0xa   :  { %p281_p6 = por %p280_p5, %p279_p4 }
   0xc   :  { %p282_p7 = pnand %p281_p6, %p275_p3 }
   0xe   :  { %285 = shalt.err (!%p282_p7)
}
   0xf   :  { %23 = dma.hbm_to_vmem [thread:$0]  %s386_s2, 32, %s21_s16, [#allocation4]  }
  0x10   :  { %286 = dma.done.wait [#allocation4], 32  }
  0x11   :  { %287 = vsyncadd [#allocation4], 4294967264  ;;  %v289_v0 = vmov 0   ;;  %v240_v1 = vld [vmem:[%s385_s1 + $0x4] ss:$8 sps:$4 sm:$0xff]   ;;  %v187_v18 = vlaneseq }
  0x12   :  { %167 = vmatprep.mubr.bf16.mxu0 %v289_v0  ;;  %v242_v2 = vld [vmem:[%s385_s1] ss:$8 sps:$4 sm:$0xff]   ;;  %135 = vmatprep.subr.bf16.mxu0 %v240_v1  ;;  %v243_v3 = vld [vmem:[%s385_s1 + $0x14] ss:$8 sps:$4 sm:$0xff]   ;;  %v245_v4 = vld [vmem:[%s385_s1 + $0x10] ss:$8 sps:$4 sm:$0xff]  }
  0x13   :  { %136 = vmatpush1.bf16.msra.mxu0 %v242_v2  ;;  %v246_v5 = vld [vmem:[%s385_s1 + $0x24] ss:$8 sps:$4 sm:$0xff]   ;;  %v248_v6 = vld [vmem:[%s385_s1 + $0x20] ss:$8 sps:$4 sm:$0xff]   ;;  %v249_v7 = vld [vmem:[%s385_s1 + $0x34] ss:$8 sps:$4 sm:$0xff]  }
  0x14   :  { %137 = vmatprep.subr.bf16.mxu0 %v243_v3  ;;  %v251_v8 = vld [vmem:[%s385_s1 + $0x30] ss:$8 sps:$4 sm:$0xff]   ;;  %v252_v9 = vld [vmem:[%s385_s1 + $0x44] ss:$8 sps:$4 sm:$0xff]   ;;  %v254_v10 = vld [vmem:[%s385_s1 + $0x40] ss:$8 sps:$4 sm:$0xff]  }
  0x15   :  { %v255_v11 = vld [vmem:[%s385_s1 + $0x54] ss:$8 sps:$4 sm:$0xff]   ;;  %v257_v12 = vld [vmem:[%s385_s1 + $0x50] ss:$8 sps:$4 sm:$0xff]   ;;  %v258_v13 = vld [vmem:[%s385_s1 + $0x64] ss:$8 sps:$4 sm:$0xff]  }
  0x16   :  { %v260_v14 = vld [vmem:[%s385_s1 + $0x60] ss:$8 sps:$4 sm:$0xff]   ;;  %v261_v15 = vld [vmem:[%s385_s1 + $0x74] ss:$8 sps:$4 sm:$0xff]   ;;  %v263_v16 = vld [vmem:[%s385_s1 + $0x70] ss:$8 sps:$4 sm:$0xff]  }
  0x17   :  { %138 = vmatpush1.bf16.msra.mxu0 %v245_v4  ;;  %v38_v17 = vld [vmem:[%s384_s0] sm:$0xf]  ;;  %v188_v19 = vshrl.u32 %v187_v18, 7 }
  0x18   :  { %139 = vmatprep.subr.bf16.mxu0 %v246_v5  ;;  %v185_v21 = vld [vmem:[#allocation3] sm:$0x3] }
  0x19   :  { %v189_v20 = vsub.s32 0, %v188_v19  ;;  %v193_v22 = vsub.s32 1, %v188_v19  ;;  %v199_v23 = vld [vmem:[%s387_s3] sm:$0xff] }
  0x1a   :  { %v200_v26 = vunpack.c.l.bf16 %v199_v23  ;;  %v201_v28 = vunpack.c.h.bf16 %v199_v23 }
  0x1b   :  { %140 = vmatpush1.bf16.msra.mxu0 %v248_v6  ;;  %v190_v24 = vrot.slane %v185_v21, %v189_v20  ;;  %v194_v25 = vrot.slane %v185_v21, %v193_v22 }
  0x1c   :  { %141 = vmatprep.subr.bf16.mxu0 %v249_v7 }
  0x1f   :  { %142 = vmatpush1.bf16.msra.mxu0 %v251_v8 }
  0x20   :  { %143 = vmatprep.subr.bf16.mxu0 %v252_v9 }
  0x23   :  { %144 = vmatpush1.bf16.msra.mxu0 %v254_v10 }
  0x24   :  { %145 = vmatprep.subr.bf16.mxu0 %v255_v11 }
  0x27   :  { %146 = vmatpush1.bf16.msra.mxu0 %v257_v12 }
  0x28   :  { %147 = vmatprep.subr.bf16.mxu0 %v258_v13 }
  0x2b   :  { %148 = vmatpush1.bf16.msra.mxu0 %v260_v14 }
  0x2c   :  { %149 = vmatprep.subr.bf16.mxu0 %v261_v15 }
  0x2f   :  { %150 = vmatpush1.bf16.msra.mxu0 %v263_v16 }
  0x32   :  { %168 = vmatmul.mubr.bf16.vlgmr.msra.gmra.mrb[0].mxu0 %v38_v17 }
 0x105   :  { %v169_v27 = vpop.f32.mrb[0].mxu0 }
 0x106   :  { %v197_v29 = vadd.f32 %v190_v24, %v169_v27  ;;  %v171_v30 = vpop.f32.mrb[1].mxu0 }
 0x107   :  { %v198_v31 = vadd.f32 %v194_v25, %v171_v30  ;;  %v173_v32 = vpop.f32.mrb[2].mxu0 }
 0x108   :  { %v202_v33 = vadd.f32 %v200_v26, %v197_v29  ;;  %v174_v34 = vpop.f32.mrb[3].mxu0 }
 0x109   :  { %v203_v35 = vadd.f32 %v201_v28, %v198_v31 }
 0x10a   :  { %v204_v36 = vmax.f32 %v202_v33, 0.0 }
 0x10b   :  { %v205_v37 = vmax.f32 %v203_v35, 0.0 }
 0x10d   :  { %v237_v38 = vpack.c.bf16 %v205_v37, %v204_v36 }
 0x10f   :  { %214 = vst [vmem:[%s388_s4] sm:$0xff] %v237_v38 }
 0x110   :  { %219 = vsyncpa [#allocation4], 1 }

// kernel: resnet_cifar100_forward.78
= control target key start
LH: loop header
LB: loop body
LE: loop exit
PB: predicated region body
PF: predicated region fallthrough
CT: control target
= control target key end

     0   :  { %11 = vsyncpa [#allocation4], 0  ;;  %s684_s0 = inlined_call_operand.vmem [shape: bf16[1,8,128], index: 0, kind: input, shape index: {}]   ;;  %s685_s1 = inlined_call_operand.vmem [shape: bf16[1,128,256], index: 1, kind: input, shape index: {}]   ;;  %s686_s2 = inlined_call_operand.hbm [shape: f32[1,256], index: 2, kind: input, shape index: {}]   ;;  %s687_s3 = inlined_call_operand.vmem [shape: bf16[1,8,128], index: 3, kind: input, shape index: {}]   ;;  %s688_s4 = inlined_call_operand.vmem [shape: bf16[1,128,256], index: 4, kind: input, shape index: {}]   ;;  %s689_s5 = inlined_call_operand.hbm [shape: f32[1,256], index: 5, kind: input, shape index: {}]   ;;  %s690_s6 = inlined_call_operand.vmem [shape: bf16[8,256], index: 6, kind: output, shape index: {}]  }
   0x1   :  { %12 = vsyncpa [#allocation6], 0  ;;  %s517_s21 = smov [#allocation3]   ;;  %s518_s23 = smov [#allocation5]  }
   0x2   :  { %s23_s22 = sshll.u32 %s517_s21, 4  ;;  %s37_s24 = sshll.u32 %s518_s23, 4  ;;  %s24_s22 = int_to_ptr.vmem [resolvable:$true] %s23_s22  ;;  %s38_s24 = int_to_ptr.vmem [resolvable:$true] %s37_s24 }
   0x3   :  { %s469_s27 = scalar_lea.hbm %s686_s2, 32 }
   0x4   :  { %p470_p0 = scmp.ne.s32.totalorder %s686_s2, %s469_s27  ;;  %p473_p1 = scmp.lt.u32.totalorder %s469_s27, %s686_s2 }
   0x6   :  { %p475_p2 = pnand %p473_p1, %p470_p0 }
   0x8   :  { %478 = shalt.err (!%p475_p2)
}
   0x9   :  { %s479_s8 = scalar_lea.vmem %s24_s22, 32  ;;  %p484_p4 = scmp.lt.s32.totalorder %s24_s22, %s24_s22 }
   0xa   :  { %p480_p3 = scmp.ne.s32.totalorder %s24_s22, %s479_s8  ;;  %p485_p5 = scmp.lt.s32.totalorder %s479_s8, %s479_s8 }
   0xc   :  { %p486_p6 = por %p485_p5, %p484_p4 }
   0xe   :  { %p487_p7 = pnand %p486_p6, %p480_p3 }
  0x10   :  { %490 = shalt.err (!%p487_p7)
}
  0x11   :  { %26 = dma.hbm_to_vmem [thread:$0]  %s686_s2, 32, %s24_s22, [#allocation4]  }
  0x12   :  { %s491_s13 = scalar_lea.hbm %s689_s5, 32 }
  0x13   :  { %p492_p8 = scmp.ne.s32.totalorder %s689_s5, %s491_s13  ;;  %p495_p9 = scmp.lt.u32.totalorder %s491_s13, %s689_s5 }
  0x15   :  { %p497_p10 = pnand %p495_p9, %p492_p8 }
  0x17   :  { %500 = shalt.err (!%p497_p10)
}
  0x18   :  { %s501_s18 = scalar_lea.vmem %s38_s24, 32  ;;  %p506_p12 = scmp.lt.s32.totalorder %s38_s24, %s38_s24 }
  0x19   :  { %p502_p11 = scmp.ne.s32.totalorder %s38_s24, %s501_s18  ;;  %p507_p13 = scmp.lt.s32.totalorder %s501_s18, %s501_s18 }
  0x1b   :  { %p508_p0 = por %p507_p13, %p506_p12 }
  0x1d   :  { %p509_p1 = pnand %p508_p0, %p502_p11 }
  0x1f   :  { %512 = shalt.err (!%p509_p1)
}
  0x20   :  { %40 = dma.hbm_to_vmem [thread:$0]  %s689_s5, 32, %s38_s24, [#allocation6]  }
  0x21   :  { %513 = dma.done.wait [#allocation4], 32  }
  0x22   :  { %514 = vsyncadd [#allocation4], 4294967264 }
  0x23   :  { %515 = dma.done.wait [#allocation6], 32  }
  0x24   :  { %516 = vsyncadd [#allocation6], 4294967264  ;;  %v519_v0 = vmov 0   ;;  %v421_v1 = vld [vmem:[%s688_s4 + $0x4] ss:$8 sps:$4 sm:$0xff]   ;;  %v71_v35 = vlaneseq }
  0x25   :  { %193 = vmatprep.mubr.bf16.mxu0 %v519_v0  ;;  %335 = vmatprep.mubr.bf16.mxu1 %v519_v0  ;;  %v423_v2 = vld [vmem:[%s685_s1 + $0x4] ss:$8 sps:$4 sm:$0xff]   ;;  %v425_v3 = vld [vmem:[%s688_s4] ss:$8 sps:$4 sm:$0xff]   ;;  %v427_v5 = vld [vmem:[%s688_s4 + $0x14] ss:$8 sps:$4 sm:$0xff]  }
  0x26   :  { %161 = vmatprep.subr.bf16.mxu0 %v421_v1  ;;  %v426_v4 = vld [vmem:[%s685_s1] ss:$8 sps:$4 sm:$0xff]   ;;  %303 = vmatprep.subr.bf16.mxu1 %v423_v2  ;;  %v429_v6 = vld [vmem:[%s685_s1 + $0x14] ss:$8 sps:$4 sm:$0xff]   ;;  %v431_v7 = vld [vmem:[%s688_s4 + $0x10] ss:$8 sps:$4 sm:$0xff]  }
  0x27   :  { %162 = vmatpush1.bf16.msra.mxu0 %v425_v3  ;;  %304 = vmatpush1.bf16.msra.mxu1 %v426_v4  ;;  %v432_v8 = vld [vmem:[%s685_s1 + $0x10] ss:$8 sps:$4 sm:$0xff]   ;;  %v433_v9 = vld [vmem:[%s688_s4 + $0x24] ss:$8 sps:$4 sm:$0xff]   ;;  %v437_v11 = vld [vmem:[%s688_s4 + $0x20] ss:$8 sps:$4 sm:$0xff]  }
  0x28   :  { %163 = vmatprep.subr.bf16.mxu0 %v427_v5  ;;  %305 = vmatprep.subr.bf16.mxu1 %v429_v6  ;;  %v435_v10 = vld [vmem:[%s685_s1 + $0x24] ss:$8 sps:$4 sm:$0xff]   ;;  %v438_v12 = vld [vmem:[%s685_s1 + $0x20] ss:$8 sps:$4 sm:$0xff]   ;;  %v439_v13 = vld [vmem:[%s688_s4 + $0x34] ss:$8 sps:$4 sm:$0xff]  }
  0x29   :  { %v441_v14 = vld [vmem:[%s685_s1 + $0x34] ss:$8 sps:$4 sm:$0xff]   ;;  %v443_v15 = vld [vmem:[%s688_s4 + $0x30] ss:$8 sps:$4 sm:$0xff]   ;;  %v445_v17 = vld [vmem:[%s688_s4 + $0x44] ss:$8 sps:$4 sm:$0xff]  }
  0x2a   :  { %v444_v16 = vld [vmem:[%s685_s1 + $0x30] ss:$8 sps:$4 sm:$0xff]   ;;  %v447_v18 = vld [vmem:[%s685_s1 + $0x44] ss:$8 sps:$4 sm:$0xff]   ;;  %v449_v19 = vld [vmem:[%s688_s4 + $0x40] ss:$8 sps:$4 sm:$0xff]  }
  0x2b   :  { %164 = vmatpush1.bf16.msra.mxu0 %v431_v7  ;;  %306 = vmatpush1.bf16.msra.mxu1 %v432_v8  ;;  %v450_v20 = vld [vmem:[%s685_s1 + $0x40] ss:$8 sps:$4 sm:$0xff]   ;;  %v451_v21 = vld [vmem:[%s688_s4 + $0x54] ss:$8 sps:$4 sm:$0xff]   ;;  %v455_v23 = vld [vmem:[%s688_s4 + $0x50] ss:$8 sps:$4 sm:$0xff]  }
  0x2c   :  { %165 = vmatprep.subr.bf16.mxu0 %v433_v9  ;;  %307 = vmatprep.subr.bf16.mxu1 %v435_v10  ;;  %v453_v22 = vld [vmem:[%s685_s1 + $0x54] ss:$8 sps:$4 sm:$0xff]   ;;  %v456_v24 = vld [vmem:[%s685_s1 + $0x50] ss:$8 sps:$4 sm:$0xff]   ;;  %v457_v25 = vld [vmem:[%s688_s4 + $0x64] ss:$8 sps:$4 sm:$0xff]  }
  0x2d   :  { %v459_v26 = vld [vmem:[%s685_s1 + $0x64] ss:$8 sps:$4 sm:$0xff]   ;;  %v461_v27 = vld [vmem:[%s688_s4 + $0x60] ss:$8 sps:$4 sm:$0xff]   ;;  %v463_v29 = vld [vmem:[%s688_s4 + $0x74] ss:$8 sps:$4 sm:$0xff]  }
  0x2e   :  { %v462_v28 = vld [vmem:[%s685_s1 + $0x60] ss:$8 sps:$4 sm:$0xff]   ;;  %v465_v30 = vld [vmem:[%s685_s1 + $0x74] ss:$8 sps:$4 sm:$0xff]   ;;  %v467_v31 = vld [vmem:[%s688_s4 + $0x70] ss:$8 sps:$4 sm:$0xff]  }
  0x2f   :  { %166 = vmatpush1.bf16.msra.mxu0 %v437_v11  ;;  %308 = vmatpush1.bf16.msra.mxu1 %v438_v12  ;;  %v468_v32 = vld [vmem:[%s685_s1 + $0x70] ss:$8 sps:$4 sm:$0xff]   ;;  %v52_v33 = vld [vmem:[%s687_s3] sm:$0xf]  ;;  %v72_v36 = vshrl.u32 %v71_v35, 7 }
  0x30   :  { %167 = vmatprep.subr.bf16.mxu0 %v439_v13  ;;  %309 = vmatprep.subr.bf16.mxu1 %v441_v14  ;;  %v206_v34 = vld [vmem:[%s684_s0] sm:$0xf] }
  0x31   :  { %v73_v37 = vsub.s32 0, %v72_v36  ;;  %v69_v38 = vld [vmem:[#allocation5] sm:$0x3]  ;;  %v77_v39 = vsub.s32 1, %v72_v36  ;;  %v353_v41 = vld [vmem:[#allocation3] sm:$0x3] }
  0x33   :  { %168 = vmatpush1.bf16.msra.mxu0 %v443_v15  ;;  %310 = vmatpush1.bf16.msra.mxu1 %v444_v16  ;;  %v74_v40 = vrot.slane %v69_v38, %v73_v37  ;;  %v78_v42 = vrot.slane %v69_v38, %v77_v39  ;;  %v358_v46 = vrot.slane %v353_v41, %v73_v37 }
  0x34   :  { %169 = vmatprep.subr.bf16.mxu0 %v445_v17  ;;  %311 = vmatprep.subr.bf16.mxu1 %v447_v18  ;;  %v362_v50 = vrot.slane %v353_v41, %v77_v39 }
  0x37   :  { %170 = vmatpush1.bf16.msra.mxu0 %v449_v19  ;;  %312 = vmatpush1.bf16.msra.mxu1 %v450_v20 }
  0x38   :  { %171 = vmatprep.subr.bf16.mxu0 %v451_v21  ;;  %313 = vmatprep.subr.bf16.mxu1 %v453_v22 }
  0x3b   :  { %172 = vmatpush1.bf16.msra.mxu0 %v455_v23  ;;  %314 = vmatpush1.bf16.msra.mxu1 %v456_v24 }
  0x3c   :  { %173 = vmatprep.subr.bf16.mxu0 %v457_v25  ;;  %315 = vmatprep.subr.bf16.mxu1 %v459_v26 }
  0x3f   :  { %174 = vmatpush1.bf16.msra.mxu0 %v461_v27  ;;  %316 = vmatpush1.bf16.msra.mxu1 %v462_v28 }
  0x40   :  { %175 = vmatprep.subr.bf16.mxu0 %v463_v29  ;;  %317 = vmatprep.subr.bf16.mxu1 %v465_v30 }
  0x43   :  { %176 = vmatpush1.bf16.msra.mxu0 %v467_v31  ;;  %318 = vmatpush1.bf16.msra.mxu1 %v468_v32 }
  0x46   :  { %194 = vmatmul.mubr.bf16.vlgmr.msra.gmra.mrb[0].mxu0 %v52_v33  ;;  %336 = vmatmul.mubr.bf16.vlgmr.msra.gmra.mrb[0].mxu1 %v206_v34 }
 0x119   :  { %v195_v43 = vpop.f32.mrb[0].mxu0  ;;  %v337_v44 = vpop.f32.mrb[0].mxu1 }
 0x11a   :  { %v196_v45 = vadd.f32 %v195_v43, %v74_v40  ;;  %v197_v47 = vpop.f32.mrb[1].mxu0  ;;  %v339_v48 = vpop.f32.mrb[1].mxu1 }
 0x11b   :  { %v198_v49 = vadd.f32 %v197_v47, %v78_v42  ;;  %v199_v51 = vpop.f32.mrb[2].mxu0  ;;  %v341_v52 = vpop.f32.mrb[2].mxu1 }
 0x11c   :  { %v344_v53 = vadd.f32 %v337_v44, %v196_v45  ;;  %v200_v54 = vpop.f32.mrb[3].mxu0  ;;  %v342_v55 = vpop.f32.mrb[3].mxu1 }
 0x11d   :  { %v345_v56 = vadd.f32 %v339_v48, %v198_v49 }
 0x11e   :  { %v365_v57 = vadd.f32 %v358_v46, %v344_v53 }
 0x11f   :  { %v366_v58 = vadd.f32 %v362_v50, %v345_v56 }
 0x120   :  { %v367_v59 = vmax.f32 %v365_v57, 0.0 }
 0x121   :  { %v368_v60 = vmax.f32 %v366_v58, 0.0 }
 0x123   :  { %v417_v61 = vpack.c.bf16 %v368_v60, %v367_v59 }
 0x125   :  { %377 = vst [vmem:[%s690_s6] sm:$0xff] %v417_v61 }
 0x126   :  { %382 = vsyncpa [#allocation4], 1 }
 0x127   :  { %383 = vsyncpa [#allocation6], 1 }

// kernel: resnet_cifar100_forward.95
= control target key start
LH: loop header
LB: loop body
LE: loop exit
PB: predicated region body
PF: predicated region fallthrough
CT: control target
= control target key end

     0   :  { %8 = vsyncpa [#allocation4], 0  ;;  %s602_s12 = smov 0   ;;  %s604_s13 = smov 0   ;;  %s692_s0 = inlined_call_operand.vmem [shape: bf16[9,2,128], index: 0, kind: input, shape index: {}]   ;;  %s693_s1 = inlined_call_operand.vmem [shape: bf16[9,128,128], index: 1, kind: input, shape index: {}]   ;;  %s694_s2 = inlined_call_operand.hbm [shape: f32[1,128], index: 2, kind: input, shape index: {}]   ;;  %s695_s3 = inlined_call_operand.vmem [shape: bf16[2,128], index: 3, kind: output, shape index: {}]  }
   0x1   :  { %s606_s14 = smov 0  }
   0x2 LB: > { %s424_s15 = sadd.s32 4294967295, %s576_s14   ;;  %s23_s16 = sadd.s32 1, %s572_s13  ;;  %s576_s14 = sphi %s606_s14, %s14_s14   ;;  %s572_s13 = sphi %s604_s13, %s705_s13   ;;  %s568_s12 = sphi %s602_s12, %s704_s12  }
   0x3   : > { %p24_p0 = scmp.ge.s32.totalorder %s23_s16, 9  ;;  %p425_p1 = scmp.ge.s32.totalorder %s576_s14, 1 }
   0x4   : > { %p132_p2 = scmp.lt.s32.totalorder %s576_s14, 10  ;;  %p627_p4 = scmp.eq.s32.totalorder %s424_s15, 0 }
   0x5   : > { %s707_s16 = smov (%p24_p0, %s23_s16), 0  ;;  %s578_s19 = smov [#allocation3]  }
   0x6   : > { %p623_p3 = pnand %p425_p1, %p132_p2  ;;  %s145_s20 = sshll.u32 %s578_s19, 4  ;;  %s146_s20 = int_to_ptr.vmem [resolvable:$true] %s145_s20 }
   0x7   : > { %s700_s18 = scalar_select %p627_p4, 1, 0 }
   0x8   : > { %s699_s17 = scalar_select %p623_p3, 1, 0 }
   0x9   : > { %p480_p5 = pneg %p623_p3  ;;  %s522_s24 = scalar_lea.hbm %s694_s2, 16 }
   0xa   : > { %p523_p7 = scmp.ne.s32.totalorder %s694_s2, %s522_s24  ;;  %p529_p11 = scmp.lt.u32.totalorder %s522_s24, %s694_s2 }
   0xb   : > { %p635_p6 = pnand %p627_p4, %p480_p5 }
   0xd   : > { %p524_p8 = pneg %p635_p6 }
   0xf   : > { %p525_p9 = pnand %p524_p8, %p523_p7 }
  0x11   : > { %p526_p10 = pneg %p525_p9 }
  0x13   : > { %p531_p12 = pnand %p529_p11, %p526_p10 }
  0x15   : > { %534 = shalt.err (!%p531_p12)
}
  0x16   : > { %s535_s29 = scalar_lea.vmem %s146_s20, 16  ;;  %s542_s30 = scalar_lea.vmem %s146_s20, 32 }
  0x17   : > { %p536_p13 = scmp.ne.s32.totalorder %s146_s20, %s535_s29  ;;  %p543_p2 = scmp.lt.s32.totalorder %s146_s20, %s146_s20 }
  0x18   : > { %p544_p5 = scmp.lt.s32.totalorder %s542_s30, %s535_s29 }
  0x19   : > { %p538_p0 = pnand %p536_p13, %p524_p8 }
  0x1a   : > { %p545_p4 = por %p544_p5, %p543_p2 }
  0x1b   : > { %p539_p1 = pneg %p538_p0 }
  0x1d   : > { %p546_p3 = pnand %p545_p4, %p539_p1 }
  0x1f   : > { %549 = shalt.err (!%p546_p3)
}
  0x20   : > { %483 = dma.hbm_to_vmem [thread:$0]  (!%p635_p6), %s694_s2, 16, %s146_s20, [#allocation4]  }
  0x21   : > { %p702_p7 = scmp.ne.s32.totalorder %s699_s17, 0 }
  0x22   : > { %p703_p9 = scmp.ne.s32.totalorder (!%p702_p7), %s700_s18, 0 }
  0x23   : > { %175 = sbr.rel (%p702_p7) target bundleno = 315 (0x13b), region = 32 }
  0x2a   : > { %563 = dma.done.wait (%p703_p9), [#allocation4], 16  }
  0x2b   : > { %565 = vsyncadd (%p703_p9), [#allocation4], 4294967280  ;;  %p203_p8 = scmp.lt.s32.totalorder %s568_s12, 8  ;;  %p432_p3 = scmp.ne.s32.totalorder %s568_s12, 0 }
  0x2c   : > { %v579_v0 = vmov (!%p432_p3), 0.0  }
  0x2d   : > { %s663_s6 = scalar_select %p203_p8, %s568_s12, 8 }
  0x2e   : > { %221 = sbr.rel (%p432_p3) target bundleno = 53 (0x35), region = 40  ;;  %222 = vst [vmem:[#allocation2] sm:$0x3] (!%p432_p3), %v579_v0 }
  0x2f   : > { %s208_s9 = scalar_lea.vmem %s692_s0, %s663_s6  ;;  %s446_s10 = sshll.u32 %s663_s6, 6 }
  0x30   : > { %s213_s17 = scalar_lea.vmem %s693_s1, %s446_s10 }
  0x35 PF: > { %v514_v1 = vld [vmem:[%s213_s17] sm:$0xff]   ;;  %v580_v2 = vmov 0.0   ;;  %v515_v3 = vld [vmem:[%s213_s17 + $0x8] sm:$0xff]   ;;  %vm581_vm0 = vmmov 0   ;;  %v516_v4 = vld [vmem:[%s213_s17 + $0x10] sm:$0xff]   ;;  %p441_p4 = scmp.ne.s32.totalorder %s568_s12, 8 }
  0x36   : > { %456 = vmatprep.subr.bf16.mxu0 %v580_v2  ;;  %472 = vmatprep.mubr.msk.bf16.mxu0 %vm581_vm0, %v580_v2  ;;  %v517_v5 = vld [vmem:[%s213_s17 + $0x18] sm:$0xff]   ;;  %v518_v6 = vld [vmem:[%s213_s17 + $0x20] sm:$0xff]   ;;  %v519_v7 = vld [vmem:[%s213_s17 + $0x28] sm:$0xff]  }
  0x37   : > { %457 = vmatpush3.bf16.msra.mxu0 %v514_v1  ;;  %v520_v8 = vld [vmem:[%s213_s17 + $0x30] sm:$0xff]   ;;  %v521_v9 = vld [vmem:[%s213_s17 + $0x38] sm:$0xff]   ;;  %v224_v10 = vld [vmem:[%s208_s9] sm:$0x1] }
  0x38   : > { %458 = vmatprep.subr.bf16.mxu0 %v580_v2  ;;  %v223_v11 = vld [vmem:[#allocation2] sm:$0x3]  ;;  %v442_v18 = vld [vmem:[#allocation3] ss:$0 sm:$0xff] (!%p441_p4) }
  0x3b   : > { %459 = vmatpush3.bf16.msra.mxu0 %v515_v3 }
  0x3c   : > { %460 = vmatprep.subr.bf16.mxu0 %v580_v2 }
  0x3f   : > { %461 = vmatpush3.bf16.msra.mxu0 %v516_v4 }
  0x40   : > { %462 = vmatprep.subr.bf16.mxu0 %v580_v2 }
  0x43   : > { %463 = vmatpush3.bf16.msra.mxu0 %v517_v5 }
  0x44   : > { %464 = vmatprep.subr.bf16.mxu0 %v580_v2 }
  0x47   : > { %465 = vmatpush3.bf16.msra.mxu0 %v518_v6 }
  0x48   : > { %466 = vmatprep.subr.bf16.mxu0 %v580_v2 }
  0x4b   : > { %467 = vmatpush3.bf16.msra.mxu0 %v519_v7 }
  0x4c   : > { %468 = vmatprep.subr.bf16.mxu0 %v580_v2 }
  0x4f   : > { %469 = vmatpush3.bf16.msra.mxu0 %v520_v8 }
  0x50   : > { %470 = vmatprep.subr.bf16.mxu0 %v580_v2 }
  0x53   : > { %471 = vmatpush3.bf16.msra.mxu0 %v521_v9 }
  0x56   : > { %473 = vmatmul.mubr.bf16.vlgmr.msra.gmra.mrb[0].mxu0 %v224_v10 }
 0x126   : > { %334 = sbr.rel (%p441_p4) target bundleno = 315 (0x13b), region = 44 }
 0x129   : > { %v323_v12 = vpop.f32.mrb[0].mxu0 }
 0x12a   : > { %v329_v13 = vadd.f32 %v323_v12, %v223_v11  ;;  %v474_v14 = vpop.f32.mrb[1].mxu0 }
 0x12b   : > { %v326_v15 = vpop.f32.mrb[2].mxu0 }
 0x12c   : > { %330 = vst [vmem:[#allocation2] sm:$0x3] %v329_v13  ;;  %v475_v16 = vpop.f32.mrb[3].mxu0 }
 0x133   : > { %v335_v17 = vld [vmem:[#allocation2] sm:$0x3] }
 0x134   : > { %v343_v19 = vadd.f32 %v442_v18, %v335_v17 }
 0x136   : > { %v344_v20 = vmax.f32 %v343_v19, 0.0 }
 0x138   : > { %v345_v21 = vpack.c.bf16 %v344_v20, %v344_v20 }
 0x13a   : > { %346 = vst [vmem:[%s695_s3] sm:$0x1] %v345_v21 }
 0x13b PF: > { %s14_s14 = sadd.s32 1, %s576_s14   ;;  %s704_s12 = smov %s572_s13 }
 0x13c   : > { %p11_p6 = scmp.ge.s32.totalorder %s14_s14, 11   ;;  %s705_s13 = smov %s707_s16 }
 0x13e   :  { %13 = sbr.rel (!%p11_p6) target bundleno = 2 (0x2), region = 78 }
 0x145   :  { %364 = vsyncpa [#allocation4], 1 }
 0x146   :  { %366 = vsyncpa [#allocation4 + $0x1], 1 }

// kernel: resnet_cifar100_forward.102
= control target key start
LH: loop header
LB: loop body
LE: loop exit
PB: predicated region body
PF: predicated region fallthrough
CT: control target
= control target key end

     0   :  { %10 = vsyncpa [#allocation4], 0  ;;  %s596_s15 = smov [#allocation3]   ;;  %s738_s0 = inlined_call_operand.vmem [shape: bf16[9,2,128], index: 0, kind: input, shape index: {}, may-alias: {0,4}]   ;;  %s739_s1 = inlined_call_operand.vmem [shape: bf16[1,2,512], index: 1, kind: input, shape index: {}]   ;;  %s740_s2 = inlined_call_operand.vmem [shape: bf16[1,512,128], index: 2, kind: input, shape index: {}]   ;;  %s741_s3 = inlined_call_operand.hbm [shape: f32[1,128], index: 3, kind: input, shape index: {}]   ;;  %s742_s4 = inlined_call_operand.vmem [shape: bf16[9,2,128], index: 4, kind: output, shape index: {}, may-alias: {0,4}]  }
   0x1   :  { %s21_s16 = sshll.u32 %s596_s15, 4  ;;  %s572_s0 = scalar_lea.hbm %s741_s3, 16  ;;  %s22_s16 = int_to_ptr.vmem [resolvable:$true] %s21_s16 }
   0x2   :  { %p573_p0 = scmp.ne.s32.totalorder %s741_s3, %s572_s0  ;;  %p576_p1 = scmp.lt.u32.totalorder %s572_s0, %s741_s3 }
   0x4   :  { %p578_p2 = pnand %p576_p1, %p573_p0 }
   0x6   :  { %581 = shalt.err (!%p578_p2)
}
   0x7   :  { %s582_s23 = scalar_lea.vmem %s22_s16, 16  ;;  %s586_s24 = scalar_lea.vmem %s22_s16, 32 }
   0x8   :  { %p583_p3 = scmp.ne.s32.totalorder %s22_s16, %s582_s23  ;;  %p587_p4 = scmp.lt.s32.totalorder %s22_s16, %s22_s16 }
   0x9   :  { %p588_p5 = scmp.lt.s32.totalorder %s586_s24, %s582_s23 }
   0xb   :  { %p589_p6 = por %p588_p5, %p587_p4 }
   0xd   :  { %p590_p7 = pnand %p589_p6, %p583_p3 }
   0xf   :  { %593 = shalt.err (!%p590_p7)
}
  0x10   :  { %24 = dma.hbm_to_vmem [thread:$0]  %s741_s3, 16, %s22_s16, [#allocation4]  }
  0x11   :  { %594 = dma.done.wait [#allocation4], 16  }
  0x12   :  { %595 = vsyncadd [#allocation4], 4294967280  ;;  %v540_v0 = vld [vmem:[%s740_s2 + $0x40] sm:$0xff]   ;;  %v544_v4 = vld [vmem:[%s740_s2 + $0x48] sm:$0xff]   ;;  %v597_v22 = vmov 1966171168   ;;  %v112_v24 = vlaneseq }
  0x13   :  { %v541_v1 = vld [vmem:[%s740_s2 + $0xc0] sm:$0xff]   ;;  %493 = vmatprep.subr.bf16.mxu0 %v540_v0  ;;  %v545_v5 = vld [vmem:[%s740_s2 + $0xc8] sm:$0xff]   ;;  %v548_v8 = vld [vmem:[%s740_s2 + $0x50] sm:$0xff]   ;;  %v110_v23 = vunpack.c.l.s4 %v597_v22  ;;  %v598_v44 = vmov 0.0  }
  0x14   :  { %v542_v2 = vld [vmem:[%s740_s2] sm:$0xff]   ;;  %515 = vmatprep.subr.bf16.mxu1 %v541_v1  ;;  %v546_v6 = vld [vmem:[%s740_s2 + $0x8] sm:$0xff]   ;;  %v549_v9 = vld [vmem:[%s740_s2 + $0xd0] sm:$0xff]   ;;  %v113_v30 = vshrl.u32 %v112_v24, 7  ;;  %33 = vst [vmem:[#allocation2] sm:$0x3] %v598_v44 }
  0x15   :  { %v543_v3 = vld [vmem:[%s740_s2 + $0x80] sm:$0xff]   ;;  %494 = vmatpush3.bf16.msra.mxu0 %v542_v2  ;;  %v547_v7 = vld [vmem:[%s740_s2 + $0x88] sm:$0xff]   ;;  %v550_v10 = vld [vmem:[%s740_s2 + $0x10] sm:$0xff]   ;;  %v111_v29 = vunpack.c.0.s8 %v110_v23 }
  0x16   :  { %516 = vmatpush3.bf16.msra.mxu1 %v543_v3  ;;  %495 = vmatprep.subr.bf16.mxu0 %v544_v4  ;;  %v551_v11 = vld [vmem:[%s740_s2 + $0x90] sm:$0xff]   ;;  %v552_v12 = vld [vmem:[%s740_s2 + $0x58] sm:$0xff]   ;;  %v556_v16 = vld [vmem:[%s740_s2 + $0x60] sm:$0xff]  }
  0x17   :  { %517 = vmatprep.subr.bf16.mxu1 %v545_v5  ;;  %v553_v13 = vld [vmem:[%s740_s2 + $0xd8] sm:$0xff]   ;;  %v557_v17 = vld [vmem:[%s740_s2 + $0xe0] sm:$0xff]   ;;  %v560_v20 = vld [vmem:[%s740_s2 + $0x68] sm:$0xff]   ;;  %v114_v35 = vsub.s32 %v111_v29, %v113_v30 }
  0x18   :  { %v554_v14 = vld [vmem:[%s740_s2 + $0x18] sm:$0xff]   ;;  %v558_v18 = vld [vmem:[%s740_s2 + $0x20] sm:$0xff]   ;;  %v561_v21 = vld [vmem:[%s740_s2 + $0xe8] sm:$0xff]  }
  0x19   :  { %496 = vmatpush3.bf16.msra.mxu0 %v546_v6  ;;  %v555_v15 = vld [vmem:[%s740_s2 + $0x98] sm:$0xff]   ;;  %v559_v19 = vld [vmem:[%s740_s2 + $0xa0] sm:$0xff]   ;;  %v562_v25 = vld [vmem:[%s740_s2 + $0x28] sm:$0xff]  }
  0x1a   :  { %518 = vmatpush3.bf16.msra.mxu1 %v547_v7  ;;  %497 = vmatprep.subr.bf16.mxu0 %v548_v8  ;;  %v563_v26 = vld [vmem:[%s740_s2 + $0xa8] sm:$0xff]   ;;  %v564_v27 = vld [vmem:[%s740_s2 + $0x70] sm:$0xff]   ;;  %v568_v33 = vld [vmem:[%s740_s2 + $0x78] sm:$0xff]  }
  0x1b   :  { %519 = vmatprep.subr.bf16.mxu1 %v549_v9  ;;  %v565_v28 = vld [vmem:[%s740_s2 + $0xf0] sm:$0xff]   ;;  %v569_v34 = vld [vmem:[%s740_s2 + $0xf8] sm:$0xff]   ;;  %v458_v38 = vld.sshfl [vmem:[%s739_s1] sm:$0x33 pattern:$0x75316420] }
  0x1c   :  { %v566_v31 = vld [vmem:[%s740_s2 + $0x30] sm:$0xff]   ;;  %v570_v36 = vld [vmem:[%s740_s2 + $0x38] sm:$0xff]   ;;  %v108_v39 = vcombine.high %v458_v38, %v458_v38  ;;  %v115_v40 = vrot.slane %v458_v38, %v114_v35  ;;  %v34_v54 = vld [vmem:[#allocation2] sm:$0x3] }
  0x1d   :  { %498 = vmatpush3.bf16.msra.mxu0 %v550_v10  ;;  %v567_v32 = vld [vmem:[%s740_s2 + $0xb0] sm:$0xff]   ;;  %v571_v37 = vld [vmem:[%s740_s2 + $0xb8] sm:$0xff]   ;;  %v491_v58 = vld [vmem:[#allocation3] ss:$0 sm:$0xff] }
  0x1e   :  { %520 = vmatpush3.bf16.msra.mxu1 %v551_v11  ;;  %499 = vmatprep.subr.bf16.mxu0 %v552_v12  ;;  %v122_v41 = vrot.slane %v108_v39, %v114_v35  ;;  %v123_v42 = vcombine.high %v115_v40, %v115_v40 }
  0x1f   :  { %521 = vmatprep.subr.bf16.mxu1 %v553_v13 }
  0x20   :  { %353 = vmatprep.mubr.bf16.mxu0 %v122_v41  ;;  %v124_v43 = vcombine.high %v122_v41, %v122_v41 }
  0x21   :  { %500 = vmatpush3.bf16.msra.mxu0 %v554_v14 }
  0x22   :  { %522 = vmatpush3.bf16.msra.mxu1 %v555_v15  ;;  %501 = vmatprep.subr.bf16.mxu0 %v556_v16 }
  0x23   :  { %523 = vmatprep.subr.bf16.mxu1 %v557_v17  ;;  %393 = vmatprep.mubr.bf16.mxu1 %v124_v43 }
  0x25   :  { %502 = vmatpush3.bf16.msra.mxu0 %v558_v18 }
  0x26   :  { %524 = vmatpush3.bf16.msra.mxu1 %v559_v19  ;;  %503 = vmatprep.subr.bf16.mxu0 %v560_v20 }
  0x27   :  { %525 = vmatprep.subr.bf16.mxu1 %v561_v21 }
  0x29   :  { %504 = vmatpush3.bf16.msra.mxu0 %v562_v25 }
  0x2a   :  { %526 = vmatpush3.bf16.msra.mxu1 %v563_v26  ;;  %505 = vmatprep.subr.bf16.mxu0 %v564_v27 }
  0x2b   :  { %527 = vmatprep.subr.bf16.mxu1 %v565_v28 }
  0x2d   :  { %506 = vmatpush3.bf16.msra.mxu0 %v566_v31 }
  0x2e   :  { %528 = vmatpush3.bf16.msra.mxu1 %v567_v32  ;;  %507 = vmatprep.subr.bf16.mxu0 %v568_v33 }
  0x2f   :  { %529 = vmatprep.subr.bf16.mxu1 %v569_v34 }
  0x31   :  { %508 = vmatpush3.bf16.msra.mxu0 %v570_v36 }
  0x32   :  { %530 = vmatpush3.bf16.msra.mxu1 %v571_v37 }
  0x34   :  { %354 = vmatmul.mubr.bf16.vlgmr.msra.gmra.mrb[0].mxu0 %v115_v40 }
  0x35   :  { %394 = vmatmul.mubr.bf16.vlgmr.msra.gmra.mrb[0].mxu1 %v123_v42 }
 0x107   :  { %v509_v45 = vpop.f32.mrb[0].mxu0 }
 0x108   :  { %v510_v46 = vpop.f32.mrb[1].mxu0  ;;  %v531_v47 = vpop.f32.mrb[0].mxu1 }
 0x109   :  { %v511_v48 = vadd.f32 %v510_v46, %v509_v45  ;;  %v512_v49 = vpop.f32.mrb[2].mxu0  ;;  %v532_v50 = vpop.f32.mrb[1].mxu1 }
 0x10a   :  { %v513_v51 = vpop.f32.mrb[3].mxu0  ;;  %v533_v52 = vadd.f32 %v532_v50, %v531_v47  ;;  %v534_v53 = vpop.f32.mrb[2].mxu1 }
 0x10b   :  { %v535_v55 = vpop.f32.mrb[3].mxu1 }
 0x10c   :  { %v396_v56 = vadd.f32 %v533_v52, %v511_v48 }
 0x10e   :  { %v401_v57 = vadd.f32 %v396_v56, %v34_v54 }
 0x110   :  { %402 = vst [vmem:[#allocation2] sm:$0x3] %v401_v57 }
 0x117   :  { %v406_v59 = vld [vmem:[#allocation2] sm:$0x3] }
 0x118   :  { %v414_v60 = vadd.f32 %v491_v58, %v406_v59 }
 0x11a   :  { %v415_v61 = vmax.f32 %v414_v60, 0.0 }
 0x11c   :  { %v416_v62 = vpack.c.bf16 %v415_v61, %v415_v61 }
 0x11e   :  { %417 = vst [vmem:[#allocation5] sm:$0x1] %v416_v62 }
 0x125   :  { %v435_v63 = vld [vmem:[#allocation5] sm:$0x1] }
 0x126   :  { %492 = vst [vmem:[%s742_s4 + $0x4] sm:$0x1] %v435_v63 }
 0x127   :  { %453 = vsyncpa [#allocation4], 1 }

// kernel: resnet_cifar100_forward.98
= control target key start
LH: loop header
LB: loop body
LE: loop exit
PB: predicated region body
PF: predicated region fallthrough
CT: control target
= control target key end

     0   :  { %v514_v1 = vmov 0   ;;  %v308_v34 = vlaneseq  ;;  %v515_v36 = vmov 1983009808   ;;  %s650_s1 = inlined_call_operand.vmem [shape: bf16[1,128,512], index: 1, kind: input, shape index: {}]   ;;  %s651_s0 = inlined_call_operand.vmem [shape: bf16[1,2,128], index: 0, kind: input, shape index: {}]   ;;  %s652_s2 = inlined_call_operand.vmem [shape: f32[1,512], index: 2, kind: input, shape index: {}]   ;;  %s653_s3 = inlined_call_operand.vmem [shape: bf16[2,512], index: 3, kind: input, shape index: {}]   ;;  %s654_s4 = inlined_call_operand.vmem [shape: bf16[2,512], index: 4, kind: output, shape index: {}]  }
   0x1   :  { %v466_v0 = vld [vmem:[%s650_s1 + $0x4] ss:$16 sps:$4 sm:$0xff]   ;;  %249 = vmatprep.mubr.bf16.mxu0 %v514_v1  ;;  %290 = vmatprep.mubr.bf16.mxu1 %v514_v1  ;;  %v468_v2 = vld [vmem:[%s650_s1 + $0xc] ss:$16 sps:$4 sm:$0xff]   ;;  %v470_v3 = vld [vmem:[%s650_s1] ss:$16 sps:$4 sm:$0xff]   ;;  %v306_v37 = vunpack.c.l.s4 %v515_v36 }
   0x2   :  { %217 = vmatprep.subr.bf16.mxu0 %v466_v0  ;;  %v471_v4 = vld [vmem:[%s650_s1 + $0x8] ss:$16 sps:$4 sm:$0xff]   ;;  %258 = vmatprep.subr.bf16.mxu1 %v468_v2  ;;  %v472_v5 = vld [vmem:[%s650_s1 + $0x24] ss:$16 sps:$4 sm:$0xff]   ;;  %v474_v6 = vld [vmem:[%s650_s1 + $0x2c] ss:$16 sps:$4 sm:$0xff]  }
   0x3   :  { %218 = vmatpush1.bf16.msra.mxu0 %v470_v3  ;;  %259 = vmatpush1.bf16.msra.mxu1 %v471_v4  ;;  %v476_v7 = vld [vmem:[%s650_s1 + $0x20] ss:$16 sps:$4 sm:$0xff]   ;;  %v477_v8 = vld [vmem:[%s650_s1 + $0x28] ss:$16 sps:$4 sm:$0xff]   ;;  %v478_v9 = vld [vmem:[%s650_s1 + $0x44] ss:$16 sps:$4 sm:$0xff]   ;;  %v307_v43 = vunpack.c.0.s8 %v306_v37 }
   0x4   :  { %219 = vmatprep.subr.bf16.mxu0 %v472_v5  ;;  %260 = vmatprep.subr.bf16.mxu1 %v474_v6  ;;  %v480_v10 = vld [vmem:[%s650_s1 + $0x4c] ss:$16 sps:$4 sm:$0xff]   ;;  %v482_v11 = vld [vmem:[%s650_s1 + $0x40] ss:$16 sps:$4 sm:$0xff]   ;;  %v483_v12 = vld [vmem:[%s650_s1 + $0x48] ss:$16 sps:$4 sm:$0xff]  }
   0x5   :  { %v484_v13 = vld [vmem:[%s650_s1 + $0x64] ss:$16 sps:$4 sm:$0xff]   ;;  %v486_v14 = vld [vmem:[%s650_s1 + $0x6c] ss:$16 sps:$4 sm:$0xff]   ;;  %v488_v15 = vld [vmem:[%s650_s1 + $0x60] ss:$16 sps:$4 sm:$0xff]  }
   0x6   :  { %v489_v16 = vld [vmem:[%s650_s1 + $0x68] ss:$16 sps:$4 sm:$0xff]   ;;  %v490_v17 = vld [vmem:[%s650_s1 + $0x84] ss:$16 sps:$4 sm:$0xff]   ;;  %v492_v18 = vld [vmem:[%s650_s1 + $0x8c] ss:$16 sps:$4 sm:$0xff]  }
   0x7   :  { %220 = vmatpush1.bf16.msra.mxu0 %v476_v7  ;;  %261 = vmatpush1.bf16.msra.mxu1 %v477_v8  ;;  %v494_v19 = vld [vmem:[%s650_s1 + $0x80] ss:$16 sps:$4 sm:$0xff]   ;;  %v495_v20 = vld [vmem:[%s650_s1 + $0x88] ss:$16 sps:$4 sm:$0xff]   ;;  %v496_v21 = vld [vmem:[%s650_s1 + $0xa4] ss:$16 sps:$4 sm:$0xff]  }
   0x8   :  { %221 = vmatprep.subr.bf16.mxu0 %v478_v9  ;;  %262 = vmatprep.subr.bf16.mxu1 %v480_v10  ;;  %v498_v22 = vld [vmem:[%s650_s1 + $0xac] ss:$16 sps:$4 sm:$0xff]   ;;  %v500_v23 = vld [vmem:[%s650_s1 + $0xa0] ss:$16 sps:$4 sm:$0xff]   ;;  %v501_v24 = vld [vmem:[%s650_s1 + $0xa8] ss:$16 sps:$4 sm:$0xff]  }
   0x9   :  { %v502_v25 = vld [vmem:[%s650_s1 + $0xc4] ss:$16 sps:$4 sm:$0xff]   ;;  %v504_v26 = vld [vmem:[%s650_s1 + $0xcc] ss:$16 sps:$4 sm:$0xff]   ;;  %v506_v27 = vld [vmem:[%s650_s1 + $0xc0] ss:$16 sps:$4 sm:$0xff]  }
   0xa   :  { %v507_v28 = vld [vmem:[%s650_s1 + $0xc8] ss:$16 sps:$4 sm:$0xff]   ;;  %v508_v29 = vld [vmem:[%s650_s1 + $0xe4] ss:$16 sps:$4 sm:$0xff]   ;;  %v510_v30 = vld [vmem:[%s650_s1 + $0xec] ss:$16 sps:$4 sm:$0xff]  }
   0xb   :  { %222 = vmatpush1.bf16.msra.mxu0 %v482_v11  ;;  %263 = vmatpush1.bf16.msra.mxu1 %v483_v12  ;;  %v512_v31 = vld [vmem:[%s650_s1 + $0xe0] ss:$16 sps:$4 sm:$0xff]   ;;  %v513_v32 = vld [vmem:[%s650_s1 + $0xe8] ss:$16 sps:$4 sm:$0xff]   ;;  %v309_v35 = vshrl.u32 %v308_v34, 7 }
   0xc   :  { %223 = vmatprep.subr.bf16.mxu0 %v484_v13  ;;  %264 = vmatprep.subr.bf16.mxu1 %v486_v14  ;;  %v24_v33 = vld [vmem:[%s651_s0] sm:$0x1]  ;;  %v516_v7 = vmov 1966171168  }
   0xd   :  { %v331_v38 = vsub.s32 0, %v309_v35  ;;  %v335_v39 = vsub.s32 1, %v309_v35  ;;  %v339_v40 = vsub.s32 2, %v309_v35  ;;  %v343_v41 = vsub.s32 3, %v309_v35  ;;  %v327_v42 = vld [vmem:[%s652_s2] sm:$0xf] }
   0xe   :  { %v310_v48 = vsub.s32 %v307_v43, %v309_v35  ;;  %v364_v61 = vld [vmem:[%s653_s3] sm:$0xf]  ;;  %v401_v8 = vunpack.c.l.s4 %v516_v7 }
   0xf   :  { %224 = vmatpush1.bf16.msra.mxu0 %v488_v15  ;;  %265 = vmatpush1.bf16.msra.mxu1 %v489_v16  ;;  %v332_v44 = vrot.slane %v327_v42, %v331_v38  ;;  %v336_v45 = vrot.slane %v327_v42, %v335_v39  ;;  %v340_v46 = vrot.slane %v327_v42, %v339_v40  ;;  %v365_v4 = vunpack.c.l.bf16 %v364_v61 }
  0x10   :  { %225 = vmatprep.subr.bf16.mxu0 %v490_v17  ;;  %266 = vmatprep.subr.bf16.mxu1 %v492_v18  ;;  %v344_v47 = vrot.slane %v327_v42, %v343_v41  ;;  %v402_v12 = vunpack.c.0.s8 %v401_v8 }
  0x11   :  { %v345_v49 = vcombine.low %v332_v44, %v336_v45 }
  0x12   :  { %v346_v50 = vcombine.low %v340_v46, %v344_v47  ;;  %v405_v17 = vsub.s32 %v402_v12, %v309_v35 }
  0x13   :  { %226 = vmatpush1.bf16.msra.mxu0 %v494_v19  ;;  %267 = vmatpush1.bf16.msra.mxu1 %v495_v20  ;;  %v353_v53 = vrot.slane %v345_v49, %v310_v48 }
  0x14   :  { %227 = vmatprep.subr.bf16.mxu0 %v496_v21  ;;  %268 = vmatprep.subr.bf16.mxu1 %v498_v22  ;;  %v360_v54 = vrot.slane %v346_v50, %v310_v48 }
  0x16   :  { %v361_v2 = vcombine.low %v353_v53, %v360_v54 }
  0x17   :  { %228 = vmatpush1.bf16.msra.mxu0 %v500_v23  ;;  %269 = vmatpush1.bf16.msra.mxu1 %v501_v24 }
  0x18   :  { %229 = vmatprep.subr.bf16.mxu0 %v502_v25  ;;  %270 = vmatprep.subr.bf16.mxu1 %v504_v26 }
  0x1b   :  { %230 = vmatpush1.bf16.msra.mxu0 %v506_v27  ;;  %271 = vmatpush1.bf16.msra.mxu1 %v507_v28 }
  0x1c   :  { %231 = vmatprep.subr.bf16.mxu0 %v508_v29  ;;  %272 = vmatprep.subr.bf16.mxu1 %v510_v30 }
  0x1f   :  { %232 = vmatpush1.bf16.msra.mxu0 %v512_v31  ;;  %273 = vmatpush1.bf16.msra.mxu1 %v513_v32 }
  0x22   :  { %250 = vmatmul.mubr.bf16.vlgmr.msra.gmra.mrb[0].mxu0 %v24_v33  ;;  %291 = vmatmul.mubr.bf16.vlgmr.msra.gmra.mrb[0].mxu1 %v24_v33 }
  0xf5   :  { %v251_v51 = vpop.f32.mrb[0].mxu0  ;;  %v292_v52 = vpop.f32.mrb[0].mxu1 }
  0xf6   :  { %v253_v55 = vpop.f32.mrb[1].mxu0  ;;  %v294_v56 = vpop.f32.mrb[1].mxu1 }
  0xf7   :  { %v303_v57 = vcombine.low %v251_v51, %v253_v55  ;;  %v304_v58 = vcombine.low %v292_v52, %v294_v56  ;;  %v255_v59 = vpop.f32.mrb[2].mxu0  ;;  %v296_v60 = vpop.f32.mrb[2].mxu1 }
  0xf8   :  { %v256_v62 = vpop.f32.mrb[3].mxu0  ;;  %v297_v63 = vpop.f32.mrb[3].mxu1 }
  0xf9   :  { %v311_v0 = vrot.slane %v303_v57, %v310_v48  ;;  %v318_v1 = vrot.slane %v304_v58, %v310_v48 }
  0xfb   :  { %v319_v3 = vcombine.low %v311_v0, %v318_v1 }
  0xfd   :  { %v363_v5 = vadd.f32 %v361_v2, %v319_v3 }
  0xff   :  { %v366_v6 = vadd.f32 %v365_v4, %v363_v5 }
 0x101   :  { %v367_v9 = vmax.f32 %v366_v6, 0.0 }
 0x103   :  { %v369_v10 = vcombine.high %v367_v9, %v367_v9  ;;  %v376_v11 = vrot.slane %v367_v9, %v310_v48 }
 0x105   :  { %v383_v13 = vrot.slane %v369_v10, %v310_v48  ;;  %v384_v14 = vcombine.high %v376_v11, %v376_v11 }
 0x107   :  { %v385_v15 = vcombine.high %v383_v13, %v383_v13  ;;  %v460_v16 = vpack.c.bf16 %v384_v14, %v376_v11 }
 0x109   :  { %v461_v18 = vpack.c.bf16 %v385_v15, %v383_v13  ;;  %v406_v19 = vrot.slane %v460_v16, %v405_v17 }
 0x10b   :  { %v413_v20 = vrot.slane %v461_v18, %v405_v17 }
 0x10d   :  { %v414_v21 = vcombine.low %v406_v19, %v413_v20 }
 0x10f   :  { %462 = vst.sshfl [vmem:[%s654_s4] sm:$0x55 pattern:$0x73625140] %v414_v21 }

// kernel: resnet_cifar100_forward.96
= control target key start
LH: loop header
LB: loop body
LE: loop exit
PB: predicated region body
PF: predicated region fallthrough
CT: control target
= control target key end

     0   :  { %v95_v38 = vlaneseq  ;;  %v1214_v39 = vmov 1966171168   ;;  %s1569_s4 = inlined_call_operand.vmem [shape: bf16[1,256,512], index: 4, kind: input, shape index: {}]   ;;  %s1570_s3 = inlined_call_operand.vmem [shape: bf16[1,2,256], index: 3, kind: input, shape index: {}]   ;;  %s1571_s1 = inlined_call_operand.vmem [shape: bf16[1,128,512], index: 1, kind: input, shape index: {}]   ;;  %s1572_s0 = inlined_call_operand.vmem [shape: bf16[1,2,128], index: 0, kind: input, shape index: {}]   ;;  %s1573_s5 = inlined_call_operand.vmem [shape: f32[1,512], index: 5, kind: input, shape index: {}]   ;;  %s1574_s2 = inlined_call_operand.vmem [shape: f32[1,512], index: 2, kind: input, shape index: {}]   ;;  %s1575_s6 = inlined_call_operand.vmem [shape: bf16[2,512], index: 6, kind: output, shape index: {}]  }
   0x1   :  { %v1070_v0 = vld [vmem:[%s1569_s4 + $0x4] ss:$16 sps:$4 sm:$0xff]   ;;  %v1072_v1 = vld [vmem:[%s1569_s4 + $0xc] ss:$16 sps:$4 sm:$0xff]   ;;  %v1074_v2 = vld [vmem:[%s1569_s4] ss:$16 sps:$4 sm:$0xff]   ;;  %v125_v40 = vunpack.c.l.s4 %v1214_v39 }
   0x2   :  { %460 = vmatprep.subr.bf16.mxu0 %v1070_v0  ;;  %v1075_v3 = vld [vmem:[%s1569_s4 + $0x8] ss:$16 sps:$4 sm:$0xff]   ;;  %501 = vmatprep.subr.bf16.mxu1 %v1072_v1  ;;  %v1076_v4 = vld [vmem:[%s1569_s4 + $0x24] ss:$16 sps:$4 sm:$0xff]   ;;  %v1078_v5 = vld [vmem:[%s1569_s4 + $0x2c] ss:$16 sps:$4 sm:$0xff]  }
   0x3   :  { %461 = vmatpush1.bf16.msra.mxu0 %v1074_v2  ;;  %502 = vmatpush1.bf16.msra.mxu1 %v1075_v3  ;;  %v1080_v6 = vld [vmem:[%s1569_s4 + $0x20] ss:$16 sps:$4 sm:$0xff]   ;;  %v1081_v7 = vld [vmem:[%s1569_s4 + $0x28] ss:$16 sps:$4 sm:$0xff]   ;;  %v1082_v8 = vld [vmem:[%s1569_s4 + $0x44] ss:$16 sps:$4 sm:$0xff]   ;;  %v126_v46 = vunpack.c.0.s8 %v125_v40 }
   0x4   :  { %462 = vmatprep.subr.bf16.mxu0 %v1076_v4  ;;  %503 = vmatprep.subr.bf16.mxu1 %v1078_v5  ;;  %v1084_v9 = vld [vmem:[%s1569_s4 + $0x4c] ss:$16 sps:$4 sm:$0xff]   ;;  %v1086_v10 = vld [vmem:[%s1569_s4 + $0x40] ss:$16 sps:$4 sm:$0xff]   ;;  %v1087_v11 = vld [vmem:[%s1569_s4 + $0x48] ss:$16 sps:$4 sm:$0xff]  }
   0x5   :  { %v1088_v12 = vld [vmem:[%s1569_s4 + $0x64] ss:$16 sps:$4 sm:$0xff]   ;;  %v1090_v13 = vld [vmem:[%s1569_s4 + $0x6c] ss:$16 sps:$4 sm:$0xff]   ;;  %v1092_v14 = vld [vmem:[%s1569_s4 + $0x60] ss:$16 sps:$4 sm:$0xff]  }
   0x6   :  { %v1093_v15 = vld [vmem:[%s1569_s4 + $0x68] ss:$16 sps:$4 sm:$0xff]   ;;  %v1094_v16 = vld [vmem:[%s1569_s4 + $0x84] ss:$16 sps:$4 sm:$0xff]   ;;  %v1096_v17 = vld [vmem:[%s1569_s4 + $0x8c] ss:$16 sps:$4 sm:$0xff]  }
   0x7   :  { %463 = vmatpush1.bf16.msra.mxu0 %v1080_v6  ;;  %504 = vmatpush1.bf16.msra.mxu1 %v1081_v7  ;;  %v1098_v18 = vld [vmem:[%s1569_s4 + $0x80] ss:$16 sps:$4 sm:$0xff]   ;;  %v1099_v19 = vld [vmem:[%s1569_s4 + $0x88] ss:$16 sps:$4 sm:$0xff]   ;;  %v1100_v20 = vld [vmem:[%s1569_s4 + $0xa4] ss:$16 sps:$4 sm:$0xff]  }
   0x8   :  { %464 = vmatprep.subr.bf16.mxu0 %v1082_v8  ;;  %505 = vmatprep.subr.bf16.mxu1 %v1084_v9  ;;  %v1102_v21 = vld [vmem:[%s1569_s4 + $0xac] ss:$16 sps:$4 sm:$0xff]   ;;  %v1104_v22 = vld [vmem:[%s1569_s4 + $0xa0] ss:$16 sps:$4 sm:$0xff]   ;;  %v1105_v23 = vld [vmem:[%s1569_s4 + $0xa8] ss:$16 sps:$4 sm:$0xff]  }
   0x9   :  { %v1106_v24 = vld [vmem:[%s1569_s4 + $0xc4] ss:$16 sps:$4 sm:$0xff]   ;;  %v1108_v25 = vld [vmem:[%s1569_s4 + $0xcc] ss:$16 sps:$4 sm:$0xff]   ;;  %v1110_v26 = vld [vmem:[%s1569_s4 + $0xc0] ss:$16 sps:$4 sm:$0xff]  }
   0xa   :  { %v1111_v27 = vld [vmem:[%s1569_s4 + $0xc8] ss:$16 sps:$4 sm:$0xff]   ;;  %v1112_v28 = vld [vmem:[%s1569_s4 + $0xe4] ss:$16 sps:$4 sm:$0xff]   ;;  %v1114_v29 = vld [vmem:[%s1569_s4 + $0xec] ss:$16 sps:$4 sm:$0xff]  }
   0xb   :  { %465 = vmatpush1.bf16.msra.mxu0 %v1086_v10  ;;  %506 = vmatpush1.bf16.msra.mxu1 %v1087_v11  ;;  %v1116_v30 = vld [vmem:[%s1569_s4 + $0xe0] ss:$16 sps:$4 sm:$0xff]   ;;  %v1117_v31 = vld [vmem:[%s1569_s4 + $0xe8] ss:$16 sps:$4 sm:$0xff]   ;;  %v1118_v32 = vld [vmem:[%s1569_s4 + $0x104] ss:$16 sps:$4 sm:$0xff]  }
   0xc   :  { %466 = vmatprep.subr.bf16.mxu0 %v1088_v12  ;;  %507 = vmatprep.subr.bf16.mxu1 %v1090_v13  ;;  %v1120_v33 = vld [vmem:[%s1569_s4 + $0x10c] ss:$16 sps:$4 sm:$0xff]   ;;  %v1122_v34 = vld [vmem:[%s1569_s4 + $0x100] ss:$16 sps:$4 sm:$0xff]   ;;  %v1123_v35 = vld [vmem:[%s1569_s4 + $0x108] ss:$16 sps:$4 sm:$0xff]  }
   0xd   :  { %v1124_v36 = vld [vmem:[%s1569_s4 + $0x124] ss:$16 sps:$4 sm:$0xff]   ;;  %v1126_v37 = vld [vmem:[%s1569_s4 + $0x12c] ss:$16 sps:$4 sm:$0xff]   ;;  %v1128_v41 = vld [vmem:[%s1569_s4 + $0x120] ss:$16 sps:$4 sm:$0xff]  }
   0xe   :  { %v1129_v42 = vld [vmem:[%s1569_s4 + $0x128] ss:$16 sps:$4 sm:$0xff]   ;;  %v1130_v43 = vld [vmem:[%s1569_s4 + $0x144] ss:$16 sps:$4 sm:$0xff]   ;;  %v1132_v44 = vld [vmem:[%s1569_s4 + $0x14c] ss:$16 sps:$4 sm:$0xff]  }
   0xf   :  { %467 = vmatpush1.bf16.msra.mxu0 %v1092_v14  ;;  %508 = vmatpush1.bf16.msra.mxu1 %v1093_v15  ;;  %v1378_v45 = vshrl.u32 %v95_v38, 7  ;;  %v1134_v47 = vld [vmem:[%s1569_s4 + $0x140] ss:$16 sps:$4 sm:$0xff]   ;;  %v1135_v48 = vld [vmem:[%s1569_s4 + $0x148] ss:$16 sps:$4 sm:$0xff]  }
  0x10   :  { %468 = vmatprep.subr.bf16.mxu0 %v1094_v16  ;;  %509 = vmatprep.subr.bf16.mxu1 %v1096_v17  ;;  %v1136_v49 = vld [vmem:[%s1569_s4 + $0x164] ss:$16 sps:$4 sm:$0xff]   ;;  %v1138_v50 = vld [vmem:[%s1569_s4 + $0x16c] ss:$16 sps:$4 sm:$0xff]   ;;  %v1140_v53 = vld [vmem:[%s1569_s4 + $0x160] ss:$16 sps:$4 sm:$0xff]  }
  0x11   :  { %v1393_v51 = vsub.s32 %v126_v46, %v1378_v45  ;;  %v967_v52 = vld.sshfl [vmem:[%s1570_s3] sm:$0x11 pattern:$0x75316420]  ;;  %v1141_v54 = vld [vmem:[%s1569_s4 + $0x168] ss:$16 sps:$4 sm:$0xff]  }
  0x12   :  { %v123_v55 = vcombine.high %v967_v52, %v967_v52  ;;  %v1142_v56 = vld [vmem:[%s1569_s4 + $0x184] ss:$16 sps:$4 sm:$0xff]   ;;  %v1144_v57 = vld [vmem:[%s1569_s4 + $0x18c] ss:$16 sps:$4 sm:$0xff]   ;;  %v1146_v59 = vld [vmem:[%s1569_s4 + $0x180] ss:$16 sps:$4 sm:$0xff]  }
  0x13   :  { %469 = vmatpush1.bf16.msra.mxu0 %v1098_v18  ;;  %510 = vmatpush1.bf16.msra.mxu1 %v1099_v19  ;;  %v1147_v60 = vld [vmem:[%s1569_s4 + $0x188] ss:$16 sps:$4 sm:$0xff]   ;;  %v1148_v61 = vld [vmem:[%s1569_s4 + $0x1a4] ss:$16 sps:$4 sm:$0xff]   ;;  %v1150_v62 = vld [vmem:[%s1569_s4 + $0x1ac] ss:$16 sps:$4 sm:$0xff]   ;;  %v130_v11 = vrot.slane %v967_v52, %v1393_v51 }
  0x14   :  { %470 = vmatprep.subr.bf16.mxu0 %v1100_v20  ;;  %511 = vmatprep.subr.bf16.mxu1 %v1102_v21  ;;  %v137_v58 = vrot.slane %v123_v55, %v1393_v51  ;;  %v1152_v63 = vld [vmem:[%s1569_s4 + $0x1a0] ss:$16 sps:$4 sm:$0xff]   ;;  %v1153_v0 = vld [vmem:[%s1569_s4 + $0x1a8] ss:$16 sps:$4 sm:$0xff]   ;;  %v1154_v1 = vld [vmem:[%s1569_s4 + $0x1c4] ss:$16 sps:$4 sm:$0xff]  }
  0x15   :  { %v1156_v2 = vld [vmem:[%s1569_s4 + $0x1cc] ss:$16 sps:$4 sm:$0xff]   ;;  %v1158_v3 = vld [vmem:[%s1569_s4 + $0x1c0] ss:$16 sps:$4 sm:$0xff]   ;;  %v1159_v4 = vld [vmem:[%s1569_s4 + $0x1c8] ss:$16 sps:$4 sm:$0xff]  }
  0x16   :  { %492 = vmatprep.mubr.bf16.mxu0 %v137_v58  ;;  %533 = vmatprep.mubr.bf16.mxu1 %v137_v58  ;;  %v1160_v5 = vld [vmem:[%s1569_s4 + $0x1e4] ss:$16 sps:$4 sm:$0xff]   ;;  %v1162_v6 = vld [vmem:[%s1569_s4 + $0x1ec] ss:$16 sps:$4 sm:$0xff]   ;;  %v1164_v7 = vld [vmem:[%s1569_s4 + $0x1e0] ss:$16 sps:$4 sm:$0xff]  }
  0x17   :  { %471 = vmatpush1.bf16.msra.mxu0 %v1104_v22  ;;  %512 = vmatpush1.bf16.msra.mxu1 %v1105_v23  ;;  %v1165_v8 = vld [vmem:[%s1569_s4 + $0x1e8] ss:$16 sps:$4 sm:$0xff]   ;;  %v1168_v9 = vld [vmem:[%s1571_s1 + $0x4] ss:$16 sps:$4 sm:$0xff]   ;;  %v1171_v10 = vld [vmem:[%s1571_s1 + $0xc] ss:$16 sps:$4 sm:$0xff]  }
  0x18   :  { %472 = vmatprep.subr.bf16.mxu0 %v1106_v24  ;;  %513 = vmatprep.subr.bf16.mxu1 %v1108_v25  ;;  %v1166_v12 = vld [vmem:[%s1571_s1] ss:$16 sps:$4 sm:$0xff]   ;;  %v1169_v13 = vld [vmem:[%s1571_s1 + $0x8] ss:$16 sps:$4 sm:$0xff]   ;;  %v1174_v14 = vld [vmem:[%s1571_s1 + $0x24] ss:$16 sps:$4 sm:$0xff]  }
  0x19   :  { %v1177_v15 = vld [vmem:[%s1571_s1 + $0x2c] ss:$16 sps:$4 sm:$0xff]   ;;  %v1172_v16 = vld [vmem:[%s1571_s1 + $0x20] ss:$16 sps:$4 sm:$0xff]   ;;  %v1175_v17 = vld [vmem:[%s1571_s1 + $0x28] ss:$16 sps:$4 sm:$0xff]  }
  0x1a   :  { %v1180_v18 = vld [vmem:[%s1571_s1 + $0x44] ss:$16 sps:$4 sm:$0xff]   ;;  %v1183_v19 = vld [vmem:[%s1571_s1 + $0x4c] ss:$16 sps:$4 sm:$0xff]   ;;  %v1215_v20 = vmov 0   ;;  %v105_v46 = vsub.s32 2, %v1378_v45 }
  0x1b   :  { %473 = vmatpush1.bf16.msra.mxu0 %v1110_v26  ;;  %514 = vmatpush1.bf16.msra.mxu1 %v1111_v27  ;;  %v1178_v21 = vld [vmem:[%s1571_s1 + $0x40] ss:$16 sps:$4 sm:$0xff]   ;;  %v1181_v22 = vld [vmem:[%s1571_s1 + $0x48] ss:$16 sps:$4 sm:$0xff]   ;;  %v1186_v23 = vld [vmem:[%s1571_s1 + $0x64] ss:$16 sps:$4 sm:$0xff]  }
  0x1c   :  { %474 = vmatprep.subr.bf16.mxu0 %v1112_v28  ;;  %515 = vmatprep.subr.bf16.mxu1 %v1114_v29  ;;  %v1189_v24 = vld [vmem:[%s1571_s1 + $0x6c] ss:$16 sps:$4 sm:$0xff]   ;;  %v1184_v25 = vld [vmem:[%s1571_s1 + $0x60] ss:$16 sps:$4 sm:$0xff]   ;;  %v1187_v26 = vld [vmem:[%s1571_s1 + $0x68] ss:$16 sps:$4 sm:$0xff]  }
  0x1d   :  { %v1192_v27 = vld [vmem:[%s1571_s1 + $0x84] ss:$16 sps:$4 sm:$0xff]   ;;  %v1195_v28 = vld [vmem:[%s1571_s1 + $0x8c] ss:$16 sps:$4 sm:$0xff]   ;;  %v1190_v29 = vld [vmem:[%s1571_s1 + $0x80] ss:$16 sps:$4 sm:$0xff]  }
  0x1e   :  { %v1205_v38 = vld [vmem:[%s1571_s1 + $0xc8] ss:$16 sps:$4 sm:$0xff]   ;;  %v1210_v39 = vld [vmem:[%s1571_s1 + $0xe4] ss:$16 sps:$4 sm:$0xff]   ;;  %v1213_v40 = vld [vmem:[%s1571_s1 + $0xec] ss:$16 sps:$4 sm:$0xff]  }
  0x1f   :  { %475 = vmatpush1.bf16.msra.mxu0 %v1116_v30  ;;  %516 = vmatpush1.bf16.msra.mxu1 %v1117_v31  ;;  %v1193_v30 = vld [vmem:[%s1571_s1 + $0x88] ss:$16 sps:$4 sm:$0xff]   ;;  %v1198_v31 = vld [vmem:[%s1571_s1 + $0xa4] ss:$16 sps:$4 sm:$0xff]   ;;  %v109_v52 = vsub.s32 3, %v1378_v45 }
  0x20   :  { %476 = vmatprep.subr.bf16.mxu0 %v1118_v32  ;;  %517 = vmatprep.subr.bf16.mxu1 %v1120_v33  ;;  %v1201_v32 = vld [vmem:[%s1571_s1 + $0xac] ss:$16 sps:$4 sm:$0xff]   ;;  %v1196_v33 = vld [vmem:[%s1571_s1 + $0xa0] ss:$16 sps:$4 sm:$0xff]  }
  0x23   :  { %477 = vmatpush1.bf16.msra.mxu0 %v1122_v34  ;;  %518 = vmatpush1.bf16.msra.mxu1 %v1123_v35  ;;  %v1199_v34 = vld [vmem:[%s1571_s1 + $0xa8] ss:$16 sps:$4 sm:$0xff]   ;;  %v1204_v35 = vld [vmem:[%s1571_s1 + $0xc4] ss:$16 sps:$4 sm:$0xff]  }
  0x24   :  { %478 = vmatprep.subr.bf16.mxu0 %v1124_v36  ;;  %519 = vmatprep.subr.bf16.mxu1 %v1126_v37  ;;  %v1207_v36 = vld [vmem:[%s1571_s1 + $0xcc] ss:$16 sps:$4 sm:$0xff]   ;;  %v1202_v37 = vld [vmem:[%s1571_s1 + $0xc0] ss:$16 sps:$4 sm:$0xff]  }
  0x27   :  { %479 = vmatpush1.bf16.msra.mxu0 %v1128_v41  ;;  %520 = vmatpush1.bf16.msra.mxu1 %v1129_v42  ;;  %v1208_v41 = vld [vmem:[%s1571_s1 + $0xe0] ss:$16 sps:$4 sm:$0xff]   ;;  %v1211_v42 = vld [vmem:[%s1571_s1 + $0xe8] ss:$16 sps:$4 sm:$0xff]  }
  0x28   :  { %480 = vmatprep.subr.bf16.mxu0 %v1130_v43  ;;  %521 = vmatprep.subr.bf16.mxu1 %v1132_v44  ;;  %v566_v43 = vld [vmem:[%s1572_s0] sm:$0x1]  ;;  %v97_v44 = vsub.s32 0, %v1378_v45 }
  0x2b   :  { %481 = vmatpush1.bf16.msra.mxu0 %v1134_v47  ;;  %522 = vmatpush1.bf16.msra.mxu1 %v1135_v48  ;;  %v93_v47 = vld [vmem:[%s1573_s5] sm:$0xf]  ;;  %v101_v48 = vsub.s32 1, %v1378_v45 }
  0x2c   :  { %482 = vmatprep.subr.bf16.mxu0 %v1136_v49  ;;  %523 = vmatprep.subr.bf16.mxu1 %v1138_v50  ;;  %v1216_v49 = vmov 1983009808  }
  0x2d   :  { %v549_v50 = vunpack.c.l.s4 %v1216_v49  ;;  %v102_v55 = vrot.slane %v93_v47, %v101_v48 }
  0x2f   :  { %483 = vmatpush1.bf16.msra.mxu0 %v1140_v53  ;;  %524 = vmatpush1.bf16.msra.mxu1 %v1141_v54  ;;  %v98_v53 = vrot.slane %v93_v47, %v97_v44  ;;  %v106_v54 = vrot.slane %v93_v47, %v105_v46 }
  0x30   :  { %484 = vmatprep.subr.bf16.mxu0 %v1142_v56  ;;  %525 = vmatprep.subr.bf16.mxu1 %v1144_v57  ;;  %v550_v56 = vunpack.c.0.s8 %v549_v50  ;;  %v110_v57 = vrot.slane %v93_v47, %v109_v52 }
  0x33   :  { %485 = vmatpush1.bf16.msra.mxu0 %v1146_v59  ;;  %526 = vmatpush1.bf16.msra.mxu1 %v1147_v60 }
  0x34   :  { %486 = vmatprep.subr.bf16.mxu0 %v1148_v61  ;;  %527 = vmatprep.subr.bf16.mxu1 %v1150_v62 }
  0x37   :  { %487 = vmatpush1.bf16.msra.mxu0 %v1152_v63  ;;  %528 = vmatpush1.bf16.msra.mxu1 %v1153_v0 }
  0x38   :  { %488 = vmatprep.subr.bf16.mxu0 %v1154_v1  ;;  %529 = vmatprep.subr.bf16.mxu1 %v1156_v2  ;;  %v553_v1 = vsub.s32 %v550_v56, %v1378_v45 }
  0x3b   :  { %489 = vmatpush1.bf16.msra.mxu0 %v1158_v3  ;;  %530 = vmatpush1.bf16.msra.mxu1 %v1159_v4 }
  0x3c   :  { %490 = vmatprep.subr.bf16.mxu0 %v1160_v5  ;;  %531 = vmatprep.subr.bf16.mxu1 %v1162_v6 }
  0x3f   :  { %491 = vmatpush1.bf16.msra.mxu0 %v1164_v7  ;;  %532 = vmatpush1.bf16.msra.mxu1 %v1165_v8 }
  0x40   :  { %759 = vmatprep.subr.bf16.mxu0 %v1168_v9  ;;  %800 = vmatprep.subr.bf16.mxu1 %v1171_v10 }
  0x42   :  { %493 = vmatmul.mubr.bf16.vlgmr.msra.gmra.mrb[0].mxu0 %v130_v11  ;;  %534 = vmatmul.mubr.bf16.vlgmr.msra.gmra.mrb[0].mxu1 %v130_v11 }
  0x43   :  { %760 = vmatpush1.bf16.msra.mxu0 %v1166_v12  ;;  %801 = vmatpush1.bf16.msra.mxu1 %v1169_v13  ;;  %v869_v12 = vld [vmem:[%s1574_s2] sm:$0xf] }
  0x44   :  { %761 = vmatprep.subr.bf16.mxu0 %v1174_v14  ;;  %802 = vmatprep.subr.bf16.mxu1 %v1177_v15  ;;  %v874_v13 = vrot.slane %v869_v12, %v97_v44  ;;  %v882_v14 = vrot.slane %v869_v12, %v105_v46  ;;  %v878_v15 = vrot.slane %v869_v12, %v101_v48 }
  0x45   :  { %791 = vmatprep.mubr.bf16.mxu0 %v1215_v20  ;;  %832 = vmatprep.mubr.bf16.mxu1 %v1215_v20 }
  0x47   :  { %762 = vmatpush1.bf16.msra.mxu0 %v1172_v16  ;;  %803 = vmatpush1.bf16.msra.mxu1 %v1175_v17  ;;  %v886_v16 = vrot.slane %v869_v12, %v109_v52  ;;  %v887_v17 = vcombine.low %v874_v13, %v878_v15 }
  0x48   :  { %763 = vmatprep.subr.bf16.mxu0 %v1180_v18  ;;  %804 = vmatprep.subr.bf16.mxu1 %v1183_v19 }
  0x49   :  { %v888_v45 = vcombine.low %v882_v14, %v886_v16 }
  0x4b   :  { %764 = vmatpush1.bf16.msra.mxu0 %v1178_v21  ;;  %805 = vmatpush1.bf16.msra.mxu1 %v1181_v22  ;;  %v895_v22 = vrot.slane %v887_v17, %v553_v1 }
  0x4c   :  { %765 = vmatprep.subr.bf16.mxu0 %v1186_v23  ;;  %806 = vmatprep.subr.bf16.mxu1 %v1189_v24  ;;  %v902_v23 = vrot.slane %v888_v45, %v553_v1 }
  0x4f   :  { %766 = vmatpush1.bf16.msra.mxu0 %v1184_v25  ;;  %807 = vmatpush1.bf16.msra.mxu1 %v1187_v26 }
  0x50   :  { %767 = vmatprep.subr.bf16.mxu0 %v1192_v27  ;;  %808 = vmatprep.subr.bf16.mxu1 %v1195_v28 }
  0x53   :  { %768 = vmatpush1.bf16.msra.mxu0 %v1190_v29  ;;  %809 = vmatpush1.bf16.msra.mxu1 %v1193_v30 }
  0x54   :  { %769 = vmatprep.subr.bf16.mxu0 %v1198_v31  ;;  %810 = vmatprep.subr.bf16.mxu1 %v1201_v32 }
  0x57   :  { %770 = vmatpush1.bf16.msra.mxu0 %v1196_v33  ;;  %811 = vmatpush1.bf16.msra.mxu1 %v1199_v34  ;;  %v903_v33 = vcombine.low %v895_v22, %v902_v23 }
  0x58   :  { %771 = vmatprep.subr.bf16.mxu0 %v1204_v35  ;;  %812 = vmatprep.subr.bf16.mxu1 %v1207_v36 }
  0x5b   :  { %772 = vmatpush1.bf16.msra.mxu0 %v1202_v37  ;;  %813 = vmatpush1.bf16.msra.mxu1 %v1205_v38 }
  0x5c   :  { %773 = vmatprep.subr.bf16.mxu0 %v1210_v39  ;;  %814 = vmatprep.subr.bf16.mxu1 %v1213_v40 }
  0x5f   :  { %774 = vmatpush1.bf16.msra.mxu0 %v1208_v41  ;;  %815 = vmatpush1.bf16.msra.mxu1 %v1211_v42 }
  0x62   :  { %792 = vmatmul.mubr.bf16.vlgmr.msra.gmra.mrb[4].mxu0 %v566_v43  ;;  %833 = vmatmul.mubr.bf16.vlgmr.msra.gmra.mrb[4].mxu1 %v566_v43 }
 0x115   :  { %v494_v58 = vpop.f32.mrb[0].mxu0  ;;  %v535_v59 = vpop.f32.mrb[0].mxu1 }
 0x116   :  { %v495_v60 = vadd.f32 %v494_v58, %v98_v53  ;;  %v536_v61 = vadd.f32 %v535_v59, %v106_v54  ;;  %v496_v62 = vpop.f32.mrb[1].mxu0  ;;  %v537_v63 = vpop.f32.mrb[1].mxu1 }
 0x117   :  { %v497_v0 = vadd.f32 %v496_v62, %v102_v55  ;;  %v538_v2 = vadd.f32 %v537_v63, %v110_v57  ;;  %v498_v3 = vpop.f32.mrb[2].mxu0  ;;  %v539_v4 = vpop.f32.mrb[2].mxu1 }
 0x118   :  { %v499_v5 = vpop.f32.mrb[3].mxu0  ;;  %v540_v6 = vpop.f32.mrb[3].mxu1 }
 0x119   :  { %v546_v7 = vcombine.low %v495_v60, %v497_v0  ;;  %v547_v8 = vcombine.low %v536_v61, %v538_v2 }
 0x11b   :  { %v554_v9 = vrot.slane %v546_v7, %v553_v1  ;;  %v561_v10 = vrot.slane %v547_v8, %v553_v1 }
 0x11d   :  { %v562_v11 = vcombine.low %v554_v9, %v561_v10 }
 0x135   :  { %v793_v18 = vpop.f32.mrb[4].mxu0  ;;  %v834_v19 = vpop.f32.mrb[4].mxu1 }
 0x136   :  { %v795_v20 = vpop.f32.mrb[5].mxu0  ;;  %v836_v21 = vpop.f32.mrb[5].mxu1 }
 0x137   :  { %v845_v24 = vcombine.low %v793_v18, %v795_v20  ;;  %v846_v25 = vcombine.low %v834_v19, %v836_v21  ;;  %v797_v26 = vpop.f32.mrb[6].mxu0  ;;  %v838_v27 = vpop.f32.mrb[6].mxu1 }
 0x138   :  { %v798_v28 = vpop.f32.mrb[7].mxu0  ;;  %v839_v29 = vpop.f32.mrb[7].mxu1 }
 0x139   :  { %v853_v30 = vrot.slane %v845_v24, %v553_v1  ;;  %v860_v31 = vrot.slane %v846_v25, %v553_v1 }
 0x13b   :  { %v861_v32 = vcombine.low %v853_v30, %v860_v31 }
 0x13d   :  { %v863_v34 = vadd.f32 %v861_v32, %v562_v11 }
 0x13f   :  { %v905_v35 = vadd.f32 %v903_v33, %v863_v34 }
 0x141   :  { %v906_v36 = vmax.f32 %v905_v35, 0.0 }
 0x143   :  { %v908_v37 = vcombine.high %v906_v36, %v906_v36  ;;  %v915_v38 = vrot.slane %v906_v36, %v553_v1 }
 0x145   :  { %v922_v39 = vrot.slane %v908_v37, %v553_v1  ;;  %v923_v40 = vcombine.high %v915_v38, %v915_v38 }
 0x147   :  { %v924_v41 = vcombine.high %v922_v39, %v922_v39  ;;  %v1064_v42 = vpack.c.bf16 %v923_v40, %v915_v38 }
 0x149   :  { %v1065_v43 = vpack.c.bf16 %v924_v41, %v922_v39  ;;  %v945_v44 = vrot.slane %v1064_v42, %v1393_v51 }
 0x14b   :  { %v952_v46 = vrot.slane %v1065_v43, %v1393_v51 }
 0x14d   :  { %v953_v47 = vcombine.low %v945_v44, %v952_v46 }
 0x14f   :  { %1066 = vst.sshfl [vmem:[%s1575_s6] sm:$0x55 pattern:$0x73625140] %v953_v47 }

// kernel: resnet_cifar100_forward.99
= control target key start
LH: loop header
LB: loop body
LE: loop exit
PB: predicated region body
PF: predicated region fallthrough
CT: control target
= control target key end

     0   :  { %s531_s12 = smov 0   ;;  %s533_s13 = smov 0   ;;  %s585_s0 = inlined_call_operand.vmem [shape: bf16[9,2,128], index: 0, kind: input, shape index: {}]   ;;  %s586_s1 = inlined_call_operand.vmem [shape: bf16[9,128,128], index: 1, kind: input, shape index: {}]   ;;  %s587_s2 = inlined_call_operand.vmem [shape: f32[1,128], index: 2, kind: input, shape index: {}]   ;;  %s588_s3 = inlined_call_operand.vmem [shape: bf16[2,128], index: 3, kind: output, shape index: {}]  }
   0x1   :  { %s535_s14 = smov 0  }
   0x2 LB: > { %s22_s15 = sadd.s32 1, %s502_s13  ;;  %p402_p0 = scmp.ge.s32.totalorder %s506_s14, 1  ;;  %s506_s14 = sphi %s535_s14, %s13_s14   ;;  %s502_s13 = sphi %s533_s13, %s590_s13   ;;  %s498_s12 = sphi %s531_s12, %s589_s12  }
   0x3   : > { %p23_p1 = scmp.ge.s32.totalorder %s22_s15, 9  ;;  %p162_p2 = scmp.lt.s32.totalorder %s506_s14, 10 }
   0x5   : > { %s592_s15 = smov (%p23_p1, %s22_s15), 0  ;;  %p163_p3 = pnand %p402_p0, %p162_p2 }
   0x6   : > { %p190_p4 = scmp.lt.s32.totalorder (!%p163_p3), %s498_s12, 8  ;;  %p405_p5 = scmp.ne.s32.totalorder (!%p163_p3), %s498_s12, 0 }
   0x7   : > { %166 = sbr.rel (%p163_p3) target bundleno = 284 (0x11c), region = 32 }
   0xe   : > { %s553_s16 = scalar_select %p190_p4, %s498_s12, 8 }
   0xf   : > { %208 = sbr.rel (%p405_p5) target bundleno = 22 (0x16), region = 36  ;;  %v508_v0 = vmov (!%p405_p5), 0.0  }
  0x10   : > { %s195_s19 = scalar_lea.vmem %s585_s0, %s553_s16  ;;  %s419_s20 = sshll.u32 %s553_s16, 6  ;;  %209 = vst [vmem:[#allocation2] sm:$0x3] (!%p405_p5), %v508_v0 }
  0x11   : > { %s200_s23 = scalar_lea.vmem %s586_s1, %s419_s20 }
  0x16 PF: > { %v476_v1 = vld [vmem:[%s200_s23] sm:$0xff]   ;;  %v509_v2 = vmov 0.0   ;;  %v477_v3 = vld [vmem:[%s200_s23 + $0x8] sm:$0xff]   ;;  %vm510_vm0 = vmmov 0   ;;  %v478_v4 = vld [vmem:[%s200_s23 + $0x10] sm:$0xff]   ;;  %p414_p6 = scmp.ne.s32.totalorder %s498_s12, 8 }
  0x17   : > { %429 = vmatprep.subr.bf16.mxu0 %v509_v2  ;;  %445 = vmatprep.mubr.msk.bf16.mxu0 %vm510_vm0, %v509_v2  ;;  %v479_v5 = vld [vmem:[%s200_s23 + $0x18] sm:$0xff]   ;;  %v480_v6 = vld [vmem:[%s200_s23 + $0x20] sm:$0xff]   ;;  %v481_v7 = vld [vmem:[%s200_s23 + $0x28] sm:$0xff]  }
  0x18   : > { %430 = vmatpush3.bf16.msra.mxu0 %v476_v1  ;;  %v482_v8 = vld [vmem:[%s200_s23 + $0x30] sm:$0xff]   ;;  %v483_v9 = vld [vmem:[%s200_s23 + $0x38] sm:$0xff]   ;;  %v211_v10 = vld [vmem:[%s195_s19] sm:$0x1] }
  0x19   : > { %431 = vmatprep.subr.bf16.mxu0 %v509_v2  ;;  %v210_v11 = vld [vmem:[#allocation2] sm:$0x3] }
  0x1a   : > { %v415_v18 = vld [vmem:[%s587_s2] ss:$0 sm:$0xff] (!%p414_p6) }
  0x1c   : > { %432 = vmatpush3.bf16.msra.mxu0 %v477_v3 }
  0x1d   : > { %433 = vmatprep.subr.bf16.mxu0 %v509_v2 }
  0x20   : > { %434 = vmatpush3.bf16.msra.mxu0 %v478_v4 }
  0x21   : > { %435 = vmatprep.subr.bf16.mxu0 %v509_v2 }
  0x24   : > { %436 = vmatpush3.bf16.msra.mxu0 %v479_v5 }
  0x25   : > { %437 = vmatprep.subr.bf16.mxu0 %v509_v2 }
  0x28   : > { %438 = vmatpush3.bf16.msra.mxu0 %v480_v6 }
  0x29   : > { %439 = vmatprep.subr.bf16.mxu0 %v509_v2 }
  0x2c   : > { %440 = vmatpush3.bf16.msra.mxu0 %v481_v7 }
  0x2d   : > { %441 = vmatprep.subr.bf16.mxu0 %v509_v2 }
  0x30   : > { %442 = vmatpush3.bf16.msra.mxu0 %v482_v8 }
  0x31   : > { %443 = vmatprep.subr.bf16.mxu0 %v509_v2 }
  0x34   : > { %444 = vmatpush3.bf16.msra.mxu0 %v483_v9 }
  0x37   : > { %446 = vmatmul.mubr.bf16.vlgmr.msra.gmra.mrb[0].mxu0 %v211_v10 }
 0x107   : > { %321 = sbr.rel (%p414_p6) target bundleno = 284 (0x11c), region = 40 }
 0x10a   : > { %v310_v12 = vpop.f32.mrb[0].mxu0 }
 0x10b   : > { %v316_v13 = vadd.f32 %v310_v12, %v210_v11  ;;  %v447_v14 = vpop.f32.mrb[1].mxu0 }
 0x10c   : > { %v313_v15 = vpop.f32.mrb[2].mxu0 }
 0x10d   : > { %317 = vst [vmem:[#allocation2] sm:$0x3] %v316_v13  ;;  %v448_v16 = vpop.f32.mrb[3].mxu0 }
 0x114   : > { %v322_v17 = vld [vmem:[#allocation2] sm:$0x3] }
 0x115   : > { %v330_v19 = vadd.f32 %v415_v18, %v322_v17 }
 0x117   : > { %v331_v20 = vmax.f32 %v330_v19, 0.0 }
 0x119   : > { %v332_v21 = vpack.c.bf16 %v331_v20, %v331_v20 }
 0x11b   : > { %333 = vst [vmem:[%s588_s3] sm:$0x1] %v332_v21 }
 0x11c PF: > { %s13_s14 = sadd.s32 1, %s506_s14   ;;  %s589_s12 = smov %s502_s13 }
 0x11d   : > { %p10_p7 = scmp.ge.s32.totalorder %s13_s14, 11   ;;  %s590_s13 = smov %s592_s15 }
 0x11f   :  { %12 = sbr.rel (!%p10_p7) target bundleno = 2 (0x2), region = 73 }

// kernel: resnet_cifar100_forward.101
= control target key start
LH: loop header
LB: loop body
LE: loop exit
PB: predicated region body
PF: predicated region fallthrough
CT: control target
= control target key end

     0   :  { %10 = vsyncpa [#allocation3], 0  ;;  %s1002_s0 = inlined_call_operand.vmem [shape: bf16[2,1,512], index: 0, kind: input, shape index: {}]   ;;  %s1003_s1 = inlined_call_operand.vmem [shape: bf16[512,128], index: 1, kind: input, shape index: {}]   ;;  %s1004_s2 = inlined_call_operand.vmem [shape: f32[1,128], index: 2, kind: input, shape index: {}]   ;;  %s1005_s3 = inlined_call_operand.vmem [shape: bf16[128,128], index: 3, kind: input, shape index: {}]   ;;  %s1006_s4 = inlined_call_operand.hbm [shape: f32[1,128], index: 4, kind: input, shape index: {}]   ;;  %s1007_s5 = inlined_call_operand.hbm [shape: f32[2,128], index: 5, kind: output, shape index: {}]  }
   0x1   :  { %11 = vsyncpa [#allocation4], 0  ;;  %s805_s18 = smov [#allocation2]   ;;  %s757_s22 = scalar_lea.hbm %s1006_s4, 16 }
   0x2   :  { %s26_s19 = sshll.u32 %s805_s18, 4  ;;  %p758_p0 = scmp.ne.s32.totalorder %s1006_s4, %s757_s22  ;;  %s27_s19 = int_to_ptr.vmem [resolvable:$true] %s26_s19 }
   0x3   :  { %p761_p1 = scmp.lt.u32.totalorder %s757_s22, %s1006_s4 }
   0x5   :  { %p763_p2 = pnand %p761_p1, %p758_p0 }
   0x7   :  { %766 = shalt.err (!%p763_p2)
}
   0x8   :  { %s767_s27 = scalar_lea.vmem %s27_s19, 16  ;;  %s771_s28 = scalar_lea.vmem %s27_s19, 32 }
   0x9   :  { %p768_p3 = scmp.ne.s32.totalorder %s27_s19, %s767_s27  ;;  %p772_p4 = scmp.lt.s32.totalorder %s27_s19, %s27_s19 }
   0xa   :  { %p773_p5 = scmp.lt.s32.totalorder %s771_s28, %s767_s27 }
   0xc   :  { %p774_p6 = por %p773_p5, %p772_p4 }
   0xe   :  { %p775_p7 = pnand %p774_p6, %p768_p3 }
  0x10   :  { %778 = shalt.err (!%p775_p7)
}
  0x11   :  { %29 = dma.hbm_to_vmem [thread:$0]  %s1006_s4, 16, %s27_s19, [#allocation3]  }
  0x12   :  { %801 = dma.done.wait [#allocation3], 16  }
  0x13   :  { %802 = vsyncadd [#allocation3], 4294967280  ;;  %v717_v0 = vld [vmem:[%s1003_s1 + $0x40] sm:$0xff]   ;;  %v721_v4 = vld [vmem:[%s1003_s1 + $0x48] sm:$0xff]   ;;  %v42_v22 = vlaneseq  ;;  %v806_v41 = vmov 0.0   ;;  %vm178_vm0 = vcmask 1041409  }
  0x14   :  { %v718_v1 = vld [vmem:[%s1003_s1 + $0xc0] sm:$0xff]   ;;  %640 = vmatprep.subr.bf16.mxu0 %v717_v0  ;;  %v722_v5 = vld [vmem:[%s1003_s1 + $0xc8] sm:$0xff]   ;;  %v725_v8 = vld [vmem:[%s1003_s1 + $0x50] sm:$0xff]   ;;  %vm807_vm1 = vmmov 0  }
  0x15   :  { %v719_v2 = vld [vmem:[%s1003_s1] sm:$0xff]   ;;  %662 = vmatprep.subr.bf16.mxu1 %v718_v1  ;;  %v723_v6 = vld [vmem:[%s1003_s1 + $0x8] sm:$0xff]   ;;  %v726_v9 = vld [vmem:[%s1003_s1 + $0xd0] sm:$0xff]   ;;  %v43_v27 = vshrl.u32 %v42_v22, 7 }
  0x16   :  { %v720_v3 = vld [vmem:[%s1003_s1 + $0x80] sm:$0xff]   ;;  %641 = vmatpush3.bf16.msra.mxu0 %v719_v2  ;;  %v724_v7 = vld [vmem:[%s1003_s1 + $0x88] sm:$0xff]   ;;  %v727_v10 = vld [vmem:[%s1003_s1 + $0x10] sm:$0xff]  }
  0x17   :  { %663 = vmatpush3.bf16.msra.mxu1 %v720_v3  ;;  %642 = vmatprep.subr.bf16.mxu0 %v721_v4  ;;  %v728_v11 = vld [vmem:[%s1003_s1 + $0x90] sm:$0xff]   ;;  %v729_v12 = vld [vmem:[%s1003_s1 + $0x58] sm:$0xff]   ;;  %v733_v16 = vld [vmem:[%s1003_s1 + $0x60] sm:$0xff]   ;;  %v48_v32 = vsub.s32 2, %v43_v27  ;;  %v56_v34 = vsub.s32 6, %v43_v27  ;;  %v44_v36 = vsub.s32 0, %v43_v27 }
  0x18   :  { %664 = vmatprep.subr.bf16.mxu1 %v722_v5  ;;  %v730_v13 = vld [vmem:[%s1003_s1 + $0xd8] sm:$0xff]   ;;  %v734_v17 = vld [vmem:[%s1003_s1 + $0xe0] sm:$0xff]   ;;  %v737_v20 = vld [vmem:[%s1003_s1 + $0x68] sm:$0xff]   ;;  %v52_v38 = vsub.s32 4, %v43_v27 }
  0x19   :  { %v731_v14 = vld [vmem:[%s1003_s1 + $0x18] sm:$0xff]   ;;  %v735_v18 = vld [vmem:[%s1003_s1 + $0x20] sm:$0xff]   ;;  %v738_v21 = vld [vmem:[%s1003_s1 + $0xe8] sm:$0xff]  }
  0x1a   :  { %643 = vmatpush3.bf16.msra.mxu0 %v723_v6  ;;  %v732_v15 = vld [vmem:[%s1003_s1 + $0x98] sm:$0xff]   ;;  %v736_v19 = vld [vmem:[%s1003_s1 + $0xa0] sm:$0xff]   ;;  %v739_v23 = vld [vmem:[%s1003_s1 + $0x28] sm:$0xff]  }
  0x1b   :  { %665 = vmatpush3.bf16.msra.mxu1 %v724_v7  ;;  %644 = vmatprep.subr.bf16.mxu0 %v725_v8  ;;  %v740_v24 = vld [vmem:[%s1003_s1 + $0xa8] sm:$0xff]   ;;  %v741_v25 = vld [vmem:[%s1003_s1 + $0x70] sm:$0xff]   ;;  %v745_v30 = vld [vmem:[%s1003_s1 + $0x78] sm:$0xff]  }
  0x1c   :  { %666 = vmatprep.subr.bf16.mxu1 %v726_v9  ;;  %v742_v26 = vld [vmem:[%s1003_s1 + $0xf0] sm:$0xff]   ;;  %v746_v31 = vld [vmem:[%s1003_s1 + $0xf8] sm:$0xff]   ;;  %v637_v37 = vld [vmem:[%s1002_s0] sm:$0xff]  }
  0x1d   :  { %v743_v28 = vld [vmem:[%s1003_s1 + $0x30] sm:$0xff]   ;;  %v747_v33 = vld [vmem:[%s1003_s1 + $0x38] sm:$0xff]   ;;  %v638_v39 = vunpack.c.l.bf16 %v637_v37  ;;  %v639_v40 = vunpack.c.h.bf16 %v637_v37 }
  0x1e   :  { %645 = vmatpush3.bf16.msra.mxu0 %v727_v10  ;;  %v744_v29 = vld [vmem:[%s1003_s1 + $0xb0] sm:$0xff]   ;;  %v748_v35 = vld [vmem:[%s1003_s1 + $0xb8] sm:$0xff]  }
  0x1f   :  { %667 = vmatpush3.bf16.msra.mxu1 %v728_v11  ;;  %646 = vmatprep.subr.bf16.mxu0 %v729_v12  ;;  %v49_v42 = vrot.slane %v638_v39, %v48_v32  ;;  %v65_v43 = vrot.slane %v639_v40, %v48_v32  ;;  %v57_v44 = vrot.slane %v638_v39, %v56_v34  ;;  %v749_v12 = vld [vmem:[%s1005_s3] sm:$0xff]  }
  0x20   :  { %668 = vmatprep.subr.bf16.mxu1 %v730_v13  ;;  %v73_v45 = vrot.slane %v639_v40, %v56_v34  ;;  %v45_v46 = vrot.slane %v638_v39, %v44_v36  ;;  %v61_v47 = vrot.slane %v639_v40, %v44_v36  ;;  %v53_v48 = vrot.slane %v638_v39, %v52_v38  ;;  %v627_v36 = vld [vmem:[#allocation2] ss:$0 sm:$0xff] }
  0x21   :  { %v69_v49 = vrot.slane %v639_v40, %v52_v38  ;;  %v83_v50 = vpack.c.bf16 %v49_v42, %v49_v42  ;;  %v87_v51 = vpack.c.bf16 %v65_v43, %v65_v43  ;;  %v85_v52 = vpack.c.bf16 %v57_v44, %v57_v44 }
  0x22   :  { %647 = vmatpush3.bf16.msra.mxu0 %v731_v14  ;;  %v89_v53 = vpack.c.bf16 %v73_v45, %v73_v45  ;;  %v82_v54 = vpack.c.bf16 %v45_v46, %v45_v46  ;;  %v86_v55 = vpack.c.bf16 %v61_v47, %v61_v47  ;;  %v84_v56 = vpack.c.bf16 %v53_v48, %v53_v48 }
  0x23   :  { %669 = vmatpush3.bf16.msra.mxu1 %v732_v15  ;;  %648 = vmatprep.subr.bf16.mxu0 %v733_v16  ;;  %v88_v57 = vpack.c.bf16 %v69_v49, %v69_v49  ;;  %v170_v58 = vunpack.c.l.b16 %v83_v50  ;;  %v174_v59 = vunpack.c.l.b16 %v87_v51  ;;  %v172_v60 = vunpack.c.l.b16 %v85_v52  ;;  %v750_v15 = vld [vmem:[%s1005_s3 + $0x8] sm:$0xff]   ;;  %v751_v16 = vld [vmem:[%s1005_s3 + $0x10] sm:$0xff]  }
  0x24   :  { %670 = vmatprep.subr.bf16.mxu1 %v734_v17  ;;  %v176_v61 = vunpack.c.l.b16 %v89_v53  ;;  %v169_v62 = vunpack.c.l.b16 %v82_v54  ;;  %v173_v63 = vunpack.c.l.b16 %v86_v55  ;;  %v171_v0 = vunpack.c.l.b16 %v84_v56  ;;  %v752_v17 = vld [vmem:[%s1005_s3 + $0x18] sm:$0xff]  }
  0x25   :  { %v175_v1 = vunpack.c.l.b16 %v88_v57  ;;  %v180_v2 = vrot.slane %v174_v59, 7 }
  0x26   :  { %649 = vmatpush3.bf16.msra.mxu0 %v735_v18  ;;  %v184_v3 = vrot.slane %v176_v61, 7  ;;  %v177_v4 = vrot.slane %v173_v63, 7  ;;  %v753_v18 = vld [vmem:[%s1005_s3 + $0x20] sm:$0xff]  }
  0x27   :  { %671 = vmatpush3.bf16.msra.mxu1 %v736_v19  ;;  %650 = vmatprep.subr.bf16.mxu0 %v737_v20  ;;  %v182_v5 = vrot.slane %v175_v1, 7  ;;  %v181_v6 = vsel %vm178_vm0, %v180_v2, %v170_v58  ;;  %v754_v19 = vld [vmem:[%s1005_s3 + $0x28] sm:$0xff]   ;;  %v755_v20 = vld [vmem:[%s1005_s3 + $0x30] sm:$0xff]  }
  0x28   :  { %672 = vmatprep.subr.bf16.mxu1 %v738_v21  ;;  %v185_v7 = vsel %vm178_vm0, %v184_v3, %v172_v60  ;;  %v187_v8 = vpack.c.b16 %v181_v6, %v181_v6  ;;  %v179_v10 = vsel %vm178_vm0, %v177_v4, %v169_v62  ;;  %v756_v21 = vld [vmem:[%s1005_s3 + $0x38] sm:$0xff]   ;;  %s808_s3 = smov [#allocation5]  }
  0x29   :  { %v189_v9 = vpack.c.b16 %v185_v7, %v185_v7  ;;  %v183_v11 = vsel %vm178_vm0, %v182_v5, %v171_v0  ;;  %v186_v13 = vpack.c.b16 %v179_v10, %v179_v10  ;;  %s585_s10 = sshll.u32 %s808_s3, 4  ;;  %s586_s10 = int_to_ptr.vmem [resolvable:$true] %s585_s10 }
  0x2a   :  { %651 = vmatpush3.bf16.msra.mxu0 %v739_v23  ;;  %v188_v14 = vpack.c.b16 %v183_v11, %v183_v11  ;;  %418 = vmatprep.mubr.bf16.mxu0 %v187_v8  ;;  %p784_p9 = scmp.lt.s32.totalorder %s586_s10, %s586_s10 }
  0x2b   :  { %673 = vmatpush3.bf16.msra.mxu1 %v740_v24  ;;  %652 = vmatprep.subr.bf16.mxu0 %v741_v25  ;;  %v594_v24 = vld [vmem:[%s1004_s2] ss:$0 sm:$0xff]  ;;  %s779_s2 = scalar_lea.vmem %s586_s10, 32 }
  0x2c   :  { %674 = vmatprep.subr.bf16.mxu1 %v742_v26  ;;  %458 = vmatprep.mubr.bf16.mxu1 %v189_v9  ;;  %p780_p8 = scmp.ne.s32.totalorder %s586_s10, %s779_s2  ;;  %p785_p10 = scmp.lt.s32.totalorder %s779_s2, %s779_s2 }
  0x2e   :  { %653 = vmatpush3.bf16.msra.mxu0 %v743_v28  ;;  %p786_p11 = por %p785_p10, %p784_p9 }
  0x2f   :  { %675 = vmatpush3.bf16.msra.mxu1 %v744_v29  ;;  %654 = vmatprep.subr.bf16.mxu0 %v745_v30 }
  0x30   :  { %676 = vmatprep.subr.bf16.mxu1 %v746_v31  ;;  %p787_p12 = pnand %p786_p11, %p780_p8 }
  0x32   :  { %655 = vmatpush3.bf16.msra.mxu0 %v747_v33 }
  0x33   :  { %677 = vmatpush3.bf16.msra.mxu1 %v748_v35  ;;  %693 = vmatprep.subr.bf16.mxu0 %v806_v41 }
  0x35   :  { %419 = vmatmul.mubr.bf16.vlgmr.msra.gmra.mrb[0].mxu0 %v186_v13 }
  0x36   :  { %459 = vmatmul.mubr.bf16.vlgmr.msra.gmra.mrb[0].mxu1 %v188_v14  ;;  %694 = vmatpush3.bf16.msra.mxu0 %v749_v12 }
  0x37   :  { %695 = vmatprep.subr.bf16.mxu0 %v806_v41  ;;  %709 = vmatprep.mubr.msk.bf16.mxu0 %vm807_vm1, %v806_v41 }
  0x3a   :  { %696 = vmatpush3.bf16.msra.mxu0 %v750_v15 }
  0x3b   :  { %697 = vmatprep.subr.bf16.mxu0 %v806_v41 }
  0x3e   :  { %698 = vmatpush3.bf16.msra.mxu0 %v751_v16 }
  0x3f   :  { %699 = vmatprep.subr.bf16.mxu0 %v806_v41 }
  0x42   :  { %700 = vmatpush3.bf16.msra.mxu0 %v752_v17 }
  0x43   :  { %701 = vmatprep.subr.bf16.mxu0 %v806_v41 }
  0x46   :  { %702 = vmatpush3.bf16.msra.mxu0 %v753_v18 }
  0x47   :  { %703 = vmatprep.subr.bf16.mxu0 %v806_v41 }
  0x4a   :  { %704 = vmatpush3.bf16.msra.mxu0 %v754_v19 }
  0x4b   :  { %705 = vmatprep.subr.bf16.mxu0 %v806_v41 }
  0x4e   :  { %706 = vmatpush3.bf16.msra.mxu0 %v755_v20 }
  0x4f   :  { %707 = vmatprep.subr.bf16.mxu0 %v806_v41 }
  0x52   :  { %708 = vmatpush3.bf16.msra.mxu0 %v756_v21 }
 0x108   :  { %v656_v22 = vpop.f32.mrb[0].mxu0 }
 0x109   :  { %v678_v23 = vpop.f32.mrb[0].mxu1  ;;  %v657_v25 = vpop.f32.mrb[1].mxu0 }
 0x10a   :  { %v679_v26 = vpop.f32.mrb[1].mxu1  ;;  %v658_v27 = vadd.f32 %v657_v25, %v656_v22  ;;  %v659_v29 = vpop.f32.mrb[2].mxu0 }
 0x10b   :  { %v680_v28 = vadd.f32 %v679_v26, %v678_v23  ;;  %v681_v30 = vpop.f32.mrb[2].mxu1  ;;  %v660_v31 = vpop.f32.mrb[3].mxu0 }
 0x10c   :  { %v682_v32 = vpop.f32.mrb[3].mxu1  ;;  %v421_v33 = vadd.f32 %v658_v27, %v594_v24 }
 0x10e   :  { %v461_v34 = vadd.f32 %v680_v28, %v421_v33 }
 0x110   :  { %v466_v35 = vpack.c.bf16 %v461_v34, %v461_v34 }
 0x112   :  { %710 = vmatmul.mubr.bf16.vlgmr.msra.gmra.mrb[4].mxu0 %v466_v35 }
 0x1e5   :  { %v572_v37 = vpop.f32.mrb[4].mxu0 }
 0x1e6   :  { %v573_v38 = vadd.f32 %v627_v36, %v572_v37  ;;  %v711_v39 = vpop.f32.mrb[5].mxu0 }
 0x1e7   :  { %v575_v40 = vpop.f32.mrb[6].mxu0 }
 0x1e8   :  { %578 = vst [vmem:[#allocation5] sm:$0x3] %v573_v38  ;;  %v712_v41 = vpop.f32.mrb[7].mxu0 }
 0x1e9   :  { %790 = shalt.err (!%p787_p12)
}
 0x1ea   :  { %s791_s13 = scalar_lea.hbm %s1007_s5, 32 }
 0x1eb   :  { %p792_p13 = scmp.ne.s32.totalorder %s1007_s5, %s791_s13  ;;  %p795_p0 = scmp.lt.u32.totalorder %s791_s13, %s1007_s5 }
 0x1ed   :  { %p797_p1 = pnand %p795_p0, %p792_p13 }
 0x1ef   :  { %800 = shalt.err (!%p797_p1)
}
 0x1f0   :  { %588 = dma.vmem_to_hbm [thread:$0]  %s586_s10, 32, %s1007_s5, [#allocation4]  }
 0x1f1   :  { %803 = dma.done.wait [#allocation4], 32  }
 0x1f2   :  { %804 = vsyncadd [#allocation4], 4294967264 }
 0x1f3   :  { %592 = vsyncpa [#allocation3], 1 }
 0x1f4   :  { %593 = vsyncpa [#allocation4], 1 }

</bundles_post_ra>
